<compile_context>
chip_gen: v7x
topology: tpu7x:2x2x1
jax: 0.10.0
libtpu: 0.0.40
codegen_flags: <defaults>
</compile_context>

<pallas_src>
import functools

import numpy as np
import jax
import jax.numpy as jnp
from jax.experimental import pallas as pl
from jax.experimental.pallas import tpu as pltpu


NEG_SLOPE = 0.2
IN_EPS = 1e-5


# ----------------------------------------------------------------------------
# Constant transposed gather matrices (numpy at trace time -> folded constants)
# G[t, q, p] = 1 iff output position p reads input position q for 4x4 tap t;
# out-of-bounds (padding) taps stay 0.
# ----------------------------------------------------------------------------
def _gather_t_stride2(h_in, w_in):
    h_out, w_out = h_in // 2, w_in // 2
    p_in, p_out = h_in * w_in, h_out * w_out
    g = np.zeros((16, p_in, p_out), np.float32)
    for i in range(4):
        for j in range(4):
            t = i * 4 + j
            for ho in range(h_out):
                for wo in range(w_out):
                    r, c = 2 * ho + i - 1, 2 * wo + j - 1
                    if 0 <= r < h_in and 0 <= c < w_in:
                        g[t, r * w_in + c, ho * w_out + wo] = 1.0
    return g


def _gather_t_stride1(h_in, w_in):
    h_out, w_out = h_in - 1, w_in - 1
    p_in, p_out = h_in * w_in, h_out * w_out
    g = np.zeros((16, p_in, p_out), np.float32)
    for i in range(4):
        for j in range(4):
            t = i * 4 + j
            for ho in range(h_out):
                for wo in range(w_out):
                    r, c = ho + i - 1, wo + j - 1
                    if 0 <= r < h_in and 0 <= c < w_in:
                        g[t, r * w_in + c, ho * w_out + wo] = 1.0
    return g


# ----------------------------------------------------------------------------
# Fused per-sample kernel (channels on sublanes, positions on lanes)
# ----------------------------------------------------------------------------
def _disc_fused_kernel(p1_ref, w1_ref, b1_ref, g2_ref, w2_ref, b2_ref,
                       g3_ref, w3_ref, b3_ref, out_ref, rhs2_ref, *, p2, p3):
    # ---- conv1 + LeakyReLU(0.2): (64, K1) @ (K1, P1) -> (64, P1) ----
    a1 = jnp.dot(w1_ref[...], p1_ref[0],
                 preferred_element_type=jnp.float32) + b1_ref[...]
    a1 = jnp.where(a1 >= 0, a1, NEG_SLOPE * a1).astype(jnp.bfloat16)

    # ---- conv2: 16 per-tap 0/1 gather matmuls build the im2col slab in a
    #      bf16 VMEM scratch (exact: gather rows are 0/1), then ONE full-depth
    #      K=1024 weight matmul -- no per-tap VPU accumulation. ----
    for t in range(16):
        tap = jnp.dot(a1, g2_ref[t], preferred_element_type=jnp.float32)
        rhs2_ref[t * 64:(t + 1) * 64, :] = tap.astype(jnp.bfloat16)
    c2 = jnp.dot(w2_ref[...], rhs2_ref[...],
                 preferred_element_type=jnp.float32) + b2_ref[...]      # (256, P2)

    # ---- InstanceNorm2d(256) (affine=False, biased var) + LeakyReLU ----
    # Single pass over c2 (sum & sum-of-squares); E[x^2]-E[x]^2 numerics are
    # fine at these magnitudes; clamp for safety.
    inv_n = 1.0 / p2
    s1 = jnp.sum(c2, axis=1, keepdims=True) * inv_n                     # (256, 1)
    s2 = jnp.sum(c2 * c2, axis=1, keepdims=True) * inv_n
    var = jnp.maximum(s2 - s1 * s1, 0.0)
    a3 = (c2 - s1) * jax.lax.rsqrt(var + IN_EPS)
    a3 = jnp.where(a3 >= 0, a3, NEG_SLOPE * a3).astype(jnp.bfloat16)    # (256, P2)

    # ---- conv3 (Cout=1): per-tap gather matmul + per-channel weight on the
    #      VPU, reduced over channels (sublanes) -> lane-dense (1, P3) row ----
    acc3 = jnp.zeros((256, p3), jnp.float32)
    for t in range(16):
        tap = jnp.dot(a3, g3_ref[t], preferred_element_type=jnp.float32)
        acc3 = acc3 + tap * w3_ref[t]                                   # w3_ref[t]: (256, 1)
    out_ref[0, :, :] = jnp.sum(acc3, axis=0, keepdims=True) + b3_ref[0]


# ----------------------------------------------------------------------------
# Parameters
# ----------------------------------------------------------------------------
def init_raw_params(key, input_nc=1):
    k = jax.random.split(key, 6)

    def winit(kk, shape):
        fan_in = shape[1] * shape[2] * shape[3]
        return jax.random.normal(kk, shape, jnp.float32) / jnp.sqrt(fan_in)

    return (winit(k[0], (64, input_nc, 4, 4)),
            jax.random.normal(k[1], (64,), jnp.float32) * 0.01,
            winit(k[2], (256, 64, 4, 4)),
            jax.random.normal(k[3], (256,), jnp.float32) * 0.01,
            winit(k[4], (1, 256, 4, 4)),
            jax.random.normal(k[5], (1,), jnp.float32) * 0.01)


def pack_params(w1, b1, w2, b2, w3, b3):
    """Pre-reshape / pre-transpose weights once, outside the jitted forward."""
    cout1, cin, _, _ = w1.shape
    # conv1: rows=cout, cols=(ci, kh, kw) to match the im2col K ordering.
    w1p = jnp.asarray(w1).reshape(cout1, cin * 16).astype(jnp.bfloat16)
    # conv2: rows=cout, cols=(tap, ci) -> one K=1024 matmul against the slab.
    w2p = jnp.transpose(jnp.asarray(w2), (0, 2, 3, 1)).reshape(256, 16 * 64)
    # conv3: per-tap (256, 1) columns (resolution independent, kept f32).
    w3p = jnp.transpose(jnp.asarray(w3)[0], (1, 2, 0)).reshape(16, 256, 1)
    return {
        "w1": w1p,                                                   # (64, K1) bf16
        "b1": jnp.asarray(b1, jnp.float32).reshape(64, 1),
        "w2": w2p.astype(jnp.bfloat16),                              # (256, 1024) bf16
        "b2": jnp.asarray(b2, jnp.float32).reshape(256, 1),
        "w3": w3p.astype(jnp.float32),                               # (16, 256, 1) f32
        "b3": jnp.asarray(b3, jnp.float32).reshape(1),               # SMEM scalar
    }


# ----------------------------------------------------------------------------
# Helpers for the forward wrapper
# ----------------------------------------------------------------------------
def _im2col_conv1_t(x):
    # (N, Cin, H, W) -> (N, Cin*16, (H//2)*(W//2)); K ordered (ci, kh, kw).
    n, c, h, w = x.shape
    ho, wo = h // 2, w // 2
    xp = jnp.pad(x, ((0, 0), (0, 0), (1, 1), (1, 1)))
    cols = [xp[:, :, i:i + 2 * ho:2, j:j + 2 * wo:2]
            for i in range(4) for j in range(4)]
    return jnp.stack(cols, axis=2).reshape(n, c * 16, ho * wo)


def _vmem_block_bytes(shape, dtype, buffers):
    """Padded VMEM footprint of one block ((8*pack, 128) tile padding)."""
    itemsize = int(np.dtype(dtype).itemsize)
    sub = 8 * (4 // itemsize)
    last = -(-shape[-1] // 128) * 128
    second = -(-(shape[-2] if len(shape) >= 2 else 1) // sub) * sub
    lead = int(np.prod(shape[:-2], dtype=np.int64)) if len(shape) > 2 else 1
    return lead * second * last * itemsize * buffers


# ----------------------------------------------------------------------------
# Forward
# ----------------------------------------------------------------------------
@jax.jit
def discriminator_forward(x, params):
    n, cin, h, w = x.shape
    assert h % 2 == 0 and w % 2 == 0 and h >= 8 and w >= 8
    h1, w1 = h // 2, w // 2            # conv1 output grid
    h2, w2 = h1 // 2, w1 // 2          # conv2 output grid
    h3, w3 = h2 - 1, w2 - 1            # conv3 output grid
    p1n, p2n, p3n = h1 * w1, h2 * w2, h3 * w3
    k1 = cin * 16

    patches1 = _im2col_conv1_t(x).astype(jnp.bfloat16)              # (N, K1, P1)
    g2 = jnp.asarray(_gather_t_stride2(h1, w1), jnp.bfloat16)       # (16, P1, P2)
    g3 = jnp.asarray(_gather_t_stride1(h2, w2), jnp.bfloat16)       # (16, P2, P3)

    # VMEM budget: single-buffered constants + double-buffered per-sample I/O
    # + scratch + live f32 intermediates, with 2x headroom (16 MiB floor,
    # 56 MiB cap keeps margin under v7x's 64 MiB physical VMEM).
    resident = (
        _vmem_block_bytes((1, k1, p1n), jnp.bfloat16, 2) +
        _vmem_block_bytes((1, 1, p3n), jnp.float32, 2) +
        _vmem_block_bytes((64, k1), jnp.bfloat16, 1) +
        _vmem_block_bytes((64, 1), jnp.float32, 1) +
        _vmem_block_bytes((16, p1n, p2n), jnp.bfloat16, 1) +
        _vmem_block_bytes((256, 16 * 64), jnp.bfloat16, 1) +
        _vmem_block_bytes((256, 1), jnp.float32, 1) +
        _vmem_block_bytes((16, p2n, p3n), jnp.bfloat16, 1) +
        _vmem_block_bytes((16, 256, 1), jnp.float32, 1) +
        _vmem_block_bytes((16 * 64, p2n), jnp.bfloat16, 1))
    intermediates = (
        2 * _vmem_block_bytes((64, p1n), jnp.float32, 1) +
        3 * _vmem_block_bytes((256, p2n), jnp.float32, 1) +
        2 * _vmem_block_bytes((256, p3n), jnp.float32, 1))
    vmem_limit = int(min(max(2 * (resident + intermediates), 16 * 2**20),
                         56 * 2**20))

    flops = 2 * n * (64 * k1 * p1n                 # conv1
                     + 16 * 64 * p1n * p2n         # conv2 gather
                     + 256 * (16 * 64) * p2n       # conv2 weights
                     + 16 * 256 * p2n * p3n        # conv3 gather
                     + 16 * 256 * p3n)             # conv3 weighted reduce
    bytes_accessed = int(
        n * k1 * p1n * 2 + n * p3n * 4 +
        16 * p1n * p2n * 2 + 16 * p2n * p3n * 2 +
        256 * 16 * 64 * 2 + 64 * k1 * 2 + 16 * 256 * 4 + (64 + 256 + 1) * 4)

    const = dict(pipeline_mode=pl.Buffered(1))     # no dead double-buffering
    out = pl.pallas_call(
        functools.partial(_disc_fused_kernel, p2=p2n, p3=p3n),
        out_shape=jax.ShapeDtypeStruct((n, 1, p3n), jnp.float32),
        grid=(n,),
        in_specs=[
            pl.BlockSpec((1, k1, p1n), lambda i: (i, 0, 0)),                 # patches
            pl.BlockSpec((64, k1), lambda i: (0, 0), **const),               # w1
            pl.BlockSpec((64, 1), lambda i: (0, 0), **const),                # b1
            pl.BlockSpec((16, p1n, p2n), lambda i: (0, 0, 0), **const),      # g2
            pl.BlockSpec((256, 16 * 64), lambda i: (0, 0), **const),         # w2
            pl.BlockSpec((256, 1), lambda i: (0, 0), **const),               # b2
            pl.BlockSpec((16, p2n, p3n), lambda i: (0, 0, 0), **const),      # g3
            pl.BlockSpec((16, 256, 1), lambda i: (0, 0, 0), **const),        # w3
            pl.BlockSpec(memory_space=pltpu.MemorySpace.SMEM),               # b3
        ],
        out_specs=pl.BlockSpec((1, 1, p3n), lambda i: (i, 0, 0)),
        scratch_shapes=[pltpu.VMEM((16 * 64, p2n), jnp.bfloat16)],           # im2col slab
        compiler_params=pltpu.CompilerParams(
            dimension_semantics=("parallel",),
            vmem_limit_bytes=vmem_limit),
        cost_estimate=pl.CostEstimate(
            flops=int(flops), transcendentals=int(n * 256),
            bytes_accessed=bytes_accessed),
    )(patches1, params["w1"], params["b1"], g2, params["w2"], params["b2"],
      g3, params["w3"], params["b3"])
    return out.reshape(n, 1, h3, w3)


# ----------------------------------------------------------------------------
# Pure-JAX f32 reference (PyTorch semantics) for a sanity check
# ----------------------------------------------------------------------------
def _reference_forward(x, w1, b1, w2, b2, w3, b3):
    def conv(v, wt, bias, stride):
        y = jax.lax.conv_general_dilated(
            v, wt, (stride, stride), ((1, 1), (1, 1)),
            dimension_numbers=("NCHW", "OIHW", "NCHW"))
        return y + bias.reshape(1, -1, 1, 1)

    lrelu = lambda v: jnp.where(v >= 0, v, NEG_SLOPE * v)
    h = lrelu(conv(x, w1, b1, 2))
    h = conv(h, w2, b2, 2)
    m = jnp.mean(h, axis=(2, 3), keepdims=True)
    v = jnp.mean(jnp.square(h - m), axis=(2, 3), keepdims=True)
    h = lrelu((h - m) * jax.lax.rsqrt(v + IN_EPS))
    return conv(h, w3, b3, 1)


if __name__ == "__main__":
    key = jax.random.PRNGKey(0)
    kx, kp = jax.random.split(key)
    x = jax.random.normal(kx, (2, 1, 16, 16), jnp.float32)           # NCHW
    raw = init_raw_params(kp, input_nc=1)
    params = pack_params(*raw)

    out = jax.block_until_ready(discriminator_forward(x, params))
    assert out.shape == (2, 1, 3, 3), out.shape

    ref = jax.block_until_ready(_reference_forward(x, *raw))
    err = float(jnp.max(jnp.abs(out - ref)))
    assert err < 0.1, f"max abs error vs f32 reference: {err}"
    print("KERNEL_OK")
</pallas_src>

<mosaic_0001>
module attributes {stable_mosaic.version = 11 : i64} {
  func.func @_disc_fused_kernel(%arg0: i32, %arg1: memref<1x16x64xbf16, #tpu.memory_space<vmem>>, %arg2: memref<64x16xbf16, #tpu.memory_space<vmem>>, %arg3: memref<64x1xf32, #tpu.memory_space<vmem>>, %arg4: memref<16x64x16xbf16, #tpu.memory_space<vmem>>, %arg5: memref<256x1024xbf16, #tpu.memory_space<vmem>>, %arg6: memref<256x1xf32, #tpu.memory_space<vmem>>, %arg7: memref<16x16x9xbf16, #tpu.memory_space<vmem>>, %arg8: memref<16x256x1xf32, #tpu.memory_space<vmem>>, %arg9: memref<1xf32, #tpu.memory_space<smem>>, %arg10: memref<1x1x9xf32, #tpu.memory_space<vmem>>, %arg11: memref<1024x16xbf16, #tpu.memory_space<vmem>>) attributes {dimension_semantics = [#tpu.dimension_semantics<parallel>], iteration_bounds = array<i64: 2>, scalar_prefetch = 0 : i64, scratch_operands = 1 : i64, tpu.core_type = #tpu.core_type<tc>, window_params = [{transform_indices = @transform_0, window_bounds = array<i64: 1, 16, 64>}, {pipeline_mode = #tpu.pipeline_mode<synchronous>, transform_indices = @transform_1, window_bounds = array<i64: 64, 16>}, {pipeline_mode = #tpu.pipeline_mode<synchronous>, transform_indices = @transform_2, window_bounds = array<i64: 64, 1>}, {pipeline_mode = #tpu.pipeline_mode<synchronous>, transform_indices = @transform_3, window_bounds = array<i64: 16, 64, 16>}, {pipeline_mode = #tpu.pipeline_mode<synchronous>, transform_indices = @transform_4, window_bounds = array<i64: 256, 1024>}, {pipeline_mode = #tpu.pipeline_mode<synchronous>, transform_indices = @transform_5, window_bounds = array<i64: 256, 1>}, {pipeline_mode = #tpu.pipeline_mode<synchronous>, transform_indices = @transform_6, window_bounds = array<i64: 16, 16, 9>}, {pipeline_mode = #tpu.pipeline_mode<synchronous>, transform_indices = @transform_7, window_bounds = array<i64: 16, 256, 1>}, {transform_indices = @transform_8, window_bounds = array<i64: 1>}, {transform_indices = @transform_9, window_bounds = array<i64: 1, 1, 9>}]} {
    %c0 = arith.constant 0 : index
    %c0_0 = arith.constant 0 : index
    %0 = vector.load %arg2[%c0, %c0_0] : memref<64x16xbf16, #tpu.memory_space<vmem>>, vector<64x16xbf16>
    %c0_1 = arith.constant 0 : index
    %c0_2 = arith.constant 0 : index
    %c0_3 = arith.constant 0 : index
    %1 = vector.load %arg1[%c0_1, %c0_2, %c0_3] : memref<1x16x64xbf16, #tpu.memory_space<vmem>>, vector<1x16x64xbf16>
    %2 = vector.shape_cast %1 : vector<1x16x64xbf16> to vector<16x64xbf16>
    %cst = arith.constant dense<0.000000e+00> : vector<64x64xf32>
    %3 = tpu.matmul %0, %2, %cst {dimension_numbers = #tpu.dot_dimension_numbers<[1], [0], [0], [1], [0, 0, 1, 1], [], []>} : vector<64x16xbf16>, vector<16x64xbf16>, vector<64x64xf32> -> vector<64x64xf32>
    %c0_4 = arith.constant 0 : index
    %c0_5 = arith.constant 0 : index
    %4 = vector.load %arg3[%c0_4, %c0_5] : memref<64x1xf32, #tpu.memory_space<vmem>>, vector<64x1xf32>
    %5 = vector.broadcast %4 : vector<64x1xf32> to vector<64x64xf32>
    %6 = arith.addf %3, %5 : vector<64x64xf32>
    %cst_6 = arith.constant 0.000000e+00 : f32
    %7 = vector.broadcast %cst_6 : f32 to vector<64x64xf32>
    %8 = arith.cmpf oge, %6, %7 : vector<64x64xf32>
    %cst_7 = arith.constant 2.000000e-01 : f32
    %9 = vector.broadcast %cst_7 : f32 to vector<64x64xf32>
    %10 = arith.mulf %9, %6 : vector<64x64xf32>
    %11 = arith.select %8, %6, %10 : vector<64x64xi1>, vector<64x64xf32>
    %12 = arith.truncf %11 : vector<64x64xf32> to vector<64x64xbf16>
    %c0_8 = arith.constant 0 : index
    %c0_9 = arith.constant 0 : index
    %c0_10 = arith.constant 0 : index
    %13 = vector.load %arg4[%c0_8, %c0_9, %c0_10] : memref<16x64x16xbf16, #tpu.memory_space<vmem>>, vector<1x64x16xbf16>
    %14 = vector.shape_cast %13 : vector<1x64x16xbf16> to vector<64x16xbf16>
    %cst_11 = arith.constant dense<0.000000e+00> : vector<64x16xf32>
    %15 = tpu.matmul %12, %14, %cst_11 {dimension_numbers = #tpu.dot_dimension_numbers<[1], [0], [0], [1], [0, 0, 1, 1], [], []>} : vector<64x64xbf16>, vector<64x16xbf16>, vector<64x16xf32> -> vector<64x16xf32>
    %16 = arith.truncf %15 : vector<64x16xf32> to vector<64x16xbf16>
    %c0_12 = arith.constant 0 : index
    %c0_13 = arith.constant 0 : index
    %17 = vector.load %arg11[%c0_12, %c0_13] : memref<1024x16xbf16, #tpu.memory_space<vmem>>, vector<64x16xbf16>
    tpu.vector_store %arg11[%c0_12, %c0_13], %16 {strides = array<i32>} : memref<1024x16xbf16, #tpu.memory_space<vmem>>, vector<64x16xbf16>,
    %c1 = arith.constant 1 : index
    %c0_14 = arith.constant 0 : index
    %c0_15 = arith.constant 0 : index
    %18 = vector.load %arg4[%c1, %c0_14, %c0_15] : memref<16x64x16xbf16, #tpu.memory_space<vmem>>, vector<1x64x16xbf16>
    %19 = vector.shape_cast %18 : vector<1x64x16xbf16> to vector<64x16xbf16>
    %cst_16 = arith.constant dense<0.000000e+00> : vector<64x16xf32>
    %20 = tpu.matmul %12, %19, %cst_16 {dimension_numbers = #tpu.dot_dimension_numbers<[1], [0], [0], [1], [0, 0, 1, 1], [], []>} : vector<64x64xbf16>, vector<64x16xbf16>, vector<64x16xf32> -> vector<64x16xf32>
    %21 = arith.truncf %20 : vector<64x16xf32> to vector<64x16xbf16>
    %c64 = arith.constant 64 : index
    %c0_17 = arith.constant 0 : index
    %22 = vector.load %arg11[%c64, %c0_17] : memref<1024x16xbf16, #tpu.memory_space<vmem>>, vector<64x16xbf16>
    tpu.vector_store %arg11[%c64, %c0_17], %21 {strides = array<i32>} : memref<1024x16xbf16, #tpu.memory_space<vmem>>, vector<64x16xbf16>,
    %c2 = arith.constant 2 : index
    %c0_18 = arith.constant 0 : index
    %c0_19 = arith.constant 0 : index
    %23 = vector.load %arg4[%c2, %c0_18, %c0_19] : memref<16x64x16xbf16, #tpu.memory_space<vmem>>, vector<1x64x16xbf16>
    %24 = vector.shape_cast %23 : vector<1x64x16xbf16> to vector<64x16xbf16>
    %cst_20 = arith.constant dense<0.000000e+00> : vector<64x16xf32>
    %25 = tpu.matmul %12, %24, %cst_20 {dimension_numbers = #tpu.dot_dimension_numbers<[1], [0], [0], [1], [0, 0, 1, 1], [], []>} : vector<64x64xbf16>, vector<64x16xbf16>, vector<64x16xf32> -> vector<64x16xf32>
    %26 = arith.truncf %25 : vector<64x16xf32> to vector<64x16xbf16>
    %c128 = arith.constant 128 : index
    %c0_21 = arith.constant 0 : index
    %27 = vector.load %arg11[%c128, %c0_21] : memref<1024x16xbf16, #tpu.memory_space<vmem>>, vector<64x16xbf16>
    tpu.vector_store %arg11[%c128, %c0_21], %26 {strides = array<i32>} : memref<1024x16xbf16, #tpu.memory_space<vmem>>, vector<64x16xbf16>,
    %c3 = arith.constant 3 : index
    %c0_22 = arith.constant 0 : index
    %c0_23 = arith.constant 0 : index
    %28 = vector.load %arg4[%c3, %c0_22, %c0_23] : memref<16x64x16xbf16, #tpu.memory_space<vmem>>, vector<1x64x16xbf16>
    %29 = vector.shape_cast %28 : vector<1x64x16xbf16> to vector<64x16xbf16>
    %cst_24 = arith.constant dense<0.000000e+00> : vector<64x16xf32>
    %30 = tpu.matmul %12, %29, %cst_24 {dimension_numbers = #tpu.dot_dimension_numbers<[1], [0], [0], [1], [0, 0, 1, 1], [], []>} : vector<64x64xbf16>, vector<64x16xbf16>, vector<64x16xf32> -> vector<64x16xf32>
    %31 = arith.truncf %30 : vector<64x16xf32> to vector<64x16xbf16>
    %c192 = arith.constant 192 : index
    %c0_25 = arith.constant 0 : index
    %32 = vector.load %arg11[%c192, %c0_25] : memref<1024x16xbf16, #tpu.memory_space<vmem>>, vector<64x16xbf16>
    tpu.vector_store %arg11[%c192, %c0_25], %31 {strides = array<i32>} : memref<1024x16xbf16, #tpu.memory_space<vmem>>, vector<64x16xbf16>,
    %c4 = arith.constant 4 : index
    %c0_26 = arith.constant 0 : index
    %c0_27 = arith.constant 0 : index
    %33 = vector.load %arg4[%c4, %c0_26, %c0_27] : memref<16x64x16xbf16, #tpu.memory_space<vmem>>, vector<1x64x16xbf16>
    %34 = vector.shape_cast %33 : vector<1x64x16xbf16> to vector<64x16xbf16>
    %cst_28 = arith.constant dense<0.000000e+00> : vector<64x16xf32>
    %35 = tpu.matmul %12, %34, %cst_28 {dimension_numbers = #tpu.dot_dimension_numbers<[1], [0], [0], [1], [0, 0, 1, 1], [], []>} : vector<64x64xbf16>, vector<64x16xbf16>, vector<64x16xf32> -> vector<64x16xf32>
    %36 = arith.truncf %35 : vector<64x16xf32> to vector<64x16xbf16>
    %c256 = arith.constant 256 : index
    %c0_29 = arith.constant 0 : index
    %37 = vector.load %arg11[%c256, %c0_29] : memref<1024x16xbf16, #tpu.memory_space<vmem>>, vector<64x16xbf16>
    tpu.vector_store %arg11[%c256, %c0_29], %36 {strides = array<i32>} : memref<1024x16xbf16, #tpu.memory_space<vmem>>, vector<64x16xbf16>,
    %c5 = arith.constant 5 : index
    %c0_30 = arith.constant 0 : index
    %c0_31 = arith.constant 0 : index
    %38 = vector.load %arg4[%c5, %c0_30, %c0_31] : memref<16x64x16xbf16, #tpu.memory_space<vmem>>, vector<1x64x16xbf16>
    %39 = vector.shape_cast %38 : vector<1x64x16xbf16> to vector<64x16xbf16>
    %cst_32 = arith.constant dense<0.000000e+00> : vector<64x16xf32>
    %40 = tpu.matmul %12, %39, %cst_32 {dimension_numbers = #tpu.dot_dimension_numbers<[1], [0], [0], [1], [0, 0, 1, 1], [], []>} : vector<64x64xbf16>, vector<64x16xbf16>, vector<64x16xf32> -> vector<64x16xf32>
    %41 = arith.truncf %40 : vector<64x16xf32> to vector<64x16xbf16>
    %c320 = arith.constant 320 : index
    %c0_33 = arith.constant 0 : index
    %42 = vector.load %arg11[%c320, %c0_33] : memref<1024x16xbf16, #tpu.memory_space<vmem>>, vector<64x16xbf16>
    tpu.vector_store %arg11[%c320, %c0_33], %41 {strides = array<i32>} : memref<1024x16xbf16, #tpu.memory_space<vmem>>, vector<64x16xbf16>,
    %c6 = arith.constant 6 : index
    %c0_34 = arith.constant 0 : index
    %c0_35 = arith.constant 0 : index
    %43 = vector.load %arg4[%c6, %c0_34, %c0_35] : memref<16x64x16xbf16, #tpu.memory_space<vmem>>, vector<1x64x16xbf16>
    %44 = vector.shape_cast %43 : vector<1x64x16xbf16> to vector<64x16xbf16>
    %cst_36 = arith.constant dense<0.000000e+00> : vector<64x16xf32>
    %45 = tpu.matmul %12, %44, %cst_36 {dimension_numbers = #tpu.dot_dimension_numbers<[1], [0], [0], [1], [0, 0, 1, 1], [], []>} : vector<64x64xbf16>, vector<64x16xbf16>, vector<64x16xf32> -> vector<64x16xf32>
    %46 = arith.truncf %45 : vector<64x16xf32> to vector<64x16xbf16>
    %c384 = arith.constant 384 : index
    %c0_37 = arith.constant 0 : index
    %47 = vector.load %arg11[%c384, %c0_37] : memref<1024x16xbf16, #tpu.memory_space<vmem>>, vector<64x16xbf16>
    tpu.vector_store %arg11[%c384, %c0_37], %46 {strides = array<i32>} : memref<1024x16xbf16, #tpu.memory_space<vmem>>, vector<64x16xbf16>,
    %c7 = arith.constant 7 : index
    %c0_38 = arith.constant 0 : index
    %c0_39 = arith.constant 0 : index
    %48 = vector.load %arg4[%c7, %c0_38, %c0_39] : memref<16x64x16xbf16, #tpu.memory_space<vmem>>, vector<1x64x16xbf16>
    %49 = vector.shape_cast %48 : vector<1x64x16xbf16> to vector<64x16xbf16>
    %cst_40 = arith.constant dense<0.000000e+00> : vector<64x16xf32>
    %50 = tpu.matmul %12, %49, %cst_40 {dimension_numbers = #tpu.dot_dimension_numbers<[1], [0], [0], [1], [0, 0, 1, 1], [], []>} : vector<64x64xbf16>, vector<64x16xbf16>, vector<64x16xf32> -> vector<64x16xf32>
    %51 = arith.truncf %50 : vector<64x16xf32> to vector<64x16xbf16>
    %c448 = arith.constant 448 : index
    %c0_41 = arith.constant 0 : index
    %52 = vector.load %arg11[%c448, %c0_41] : memref<1024x16xbf16, #tpu.memory_space<vmem>>, vector<64x16xbf16>
    tpu.vector_store %arg11[%c448, %c0_41], %51 {strides = array<i32>} : memref<1024x16xbf16, #tpu.memory_space<vmem>>, vector<64x16xbf16>,
    %c8 = arith.constant 8 : index
    %c0_42 = arith.constant 0 : index
    %c0_43 = arith.constant 0 : index
    %53 = vector.load %arg4[%c8, %c0_42, %c0_43] : memref<16x64x16xbf16, #tpu.memory_space<vmem>>, vector<1x64x16xbf16>
    %54 = vector.shape_cast %53 : vector<1x64x16xbf16> to vector<64x16xbf16>
    %cst_44 = arith.constant dense<0.000000e+00> : vector<64x16xf32>
    %55 = tpu.matmul %12, %54, %cst_44 {dimension_numbers = #tpu.dot_dimension_numbers<[1], [0], [0], [1], [0, 0, 1, 1], [], []>} : vector<64x64xbf16>, vector<64x16xbf16>, vector<64x16xf32> -> vector<64x16xf32>
    %56 = arith.truncf %55 : vector<64x16xf32> to vector<64x16xbf16>
    %c512 = arith.constant 512 : index
    %c0_45 = arith.constant 0 : index
    %57 = vector.load %arg11[%c512, %c0_45] : memref<1024x16xbf16, #tpu.memory_space<vmem>>, vector<64x16xbf16>
    tpu.vector_store %arg11[%c512, %c0_45], %56 {strides = array<i32>} : memref<1024x16xbf16, #tpu.memory_space<vmem>>, vector<64x16xbf16>,
    %c9 = arith.constant 9 : index
    %c0_46 = arith.constant 0 : index
    %c0_47 = arith.constant 0 : index
    %58 = vector.load %arg4[%c9, %c0_46, %c0_47] : memref<16x64x16xbf16, #tpu.memory_space<vmem>>, vector<1x64x16xbf16>
    %59 = vector.shape_cast %58 : vector<1x64x16xbf16> to vector<64x16xbf16>
    %cst_48 = arith.constant dense<0.000000e+00> : vector<64x16xf32>
    %60 = tpu.matmul %12, %59, %cst_48 {dimension_numbers = #tpu.dot_dimension_numbers<[1], [0], [0], [1], [0, 0, 1, 1], [], []>} : vector<64x64xbf16>, vector<64x16xbf16>, vector<64x16xf32> -> vector<64x16xf32>
    %61 = arith.truncf %60 : vector<64x16xf32> to vector<64x16xbf16>
    %c576 = arith.constant 576 : index
    %c0_49 = arith.constant 0 : index
    %62 = vector.load %arg11[%c576, %c0_49] : memref<1024x16xbf16, #tpu.memory_space<vmem>>, vector<64x16xbf16>
    tpu.vector_store %arg11[%c576, %c0_49], %61 {strides = array<i32>} : memref<1024x16xbf16, #tpu.memory_space<vmem>>, vector<64x16xbf16>,
    %c10 = arith.constant 10 : index
    %c0_50 = arith.constant 0 : index
    %c0_51 = arith.constant 0 : index
    %63 = vector.load %arg4[%c10, %c0_50, %c0_51] : memref<16x64x16xbf16, #tpu.memory_space<vmem>>, vector<1x64x16xbf16>
    %64 = vector.shape_cast %63 : vector<1x64x16xbf16> to vector<64x16xbf16>
    %cst_52 = arith.constant dense<0.000000e+00> : vector<64x16xf32>
    %65 = tpu.matmul %12, %64, %cst_52 {dimension_numbers = #tpu.dot_dimension_numbers<[1], [0], [0], [1], [0, 0, 1, 1], [], []>} : vector<64x64xbf16>, vector<64x16xbf16>, vector<64x16xf32> -> vector<64x16xf32>
    %66 = arith.truncf %65 : vector<64x16xf32> to vector<64x16xbf16>
    %c640 = arith.constant 640 : index
    %c0_53 = arith.constant 0 : index
    %67 = vector.load %arg11[%c640, %c0_53] : memref<1024x16xbf16, #tpu.memory_space<vmem>>, vector<64x16xbf16>
    tpu.vector_store %arg11[%c640, %c0_53], %66 {strides = array<i32>} : memref<1024x16xbf16, #tpu.memory_space<vmem>>, vector<64x16xbf16>,
    %c11 = arith.constant 11 : index
    %c0_54 = arith.constant 0 : index
    %c0_55 = arith.constant 0 : index
    %68 = vector.load %arg4[%c11, %c0_54, %c0_55] : memref<16x64x16xbf16, #tpu.memory_space<vmem>>, vector<1x64x16xbf16>
    %69 = vector.shape_cast %68 : vector<1x64x16xbf16> to vector<64x16xbf16>
    %cst_56 = arith.constant dense<0.000000e+00> : vector<64x16xf32>
    %70 = tpu.matmul %12, %69, %cst_56 {dimension_numbers = #tpu.dot_dimension_numbers<[1], [0], [0], [1], [0, 0, 1, 1], [], []>} : vector<64x64xbf16>, vector<64x16xbf16>, vector<64x16xf32> -> vector<64x16xf32>
    %71 = arith.truncf %70 : vector<64x16xf32> to vector<64x16xbf16>
    %c704 = arith.constant 704 : index
    %c0_57 = arith.constant 0 : index
    %72 = vector.load %arg11[%c704, %c0_57] : memref<1024x16xbf16, #tpu.memory_space<vmem>>, vector<64x16xbf16>
    tpu.vector_store %arg11[%c704, %c0_57], %71 {strides = array<i32>} : memref<1024x16xbf16, #tpu.memory_space<vmem>>, vector<64x16xbf16>,
    %c12 = arith.constant 12 : index
    %c0_58 = arith.constant 0 : index
    %c0_59 = arith.constant 0 : index
    %73 = vector.load %arg4[%c12, %c0_58, %c0_59] : memref<16x64x16xbf16, #tpu.memory_space<vmem>>, vector<1x64x16xbf16>
    %74 = vector.shape_cast %73 : vector<1x64x16xbf16> to vector<64x16xbf16>
    %cst_60 = arith.constant dense<0.000000e+00> : vector<64x16xf32>
    %75 = tpu.matmul %12, %74, %cst_60 {dimension_numbers = #tpu.dot_dimension_numbers<[1], [0], [0], [1], [0, 0, 1, 1], [], []>} : vector<64x64xbf16>, vector<64x16xbf16>, vector<64x16xf32> -> vector<64x16xf32>
    %76 = arith.truncf %75 : vector<64x16xf32> to vector<64x16xbf16>
    %c768 = arith.constant 768 : index
    %c0_61 = arith.constant 0 : index
    %77 = vector.load %arg11[%c768, %c0_61] : memref<1024x16xbf16, #tpu.memory_space<vmem>>, vector<64x16xbf16>
    tpu.vector_store %arg11[%c768, %c0_61], %76 {strides = array<i32>} : memref<1024x16xbf16, #tpu.memory_space<vmem>>, vector<64x16xbf16>,
    %c13 = arith.constant 13 : index
    %c0_62 = arith.constant 0 : index
    %c0_63 = arith.constant 0 : index
    %78 = vector.load %arg4[%c13, %c0_62, %c0_63] : memref<16x64x16xbf16, #tpu.memory_space<vmem>>, vector<1x64x16xbf16>
    %79 = vector.shape_cast %78 : vector<1x64x16xbf16> to vector<64x16xbf16>
    %cst_64 = arith.constant dense<0.000000e+00> : vector<64x16xf32>
    %80 = tpu.matmul %12, %79, %cst_64 {dimension_numbers = #tpu.dot_dimension_numbers<[1], [0], [0], [1], [0, 0, 1, 1], [], []>} : vector<64x64xbf16>, vector<64x16xbf16>, vector<64x16xf32> -> vector<64x16xf32>
    %81 = arith.truncf %80 : vector<64x16xf32> to vector<64x16xbf16>
    %c832 = arith.constant 832 : index
    %c0_65 = arith.constant 0 : index
    %82 = vector.load %arg11[%c832, %c0_65] : memref<1024x16xbf16, #tpu.memory_space<vmem>>, vector<64x16xbf16>
    tpu.vector_store %arg11[%c832, %c0_65], %81 {strides = array<i32>} : memref<1024x16xbf16, #tpu.memory_space<vmem>>, vector<64x16xbf16>,
    %c14 = arith.constant 14 : index
    %c0_66 = arith.constant 0 : index
    %c0_67 = arith.constant 0 : index
    %83 = vector.load %arg4[%c14, %c0_66, %c0_67] : memref<16x64x16xbf16, #tpu.memory_space<vmem>>, vector<1x64x16xbf16>
    %84 = vector.shape_cast %83 : vector<1x64x16xbf16> to vector<64x16xbf16>
    %cst_68 = arith.constant dense<0.000000e+00> : vector<64x16xf32>
    %85 = tpu.matmul %12, %84, %cst_68 {dimension_numbers = #tpu.dot_dimension_numbers<[1], [0], [0], [1], [0, 0, 1, 1], [], []>} : vector<64x64xbf16>, vector<64x16xbf16>, vector<64x16xf32> -> vector<64x16xf32>
    %86 = arith.truncf %85 : vector<64x16xf32> to vector<64x16xbf16>
    %c896 = arith.constant 896 : index
    %c0_69 = arith.constant 0 : index
    %87 = vector.load %arg11[%c896, %c0_69] : memref<1024x16xbf16, #tpu.memory_space<vmem>>, vector<64x16xbf16>
    tpu.vector_store %arg11[%c896, %c0_69], %86 {strides = array<i32>} : memref<1024x16xbf16, #tpu.memory_space<vmem>>, vector<64x16xbf16>,
    %c15 = arith.constant 15 : index
    %c0_70 = arith.constant 0 : index
    %c0_71 = arith.constant 0 : index
    %88 = vector.load %arg4[%c15, %c0_70, %c0_71] : memref<16x64x16xbf16, #tpu.memory_space<vmem>>, vector<1x64x16xbf16>
    %89 = vector.shape_cast %88 : vector<1x64x16xbf16> to vector<64x16xbf16>
    %cst_72 = arith.constant dense<0.000000e+00> : vector<64x16xf32>
    %90 = tpu.matmul %12, %89, %cst_72 {dimension_numbers = #tpu.dot_dimension_numbers<[1], [0], [0], [1], [0, 0, 1, 1], [], []>} : vector<64x64xbf16>, vector<64x16xbf16>, vector<64x16xf32> -> vector<64x16xf32>
    %91 = arith.truncf %90 : vector<64x16xf32> to vector<64x16xbf16>
    %c960 = arith.constant 960 : index
    %c0_73 = arith.constant 0 : index
    %92 = vector.load %arg11[%c960, %c0_73] : memref<1024x16xbf16, #tpu.memory_space<vmem>>, vector<64x16xbf16>
    tpu.vector_store %arg11[%c960, %c0_73], %91 {strides = array<i32>} : memref<1024x16xbf16, #tpu.memory_space<vmem>>, vector<64x16xbf16>,
    %c0_74 = arith.constant 0 : index
    %c0_75 = arith.constant 0 : index
    %93 = vector.load %arg5[%c0_74, %c0_75] : memref<256x1024xbf16, #tpu.memory_space<vmem>>, vector<256x1024xbf16>
    %c0_76 = arith.constant 0 : index
    %c0_77 = arith.constant 0 : index
    %94 = vector.load %arg11[%c0_76, %c0_77] : memref<1024x16xbf16, #tpu.memory_space<vmem>>, vector<1024x16xbf16>
    %cst_78 = arith.constant dense<0.000000e+00> : vector<256x16xf32>
    %95 = tpu.matmul %93, %94, %cst_78 {dimension_numbers = #tpu.dot_dimension_numbers<[1], [0], [0], [1], [0, 0, 1, 1], [], []>} : vector<256x1024xbf16>, vector<1024x16xbf16>, vector<256x16xf32> -> vector<256x16xf32>
    %c0_79 = arith.constant 0 : index
    %c0_80 = arith.constant 0 : index
    %96 = vector.load %arg6[%c0_79, %c0_80] : memref<256x1xf32, #tpu.memory_space<vmem>>, vector<256x1xf32>
    %97 = vector.broadcast %96 : vector<256x1xf32> to vector<256x16xf32>
    %98 = arith.addf %95, %97 : vector<256x16xf32>
    %cst_81 = arith.constant dense<0.000000e+00> : vector<256xf32>
    %99 = vector.multi_reduction <add>, %98, %cst_81 [1] : vector<256x16xf32> to vector<256xf32>
    %100 = vector.shape_cast %99 : vector<256xf32> to vector<256x1xf32>
    %cst_82 = arith.constant 6.250000e-02 : f32
    %101 = vector.broadcast %cst_82 : f32 to vector<256x1xf32>
    %102 = arith.mulf %100, %101 : vector<256x1xf32>
    %103 = arith.mulf %98, %98 : vector<256x16xf32>
    %cst_83 = arith.constant dense<0.000000e+00> : vector<256xf32>
    %104 = vector.multi_reduction <add>, %103, %cst_83 [1] : vector<256x16xf32> to vector<256xf32>
    %105 = vector.shape_cast %104 : vector<256xf32> to vector<256x1xf32>
    %cst_84 = arith.constant 6.250000e-02 : f32
    %106 = vector.broadcast %cst_84 : f32 to vector<256x1xf32>
    %107 = arith.mulf %105, %106 : vector<256x1xf32>
    %108 = arith.mulf %102, %102 : vector<256x1xf32>
    %109 = arith.subf %107, %108 : vector<256x1xf32>
    %cst_85 = arith.constant 0.000000e+00 : f32
    %110 = vector.broadcast %cst_85 : f32 to vector<256x1xf32>
    %111 = arith.maximumf %109, %110 : vector<256x1xf32>
    %112 = vector.broadcast %102 : vector<256x1xf32> to vector<256x16xf32>
    %113 = arith.subf %98, %112 : vector<256x16xf32>
    %cst_86 = arith.constant 9.99999974E-6 : f32
    %114 = vector.broadcast %cst_86 : f32 to vector<256x1xf32>
    %115 = arith.addf %111, %114 : vector<256x1xf32>
    %116 = math.rsqrt %115 : vector<256x1xf32>
    %117 = vector.broadcast %116 : vector<256x1xf32> to vector<256x16xf32>
    %118 = arith.mulf %113, %117 : vector<256x16xf32>
    %cst_87 = arith.constant 0.000000e+00 : f32
    %119 = vector.broadcast %cst_87 : f32 to vector<256x16xf32>
    %120 = arith.cmpf oge, %118, %119 : vector<256x16xf32>
    %cst_88 = arith.constant 2.000000e-01 : f32
    %121 = vector.broadcast %cst_88 : f32 to vector<256x16xf32>
    %122 = arith.mulf %121, %118 : vector<256x16xf32>
    %123 = arith.select %120, %118, %122 : vector<256x16xi1>, vector<256x16xf32>
    %124 = arith.truncf %123 : vector<256x16xf32> to vector<256x16xbf16>
    %cst_89 = arith.constant 0.000000e+00 : f32
    %125 = vector.broadcast %cst_89 : f32 to vector<256x9xf32>
    %c0_90 = arith.constant 0 : index
    %c0_91 = arith.constant 0 : index
    %c0_92 = arith.constant 0 : index
    %126 = vector.load %arg7[%c0_90, %c0_91, %c0_92] : memref<16x16x9xbf16, #tpu.memory_space<vmem>>, vector<1x16x9xbf16>
    %127 = vector.shape_cast %126 : vector<1x16x9xbf16> to vector<16x9xbf16>
    %cst_93 = arith.constant dense<0.000000e+00> : vector<256x9xf32>
    %128 = tpu.matmul %124, %127, %cst_93 {dimension_numbers = #tpu.dot_dimension_numbers<[1], [0], [0], [1], [0, 0, 1, 1], [], []>} : vector<256x16xbf16>, vector<16x9xbf16>, vector<256x9xf32> -> vector<256x9xf32>
    %c0_94 = arith.constant 0 : index
    %c0_95 = arith.constant 0 : index
    %c0_96 = arith.constant 0 : index
    %129 = vector.load %arg8[%c0_94, %c0_95, %c0_96] : memref<16x256x1xf32, #tpu.memory_space<vmem>>, vector<1x256x1xf32>
    %130 = vector.shape_cast %129 : vector<1x256x1xf32> to vector<256x1xf32>
    %131 = vector.broadcast %130 : vector<256x1xf32> to vector<256x9xf32>
    %132 = arith.mulf %128, %131 : vector<256x9xf32>
    %133 = arith.addf %125, %132 : vector<256x9xf32>
    %c1_97 = arith.constant 1 : index
    %c0_98 = arith.constant 0 : index
    %c0_99 = arith.constant 0 : index
    %134 = vector.load %arg7[%c1_97, %c0_98, %c0_99] : memref<16x16x9xbf16, #tpu.memory_space<vmem>>, vector<1x16x9xbf16>
    %135 = vector.shape_cast %134 : vector<1x16x9xbf16> to vector<16x9xbf16>
    %cst_100 = arith.constant dense<0.000000e+00> : vector<256x9xf32>
    %136 = tpu.matmul %124, %135, %cst_100 {dimension_numbers = #tpu.dot_dimension_numbers<[1], [0], [0], [1], [0, 0, 1, 1], [], []>} : vector<256x16xbf16>, vector<16x9xbf16>, vector<256x9xf32> -> vector<256x9xf32>
    %c1_101 = arith.constant 1 : index
    %c0_102 = arith.constant 0 : index
    %c0_103 = arith.constant 0 : index
    %137 = vector.load %arg8[%c1_101, %c0_102, %c0_103] : memref<16x256x1xf32, #tpu.memory_space<vmem>>, vector<1x256x1xf32>
    %138 = vector.shape_cast %137 : vector<1x256x1xf32> to vector<256x1xf32>
    %139 = vector.broadcast %138 : vector<256x1xf32> to vector<256x9xf32>
    %140 = arith.mulf %136, %139 : vector<256x9xf32>
    %141 = arith.addf %133, %140 : vector<256x9xf32>
    %c2_104 = arith.constant 2 : index
    %c0_105 = arith.constant 0 : index
    %c0_106 = arith.constant 0 : index
    %142 = vector.load %arg7[%c2_104, %c0_105, %c0_106] : memref<16x16x9xbf16, #tpu.memory_space<vmem>>, vector<1x16x9xbf16>
    %143 = vector.shape_cast %142 : vector<1x16x9xbf16> to vector<16x9xbf16>
    %cst_107 = arith.constant dense<0.000000e+00> : vector<256x9xf32>
    %144 = tpu.matmul %124, %143, %cst_107 {dimension_numbers = #tpu.dot_dimension_numbers<[1], [0], [0], [1], [0, 0, 1, 1], [], []>} : vector<256x16xbf16>, vector<16x9xbf16>, vector<256x9xf32> -> vector<256x9xf32>
    %c2_108 = arith.constant 2 : index
    %c0_109 = arith.constant 0 : index
    %c0_110 = arith.constant 0 : index
    %145 = vector.load %arg8[%c2_108, %c0_109, %c0_110] : memref<16x256x1xf32, #tpu.memory_space<vmem>>, vector<1x256x1xf32>
    %146 = vector.shape_cast %145 : vector<1x256x1xf32> to vector<256x1xf32>
    %147 = vector.broadcast %146 : vector<256x1xf32> to vector<256x9xf32>
    %148 = arith.mulf %144, %147 : vector<256x9xf32>
    %149 = arith.addf %141, %148 : vector<256x9xf32>
    %c3_111 = arith.constant 3 : index
    %c0_112 = arith.constant 0 : index
    %c0_113 = arith.constant 0 : index
    %150 = vector.load %arg7[%c3_111, %c0_112, %c0_113] : memref<16x16x9xbf16, #tpu.memory_space<vmem>>, vector<1x16x9xbf16>
    %151 = vector.shape_cast %150 : vector<1x16x9xbf16> to vector<16x9xbf16>
    %cst_114 = arith.constant dense<0.000000e+00> : vector<256x9xf32>
    %152 = tpu.matmul %124, %151, %cst_114 {dimension_numbers = #tpu.dot_dimension_numbers<[1], [0], [0], [1], [0, 0, 1, 1], [], []>} : vector<256x16xbf16>, vector<16x9xbf16>, vector<256x9xf32> -> vector<256x9xf32>
    %c3_115 = arith.constant 3 : index
    %c0_116 = arith.constant 0 : index
    %c0_117 = arith.constant 0 : index
    %153 = vector.load %arg8[%c3_115, %c0_116, %c0_117] : memref<16x256x1xf32, #tpu.memory_space<vmem>>, vector<1x256x1xf32>
    %154 = vector.shape_cast %153 : vector<1x256x1xf32> to vector<256x1xf32>
    %155 = vector.broadcast %154 : vector<256x1xf32> to vector<256x9xf32>
    %156 = arith.mulf %152, %155 : vector<256x9xf32>
    %157 = arith.addf %149, %156 : vector<256x9xf32>
    %c4_118 = arith.constant 4 : index
    %c0_119 = arith.constant 0 : index
    %c0_120 = arith.constant 0 : index
    %158 = vector.load %arg7[%c4_118, %c0_119, %c0_120] : memref<16x16x9xbf16, #tpu.memory_space<vmem>>, vector<1x16x9xbf16>
    %159 = vector.shape_cast %158 : vector<1x16x9xbf16> to vector<16x9xbf16>
    %cst_121 = arith.constant dense<0.000000e+00> : vector<256x9xf32>
    %160 = tpu.matmul %124, %159, %cst_121 {dimension_numbers = #tpu.dot_dimension_numbers<[1], [0], [0], [1], [0, 0, 1, 1], [], []>} : vector<256x16xbf16>, vector<16x9xbf16>, vector<256x9xf32> -> vector<256x9xf32>
    %c4_122 = arith.constant 4 : index
    %c0_123 = arith.constant 0 : index
    %c0_124 = arith.constant 0 : index
    %161 = vector.load %arg8[%c4_122, %c0_123, %c0_124] : memref<16x256x1xf32, #tpu.memory_space<vmem>>, vector<1x256x1xf32>
    %162 = vector.shape_cast %161 : vector<1x256x1xf32> to vector<256x1xf32>
    %163 = vector.broadcast %162 : vector<256x1xf32> to vector<256x9xf32>
    %164 = arith.mulf %160, %163 : vector<256x9xf32>
    %165 = arith.addf %157, %164 : vector<256x9xf32>
    %c5_125 = arith.constant 5 : index
    %c0_126 = arith.constant 0 : index
    %c0_127 = arith.constant 0 : index
    %166 = vector.load %arg7[%c5_125, %c0_126, %c0_127] : memref<16x16x9xbf16, #tpu.memory_space<vmem>>, vector<1x16x9xbf16>
    %167 = vector.shape_cast %166 : vector<1x16x9xbf16> to vector<16x9xbf16>
    %cst_128 = arith.constant dense<0.000000e+00> : vector<256x9xf32>
    %168 = tpu.matmul %124, %167, %cst_128 {dimension_numbers = #tpu.dot_dimension_numbers<[1], [0], [0], [1], [0, 0, 1, 1], [], []>} : vector<256x16xbf16>, vector<16x9xbf16>, vector<256x9xf32> -> vector<256x9xf32>
    %c5_129 = arith.constant 5 : index
    %c0_130 = arith.constant 0 : index
    %c0_131 = arith.constant 0 : index
    %169 = vector.load %arg8[%c5_129, %c0_130, %c0_131] : memref<16x256x1xf32, #tpu.memory_space<vmem>>, vector<1x256x1xf32>
    %170 = vector.shape_cast %169 : vector<1x256x1xf32> to vector<256x1xf32>
    %171 = vector.broadcast %170 : vector<256x1xf32> to vector<256x9xf32>
    %172 = arith.mulf %168, %171 : vector<256x9xf32>
    %173 = arith.addf %165, %172 : vector<256x9xf32>
    %c6_132 = arith.constant 6 : index
    %c0_133 = arith.constant 0 : index
    %c0_134 = arith.constant 0 : index
    %174 = vector.load %arg7[%c6_132, %c0_133, %c0_134] : memref<16x16x9xbf16, #tpu.memory_space<vmem>>, vector<1x16x9xbf16>
    %175 = vector.shape_cast %174 : vector<1x16x9xbf16> to vector<16x9xbf16>
    %cst_135 = arith.constant dense<0.000000e+00> : vector<256x9xf32>
    %176 = tpu.matmul %124, %175, %cst_135 {dimension_numbers = #tpu.dot_dimension_numbers<[1], [0], [0], [1], [0, 0, 1, 1], [], []>} : vector<256x16xbf16>, vector<16x9xbf16>, vector<256x9xf32> -> vector<256x9xf32>
    %c6_136 = arith.constant 6 : index
    %c0_137 = arith.constant 0 : index
    %c0_138 = arith.constant 0 : index
    %177 = vector.load %arg8[%c6_136, %c0_137, %c0_138] : memref<16x256x1xf32, #tpu.memory_space<vmem>>, vector<1x256x1xf32>
    %178 = vector.shape_cast %177 : vector<1x256x1xf32> to vector<256x1xf32>
    %179 = vector.broadcast %178 : vector<256x1xf32> to vector<256x9xf32>
    %180 = arith.mulf %176, %179 : vector<256x9xf32>
    %181 = arith.addf %173, %180 : vector<256x9xf32>
    %c7_139 = arith.constant 7 : index
    %c0_140 = arith.constant 0 : index
    %c0_141 = arith.constant 0 : index
    %182 = vector.load %arg7[%c7_139, %c0_140, %c0_141] : memref<16x16x9xbf16, #tpu.memory_space<vmem>>, vector<1x16x9xbf16>
    %183 = vector.shape_cast %182 : vector<1x16x9xbf16> to vector<16x9xbf16>
    %cst_142 = arith.constant dense<0.000000e+00> : vector<256x9xf32>
    %184 = tpu.matmul %124, %183, %cst_142 {dimension_numbers = #tpu.dot_dimension_numbers<[1], [0], [0], [1], [0, 0, 1, 1], [], []>} : vector<256x16xbf16>, vector<16x9xbf16>, vector<256x9xf32> -> vector<256x9xf32>
    %c7_143 = arith.constant 7 : index
    %c0_144 = arith.constant 0 : index
    %c0_145 = arith.constant 0 : index
    %185 = vector.load %arg8[%c7_143, %c0_144, %c0_145] : memref<16x256x1xf32, #tpu.memory_space<vmem>>, vector<1x256x1xf32>
    %186 = vector.shape_cast %185 : vector<1x256x1xf32> to vector<256x1xf32>
    %187 = vector.broadcast %186 : vector<256x1xf32> to vector<256x9xf32>
    %188 = arith.mulf %184, %187 : vector<256x9xf32>
    %189 = arith.addf %181, %188 : vector<256x9xf32>
    %c8_146 = arith.constant 8 : index
    %c0_147 = arith.constant 0 : index
    %c0_148 = arith.constant 0 : index
    %190 = vector.load %arg7[%c8_146, %c0_147, %c0_148] : memref<16x16x9xbf16, #tpu.memory_space<vmem>>, vector<1x16x9xbf16>
    %191 = vector.shape_cast %190 : vector<1x16x9xbf16> to vector<16x9xbf16>
    %cst_149 = arith.constant dense<0.000000e+00> : vector<256x9xf32>
    %192 = tpu.matmul %124, %191, %cst_149 {dimension_numbers = #tpu.dot_dimension_numbers<[1], [0], [0], [1], [0, 0, 1, 1], [], []>} : vector<256x16xbf16>, vector<16x9xbf16>, vector<256x9xf32> -> vector<256x9xf32>
    %c8_150 = arith.constant 8 : index
    %c0_151 = arith.constant 0 : index
    %c0_152 = arith.constant 0 : index
    %193 = vector.load %arg8[%c8_150, %c0_151, %c0_152] : memref<16x256x1xf32, #tpu.memory_space<vmem>>, vector<1x256x1xf32>
    %194 = vector.shape_cast %193 : vector<1x256x1xf32> to vector<256x1xf32>
    %195 = vector.broadcast %194 : vector<256x1xf32> to vector<256x9xf32>
    %196 = arith.mulf %192, %195 : vector<256x9xf32>
    %197 = arith.addf %189, %196 : vector<256x9xf32>
    %c9_153 = arith.constant 9 : index
    %c0_154 = arith.constant 0 : index
    %c0_155 = arith.constant 0 : index
    %198 = vector.load %arg7[%c9_153, %c0_154, %c0_155] : memref<16x16x9xbf16, #tpu.memory_space<vmem>>, vector<1x16x9xbf16>
    %199 = vector.shape_cast %198 : vector<1x16x9xbf16> to vector<16x9xbf16>
    %cst_156 = arith.constant dense<0.000000e+00> : vector<256x9xf32>
    %200 = tpu.matmul %124, %199, %cst_156 {dimension_numbers = #tpu.dot_dimension_numbers<[1], [0], [0], [1], [0, 0, 1, 1], [], []>} : vector<256x16xbf16>, vector<16x9xbf16>, vector<256x9xf32> -> vector<256x9xf32>
    %c9_157 = arith.constant 9 : index
    %c0_158 = arith.constant 0 : index
    %c0_159 = arith.constant 0 : index
    %201 = vector.load %arg8[%c9_157, %c0_158, %c0_159] : memref<16x256x1xf32, #tpu.memory_space<vmem>>, vector<1x256x1xf32>
    %202 = vector.shape_cast %201 : vector<1x256x1xf32> to vector<256x1xf32>
    %203 = vector.broadcast %202 : vector<256x1xf32> to vector<256x9xf32>
    %204 = arith.mulf %200, %203 : vector<256x9xf32>
    %205 = arith.addf %197, %204 : vector<256x9xf32>
    %c10_160 = arith.constant 10 : index
    %c0_161 = arith.constant 0 : index
    %c0_162 = arith.constant 0 : index
    %206 = vector.load %arg7[%c10_160, %c0_161, %c0_162] : memref<16x16x9xbf16, #tpu.memory_space<vmem>>, vector<1x16x9xbf16>
    %207 = vector.shape_cast %206 : vector<1x16x9xbf16> to vector<16x9xbf16>
    %cst_163 = arith.constant dense<0.000000e+00> : vector<256x9xf32>
    %208 = tpu.matmul %124, %207, %cst_163 {dimension_numbers = #tpu.dot_dimension_numbers<[1], [0], [0], [1], [0, 0, 1, 1], [], []>} : vector<256x16xbf16>, vector<16x9xbf16>, vector<256x9xf32> -> vector<256x9xf32>
    %c10_164 = arith.constant 10 : index
    %c0_165 = arith.constant 0 : index
    %c0_166 = arith.constant 0 : index
    %209 = vector.load %arg8[%c10_164, %c0_165, %c0_166] : memref<16x256x1xf32, #tpu.memory_space<vmem>>, vector<1x256x1xf32>
    %210 = vector.shape_cast %209 : vector<1x256x1xf32> to vector<256x1xf32>
    %211 = vector.broadcast %210 : vector<256x1xf32> to vector<256x9xf32>
    %212 = arith.mulf %208, %211 : vector<256x9xf32>
    %213 = arith.addf %205, %212 : vector<256x9xf32>
    %c11_167 = arith.constant 11 : index
    %c0_168 = arith.constant 0 : index
    %c0_169 = arith.constant 0 : index
    %214 = vector.load %arg7[%c11_167, %c0_168, %c0_169] : memref<16x16x9xbf16, #tpu.memory_space<vmem>>, vector<1x16x9xbf16>
    %215 = vector.shape_cast %214 : vector<1x16x9xbf16> to vector<16x9xbf16>
    %cst_170 = arith.constant dense<0.000000e+00> : vector<256x9xf32>
    %216 = tpu.matmul %124, %215, %cst_170 {dimension_numbers = #tpu.dot_dimension_numbers<[1], [0], [0], [1], [0, 0, 1, 1], [], []>} : vector<256x16xbf16>, vector<16x9xbf16>, vector<256x9xf32> -> vector<256x9xf32>
    %c11_171 = arith.constant 11 : index
    %c0_172 = arith.constant 0 : index
    %c0_173 = arith.constant 0 : index
    %217 = vector.load %arg8[%c11_171, %c0_172, %c0_173] : memref<16x256x1xf32, #tpu.memory_space<vmem>>, vector<1x256x1xf32>
    %218 = vector.shape_cast %217 : vector<1x256x1xf32> to vector<256x1xf32>
    %219 = vector.broadcast %218 : vector<256x1xf32> to vector<256x9xf32>
    %220 = arith.mulf %216, %219 : vector<256x9xf32>
    %221 = arith.addf %213, %220 : vector<256x9xf32>
    %c12_174 = arith.constant 12 : index
    %c0_175 = arith.constant 0 : index
    %c0_176 = arith.constant 0 : index
    %222 = vector.load %arg7[%c12_174, %c0_175, %c0_176] : memref<16x16x9xbf16, #tpu.memory_space<vmem>>, vector<1x16x9xbf16>
    %223 = vector.shape_cast %222 : vector<1x16x9xbf16> to vector<16x9xbf16>
    %cst_177 = arith.constant dense<0.000000e+00> : vector<256x9xf32>
    %224 = tpu.matmul %124, %223, %cst_177 {dimension_numbers = #tpu.dot_dimension_numbers<[1], [0], [0], [1], [0, 0, 1, 1], [], []>} : vector<256x16xbf16>, vector<16x9xbf16>, vector<256x9xf32> -> vector<256x9xf32>
    %c12_178 = arith.constant 12 : index
    %c0_179 = arith.constant 0 : index
    %c0_180 = arith.constant 0 : index
    %225 = vector.load %arg8[%c12_178, %c0_179, %c0_180] : memref<16x256x1xf32, #tpu.memory_space<vmem>>, vector<1x256x1xf32>
    %226 = vector.shape_cast %225 : vector<1x256x1xf32> to vector<256x1xf32>
    %227 = vector.broadcast %226 : vector<256x1xf32> to vector<256x9xf32>
    %228 = arith.mulf %224, %227 : vector<256x9xf32>
    %229 = arith.addf %221, %228 : vector<256x9xf32>
    %c13_181 = arith.constant 13 : index
    %c0_182 = arith.constant 0 : index
    %c0_183 = arith.constant 0 : index
    %230 = vector.load %arg7[%c13_181, %c0_182, %c0_183] : memref<16x16x9xbf16, #tpu.memory_space<vmem>>, vector<1x16x9xbf16>
    %231 = vector.shape_cast %230 : vector<1x16x9xbf16> to vector<16x9xbf16>
    %cst_184 = arith.constant dense<0.000000e+00> : vector<256x9xf32>
    %232 = tpu.matmul %124, %231, %cst_184 {dimension_numbers = #tpu.dot_dimension_numbers<[1], [0], [0], [1], [0, 0, 1, 1], [], []>} : vector<256x16xbf16>, vector<16x9xbf16>, vector<256x9xf32> -> vector<256x9xf32>
    %c13_185 = arith.constant 13 : index
    %c0_186 = arith.constant 0 : index
    %c0_187 = arith.constant 0 : index
    %233 = vector.load %arg8[%c13_185, %c0_186, %c0_187] : memref<16x256x1xf32, #tpu.memory_space<vmem>>, vector<1x256x1xf32>
    %234 = vector.shape_cast %233 : vector<1x256x1xf32> to vector<256x1xf32>
    %235 = vector.broadcast %234 : vector<256x1xf32> to vector<256x9xf32>
    %236 = arith.mulf %232, %235 : vector<256x9xf32>
    %237 = arith.addf %229, %236 : vector<256x9xf32>
    %c14_188 = arith.constant 14 : index
    %c0_189 = arith.constant 0 : index
    %c0_190 = arith.constant 0 : index
    %238 = vector.load %arg7[%c14_188, %c0_189, %c0_190] : memref<16x16x9xbf16, #tpu.memory_space<vmem>>, vector<1x16x9xbf16>
    %239 = vector.shape_cast %238 : vector<1x16x9xbf16> to vector<16x9xbf16>
    %cst_191 = arith.constant dense<0.000000e+00> : vector<256x9xf32>
    %240 = tpu.matmul %124, %239, %cst_191 {dimension_numbers = #tpu.dot_dimension_numbers<[1], [0], [0], [1], [0, 0, 1, 1], [], []>} : vector<256x16xbf16>, vector<16x9xbf16>, vector<256x9xf32> -> vector<256x9xf32>
    %c14_192 = arith.constant 14 : index
    %c0_193 = arith.constant 0 : index
    %c0_194 = arith.constant 0 : index
    %241 = vector.load %arg8[%c14_192, %c0_193, %c0_194] : memref<16x256x1xf32, #tpu.memory_space<vmem>>, vector<1x256x1xf32>
    %242 = vector.shape_cast %241 : vector<1x256x1xf32> to vector<256x1xf32>
    %243 = vector.broadcast %242 : vector<256x1xf32> to vector<256x9xf32>
    %244 = arith.mulf %240, %243 : vector<256x9xf32>
    %245 = arith.addf %237, %244 : vector<256x9xf32>
    %c15_195 = arith.constant 15 : index
    %c0_196 = arith.constant 0 : index
    %c0_197 = arith.constant 0 : index
    %246 = vector.load %arg7[%c15_195, %c0_196, %c0_197] : memref<16x16x9xbf16, #tpu.memory_space<vmem>>, vector<1x16x9xbf16>
    %247 = vector.shape_cast %246 : vector<1x16x9xbf16> to vector<16x9xbf16>
    %cst_198 = arith.constant dense<0.000000e+00> : vector<256x9xf32>
    %248 = tpu.matmul %124, %247, %cst_198 {dimension_numbers = #tpu.dot_dimension_numbers<[1], [0], [0], [1], [0, 0, 1, 1], [], []>} : vector<256x16xbf16>, vector<16x9xbf16>, vector<256x9xf32> -> vector<256x9xf32>
    %c15_199 = arith.constant 15 : index
    %c0_200 = arith.constant 0 : index
    %c0_201 = arith.constant 0 : index
    %249 = vector.load %arg8[%c15_199, %c0_200, %c0_201] : memref<16x256x1xf32, #tpu.memory_space<vmem>>, vector<1x256x1xf32>
    %250 = vector.shape_cast %249 : vector<1x256x1xf32> to vector<256x1xf32>
    %251 = vector.broadcast %250 : vector<256x1xf32> to vector<256x9xf32>
    %252 = arith.mulf %248, %251 : vector<256x9xf32>
    %253 = arith.addf %245, %252 : vector<256x9xf32>
    %cst_202 = arith.constant dense<0.000000e+00> : vector<9xf32>
    %254 = vector.multi_reduction <add>, %253, %cst_202 [0] : vector<256x9xf32> to vector<9xf32>
    %255 = vector.shape_cast %254 : vector<9xf32> to vector<1x9xf32>
    %c0_203 = arith.constant 0 : index
    %256 = memref.load %arg9[%c0_203] : memref<1xf32, #tpu.memory_space<smem>>
    %257 = vector.broadcast %256 : f32 to vector<1x9xf32>
    %258 = arith.addf %255, %257 : vector<1x9xf32>
    %c0_204 = arith.constant 0 : index
    %c0_205 = arith.constant 0 : index
    %c0_206 = arith.constant 0 : index
    %259 = vector.load %arg10[%c0_204, %c0_205, %c0_206] : memref<1x1x9xf32, #tpu.memory_space<vmem>>, vector<1x1x9xf32>
    %260 = vector.shape_cast %259 : vector<1x1x9xf32> to vector<1x9xf32>
    %261 = vector.shape_cast %258 : vector<1x9xf32> to vector<1x1x9xf32>
    tpu.vector_store %arg10[%c0_204, %c0_205, %c0_206], %261 {strides = array<i32>} : memref<1x1x9xf32, #tpu.memory_space<vmem>>, vector<1x1x9xf32>,
    return
  }
  func.func @transform_0(%arg0: i32) -> (i32, i32, i32) {
    %c0_i32 = arith.constant 0 : i32
    %c0_i32_0 = arith.constant 0 : i32
    %c0_i32_1 = arith.constant 0 : i32
    return %arg0, %c0_i32, %c0_i32_0 : i32, i32, i32
  }
  func.func @transform_1(%arg0: i32) -> (i32, i32) {
    %c0_i32 = arith.constant 0 : i32
    %c0_i32_0 = arith.constant 0 : i32
    %c0_i32_1 = arith.constant 0 : i32
    return %c0_i32, %c0_i32_0 : i32, i32
  }
  func.func @transform_2(%arg0: i32) -> (i32, i32) {
    %c0_i32 = arith.constant 0 : i32
    %c0_i32_0 = arith.constant 0 : i32
    %c0_i32_1 = arith.constant 0 : i32
    return %c0_i32, %c0_i32_0 : i32, i32
  }
  func.func @transform_3(%arg0: i32) -> (i32, i32, i32) {
    %c0_i32 = arith.constant 0 : i32
    %c0_i32_0 = arith.constant 0 : i32
    %c0_i32_1 = arith.constant 0 : i32
    %c0_i32_2 = arith.constant 0 : i32
    return %c0_i32, %c0_i32_0, %c0_i32_1 : i32, i32, i32
  }
  func.func @transform_4(%arg0: i32) -> (i32, i32) {
    %c0_i32 = arith.constant 0 : i32
    %c0_i32_0 = arith.constant 0 : i32
    %c0_i32_1 = arith.constant 0 : i32
    return %c0_i32, %c0_i32_0 : i32, i32
  }
  func.func @transform_5(%arg0: i32) -> (i32, i32) {
    %c0_i32 = arith.constant 0 : i32
    %c0_i32_0 = arith.constant 0 : i32
    %c0_i32_1 = arith.constant 0 : i32
    return %c0_i32, %c0_i32_0 : i32, i32
  }
  func.func @transform_6(%arg0: i32) -> (i32, i32, i32) {
    %c0_i32 = arith.constant 0 : i32
    %c0_i32_0 = arith.constant 0 : i32
    %c0_i32_1 = arith.constant 0 : i32
    %c0_i32_2 = arith.constant 0 : i32
    return %c0_i32, %c0_i32_0, %c0_i32_1 : i32, i32, i32
  }
  func.func @transform_7(%arg0: i32) -> (i32, i32, i32) {
    %c0_i32 = arith.constant 0 : i32
    %c0_i32_0 = arith.constant 0 : i32
    %c0_i32_1 = arith.constant 0 : i32
    %c0_i32_2 = arith.constant 0 : i32
    return %c0_i32, %c0_i32_0, %c0_i32_1 : i32, i32, i32
  }
  func.func @transform_8(%arg0: i32) -> i32 {
    %c0_i32 = arith.constant 0 : i32
    %c0_i32_0 = arith.constant 0 : i32
    return %c0_i32 : i32
  }
  func.func @transform_9(%arg0: i32) -> (i32, i32, i32) {
    %c0_i32 = arith.constant 0 : i32
    %c0_i32_0 = arith.constant 0 : i32
    %c0_i32_1 = arith.constant 0 : i32
    return %arg0, %c0_i32, %c0_i32_0 : i32, i32, i32
  }
}

</mosaic_0001>

<bundles_post_ra>
// kernel: discriminator_forward.1
= control target key start
LH: loop header
LB: loop body
LE: loop exit
PB: predicated region body
PF: predicated region fallthrough
CT: control target
= control target key end

     0   :  { %s14583_s11 = smov 0   ;;  %s20784_s0 = inlined_call_operand.vmem [shape: bf16[2,16,64], index: 0, kind: input, shape index: {}]   ;;  %s20785_s1 = inlined_call_operand.vmem [shape: bf16[64,16], index: 1, kind: input, shape index: {}]   ;;  %s20786_s2 = inlined_call_operand.vmem [shape: f32[64,1], index: 2, kind: input, shape index: {}]   ;;  %s20787_s3 = inlined_call_operand.vmem [shape: bf16[16,64,16], index: 3, kind: input, shape index: {}]   ;;  %s20788_s4 = inlined_call_operand.vmem [shape: bf16[256,1024], index: 4, kind: input, shape index: {}]   ;;  %s20789_s5 = inlined_call_operand.vmem [shape: f32[256,1], index: 5, kind: input, shape index: {}]   ;;  %s20790_s6 = inlined_call_operand.vmem [shape: bf16[16,16,9], index: 6, kind: input, shape index: {}]   ;;  %s20791_s7 = inlined_call_operand.vmem [shape: f32[16,256,1], index: 7, kind: input, shape index: {}]   ;;  %s20792_s8 = inlined_call_operand.<no memory space> [shape: f32[1], index: 8, kind: input, shape index: {}]   ;;  %s20793_s9 = inlined_call_operand.vmem [shape: f32[2,1,9], index: 9, kind: output, shape index: {}]  }
   0x1   :  { %14 = sst [smem:[#allocation3]] %s20792_s8 }
   0x2 LB: > { %s11521_s12 = sadd.s32 4294967295, %s14527_s11   ;;  %p11525_p0 = scmp.ge.s32.totalorder %s14527_s11, 1  ;;  %s14527_s11 = sphi %s14583_s11, %s20_s11  }
   0x3   : > { %p288_p1 = scmp.lt.s32.totalorder %s14527_s11, 3 }
   0x5   : > { %p289_p2 = pnand %p11525_p0, %p288_p1 }
   0x7   : > { %292 = sbr.rel (%p289_p2) target bundleno = 1892 (0x764), region = 56 }
   0xe   : > { %v343_v0 = vld [vmem:[%s20786_s2 + $0x10] sm:$0xff]  ;;  %v341_v1 = vld [vmem:[%s20786_s2] sm:$0xff]  ;;  %p322_p3 = scmp.lt.s32.totalorder %s11521_s12, 1  ;;  %v14529_v2 = vmov 0   ;;  %v344_v3 = vld [vmem:[%s20786_s2 + $0x18] sm:$0xff]  ;;  %vm415_vm0 = vcmask 130048  }
   0xf   : > { %14371 = vset.pattern.permute.xlu1 %v14529_v2  ;;  %14370 = vset.pattern.permute.xlu0 %v14529_v2  ;;  %v14373_v4 = vld [vmem:[%s20785_s1] sm:$0xff]   ;;  %v342_v5 = vld [vmem:[%s20786_s2 + $0x8] sm:$0xff]  ;;  %v14375_v10 = vld [vmem:[%s20785_s1 + $0x10] sm:$0xff]   ;;  %vm553_vm5 = vcmask 523264   ;;  %s11469_s24 = sld [smem:[#allocation3]] }
  0x10   : > { %361 = vperm.xlu1 %14371, %v343_v0   ;;  %351 = vperm.xlu0 %14370, %v341_v1   ;;  %s21755_s12 = smov (!%p322_p3, %s11521_s12), 1  ;;  %v346_v6 = vld [vmem:[%s20786_s2 + $0x28] sm:$0xff]  ;;  %v345_v8 = vld [vmem:[%s20786_s2 + $0x20] sm:$0xff]  ;;  %v348_v11 = vld [vmem:[%s20786_s2 + $0x38] sm:$0xff] }
  0x11   : > { %s12697_s22 = sshll.u32 %s21755_s12, 3  ;;  %13553 = vmatprep.mubr.msk.bf16.mxu0 %vm415_vm0, %v14373_v4  ;;  %v14374_v9 = vld [vmem:[%s20785_s1 + $0x8] sm:$0xff]   ;;  %v347_v12 = vld [vmem:[%s20786_s2 + $0x30] sm:$0xff]  ;;  %v2421_v14 = vld [vmem:[%s20789_s5] sm:$0xff]  ;;  %s329_s27 = scalar_lea.vmem %s20793_s9, %s21755_s12 }
  0x12   : > { %s326_s25 = scalar_lea.vmem %s20784_s0, %s12697_s22  ;;  %v2422_v13 = vld [vmem:[%s20789_s5 + $0x8] sm:$0xff]  ;;  %v14376_v15 = vld [vmem:[%s20785_s1 + $0x18] sm:$0xff]   ;;  %v2423_v17 = vld [vmem:[%s20789_s5 + $0x10] sm:$0xff] }
  0x13   : > { %v14372_v7 = vld [vmem:[%s326_s25] sm:$0xff]   ;;  %v2424_v16 = vld [vmem:[%s20789_s5 + $0x18] sm:$0xff]  ;;  %v2426_v18 = vld [vmem:[%s20789_s5 + $0x28] sm:$0xff] }
  0x14   : > { %366 = vperm.xlu1 %14371, %v344_v3   ;;  %356 = vperm.xlu0 %14370, %v342_v5   ;;  %v2425_v19 = vld [vmem:[%s20789_s5 + $0x20] sm:$0xff]  ;;  %v2428_v20 = vld [vmem:[%s20789_s5 + $0x38] sm:$0xff]  ;;  %v2427_v21 = vld [vmem:[%s20789_s5 + $0x30] sm:$0xff] }
  0x15   : > { %13551 = vmatprep.subr.bf16.mxu0 %v14372_v7  ;;  %v2430_v22 = vld [vmem:[%s20789_s5 + $0x48] sm:$0xff]  ;;  %v2429_v23 = vld [vmem:[%s20789_s5 + $0x40] sm:$0xff]  ;;  %v2432_v24 = vld [vmem:[%s20789_s5 + $0x58] sm:$0xff] }
  0x16   : > { %13552 = vmatpush3.bf16.msra.mxu0 %v14372_v7  ;;  %v2431_v25 = vld [vmem:[%s20789_s5 + $0x50] sm:$0xff]  ;;  %v2434_v26 = vld [vmem:[%s20789_s5 + $0x68] sm:$0xff]  ;;  %v2433_v27 = vld [vmem:[%s20789_s5 + $0x60] sm:$0xff] }
  0x17   : > { %v2436_v28 = vld [vmem:[%s20789_s5 + $0x78] sm:$0xff]  ;;  %v2435_v29 = vld [vmem:[%s20789_s5 + $0x70] sm:$0xff]  ;;  %v2438_v30 = vld [vmem:[%s20789_s5 + $0x88] sm:$0xff] }
  0x18   : > { %376 = vperm.xlu1 %14371, %v346_v6   ;;  %371 = vperm.xlu0 %14370, %v345_v8   ;;  %v2437_v31 = vld [vmem:[%s20789_s5 + $0x80] sm:$0xff]  ;;  %v2440_v32 = vld [vmem:[%s20789_s5 + $0x98] sm:$0xff]  ;;  %v2439_v33 = vld [vmem:[%s20789_s5 + $0x90] sm:$0xff] }
  0x19   : > { %13554 = vmatmul.mubr.msk.bf16.vlgmr.msra.gmra.mrb[0].mxu0 %vm415_vm0, %v14374_v9  ;;  %v2442_v34 = vld [vmem:[%s20789_s5 + $0xa8] sm:$0xff]  ;;  %v2441_v35 = vld [vmem:[%s20789_s5 + $0xa0] sm:$0xff]  ;;  %v2444_v36 = vld [vmem:[%s20789_s5 + $0xb8] sm:$0xff] }
  0x1a   : > { %13557 = vmatprep.mubr.msk.bf16.mxu0 %vm415_vm0, %v14375_v10  ;;  %v2443_v37 = vld [vmem:[%s20789_s5 + $0xb0] sm:$0xff]  ;;  %v2446_v38 = vld [vmem:[%s20789_s5 + $0xc8] sm:$0xff]  ;;  %v2445_v39 = vld [vmem:[%s20789_s5 + $0xc0] sm:$0xff] }
  0x1b   : > { %v2448_v40 = vld [vmem:[%s20789_s5 + $0xd8] sm:$0xff]  ;;  %v2447_v41 = vld [vmem:[%s20789_s5 + $0xd0] sm:$0xff]  ;;  %v2450_v42 = vld [vmem:[%s20789_s5 + $0xe8] sm:$0xff] }
  0x1c   : > { %386 = vperm.xlu1 %14371, %v348_v11   ;;  %381 = vperm.xlu0 %14370, %v347_v12   ;;  %v2449_v43 = vld [vmem:[%s20789_s5 + $0xe0] sm:$0xff]  ;;  %v2452_v44 = vld [vmem:[%s20789_s5 + $0xf8] sm:$0xff]  ;;  %v2451_v45 = vld [vmem:[%s20789_s5 + $0xf0] sm:$0xff] }
  0x1d   : > { %v4738_v46 = vld [vmem:[%s20791_s7] sm:$0xff]  ;;  %v4739_v47 = vld [vmem:[%s20791_s7 + $0x8] sm:$0xff]  ;;  %v4740_v48 = vld [vmem:[%s20791_s7 + $0x10] sm:$0xff] }
  0x1e   : > { %v4742_v49 = vld [vmem:[%s20791_s7 + $0x20] sm:$0xff]  ;;  %v4741_v50 = vld [vmem:[%s20791_s7 + $0x18] sm:$0xff]  ;;  %v4744_v51 = vld [vmem:[%s20791_s7 + $0x30] sm:$0xff] }
  0x1f   : > { %v4743_v52 = vld [vmem:[%s20791_s7 + $0x28] sm:$0xff]  ;;  %v4746_v53 = vld [vmem:[%s20791_s7 + $0x40] sm:$0xff]  ;;  %v4745_v56 = vld [vmem:[%s20791_s7 + $0x38] sm:$0xff] }
  0x20   : > { %2460 = vperm.xlu1 %14371, %v2422_v13   ;;  %2455 = vperm.xlu0 %14370, %v2421_v14   ;;  %v14377_v54 = vld [vmem:[%s20787_s3] sm:$0xff]   ;;  %v4748_v57 = vld [vmem:[%s20791_s7 + $0x50] sm:$0xff]  ;;  %v14379_v58 = vld [vmem:[%s20787_s3 + $0x8] sm:$0xff]  }
  0x21   : > { %13558 = vmatmul.mubr.msk.bf16.gmra.mrb[4].mxu0 %vm415_vm0, %v14376_v15  ;;  %v14378_v55 = vld [vmem:[%s20787_s3 + $0x20] sm:$0xff]   ;;  %13561 = vmatprep.subr.bf16.mxu1 %v14377_v54  ;;  %v14380_v59 = vld [vmem:[%s20787_s3 + $0x28] sm:$0xff]   ;;  %v14381_v60 = vld [vmem:[%s20787_s3 + $0x10] sm:$0xff]  }
  0x22   : > { %13577 = vmatprep.subr.bf16.mxu0 %v14378_v55  ;;  %13562 = vmatpush3.bf16.msra.mxu1 %v14377_v54  ;;  %v14382_v61 = vld [vmem:[%s20787_s3 + $0x30] sm:$0xff]   ;;  %v4747_v62 = vld [vmem:[%s20791_s7 + $0x48] sm:$0xff]  ;;  %v4750_v63 = vld [vmem:[%s20791_s7 + $0x60] sm:$0xff] }
  0x23   : > { %13578 = vmatpush3.bf16.msra.mxu0 %v14378_v55  ;;  %13563 = vmatprep.subr.bf16.mxu1 %v14379_v58  ;;  %v14383_v0 = vld [vmem:[%s20787_s3 + $0x18] sm:$0xff]   ;;  %v4752_v2 = vld [vmem:[%s20791_s7 + $0x70] sm:$0xff]  ;;  %v14802_v4 = vld [vmem:[%s20787_s3 + $0x40] sm:$0xff]  }
  0x24   : > { %2470 = vperm.xlu1 %14371, %v2424_v16   ;;  %2465 = vperm.xlu0 %14370, %v2423_v17   ;;  %v4749_v1 = vld [vmem:[%s20791_s7 + $0x58] sm:$0xff]  ;;  %v4751_v5 = vld [vmem:[%s20791_s7 + $0x68] sm:$0xff]  ;;  %v4754_v6 = vld [vmem:[%s20791_s7 + $0x80] sm:$0xff] }
  0x25   : > { %13579 = vmatprep.subr.bf16.mxu0 %v14380_v59  ;;  %v14384_v3 = vld [vmem:[%s20787_s3 + $0x38] sm:$0xff]   ;;  %v14813_v7 = vld [vmem:[%s20787_s3 + $0x60] sm:$0xff]   ;;  %v4756_v9 = vld [vmem:[%s20791_s7 + $0x90] sm:$0xff] }
  0x26   : > { %13564 = vmatpush3.bf16.msra.mxu1 %v14379_v58  ;;  %v4753_v8 = vld [vmem:[%s20791_s7 + $0x78] sm:$0xff]  ;;  %v4755_v10 = vld [vmem:[%s20791_s7 + $0x88] sm:$0xff]  ;;  %v4758_v11 = vld [vmem:[%s20791_s7 + $0xa0] sm:$0xff] }
  0x27   : > { %13580 = vmatpush3.bf16.msra.mxu0 %v14380_v59  ;;  %13565 = vmatprep.subr.bf16.mxu1 %v14381_v60  ;;  %v4757_v12 = vld [vmem:[%s20791_s7 + $0x98] sm:$0xff]  ;;  %v4760_v13 = vld [vmem:[%s20791_s7 + $0xb0] sm:$0xff]  ;;  %v4759_v14 = vld [vmem:[%s20791_s7 + $0xa8] sm:$0xff] }
  0x28   : > { %2480 = vperm.xlu1 %14371, %v2426_v18   ;;  %2475 = vperm.xlu0 %14370, %v2425_v19   ;;  %v4762_v15 = vld [vmem:[%s20791_s7 + $0xc0] sm:$0xff]  ;;  %v4761_v16 = vld [vmem:[%s20791_s7 + $0xb8] sm:$0xff]  ;;  %v4764_v17 = vld [vmem:[%s20791_s7 + $0xd0] sm:$0xff] }
  0x29   : > { %13581 = vmatprep.subr.bf16.mxu0 %v14382_v61 }
  0x2a   : > { %13566 = vmatpush3.bf16.msra.mxu1 %v14381_v60  ;;  %v11962_v60 = vld [vmem:[%s20791_s7 + $0x168] sm:$0xff] }
  0x2b   : > { %13582 = vmatpush3.bf16.msra.mxu0 %v14382_v61  ;;  %13567 = vmatprep.subr.bf16.mxu1 %v14383_v0  ;;  %v11965_v61 = vld [vmem:[%s20791_s7 + $0x180] sm:$0xff] }
  0x2c   : > { %2490 = vperm.xlu1 %14371, %v2428_v20   ;;  %2485 = vperm.xlu0 %14370, %v2427_v21   ;;  %v4763_v20 = vld [vmem:[%s20791_s7 + $0xc8] sm:$0xff]  ;;  %v4766_v21 = vld [vmem:[%s20791_s7 + $0xe0] sm:$0xff] }
  0x2d   : > { %13583 = vmatprep.subr.bf16.mxu0 %v14384_v3 }
  0x2e   : > { %13568 = vmatpush3.bf16.msra.mxu1 %v14383_v0  ;;  %v11964_v0 = vld [vmem:[%s20791_s7 + $0x178] sm:$0xff] }
  0x2f   : > { %13584 = vmatpush3.bf16.msra.mxu0 %v14384_v3  ;;  %13593 = vmatprep.subr.bf16.mxu1 %v14802_v4 }
  0x30   : > { %2500 = vperm.xlu1 %14371, %v2430_v22   ;;  %2495 = vperm.xlu0 %14370, %v2429_v23  }
  0x31   : > { %13609 = vmatprep.subr.bf16.mxu0 %v14813_v7 }
  0x34   : > { %2510 = vperm.xlu1 %14371, %v2432_v24   ;;  %2505 = vperm.xlu0 %14370, %v2431_v25   ;;  %v4765_v24 = vld [vmem:[%s20791_s7 + $0xd8] sm:$0xff]  ;;  %v4768_v25 = vld [vmem:[%s20791_s7 + $0xf0] sm:$0xff] }
  0x38   : > { %2520 = vperm.xlu1 %14371, %v2434_v26   ;;  %2515 = vperm.xlu0 %14370, %v2433_v27  }
  0x3c   : > { %2530 = vperm.xlu1 %14371, %v2436_v28   ;;  %2525 = vperm.xlu0 %14370, %v2435_v29   ;;  %v4767_v28 = vld [vmem:[%s20791_s7 + $0xe8] sm:$0xff]  ;;  %v11949_v29 = vld [vmem:[%s20791_s7 + $0x100] sm:$0xff] }
  0x40   : > { %2540 = vperm.xlu1 %14371, %v2438_v30   ;;  %2535 = vperm.xlu0 %14370, %v2437_v31  }
  0x44   : > { %2550 = vperm.xlu1 %14371, %v2440_v32   ;;  %2545 = vperm.xlu0 %14370, %v2439_v33   ;;  %v4769_v32 = vld [vmem:[%s20791_s7 + $0xf8] sm:$0xff]  ;;  %v11951_v33 = vld [vmem:[%s20791_s7 + $0x110] sm:$0xff] }
  0x48   : > { %2560 = vperm.xlu1 %14371, %v2442_v34   ;;  %2555 = vperm.xlu0 %14370, %v2441_v35  }
  0x4c   : > { %2570 = vperm.xlu1 %14371, %v2444_v36   ;;  %2565 = vperm.xlu0 %14370, %v2443_v37   ;;  %v11950_v36 = vld [vmem:[%s20791_s7 + $0x108] sm:$0xff]  ;;  %v11953_v37 = vld [vmem:[%s20791_s7 + $0x120] sm:$0xff] }
  0x50   : > { %2580 = vperm.xlu1 %14371, %v2446_v38   ;;  %2575 = vperm.xlu0 %14370, %v2445_v39  }
  0x54   : > { %2590 = vperm.xlu1 %14371, %v2448_v40   ;;  %2585 = vperm.xlu0 %14370, %v2447_v41   ;;  %v11952_v40 = vld [vmem:[%s20791_s7 + $0x118] sm:$0xff]  ;;  %v11955_v41 = vld [vmem:[%s20791_s7 + $0x130] sm:$0xff] }
  0x58   : > { %2600 = vperm.xlu1 %14371, %v2450_v42   ;;  %2595 = vperm.xlu0 %14370, %v2449_v43  }
  0x5c   : > { %2610 = vperm.xlu1 %14371, %v2452_v44   ;;  %2605 = vperm.xlu0 %14370, %v2451_v45   ;;  %v11954_v44 = vld [vmem:[%s20791_s7 + $0x128] sm:$0xff]  ;;  %v11957_v45 = vld [vmem:[%s20791_s7 + $0x140] sm:$0xff] }
  0x60   : > { %4772 = vperm.xlu1 %14371, %v4738_v46   ;;  %4777 = vperm.xlu0 %14370, %v4739_v47  }
  0x64   : > { %4782 = vperm.xlu1 %14371, %v4740_v48   ;;  %4792 = vperm.xlu0 %14370, %v4742_v49   ;;  %v11956_v48 = vld [vmem:[%s20791_s7 + $0x138] sm:$0xff]  ;;  %v11959_v49 = vld [vmem:[%s20791_s7 + $0x150] sm:$0xff] }
  0x68   : > { %4787 = vperm.xlu1 %14371, %v4741_v50   ;;  %4802 = vperm.xlu0 %14370, %v4744_v51  }
  0x6c   : > { %4797 = vperm.xlu1 %14371, %v4743_v52   ;;  %4812 = vperm.xlu0 %14370, %v4746_v53   ;;  %v11958_v52 = vld [vmem:[%s20791_s7 + $0x148] sm:$0xff]  ;;  %v11961_v53 = vld [vmem:[%s20791_s7 + $0x160] sm:$0xff] }
  0x70   : > { %4807 = vperm.xlu1 %14371, %v4745_v56   ;;  %4822 = vperm.xlu0 %14370, %v4748_v57   ;;  %v11960_v56 = vld [vmem:[%s20791_s7 + $0x158] sm:$0xff]  ;;  %v11963_v57 = vld [vmem:[%s20791_s7 + $0x170] sm:$0xff] }
  0x74   : > { %4817 = vperm.xlu1 %14371, %v4747_v62   ;;  %4832 = vperm.xlu0 %14370, %v4750_v63  }
  0x78   : > { %4827 = vperm.xlu1 %14371, %v4749_v1   ;;  %4842 = vperm.xlu0 %14370, %v4752_v2   ;;  %v11967_v1 = vld [vmem:[%s20791_s7 + $0x190] sm:$0xff] }
  0x7c   : > { %4837 = vperm.xlu1 %14371, %v4751_v5   ;;  %4852 = vperm.xlu0 %14370, %v4754_v6   ;;  %v11966_v5 = vld [vmem:[%s20791_s7 + $0x188] sm:$0xff]  ;;  %v11969_v6 = vld [vmem:[%s20791_s7 + $0x1a0] sm:$0xff] }
  0x80   : > { %4847 = vperm.xlu1 %14371, %v4753_v8   ;;  %4862 = vperm.xlu0 %14370, %v4756_v9  }
  0x84   : > { %4857 = vperm.xlu1 %14371, %v4755_v10   ;;  %4872 = vperm.xlu0 %14370, %v4758_v11   ;;  %v11968_v10 = vld [vmem:[%s20791_s7 + $0x198] sm:$0xff]  ;;  %v11971_v11 = vld [vmem:[%s20791_s7 + $0x1b0] sm:$0xff] }
  0x88   : > { %4867 = vperm.xlu1 %14371, %v4757_v12   ;;  %4882 = vperm.xlu0 %14370, %v4760_v13  }
  0x8c   : > { %4877 = vperm.xlu1 %14371, %v4759_v14   ;;  %4892 = vperm.xlu0 %14370, %v4762_v15   ;;  %v11970_v14 = vld [vmem:[%s20791_s7 + $0x1a8] sm:$0xff]  ;;  %v11973_v15 = vld [vmem:[%s20791_s7 + $0x1c0] sm:$0xff] }
  0x8f   : > { %v14847_v18 = vpop.permute.xlu1 %361  ;;  %v14849_v19 = vpop.permute.xlu0 %351 }
  0x90   : > { %4887 = vperm.xlu1 %14371, %v4761_v16   ;;  %4902 = vperm.xlu0 %14370, %v4764_v17  }
  0x93   : > { %v14857_v22 = vpop.permute.xlu1 %366  ;;  %v14859_v23 = vpop.permute.xlu0 %356 }
  0x94   : > { %4897 = vperm.xlu1 %14371, %v4763_v20   ;;  %4912 = vperm.xlu0 %14370, %v4766_v21   ;;  %v11972_v20 = vld [vmem:[%s20791_s7 + $0x1b8] sm:$0xff]  ;;  %v11975_v21 = vld [vmem:[%s20791_s7 + $0x1d0] sm:$0xff] }
  0x97   : > { %v14867_v26 = vpop.permute.xlu1 %376  ;;  %v14869_v27 = vpop.permute.xlu0 %371 }
  0x98   : > { %4907 = vperm.xlu1 %14371, %v4765_v24   ;;  %4922 = vperm.xlu0 %14370, %v4768_v25  }
  0x9b   : > { %v14877_v30 = vpop.permute.xlu1 %386  ;;  %v14879_v31 = vpop.permute.xlu0 %381 }
  0x9c   : > { %4917 = vperm.xlu1 %14371, %v4767_v28   ;;  %5199 = vperm.xlu0 %14370, %v11949_v29   ;;  %v11974_v28 = vld [vmem:[%s20791_s7 + $0x1c8] sm:$0xff]  ;;  %v11977_v29 = vld [vmem:[%s20791_s7 + $0x1e0] sm:$0xff] }
  0x9f   : > { %v14887_v34 = vpop.permute.xlu1 %2460  ;;  %v14889_v35 = vpop.permute.xlu0 %2455 }
  0xa0   : > { %4927 = vperm.xlu1 %14371, %v4769_v32   ;;  %5209 = vperm.xlu0 %14370, %v11951_v33  }
  0xa3   : > { %v14897_v38 = vpop.permute.xlu1 %2470  ;;  %v14899_v39 = vpop.permute.xlu0 %2465 }
  0xa4   : > { %5204 = vperm.xlu1 %14371, %v11950_v36   ;;  %5219 = vperm.xlu0 %14370, %v11953_v37   ;;  %v11976_v36 = vld [vmem:[%s20791_s7 + $0x1d8] sm:$0xff]  ;;  %v11979_v37 = vld [vmem:[%s20791_s7 + $0x1f0] sm:$0xff] }
  0xa7   : > { %v14907_v42 = vpop.permute.xlu1 %2480  ;;  %v14909_v43 = vpop.permute.xlu0 %2475 }
  0xa8   : > { %5214 = vperm.xlu1 %14371, %v11952_v40   ;;  %5229 = vperm.xlu0 %14370, %v11955_v41  }
  0xab   : > { %v14917_v46 = vpop.permute.xlu1 %2490  ;;  %v14919_v47 = vpop.permute.xlu0 %2485 }
  0xac   : > { %5224 = vperm.xlu1 %14371, %v11954_v44   ;;  %5239 = vperm.xlu0 %14370, %v11957_v45   ;;  %v11978_v44 = vld [vmem:[%s20791_s7 + $0x1e8] sm:$0xff]  ;;  %v12000_v45 = vld [vmem:[%s20791_s7 + $0x200] sm:$0xff] }
  0xaf   : > { %v14927_v50 = vpop.permute.xlu1 %2500  ;;  %v14929_v51 = vpop.permute.xlu0 %2495 }
  0xb0   : > { %5234 = vperm.xlu1 %14371, %v11956_v48   ;;  %5249 = vperm.xlu0 %14370, %v11959_v49   ;;  %v11980_v49 = vld [vmem:[%s20791_s7 + $0x1f8] sm:$0xff] }
  0xb3   : > { %v14937_v54 = vpop.permute.xlu1 %2510  ;;  %v14939_v55 = vpop.permute.xlu0 %2505 }
  0xb4   : > { %5244 = vperm.xlu1 %14371, %v11958_v52   ;;  %5259 = vperm.xlu0 %14370, %v11961_v53   ;;  %v12002_v52 = vld [vmem:[%s20791_s7 + $0x210] sm:$0xff] }
  0xb7   : > { %v14947_v58 = vpop.permute.xlu1 %2520  ;;  %v14949_v59 = vpop.permute.xlu0 %2515 }
  0xb8   : > { %5254 = vperm.xlu1 %14371, %v11960_v56   ;;  %5269 = vperm.xlu0 %14370, %v11963_v57   ;;  %v12001_v57 = vld [vmem:[%s20791_s7 + $0x208] sm:$0xff] }
  0xbb   : > { %v14957_v62 = vpop.permute.xlu1 %2530  ;;  %v14959_v63 = vpop.permute.xlu0 %2525 }
  0xbc   : > { %5264 = vperm.xlu1 %14371, %v11962_v60   ;;  %5279 = vperm.xlu0 %14370, %v11965_v61   ;;  %v12004_v60 = vld [vmem:[%s20791_s7 + $0x220] sm:$0xff] }
  0xbf   : > { %v14967_v2 = vpop.permute.xlu1 %2540  ;;  %v14969_v3 = vpop.permute.xlu0 %2535 }
  0xc0   : > { %5274 = vperm.xlu1 %14371, %v11964_v0   ;;  %5289 = vperm.xlu0 %14370, %v11967_v1   ;;  %v12003_v0 = vld [vmem:[%s20791_s7 + $0x218] sm:$0xff]  ;;  %v12006_v1 = vld [vmem:[%s20791_s7 + $0x230] sm:$0xff] }
  0xc3   : > { %v14977_v8 = vpop.permute.xlu1 %2550  ;;  %v14979_v9 = vpop.permute.xlu0 %2545 }
  0xc4   : > { %5284 = vperm.xlu1 %14371, %v11966_v5   ;;  %5299 = vperm.xlu0 %14370, %v11969_v6   ;;  %v12005_v6 = vld [vmem:[%s20791_s7 + $0x228] sm:$0xff] }
  0xc7   : > { %v14987_v12 = vpop.permute.xlu1 %2560  ;;  %v14989_v13 = vpop.permute.xlu0 %2555 }
  0xc8   : > { %5294 = vperm.xlu1 %14371, %v11968_v10   ;;  %5309 = vperm.xlu0 %14370, %v11971_v11   ;;  %v12008_v10 = vld [vmem:[%s20791_s7 + $0x240] sm:$0xff] }
  0xcb   : > { %v14997_v16 = vpop.permute.xlu1 %2570  ;;  %v14999_v17 = vpop.permute.xlu0 %2565 }
  0xcc   : > { %5304 = vperm.xlu1 %14371, %v11970_v14   ;;  %5319 = vperm.xlu0 %14370, %v11973_v15  }
  0xcf   : > { %v15007_v24 = vpop.permute.xlu1 %2580  ;;  %v15009_v25 = vpop.permute.xlu0 %2575 }
  0xd0   : > { %5314 = vperm.xlu1 %14371, %v11972_v20   ;;  %5329 = vperm.xlu0 %14370, %v11975_v21   ;;  %v12007_v20 = vld [vmem:[%s20791_s7 + $0x238] sm:$0xff]  ;;  %v12010_v21 = vld [vmem:[%s20791_s7 + $0x250] sm:$0xff] }
  0xd3   : > { %v15017_v32 = vpop.permute.xlu1 %2590  ;;  %v15019_v33 = vpop.permute.xlu0 %2585 }
  0xd4   : > { %5324 = vperm.xlu1 %14371, %v11974_v28   ;;  %5339 = vperm.xlu0 %14370, %v11977_v29  }
  0xd7   : > { %v15027_v40 = vpop.permute.xlu1 %2600  ;;  %v15029_v41 = vpop.permute.xlu0 %2595 }
  0xd8   : > { %5334 = vperm.xlu1 %14371, %v11976_v36   ;;  %5349 = vperm.xlu0 %14370, %v11979_v37  }
  0xdb   : > { %v15037_v48 = vpop.permute.xlu1 %2610  ;;  %v15045_v53 = vpop.permute.xlu0 %2605 }
  0xdc   : > { %5344 = vperm.xlu1 %14371, %v11978_v44   ;;  %5626 = vperm.xlu0 %14370, %v12000_v45  }
  0xdf   : > { %v15047_v56 = vpop.permute.xlu1 %4772  ;;  %v15055_v61 = vpop.permute.xlu0 %4777 }
  0xe0   : > { %20804 = vst [vmem:[#allocation4_spill] sm:$0xff] %v15047_v56  ;;  %5354 = vperm.xlu1 %14371, %v11980_v49   ;;  %5636 = vperm.xlu0 %14370, %v12002_v52   ;;  %20805 = vst [vmem:[#allocation5_spill] sm:$0xff] %v15055_v61 }
  0xe3   : > { %v15063_v5 = vpop.permute.xlu1 %4782  ;;  %v15071_v11 = vpop.permute.xlu0 %4792 }
  0xe4   : > { %5631 = vperm.xlu1 %14371, %v12001_v57   ;;  %5646 = vperm.xlu0 %14370, %v12004_v60   ;;  %20806 = vst [vmem:[#allocation6_spill] sm:$0xff] %v15071_v11  ;;  %v12009_v57 = vld [vmem:[%s20791_s7 + $0x248] sm:$0xff] }
  0xe7   : > { %v15073_v14 = vpop.permute.xlu1 %4787  ;;  %v15083_v44 = vpop.permute.xlu0 %4802 }
  0xe8   : > { %5641 = vperm.xlu1 %14371, %v12003_v0   ;;  %5656 = vperm.xlu0 %14370, %v12006_v1   ;;  %20807 = vst [vmem:[#allocation7_spill] sm:$0xff] %v15073_v14  ;;  %20808 = vst [vmem:[#allocation8_spill] sm:$0xff] %v15083_v44 }
  0xeb   : > { %v15092_v60 = vpop.permute.xlu1 %4797 }
  0xec   : > { %5651 = vperm.xlu1 %14371, %v12005_v6   ;;  %5666 = vperm.xlu0 %14370, %v12008_v10   ;;  %v13555_v15 = vpop.f32.mrb[0].mxu0  ;;  %20809 = vst [vmem:[#allocation9_spill] sm:$0xff] %v15092_v60 }
  0xed   : > { %v471_v28 = vadd.f32 %v13555_v15, %v14847_v18  ;;  %v462_v29 = vpop.f32.mrb[1].mxu0  ;;  %v12012_v18 = vld [vmem:[%s20791_s7 + $0x260] sm:$0xff] }
  0xee   : > { %v463_v36 = vadd.f32 %v462_v29, %v14849_v19  ;;  %v13556_v37 = vpop.f32.mrb[2].mxu0 }
  0xef   : > { %v503_v45 = vmul.f32 0.2, %v471_v28  ;;  %v474_v49 = vadd.f32 %v13556_v37, %v14857_v22  ;;  %v465_v52 = vpop.f32.mrb[3].mxu0  ;;  %vm495_vm1 = vcmp.ge.f32.partialorder %v471_v28, 0.0 }
  0xf0   : > { %5661 = vperm.xlu1 %14371, %v12007_v20   ;;  %5676 = vperm.xlu0 %14370, %v12010_v21   ;;  %v501_v19 = vmul.f32 0.2, %v463_v36  ;;  %v466_v0 = vadd.f32 %v465_v52, %v14859_v23  ;;  %vm493_vm2 = vcmp.ge.f32.partialorder %v463_v36, 0.0  ;;  %v12011_v20 = vld [vmem:[%s20791_s7 + $0x258] sm:$0xff]  ;;  %v12014_v21 = vld [vmem:[%s20791_s7 + $0x270] sm:$0xff] }
  0xf1   : > { %vm496_vm3 = vcmp.ge.f32.partialorder %v474_v49, 0.0  ;;  %v504_v1 = vmul.f32 0.2, %v474_v49  ;;  %v511_v6 = vsel %vm495_vm1, %v471_v28, %v503_v45 }
  0xf2   : > { %vm494_vm4 = vcmp.ge.f32.partialorder %v466_v0, 0.0  ;;  %v502_v22 = vmul.f32 0.2, %v466_v0  ;;  %v509_v23 = vsel %vm493_vm2, %v463_v36, %v501_v19  ;;  %v12013_v36 = vld [vmem:[%s20791_s7 + $0x268] sm:$0xff] }
  0xf3   : > { %v512_v10 = vsel %vm496_vm3, %v474_v49, %v504_v1  ;;  %v15109_v49 = vpop.permute.xlu1 %4807 }
  0xf4   : > { %5671 = vperm.xlu1 %14371, %v12009_v57   ;;  %5686 = vperm.xlu0 %14370, %v12012_v18   ;;  %v13559_v15 = vpop.f32.mrb[4].mxu0  ;;  %v15101_v29 = vpack.c.bf16 %v512_v10, %v511_v6  ;;  %v510_v37 = vsel %vm494_vm4, %v466_v0, %v502_v22  ;;  %v15104_v18 = vpop.permute.xlu0 %4812  ;;  %20811 = vst [vmem:[#allocation11_spill] sm:$0xff] %v15109_v49  ;;  %v14387_v22 = vld [vmem:[%s20787_s3 + $0x48] sm:$0xff]  }
  0xf5   : > { %v487_v52 = vadd.f32 %v13559_v15, %v14879_v31  ;;  %v478_v57 = vpop.f32.mrb[5].mxu0  ;;  %20810 = vst [vmem:[#allocation10_spill] sm:$0xff] %v15104_v18  ;;  %v15106_v28 = vpack.c.bf16 %v510_v37, %v509_v23  ;;  %v14388_v6 = vld [vmem:[%s20787_s3 + $0x68] sm:$0xff]   ;;  %v12015_v37 = vld [vmem:[%s20791_s7 + $0x278] sm:$0xff]  ;;  %v12104_v18 = vld [vmem:[%s20791_s7 + $0x410] sm:$0xff] }
  0xf6   : > { %v479_v45 = vadd.f32 %v478_v57, %v14869_v27  ;;  %v13560_v1 = vpop.f32.mrb[6].mxu0  ;;  %v12016_v27 = vld [vmem:[%s20791_s7 + $0x280] sm:$0xff] }
  0xf7   : > { %v507_v19 = vmul.f32 0.2, %v487_v52  ;;  %v490_v0 = vadd.f32 %v13560_v1, %v14877_v30  ;;  %v481_v31 = vpop.f32.mrb[7].mxu0  ;;  %13569 = vmatprep.mubr.msk.bf16.mxu1 %vm553_vm5, %v15106_v28  ;;  %13585 = vmatprep.mubr.msk.bf16.mxu0 %vm553_vm5, %v15106_v28  ;;  %vm499_vm6 = vcmp.ge.f32.partialorder %v487_v52, 0.0  ;;  %v15143_v57 = vpop.permute.xlu1 %4817 }
  0xf8   : > { %5681 = vperm.xlu1 %14371, %v12011_v20   ;;  %5696 = vperm.xlu0 %14370, %v12014_v21   ;;  %v505_v30 = vmul.f32 0.2, %v479_v45  ;;  %v482_v10 = vadd.f32 %v481_v31, %v14867_v26  ;;  %vm497_vm7 = vcmp.ge.f32.partialorder %v479_v45, 0.0  ;;  %v15135_v21 = vpop.permute.xlu0 %4822  ;;  %20813 = vst [vmem:[#allocation13_spill] sm:$0xff] %v15143_v57  ;;  %v12078_v57 = vld [vmem:[%s20791_s7 + $0x3d8] sm:$0xff] }
  0xf9   : > { %13570 = vmatmul.mubr.msk.bf16.vlgmr.msra.gmra.mrb[0].mxu1 %vm553_vm5, %v15101_v29  ;;  %13586 = vmatmul.mubr.msk.bf16.vlgmr.msra.gmra.mrb[8].mxu0 %vm553_vm5, %v15101_v29  ;;  %vm500_vm8 = vcmp.ge.f32.partialorder %v490_v0, 0.0  ;;  %v508_v15 = vmul.f32 0.2, %v490_v0  ;;  %20812 = vst [vmem:[#allocation12_spill] sm:$0xff] %v15135_v21  ;;  %v515_v26 = vsel %vm499_vm6, %v487_v52, %v507_v19  ;;  %v14389_v52 = vld [vmem:[%s20787_s3 + $0x50] sm:$0xff]  }
  0xfa   : > { %13594 = vmatpush3.bf16.msra.mxu1 %v14802_v4  ;;  %13610 = vmatpush3.bf16.msra.mxu0 %v14813_v7  ;;  %vm498_vm9 = vcmp.ge.f32.partialorder %v482_v10, 0.0  ;;  %v506_v20 = vmul.f32 0.2, %v482_v10  ;;  %v12018_v4 = vld [vmem:[%s20791_s7 + $0x290] sm:$0xff]  ;;  %v513_v7 = vsel %vm497_vm7, %v479_v45, %v505_v30  ;;  %v12017_v45 = vld [vmem:[%s20791_s7 + $0x288] sm:$0xff] }
  0xfb   : > { %v516_v23 = vsel %vm500_vm8, %v490_v0, %v508_v15  ;;  %13595 = vmatprep.subr.bf16.mxu1 %v14387_v22  ;;  %13611 = vmatprep.subr.bf16.mxu0 %v14388_v6  ;;  %v14390_v19 = vld [vmem:[%s20787_s3 + $0x70] sm:$0xff]   ;;  %v15178_v30 = vpop.permute.xlu1 %4827  ;;  %v12019_v15 = vld [vmem:[%s20791_s7 + $0x298] sm:$0xff] }
  0xfc   : > { %5691 = vperm.xlu1 %14371, %v12013_v36   ;;  %5706 = vperm.xlu0 %14370, %v12016_v27   ;;  %v15146_v1 = vpack.c.bf16 %v516_v23, %v515_v26  ;;  %v514_v36 = vsel %vm498_vm9, %v482_v10, %v506_v20  ;;  %v15167_v0 = vpop.permute.xlu0 %4832  ;;  %v12020_v27 = vld [vmem:[%s20791_s7 + $0x2a0] sm:$0xff]  ;;  %20815 = vst [vmem:[#allocation15_spill] sm:$0xff] %v15178_v30  ;;  %v12022_v20 = vld [vmem:[%s20791_s7 + $0x2b0] sm:$0xff] }
  0xfd   : > { %v15148_v31 = vpack.c.bf16 %v514_v36, %v513_v7  ;;  %20814 = vst [vmem:[#allocation14_spill] sm:$0xff] %v15167_v0  ;;  %v14393_v10 = vld [vmem:[%s20787_s3 + $0x80] sm:$0xff]   ;;  %v14395_v7 = vld [vmem:[%s20787_s3 + $0x88] sm:$0xff]   ;;  %v12077_v0 = vld [vmem:[%s20791_s7 + $0x3d0] sm:$0xff] }
  0xfe   : > { %13596 = vmatpush3.bf16.msra.mxu1 %v14387_v22  ;;  %13612 = vmatpush3.bf16.msra.mxu0 %v14388_v6  ;;  %v14391_v22 = vld [vmem:[%s20787_s3 + $0x58] sm:$0xff]   ;;  %v14394_v26 = vld [vmem:[%s20787_s3 + $0xa0] sm:$0xff]  }
  0xff   : > { %13573 = vmatprep.mubr.msk.bf16.mxu1 %vm553_vm5, %v15148_v31  ;;  %13589 = vmatprep.mubr.msk.bf16.mxu0 %vm553_vm5, %v15148_v31  ;;  %v14392_v6 = vld [vmem:[%s20787_s3 + $0x78] sm:$0xff]   ;;  %v12024_v36 = vld [vmem:[%s20791_s7 + $0x2c0] sm:$0xff] }
 0x100   : > { %5701 = vperm.xlu1 %14371, %v12015_v37   ;;  %5716 = vperm.xlu0 %14370, %v12018_v4   ;;  %v15196_v23 = vpop.permute.xlu0 %4842  ;;  %v15198_v37 = vpop.permute.xlu1 %4837  ;;  %v12021_v4 = vld [vmem:[%s20791_s7 + $0x2a8] sm:$0xff] }
 0x101   : > { %13574 = vmatmul.mubr.msk.bf16.gmra.mrb[4].mxu1 %vm553_vm5, %v15146_v1  ;;  %13590 = vmatmul.mubr.msk.bf16.gmra.mrb[12].mxu0 %vm553_vm5, %v15146_v1  ;;  %20816 = vst [vmem:[#allocation16_spill] sm:$0xff] %v15196_v23  ;;  %20817 = vst [vmem:[#allocation17_spill] sm:$0xff] %v15198_v37  ;;  %v14429_v23 = vld [vmem:[%s20787_s3 + $0x190] sm:$0xff]  }
 0x102   : > { %13597 = vmatprep.subr.bf16.mxu1 %v14389_v52  ;;  %13613 = vmatprep.subr.bf16.mxu0 %v14390_v19 }
 0x103   : > { %13598 = vmatpush3.bf16.msra.mxu1 %v14389_v52  ;;  %13601 = vmatprep.mubr.msk.bf16.mxu1 %vm553_vm5, %v15106_v28  ;;  %v14396_v52 = vld [vmem:[%s20787_s3 + $0xa8] sm:$0xff]  }
 0x104   : > { %13614 = vmatpush3.bf16.msra.mxu0 %v14390_v19  ;;  %13617 = vmatprep.mubr.msk.bf16.mxu0 %vm553_vm5, %v15106_v28  ;;  %v15220_v19 = vpop.permute.xlu0 %4852 }
 0x105   : > { %5711 = vperm.xlu1 %14371, %v12017_v45   ;;  %5726 = vperm.xlu0 %14370, %v12020_v27   ;;  %20818 = vst [vmem:[#allocation18_spill] sm:$0xff] %v15220_v19  ;;  %v12023_v45 = vld [vmem:[%s20791_s7 + $0x2b8] sm:$0xff]  ;;  %v15225_v27 = vpop.permute.xlu1 %4847 }
 0x106   : > { %13599 = vmatprep.subr.bf16.mxu1 %v14391_v22  ;;  %13615 = vmatprep.subr.bf16.mxu0 %v14392_v6  ;;  %20819 = vst [vmem:[#allocation19_spill] sm:$0xff] %v15225_v27  ;;  %v12074_v27 = vld [vmem:[%s20791_s7 + $0x3b8] sm:$0xff] }
 0x107   : > { %13600 = vmatpush3.bf16.msra.mxu1 %v14391_v22  ;;  %v12026_v22 = vld [vmem:[%s20791_s7 + $0x2d0] sm:$0xff] }
 0x108   : > { %13616 = vmatpush3.bf16.msra.mxu0 %v14392_v6  ;;  %13625 = vmatprep.subr.bf16.mxu1 %v14393_v10  ;;  %v14397_v6 = vld [vmem:[%s20787_s3 + $0x90] sm:$0xff]  }
 0x109   : > { %5721 = vperm.xlu1 %14371, %v12019_v15   ;;  %5736 = vperm.xlu0 %14370, %v12022_v20   ;;  %v12025_v15 = vld [vmem:[%s20791_s7 + $0x2c8] sm:$0xff]  ;;  %v14399_v20 = vld [vmem:[%s20787_s3 + $0x98] sm:$0xff]  }
 0x10a   : > { %13602 = vmatmul.mubr.msk.bf16.vlgmr.msra.gmra.mrb[8].mxu1 %vm553_vm5, %v15101_v29  ;;  %13641 = vmatprep.subr.bf16.mxu0 %v14394_v26 }
 0x10b   : > { %13618 = vmatmul.mubr.msk.bf16.vlgmr.msra.gmra.mrb[16].mxu0 %vm553_vm5, %v15101_v29  ;;  %13605 = vmatprep.mubr.msk.bf16.mxu1 %vm553_vm5, %v15148_v31 }
 0x10c   : > { %13621 = vmatprep.mubr.msk.bf16.mxu0 %vm553_vm5, %v15148_v31  ;;  %13626 = vmatpush3.bf16.msra.mxu1 %v14393_v10  ;;  %v14398_v10 = vld [vmem:[%s20787_s3 + $0xb0] sm:$0xff]  }
 0x10d   : > { %13642 = vmatpush3.bf16.msra.mxu0 %v14394_v26  ;;  %5731 = vperm.xlu1 %14371, %v12021_v4   ;;  %v15246_v26 = vpop.permute.xlu0 %4862  ;;  %v12028_v4 = vld [vmem:[%s20791_s7 + $0x2e0] sm:$0xff] }
 0x10e   : > { %5746 = vperm.xlu0 %14370, %v12024_v36   ;;  %13627 = vmatprep.subr.bf16.mxu1 %v14395_v7  ;;  %20820 = vst [vmem:[#allocation20_spill] sm:$0xff] %v15246_v26  ;;  %v15254_v36 = vpop.permute.xlu1 %4857 }
 0x10f   : > { %13643 = vmatprep.subr.bf16.mxu0 %v14396_v52  ;;  %20821 = vst [vmem:[#allocation21_spill] sm:$0xff] %v15254_v36  ;;  %v12053_v36 = vld [vmem:[%s20791_s7 + $0x310] sm:$0xff] }
 0x110   : > { %13628 = vmatpush3.bf16.msra.mxu1 %v14395_v7  ;;  %v14400_v7 = vld [vmem:[%s20787_s3 + $0xb8] sm:$0xff]  }
 0x111   : > { %13644 = vmatpush3.bf16.msra.mxu0 %v14396_v52  ;;  %5741 = vperm.xlu1 %14371, %v12023_v45   ;;  %v14401_v52 = vld [vmem:[%s20787_s3 + $0xc0] sm:$0xff]  }
 0x112   : > { %5756 = vperm.xlu0 %14370, %v12026_v22   ;;  %13606 = vmatmul.mubr.msk.bf16.gmra.mrb[12].mxu1 %vm553_vm5, %v15146_v1  ;;  %v14402_v45 = vld [vmem:[%s20787_s3 + $0xe0] sm:$0xff]   ;;  %v12027_v22 = vld [vmem:[%s20791_s7 + $0x2d8] sm:$0xff] }
 0x113   : > { %13622 = vmatmul.mubr.msk.bf16.gmra.mrb[20].mxu0 %vm553_vm5, %v15146_v1  ;;  %13629 = vmatprep.subr.bf16.mxu1 %v14397_v6 }
 0x114   : > { %13645 = vmatprep.subr.bf16.mxu0 %v14398_v10  ;;  %13630 = vmatpush3.bf16.msra.mxu1 %v14397_v6  ;;  %v12030_v6 = vld [vmem:[%s20791_s7 + $0x2f0] sm:$0xff] }
 0x115   : > { %13633 = vmatprep.mubr.msk.bf16.mxu1 %vm553_vm5, %v15106_v28  ;;  %13646 = vmatpush3.bf16.msra.mxu0 %v14398_v10  ;;  %v15272_v10 = vpop.permute.xlu0 %4872 }
 0x116   : > { %13649 = vmatprep.mubr.msk.bf16.mxu0 %vm553_vm5, %v15106_v28  ;;  %5751 = vperm.xlu1 %14371, %v12025_v15   ;;  %20822 = vst [vmem:[#allocation22_spill] sm:$0xff] %v15272_v10  ;;  %v15274_v15 = vpop.permute.xlu1 %4867 }
 0x117   : > { %5766 = vperm.xlu0 %14370, %v12028_v4   ;;  %13631 = vmatprep.subr.bf16.mxu1 %v14399_v20  ;;  %20823 = vst [vmem:[#allocation23_spill] sm:$0xff] %v15274_v15  ;;  %v14403_v4 = vld [vmem:[%s20787_s3 + $0xc8] sm:$0xff]   ;;  %v14405_v15 = vld [vmem:[%s20787_s3 + $0xd0] sm:$0xff]  }
 0x118   : > { %13647 = vmatprep.subr.bf16.mxu0 %v14400_v7  ;;  %13632 = vmatpush3.bf16.msra.mxu1 %v14399_v20  ;;  %v12029_v20 = vld [vmem:[%s20791_s7 + $0x2e8] sm:$0xff] }
 0x119   : > { %13648 = vmatpush3.bf16.msra.mxu0 %v14400_v7  ;;  %13657 = vmatprep.subr.bf16.mxu1 %v14401_v52  ;;  %v12051_v7 = vld [vmem:[%s20791_s7 + $0x300] sm:$0xff]  ;;  %v15299_v10 = vpop.permute.xlu0 %4882 }
 0x11a   : > { %5761 = vperm.xlu1 %14371, %v12027_v22   ;;  %13673 = vmatprep.subr.bf16.mxu0 %v14402_v45  ;;  %v14404_v22 = vld [vmem:[%s20787_s3 + $0xe8] sm:$0xff]   ;;  %20824 = vst [vmem:[#allocation24_spill] sm:$0xff] %v15299_v10 }
 0x11b   : > { %5776 = vperm.xlu0 %14370, %v12030_v6   ;;  %13634 = vmatmul.mubr.msk.bf16.vlgmr.msra.gmra.mrb[16].mxu1 %vm553_vm5, %v15101_v29  ;;  %v12031_v6 = vld [vmem:[%s20791_s7 + $0x2f8] sm:$0xff] }
 0x11c   : > { %13650 = vmatmul.mubr.msk.bf16.vlgmr.msra.gmra.mrb[24].mxu0 %vm553_vm5, %v15101_v29  ;;  %13637 = vmatprep.mubr.msk.bf16.mxu1 %vm553_vm5, %v15148_v31 }
 0x11d   : > { %13653 = vmatprep.mubr.msk.bf16.mxu0 %vm553_vm5, %v15148_v31  ;;  %13658 = vmatpush3.bf16.msra.mxu1 %v14401_v52  ;;  %v15307_v52 = vpop.permute.xlu1 %4877 }
 0x11e   : > { %13674 = vmatpush3.bf16.msra.mxu0 %v14402_v45  ;;  %5771 = vperm.xlu1 %14371, %v12029_v20   ;;  %20825 = vst [vmem:[#allocation25_spill] sm:$0xff] %v15307_v52  ;;  %v14406_v45 = vld [vmem:[%s20787_s3 + $0xf0] sm:$0xff]   ;;  %v12052_v20 = vld [vmem:[%s20791_s7 + $0x308] sm:$0xff] }
 0x11f   : > { %6053 = vperm.xlu0 %14370, %v12051_v7   ;;  %13659 = vmatprep.subr.bf16.mxu1 %v14403_v4  ;;  %v14408_v7 = vld [vmem:[%s20787_s3 + $0xf8] sm:$0xff]  }
 0x120   : > { %13675 = vmatprep.subr.bf16.mxu0 %v14404_v22 }
 0x121   : > { %13660 = vmatpush3.bf16.msra.mxu1 %v14403_v4  ;;  %v14407_v4 = vld [vmem:[%s20787_s3 + $0xd8] sm:$0xff]   ;;  %v15335_v52 = vpop.permute.xlu1 %4887 }
 0x122   : > { %13676 = vmatpush3.bf16.msra.mxu0 %v14404_v22  ;;  %5781 = vperm.xlu1 %14371, %v12031_v6   ;;  %v15328_v22 = vpop.permute.xlu0 %4892  ;;  %v14409_v6 = vld [vmem:[%s20787_s3 + $0x100] sm:$0xff]   ;;  %20827 = vst [vmem:[#allocation27_spill] sm:$0xff] %v15335_v52 }
 0x123   : > { %6063 = vperm.xlu0 %14370, %v12053_v36   ;;  %13638 = vmatmul.mubr.msk.bf16.gmra.mrb[20].mxu1 %vm553_vm5, %v15146_v1  ;;  %v12055_v36 = vld [vmem:[%s20791_s7 + $0x320] sm:$0xff]  ;;  %20826 = vst [vmem:[#allocation26_spill] sm:$0xff] %v15328_v22  ;;  %v12057_v22 = vld [vmem:[%s20791_s7 + $0x330] sm:$0xff] }
 0x124   : > { %13654 = vmatmul.mubr.msk.bf16.gmra.mrb[28].mxu0 %vm553_vm5, %v15146_v1  ;;  %13661 = vmatprep.subr.bf16.mxu1 %v14405_v15 }
 0x125   : > { %13677 = vmatprep.subr.bf16.mxu0 %v14406_v45  ;;  %13662 = vmatpush3.bf16.msra.mxu1 %v14405_v15  ;;  %v14410_v15 = vld [vmem:[%s20787_s3 + $0x120] sm:$0xff]   ;;  %v15358_v52 = vpop.permute.xlu1 %4897 }
 0x126   : > { %13665 = vmatprep.mubr.msk.bf16.mxu1 %vm553_vm5, %v15106_v28  ;;  %13678 = vmatpush3.bf16.msra.mxu0 %v14406_v45  ;;  %v12054_v45 = vld [vmem:[%s20791_s7 + $0x318] sm:$0xff]  ;;  %20829 = vst [vmem:[#allocation29_spill] sm:$0xff] %v15358_v52  ;;  %v12061_v52 = vld [vmem:[%s20791_s7 + $0x350] sm:$0xff] }
 0x127   : > { %13681 = vmatprep.mubr.msk.bf16.mxu0 %vm553_vm5, %v15106_v28  ;;  %6058 = vperm.xlu1 %14371, %v12052_v20   ;;  %v15348_v20 = vpop.permute.xlu0 %4902 }
 0x128   : > { %6073 = vperm.xlu0 %14370, %v12055_v36   ;;  %13663 = vmatprep.subr.bf16.mxu1 %v14407_v4  ;;  %20828 = vst [vmem:[#allocation28_spill] sm:$0xff] %v15348_v20  ;;  %v12056_v36 = vld [vmem:[%s20791_s7 + $0x328] sm:$0xff]  ;;  %v14413_v20 = vld [vmem:[%s20787_s3 + $0x110] sm:$0xff]  }
 0x129   : > { %13679 = vmatprep.subr.bf16.mxu0 %v14408_v7  ;;  %13664 = vmatpush3.bf16.msra.mxu1 %v14407_v4  ;;  %v14411_v4 = vld [vmem:[%s20787_s3 + $0x108] sm:$0xff]  }
 0x12a   : > { %13680 = vmatpush3.bf16.msra.mxu0 %v14408_v7  ;;  %13689 = vmatprep.subr.bf16.mxu1 %v14409_v6  ;;  %v12059_v7 = vld [vmem:[%s20791_s7 + $0x340] sm:$0xff] }
 0x12b   : > { %6068 = vperm.xlu1 %14371, %v12054_v45   ;;  %13705 = vmatprep.subr.bf16.mxu0 %v14410_v15  ;;  %v12058_v45 = vld [vmem:[%s20791_s7 + $0x338] sm:$0xff]  ;;  %v15381_v10 = vpop.permute.xlu0 %4912 }
 0x12c   : > { %6083 = vperm.xlu0 %14370, %v12057_v22   ;;  %13666 = vmatmul.mubr.msk.bf16.vlgmr.msra.gmra.mrb[24].mxu1 %vm553_vm5, %v15101_v29  ;;  %v14412_v22 = vld [vmem:[%s20787_s3 + $0x128] sm:$0xff]   ;;  %20830 = vst [vmem:[#allocation30_spill] sm:$0xff] %v15381_v10 }
 0x12d   : > { %13682 = vmatmul.mubr.msk.bf16.vlgmr.msra.gmra.mrb[32].mxu0 %vm553_vm5, %v15101_v29  ;;  %13669 = vmatprep.mubr.msk.bf16.mxu1 %vm553_vm5, %v15148_v31 }
 0x12e   : > { %13685 = vmatprep.mubr.msk.bf16.mxu0 %vm553_vm5, %v15148_v31  ;;  %13690 = vmatpush3.bf16.msra.mxu1 %v14409_v6  ;;  %v14414_v6 = vld [vmem:[%s20787_s3 + $0x130] sm:$0xff]  }
 0x12f   : > { %13706 = vmatpush3.bf16.msra.mxu0 %v14410_v15  ;;  %6078 = vperm.xlu1 %14371, %v12056_v36   ;;  %v15386_v15 = vpop.permute.xlu1 %4907  ;;  %v12060_v36 = vld [vmem:[%s20791_s7 + $0x348] sm:$0xff] }
 0x130   : > { %6093 = vperm.xlu0 %14370, %v12059_v7   ;;  %13691 = vmatprep.subr.bf16.mxu1 %v14411_v4  ;;  %20831 = vst [vmem:[#allocation31_spill] sm:$0xff] %v15386_v15  ;;  %v14416_v7 = vld [vmem:[%s20787_s3 + $0x138] sm:$0xff]   ;;  %v12069_v15 = vld [vmem:[%s20791_s7 + $0x390] sm:$0xff] }
 0x131   : > { %13707 = vmatprep.subr.bf16.mxu0 %v14412_v22 }
 0x132   : > { %13692 = vmatpush3.bf16.msra.mxu1 %v14411_v4  ;;  %v14415_v4 = vld [vmem:[%s20787_s3 + $0x118] sm:$0xff]  }
 0x133   : > { %13708 = vmatpush3.bf16.msra.mxu0 %v14412_v22  ;;  %6088 = vperm.xlu1 %14371, %v12058_v45   ;;  %v14417_v22 = vld [vmem:[%s20787_s3 + $0x140] sm:$0xff]   ;;  %v15409_v45 = vpop.permute.xlu0 %4922  ;;  %v15416_v10 = vpop.permute.xlu1 %4917 }
 0x134   : > { %6103 = vperm.xlu0 %14370, %v12061_v52   ;;  %13670 = vmatmul.mubr.msk.bf16.gmra.mrb[28].mxu1 %vm553_vm5, %v15146_v1  ;;  %v12063_v52 = vld [vmem:[%s20791_s7 + $0x360] sm:$0xff]  ;;  %20832 = vst [vmem:[#allocation32_spill] sm:$0xff] %v15409_v45  ;;  %20833 = vst [vmem:[#allocation33_spill] sm:$0xff] %v15416_v10  ;;  %v12065_v45 = vld [vmem:[%s20791_s7 + $0x370] sm:$0xff] }
 0x135   : > { %13686 = vmatmul.mubr.msk.bf16.gmra.mrb[36].mxu0 %vm553_vm5, %v15146_v1  ;;  %13693 = vmatprep.subr.bf16.mxu1 %v14413_v20  ;;  %v12066_v10 = vld [vmem:[%s20791_s7 + $0x378] sm:$0xff] }
 0x136   : > { %13709 = vmatprep.subr.bf16.mxu0 %v14414_v6  ;;  %13694 = vmatpush3.bf16.msra.mxu1 %v14413_v20  ;;  %v14418_v20 = vld [vmem:[%s20787_s3 + $0x160] sm:$0xff]  }
 0x137   : > { %13697 = vmatprep.mubr.msk.bf16.mxu1 %vm553_vm5, %v15106_v28  ;;  %13710 = vmatpush3.bf16.msra.mxu0 %v14414_v6  ;;  %v12062_v6 = vld [vmem:[%s20791_s7 + $0x358] sm:$0xff] }
 0x138   : > { %13713 = vmatprep.mubr.msk.bf16.mxu0 %vm553_vm5, %v15106_v28  ;;  %6098 = vperm.xlu1 %14371, %v12060_v36   ;;  %v12064_v36 = vld [vmem:[%s20791_s7 + $0x368] sm:$0xff] }
 0x139   : > { %6113 = vperm.xlu0 %14370, %v12063_v52   ;;  %13695 = vmatprep.subr.bf16.mxu1 %v14415_v4  ;;  %v15432_v52 = vpop.permute.xlu0 %5199 }
 0x13a   : > { %13711 = vmatprep.subr.bf16.mxu0 %v14416_v7  ;;  %13696 = vmatpush3.bf16.msra.mxu1 %v14415_v4  ;;  %v14419_v4 = vld [vmem:[%s20787_s3 + $0x148] sm:$0xff]   ;;  %20834 = vst [vmem:[#allocation34_spill] sm:$0xff] %v15432_v52 }
 0x13b   : > { %13712 = vmatpush3.bf16.msra.mxu0 %v14416_v7  ;;  %13721 = vmatprep.subr.bf16.mxu1 %v14417_v22  ;;  %v12067_v7 = vld [vmem:[%s20791_s7 + $0x380] sm:$0xff] }
 0x13c   : > { %6108 = vperm.xlu1 %14371, %v12062_v6   ;;  %13737 = vmatprep.subr.bf16.mxu0 %v14418_v20  ;;  %v15444_v6 = vpop.permute.xlu1 %4927 }
 0x13d   : > { %6123 = vperm.xlu0 %14370, %v12065_v45   ;;  %13698 = vmatmul.mubr.msk.bf16.vlgmr.msra.gmra.mrb[32].mxu1 %vm553_vm5, %v15101_v29  ;;  %v14420_v45 = vld [vmem:[%s20787_s3 + $0x168] sm:$0xff]   ;;  %20835 = vst [vmem:[#allocation35_spill] sm:$0xff] %v15444_v6  ;;  %v14421_v6 = vld [vmem:[%s20787_s3 + $0x150] sm:$0xff]  }
 0x13e   : > { %13714 = vmatmul.mubr.msk.bf16.vlgmr.msra.gmra.mrb[40].mxu0 %vm553_vm5, %v15101_v29  ;;  %13701 = vmatprep.mubr.msk.bf16.mxu1 %vm553_vm5, %v15148_v31 }
 0x13f   : > { %13717 = vmatprep.mubr.msk.bf16.mxu0 %vm553_vm5, %v15148_v31  ;;  %13722 = vmatpush3.bf16.msra.mxu1 %v14417_v22  ;;  %v14422_v22 = vld [vmem:[%s20787_s3 + $0x170] sm:$0xff]  }
 0x140   : > { %13738 = vmatpush3.bf16.msra.mxu0 %v14418_v20  ;;  %6118 = vperm.xlu1 %14371, %v12064_v36   ;;  %v15460_v20 = vpop.permute.xlu0 %5209  ;;  %v15462_v36 = vpop.permute.xlu1 %5204 }
 0x141   : > { %6133 = vperm.xlu0 %14370, %v12067_v7   ;;  %13723 = vmatprep.subr.bf16.mxu1 %v14419_v4  ;;  %20836 = vst [vmem:[#allocation36_spill] sm:$0xff] %v15462_v36  ;;  %v14423_v7 = vld [vmem:[%s20787_s3 + $0x158] sm:$0xff]  }
 0x142   : > { %13739 = vmatprep.subr.bf16.mxu0 %v14420_v45 }
 0x143   : > { %13724 = vmatpush3.bf16.msra.mxu1 %v14419_v4  ;;  %v12068_v4 = vld [vmem:[%s20791_s7 + $0x388] sm:$0xff] }
 0x144   : > { %13740 = vmatpush3.bf16.msra.mxu0 %v14420_v45  ;;  %6128 = vperm.xlu1 %14371, %v12066_v10   ;;  %v12071_v10 = vld [vmem:[%s20791_s7 + $0x3a0] sm:$0xff]  ;;  %v15490_v19 = vpop.permute.xlu0 %5219  ;;  %v15495_v26 = vpop.permute.xlu1 %5214 }
 0x145   : > { %6143 = vperm.xlu0 %14370, %v12069_v15   ;;  %13702 = vmatmul.mubr.msk.bf16.gmra.mrb[36].mxu1 %vm553_vm5, %v15146_v1  ;;  %v14424_v15 = vld [vmem:[%s20787_s3 + $0x178] sm:$0xff]   ;;  %v14425_v45 = vld [vmem:[%s20787_s3 + $0x180] sm:$0xff]   ;;  %20837 = vst [vmem:[#allocation37_spill] sm:$0xff] %v15490_v19  ;;  %20838 = vst [vmem:[#allocation38_spill] sm:$0xff] %v15495_v26 }
 0x146   : > { %13718 = vmatmul.mubr.msk.bf16.gmra.mrb[44].mxu0 %vm553_vm5, %v15146_v1  ;;  %13725 = vmatprep.subr.bf16.mxu1 %v14421_v6 }
 0x147   : > { %13741 = vmatprep.subr.bf16.mxu0 %v14422_v22  ;;  %13726 = vmatpush3.bf16.msra.mxu1 %v14421_v6  ;;  %v14426_v6 = vld [vmem:[%s20787_s3 + $0x1a0] sm:$0xff]  }
 0x148   : > { %13729 = vmatprep.mubr.msk.bf16.mxu1 %vm553_vm5, %v15106_v28  ;;  %13742 = vmatpush3.bf16.msra.mxu0 %v14422_v22  ;;  %v12070_v22 = vld [vmem:[%s20791_s7 + $0x398] sm:$0xff]  ;;  %v15522_v37 = vpop.permute.xlu1 %5224 }
 0x149   : > { %13745 = vmatprep.mubr.msk.bf16.mxu0 %vm553_vm5, %v15106_v28  ;;  %6138 = vperm.xlu1 %14371, %v12068_v4   ;;  %v12073_v4 = vld [vmem:[%s20791_s7 + $0x3b0] sm:$0xff]  ;;  %20840 = vst [vmem:[#allocation40_spill] sm:$0xff] %v15522_v37 }
 0x14a   : > { %6153 = vperm.xlu0 %14370, %v12071_v10   ;;  %13727 = vmatprep.subr.bf16.mxu1 %v14423_v7  ;;  %v12072_v10 = vld [vmem:[%s20791_s7 + $0x3a8] sm:$0xff] }
 0x14b   : > { %13743 = vmatprep.subr.bf16.mxu0 %v14424_v15  ;;  %13728 = vmatpush3.bf16.msra.mxu1 %v14423_v7  ;;  %v14427_v7 = vld [vmem:[%s20787_s3 + $0x188] sm:$0xff]  }
 0x14c   : > { %13744 = vmatpush3.bf16.msra.mxu0 %v14424_v15  ;;  %13753 = vmatprep.subr.bf16.mxu1 %v14425_v45  ;;  %v12075_v15 = vld [vmem:[%s20791_s7 + $0x3c0] sm:$0xff] }
 0x14d   : > { %6148 = vperm.xlu1 %14371, %v12070_v22   ;;  %13769 = vmatprep.subr.bf16.mxu0 %v14426_v6  ;;  %v14428_v22 = vld [vmem:[%s20787_s3 + $0x1a8] sm:$0xff]  }
 0x14e   : > { %6163 = vperm.xlu0 %14370, %v12073_v4   ;;  %13730 = vmatmul.mubr.msk.bf16.vlgmr.msra.gmra.mrb[40].mxu1 %vm553_vm5, %v15101_v29  ;;  %v15518_v4 = vpop.permute.xlu0 %5229 }
 0x14f   : > { %13746 = vmatmul.mubr.msk.bf16.vlgmr.msra.gmra.mrb[48].mxu0 %vm553_vm5, %v15101_v29  ;;  %13733 = vmatprep.mubr.msk.bf16.mxu1 %vm553_vm5, %v15148_v31  ;;  %20839 = vst [vmem:[#allocation39_spill] sm:$0xff] %v15518_v4 }
 0x150   : > { %13749 = vmatprep.mubr.msk.bf16.mxu0 %vm553_vm5, %v15148_v31  ;;  %13754 = vmatpush3.bf16.msra.mxu1 %v14425_v45  ;;  %v14430_v45 = vld [vmem:[%s20787_s3 + $0x1b0] sm:$0xff]  }
 0x151   : > { %13770 = vmatpush3.bf16.msra.mxu0 %v14426_v6  ;;  %6158 = vperm.xlu1 %14371, %v12072_v10   ;;  %v15540_v10 = vpop.permute.xlu1 %5234 }
 0x152   : > { %6173 = vperm.xlu0 %14370, %v12075_v15   ;;  %13755 = vmatprep.subr.bf16.mxu1 %v14427_v7  ;;  %v15536_v6 = vpop.permute.xlu0 %5239  ;;  %20842 = vst [vmem:[#allocation42_spill] sm:$0xff] %v15540_v10  ;;  %v14432_v15 = vld [vmem:[%s20787_s3 + $0x1b8] sm:$0xff]  }
 0x153   : > { %13771 = vmatprep.subr.bf16.mxu0 %v14428_v22  ;;  %20841 = vst [vmem:[#allocation41_spill] sm:$0xff] %v15536_v6 }
 0x154   : > { %13756 = vmatpush3.bf16.msra.mxu1 %v14427_v7  ;;  %v12076_v7 = vld [vmem:[%s20791_s7 + $0x3c8] sm:$0xff] }
 0x155   : > { %13772 = vmatpush3.bf16.msra.mxu0 %v14428_v22  ;;  %6168 = vperm.xlu1 %14371, %v12074_v27   ;;  %v14431_v27 = vld [vmem:[%s20787_s3 + $0x198] sm:$0xff]   ;;  %v14433_v22 = vld [vmem:[%s20787_s3 + $0x1c0] sm:$0xff]   ;;  %v15574_v6 = vpop.permute.xlu1 %5244 }
 0x156   : > { %6183 = vperm.xlu0 %14370, %v12077_v0   ;;  %13734 = vmatmul.mubr.msk.bf16.gmra.mrb[44].mxu1 %vm553_vm5, %v15146_v1  ;;  %v12079_v0 = vld [vmem:[%s20791_s7 + $0x3e0] sm:$0xff]  ;;  %v15569_v30 = vpop.permute.xlu0 %5249  ;;  %20844 = vst [vmem:[#allocation44_spill] sm:$0xff] %v15574_v6  ;;  %v12082_v6 = vld [vmem:[%s20791_s7 + $0x3f8] sm:$0xff] }
 0x157   : > { %13750 = vmatmul.mubr.msk.bf16.gmra.mrb[52].mxu0 %vm553_vm5, %v15146_v1  ;;  %13757 = vmatprep.subr.bf16.mxu1 %v14429_v23  ;;  %20843 = vst [vmem:[#allocation43_spill] sm:$0xff] %v15569_v30 }
 0x158   : > { %13773 = vmatprep.subr.bf16.mxu0 %v14430_v45  ;;  %13758 = vmatpush3.bf16.msra.mxu1 %v14429_v23  ;;  %v14434_v23 = vld [vmem:[%s20787_s3 + $0x1e0] sm:$0xff]  }
 0x159   : > { %13761 = vmatprep.mubr.msk.bf16.mxu1 %vm553_vm5, %v15106_v28  ;;  %13774 = vmatpush3.bf16.msra.mxu0 %v14430_v45  ;;  %v12081_v45 = vld [vmem:[%s20791_s7 + $0x3f0] sm:$0xff] }
 0x15a   : > { %13777 = vmatprep.mubr.msk.bf16.mxu0 %vm553_vm5, %v15106_v28  ;;  %6178 = vperm.xlu1 %14371, %v12076_v7   ;;  %v12080_v7 = vld [vmem:[%s20791_s7 + $0x3e8] sm:$0xff] }
 0x15b   : > { %6193 = vperm.xlu0 %14370, %v12079_v0   ;;  %13759 = vmatprep.subr.bf16.mxu1 %v14431_v27  ;;  %v14436_v0 = vld [vmem:[%s20787_s3 + $0x1e8] sm:$0xff]  }
 0x15c   : > { %13775 = vmatprep.subr.bf16.mxu0 %v14432_v15  ;;  %13760 = vmatpush3.bf16.msra.mxu1 %v14431_v27  ;;  %v14435_v27 = vld [vmem:[%s20787_s3 + $0x1c8] sm:$0xff]  }
 0x15d   : > { %13776 = vmatpush3.bf16.msra.mxu0 %v14432_v15  ;;  %13785 = vmatprep.subr.bf16.mxu1 %v14433_v22  ;;  %v15596_v15 = vpop.permute.xlu0 %5259 }
 0x15e   : > { %6188 = vperm.xlu1 %14371, %v12078_v57   ;;  %13801 = vmatprep.subr.bf16.mxu0 %v14434_v23  ;;  %v12102_v57 = vld [vmem:[%s20791_s7 + $0x400] sm:$0xff]  ;;  %20845 = vst [vmem:[#allocation45_spill] sm:$0xff] %v15596_v15 }
 0x15f   : > { %6203 = vperm.xlu0 %14370, %v12081_v45   ;;  %13762 = vmatmul.mubr.msk.bf16.vlgmr.msra.gmra.mrb[48].mxu1 %vm553_vm5, %v15101_v29  ;;  %v15598_v45 = vpop.permute.xlu1 %5254 }
 0x160   : > { %13778 = vmatmul.mubr.msk.bf16.vlgmr.msra.gmra.mrb[56].mxu0 %vm553_vm5, %v15101_v29  ;;  %13765 = vmatprep.mubr.msk.bf16.mxu1 %vm553_vm5, %v15148_v31  ;;  %20846 = vst [vmem:[#allocation46_spill] sm:$0xff] %v15598_v45 }
 0x161   : > { %13781 = vmatprep.mubr.msk.bf16.mxu0 %vm553_vm5, %v15148_v31  ;;  %13786 = vmatpush3.bf16.msra.mxu1 %v14433_v22  ;;  %v14437_v22 = vld [vmem:[%s20787_s3 + $0x1d0] sm:$0xff]  }
 0x162   : > { %13802 = vmatpush3.bf16.msra.mxu0 %v14434_v23  ;;  %6198 = vperm.xlu1 %14371, %v12080_v7   ;;  %v14438_v23 = vld [vmem:[%s20787_s3 + $0x1f0] sm:$0xff]   ;;  %v15614_v7 = vpop.permute.xlu0 %5269 }
 0x163   : > { %6480 = vperm.xlu0 %14370, %v12102_v57   ;;  %13787 = vmatprep.subr.bf16.mxu1 %v14435_v27  ;;  %20847 = vst [vmem:[#allocation47_spill] sm:$0xff] %v15614_v7  ;;  %v14439_v57 = vld [vmem:[%s20787_s3 + $0x1d8] sm:$0xff]  }
 0x164   : > { %13803 = vmatprep.subr.bf16.mxu0 %v14436_v0 }
 0x165   : > { %13788 = vmatpush3.bf16.msra.mxu1 %v14435_v27  ;;  %v12103_v27 = vld [vmem:[%s20791_s7 + $0x408] sm:$0xff] }
 0x166   : > { %13804 = vmatpush3.bf16.msra.mxu0 %v14436_v0  ;;  %6208 = vperm.xlu1 %14371, %v12082_v6   ;;  %v15624_v0 = vpop.permute.xlu1 %5264  ;;  %v14440_v6 = vld [vmem:[%s20787_s3 + $0x1f8] sm:$0xff]   ;;  %v15642_v15 = vpop.permute.xlu0 %5279 }
 0x167   : > { %6490 = vperm.xlu0 %14370, %v12104_v18   ;;  %13766 = vmatmul.mubr.msk.bf16.gmra.mrb[52].mxu1 %vm553_vm5, %v15146_v1  ;;  %20848 = vst [vmem:[#allocation48_spill] sm:$0xff] %v15624_v0  ;;  %v12106_v18 = vld [vmem:[%s20791_s7 + $0x420] sm:$0xff]  ;;  %v12108_v0 = vld [vmem:[%s20791_s7 + $0x430] sm:$0xff]  ;;  %20849 = vst [vmem:[#allocation49_spill] sm:$0xff] %v15642_v15 }
 0x168   : > { %13782 = vmatmul.mubr.msk.bf16.gmra.mrb[60].mxu0 %vm553_vm5, %v15146_v1  ;;  %13789 = vmatprep.subr.bf16.mxu1 %v14437_v22 }
 0x169   : > { %13805 = vmatprep.subr.bf16.mxu0 %v14438_v23  ;;  %13790 = vmatpush3.bf16.msra.mxu1 %v14437_v22  ;;  %v12105_v22 = vld [vmem:[%s20791_s7 + $0x418] sm:$0xff] }
 0x16a   : > { %13793 = vmatprep.mubr.msk.bf16.mxu1 %vm553_vm5, %v15106_v28  ;;  %13806 = vmatpush3.bf16.msra.mxu0 %v14438_v23  ;;  %v15644_v23 = vpop.permute.xlu1 %5274 }
 0x16b   : > { %13809 = vmatprep.mubr.msk.bf16.mxu0 %vm553_vm5, %v15106_v28  ;;  %6485 = vperm.xlu1 %14371, %v12103_v27   ;;  %20850 = vst [vmem:[#allocation50_spill] sm:$0xff] %v15644_v23  ;;  %v12107_v28 = vld [vmem:[%s20791_s7 + $0x428] sm:$0xff]  ;;  %v12110_v27 = vld [vmem:[%s20791_s7 + $0x440] sm:$0xff] }
 0x16c   : > { %6500 = vperm.xlu0 %14370, %v12106_v18   ;;  %13791 = vmatprep.subr.bf16.mxu1 %v14439_v57 }
 0x16d   : > { %13807 = vmatprep.subr.bf16.mxu0 %v14440_v6  ;;  %13792 = vmatpush3.bf16.msra.mxu1 %v14439_v57  ;;  %v15660_v57 = vpop.permute.xlu0 %5289 }
 0x16e   : > { %13808 = vmatpush3.bf16.msra.mxu0 %v14440_v6  ;;  %20851 = vst [vmem:[#allocation51_spill] sm:$0xff] %v15660_v57  ;;  %v15665_v18 = vpop.permute.xlu1 %5284  ;;  %v12114_v6 = vld [vmem:[%s20791_s7 + $0x460] sm:$0xff] }
 0x16f   : > { %6495 = vperm.xlu1 %14371, %v12105_v22   ;;  %20852 = vst [vmem:[#allocation52_spill] sm:$0xff] %v15665_v18 }
 0x170   : > { %6510 = vperm.xlu0 %14370, %v12108_v0   ;;  %13794 = vmatmul.mubr.msk.bf16.vlgmr.msra.gmra.mrb[56].mxu1 %vm553_vm5, %v15101_v29  ;;  %v12109_v0 = vld [vmem:[%s20791_s7 + $0x438] sm:$0xff] }
 0x171   : > { %13810 = vmatmul.mubr.msk.bf16.vlgmr.msra.gmra.mrb[64].mxu0 %vm553_vm5, %v15101_v29  ;;  %13797 = vmatprep.mubr.msk.bf16.mxu1 %vm553_vm5, %v15148_v31  ;;  %v12112_v29 = vld [vmem:[%s20791_s7 + $0x450] sm:$0xff]  ;;  %v15680_v22 = vpop.permute.xlu0 %5299 }
 0x172   : > { %13813 = vmatprep.mubr.msk.bf16.mxu0 %vm553_vm5, %v15148_v31  ;;  %v12111_v31 = vld [vmem:[%s20791_s7 + $0x448] sm:$0xff]  ;;  %20853 = vst [vmem:[#allocation53_spill] sm:$0xff] %v15680_v22 }
 0x173   : > { %6505 = vperm.xlu1 %14371, %v12107_v28   ;;  %v15682_v28 = vpop.permute.xlu1 %5294 }
 0x174   : > { %6520 = vperm.xlu0 %14370, %v12110_v27   ;;  %20854 = vst [vmem:[#allocation54_spill] sm:$0xff] %v15682_v28  ;;  %v12113_v27 = vld [vmem:[%s20791_s7 + $0x458] sm:$0xff] }
 0x177   : > { %6515 = vperm.xlu1 %14371, %v12109_v0   ;;  %v12116_v0 = vld [vmem:[%s20791_s7 + $0x470] sm:$0xff]  ;;  %v15695_v22 = vpop.permute.xlu1 %5304 }
 0x178   : > { %6530 = vperm.xlu0 %14370, %v12112_v29   ;;  %13798 = vmatmul.mubr.msk.bf16.gmra.mrb[60].mxu1 %vm553_vm5, %v15146_v1  ;;  %v12115_v29 = vld [vmem:[%s20791_s7 + $0x468] sm:$0xff]  ;;  %20856 = vst [vmem:[#allocation56_spill] sm:$0xff] %v15695_v22 }
 0x179   : > { %13814 = vmatmul.mubr.msk.bf16.gmra.mrb[68].mxu0 %vm553_vm5, %v15146_v1  ;;  %v15690_v1 = vpop.permute.xlu0 %5309  ;;  %v12119_v22 = vld [vmem:[%s20791_s7 + $0x488] sm:$0xff] }
 0x17a   : > { %20855 = vst [vmem:[#allocation55_spill] sm:$0xff] %v15690_v1 }
 0x17b   : > { %6525 = vperm.xlu1 %14371, %v12111_v31   ;;  %v12118_v31 = vld [vmem:[%s20791_s7 + $0x480] sm:$0xff]  ;;  %v15708_v1 = vpop.permute.xlu1 %5314 }
 0x17c   : > { %6540 = vperm.xlu0 %14370, %v12114_v6   ;;  %v12117_v6 = vld [vmem:[%s20791_s7 + $0x478] sm:$0xff]  ;;  %20858 = vst [vmem:[#allocation58_spill] sm:$0xff] %v15708_v1 }
 0x17f   : > { %6535 = vperm.xlu1 %14371, %v12113_v27   ;;  %v12120_v27 = vld [vmem:[%s20791_s7 + $0x490] sm:$0xff]  ;;  %v15721_v18 = vpop.permute.xlu1 %5324 }
 0x180   : > { %6550 = vperm.xlu0 %14370, %v12116_v0   ;;  %v15706_v0 = vpop.permute.xlu0 %5319  ;;  %20860 = vst [vmem:[#allocation60_spill] sm:$0xff] %v15721_v18  ;;  %v12128_v18 = vld [vmem:[%s20791_s7 + $0x4d0] sm:$0xff] }
 0x181   : > { %20857 = vst [vmem:[#allocation57_spill] sm:$0xff] %v15706_v0  ;;  %v12121_v0 = vld [vmem:[%s20791_s7 + $0x498] sm:$0xff] }
 0x183   : > { %6545 = vperm.xlu1 %14371, %v12115_v29   ;;  %v12122_v29 = vld [vmem:[%s20791_s7 + $0x4a0] sm:$0xff]  ;;  %v15748_v28 = vpop.permute.xlu1 %5334 }
 0x184   : > { %6560 = vperm.xlu0 %14370, %v12118_v31   ;;  %v15716_v31 = vpop.permute.xlu0 %5329  ;;  %20862 = vst [vmem:[#allocation62_spill] sm:$0xff] %v15748_v28 }
 0x185   : > { %20859 = vst [vmem:[#allocation59_spill] sm:$0xff] %v15716_v31  ;;  %v12126_v31 = vld [vmem:[%s20791_s7 + $0x4c0] sm:$0xff] }
 0x187   : > { %6555 = vperm.xlu1 %14371, %v12117_v6   ;;  %v12124_v6 = vld [vmem:[%s20791_s7 + $0x4b0] sm:$0xff] }
 0x188   : > { %6570 = vperm.xlu0 %14370, %v12120_v27   ;;  %v15729_v27 = vld [vmem:[%s20788_s4] sm:$0xff]  ;;  %v15746_v1 = vpop.permute.xlu0 %5339 }
 0x189   : > { %20861 = vst [vmem:[#allocation61_spill] sm:$0xff] %v15746_v1  ;;  %v15761_v1 = vpop.permute.xlu1 %5344 }
 0x18a   : > { %20864 = vst [vmem:[#allocation64_spill] sm:$0xff] %v15761_v1  ;;  %v12131_v1 = vld [vmem:[%s20791_s7 + $0x4e8] sm:$0xff] }
 0x18b   : > { %6565 = vperm.xlu1 %14371, %v12119_v22   ;;  %v15734_v22 = vld [vmem:[%s20788_s4 + $0x20] sm:$0xff] }
 0x18c   : > { %6580 = vperm.xlu0 %14370, %v12122_v29   ;;  %v12123_v29 = vld [vmem:[%s20791_s7 + $0x4a8] sm:$0xff]  ;;  %v15756_v15 = vpop.permute.xlu0 %5349 }
 0x18d   : > { %20863 = vst [vmem:[#allocation63_spill] sm:$0xff] %v15756_v15  ;;  %v15774_v15 = vpop.permute.xlu1 %5354 }
 0x18e   : > { %20866 = vst [vmem:[#allocation66_spill] sm:$0xff] %v15774_v15 }
 0x18f   : > { %6575 = vperm.xlu1 %14371, %v12121_v0   ;;  %v11786_v0 = vcombine.high %v15729_v27, %v15734_v22 }
 0x190   : > { %6590 = vperm.xlu0 %14370, %v12124_v6   ;;  %v12125_v6 = vld [vmem:[%s20791_s7 + $0x4b8] sm:$0xff] }
 0x191   : > { %3285 = vmatprep.mubr.bf16.mxu1 %v11786_v0  ;;  %v12127_v0 = vld [vmem:[%s20791_s7 + $0x4c8] sm:$0xff]  ;;  %v15787_v28 = vpop.permute.xlu1 %5631 }
 0x192   : > { %20868 = vst [vmem:[#allocation68_spill] sm:$0xff] %v15787_v28  ;;  %v12156_v28 = vld [vmem:[%s20791_s7 + $0x518] sm:$0xff] }
 0x193   : > { %6585 = vperm.xlu1 %14371, %v12123_v29   ;;  %v12129_v29 = vld [vmem:[%s20791_s7 + $0x4d8] sm:$0xff] }
 0x194   : > { %6600 = vperm.xlu0 %14370, %v12126_v31   ;;  %v12130_v31 = vld [vmem:[%s20791_s7 + $0x4e0] sm:$0xff] }
 0x197   : > { %6595 = vperm.xlu1 %14371, %v12125_v6   ;;  %v15772_v6 = vpop.permute.xlu0 %5626 }
 0x198   : > { %6610 = vperm.xlu0 %14370, %v12128_v18   ;;  %v12132_v18 = vld [vmem:[%s20791_s7 + $0x4f0] sm:$0xff]  ;;  %20865 = vst [vmem:[#allocation65_spill] sm:$0xff] %v15772_v6  ;;  %v12133_v6 = vld [vmem:[%s20791_s7 + $0x4f8] sm:$0xff] }
 0x19b   : > { %6605 = vperm.xlu1 %14371, %v12127_v0   ;;  %v12153_v0 = vld [vmem:[%s20791_s7 + $0x500] sm:$0xff] }
 0x19c   : > { %6620 = vperm.xlu0 %14370, %v12130_v31   ;;  %v15782_v31 = vpop.permute.xlu0 %5636 }
 0x19d   : > { %20867 = vst [vmem:[#allocation67_spill] sm:$0xff] %v15782_v31  ;;  %v15800_v31 = vpop.permute.xlu1 %5641 }
 0x19e   : > { %20870 = vst [vmem:[#allocation70_spill] sm:$0xff] %v15800_v31  ;;  %v12164_v31 = vld [vmem:[%s20791_s7 + $0x558] sm:$0xff] }
 0x19f   : > { %6615 = vperm.xlu1 %14371, %v12129_v29   ;;  %v12155_v29 = vld [vmem:[%s20791_s7 + $0x510] sm:$0xff] }
 0x1a0   : > { %6630 = vperm.xlu0 %14370, %v12132_v18   ;;  %v12154_v18 = vld [vmem:[%s20791_s7 + $0x508] sm:$0xff] }
 0x1a3   : > { %6625 = vperm.xlu1 %14371, %v12131_v1   ;;  %v12157_v1 = vld [vmem:[%s20791_s7 + $0x520] sm:$0xff] }
 0x1a4   : > { %6907 = vperm.xlu0 %14370, %v12153_v0   ;;  %v15798_v0 = vpop.permute.xlu0 %5646 }
 0x1a5   : > { %20869 = vst [vmem:[#allocation69_spill] sm:$0xff] %v15798_v0  ;;  %v15823_v0 = vpop.permute.xlu1 %5651 }
 0x1a6   : > { %20872 = vst [vmem:[#allocation72_spill] sm:$0xff] %v15823_v0  ;;  %v12163_v0 = vld [vmem:[%s20791_s7 + $0x550] sm:$0xff] }
 0x1a7   : > { %6635 = vperm.xlu1 %14371, %v12133_v6   ;;  %v12159_v6 = vld [vmem:[%s20791_s7 + $0x530] sm:$0xff] }
 0x1a8   : > { %6917 = vperm.xlu0 %14370, %v12155_v29   ;;  %v15811_v29 = vld [vmem:[%s20788_s4 + $0x8] sm:$0xff]  ;;  %v15813_v15 = vpop.permute.xlu0 %5656 }
 0x1a9   : > { %20871 = vst [vmem:[#allocation71_spill] sm:$0xff] %v15813_v15  ;;  %v12160_v15 = vld [vmem:[%s20791_s7 + $0x538] sm:$0xff]  ;;  %v15840_v23 = vpop.permute.xlu1 %5661 }
 0x1aa   : > { %20874 = vst [vmem:[#allocation74_spill] sm:$0xff] %v15840_v23 }
 0x1ab   : > { %6912 = vperm.xlu1 %14371, %v12154_v18   ;;  %v12158_v18 = vld [vmem:[%s20791_s7 + $0x528] sm:$0xff] }
 0x1ac   : > { %6927 = vperm.xlu0 %14370, %v12157_v1   ;;  %v15821_v1 = vld [vmem:[%s20788_s4 + $0x28] sm:$0xff]  ;;  %v15838_v57 = vpop.permute.xlu0 %5666 }
 0x1ad   : > { %20873 = vst [vmem:[#allocation73_spill] sm:$0xff] %v15838_v57  ;;  %v15853_v57 = vpop.permute.xlu1 %5671 }
 0x1ae   : > { %20876 = vst [vmem:[#allocation76_spill] sm:$0xff] %v15853_v57 }
 0x1af   : > { %6922 = vperm.xlu1 %14371, %v12156_v28   ;;  %v12161_v28 = vld [vmem:[%s20791_s7 + $0x540] sm:$0xff] }
 0x1b0   : > { %6937 = vperm.xlu0 %14370, %v12159_v6   ;;  %v11788_v6 = vcombine.high %v15811_v29, %v15821_v1 }
 0x1b2   : > { %3446 = vmatprep.mubr.bf16.mxu0 %v11788_v6  ;;  %v15848_v6 = vpop.permute.xlu0 %5676 }
 0x1b3   : > { %6932 = vperm.xlu1 %14371, %v12158_v18   ;;  %v12162_v18 = vld [vmem:[%s20791_s7 + $0x548] sm:$0xff]  ;;  %20875 = vst [vmem:[#allocation75_spill] sm:$0xff] %v15848_v6 }
 0x1b4   : > { %6947 = vperm.xlu0 %14370, %v12161_v28   ;;  %v12165_v28 = vld [vmem:[%s20791_s7 + $0x560] sm:$0xff] }
 0x1b7   : > { %6942 = vperm.xlu1 %14371, %v12160_v15   ;;  %v12166_v15 = vld [vmem:[%s20791_s7 + $0x568] sm:$0xff] }
 0x1b8   : > { %6957 = vperm.xlu0 %14370, %v12163_v0   ;;  %v15858_v0 = vpop.permute.xlu1 %5681 }
 0x1b9   : > { %20877 = vst [vmem:[#allocation77_spill] sm:$0xff] %v15858_v0 }
 0x1bb   : > { %6952 = vperm.xlu1 %14371, %v12162_v18  }
 0x1bc   : > { %6967 = vperm.xlu0 %14370, %v12165_v28  }
 0x1bf   : > { %6962 = vperm.xlu1 %14371, %v12164_v31  }
 0x1c3   : > { %6972 = vperm.xlu1 %14371, %v12166_v15  }
 0x1cc   : > { %v13571_v23 = vpop.f32.mrb[0].mxu1  ;;  %v13587_v7 = vpop.f32.mrb[8].mxu0 }
 0x1cd   : > { %v600_v18 = vpop.f32.mrb[1].mxu1  ;;  %v706_v45 = vpop.f32.mrb[9].mxu0 }
 0x1ce   : > { %v13572_v6 = vpop.f32.mrb[2].mxu1  ;;  %v13588_v28 = vpop.f32.mrb[10].mxu0 }
 0x1cf   : > { %v632_v30 = vpack.c.bf16 %v13572_v6, %v13571_v23  ;;  %v738_v21 = vpack.c.bf16 %v13588_v28, %v13587_v7  ;;  %v603_v37 = vpop.f32.mrb[3].mxu1  ;;  %v709_v10 = vpop.f32.mrb[11].mxu0 }
 0x1d0   : > { %v631_v60 = vpack.c.bf16 %v603_v37, %v600_v18  ;;  %v737_v31 = vpack.c.bf16 %v709_v10, %v706_v45 }
 0x1d1   : > { %636 = vst.msk [vmem:[#allocation2 + $0x8] sm:$0xff] %vm415_vm0, %v632_v30  ;;  %742 = vst.msk [vmem:[#allocation2 + $0x28] sm:$0xff] %vm415_vm0, %v738_v21 }
 0x1d2   : > { %635 = vst.msk [vmem:[#allocation2] sm:$0xff] %vm415_vm0, %v631_v60  ;;  %741 = vst.msk [vmem:[#allocation2 + $0x20] sm:$0xff] %vm415_vm0, %v737_v31 }
 0x1d4   : > { %v13575_v15 = vpop.f32.mrb[4].mxu1  ;;  %v13591_v57 = vpop.f32.mrb[12].mxu0 }
 0x1d5   : > { %v616_v0 = vpop.f32.mrb[5].mxu1  ;;  %v722_v49 = vpop.f32.mrb[13].mxu0 }
 0x1d6   : > { %v13576_v19 = vpop.f32.mrb[6].mxu1  ;;  %v13592_v11 = vpop.f32.mrb[14].mxu0 }
 0x1d7   : > { %v634_v23 = vpack.c.bf16 %v13576_v19, %v13575_v15  ;;  %v740_v7 = vpack.c.bf16 %v13592_v11, %v13591_v57  ;;  %v619_v6 = vpop.f32.mrb[7].mxu1  ;;  %v725_v37 = vpop.f32.mrb[15].mxu0 }
 0x1d8   : > { %v633_v18 = vpack.c.bf16 %v619_v6, %v616_v0  ;;  %v739_v28 = vpack.c.bf16 %v725_v37, %v722_v49 }
 0x1d9   : > { %638 = vst.msk [vmem:[#allocation2 + $0x18] sm:$0xff] %vm415_vm0, %v634_v23  ;;  %744 = vst.msk [vmem:[#allocation2 + $0x38] sm:$0xff] %vm415_vm0, %v740_v7 }
 0x1da   : > { %637 = vst.msk [vmem:[#allocation2 + $0x10] sm:$0xff] %vm415_vm0, %v633_v18  ;;  %743 = vst.msk [vmem:[#allocation2 + $0x30] sm:$0xff] %vm415_vm0, %v739_v28 }
 0x1dd   : > { %v13603_v60 = vpop.f32.mrb[8].mxu1 }
 0x1de   : > { %v13619_v21 = vpop.f32.mrb[16].mxu0  ;;  %v812_v30 = vpop.f32.mrb[9].mxu1 }
 0x1df   : > { %v918_v10 = vpop.f32.mrb[17].mxu0  ;;  %v13604_v45 = vpop.f32.mrb[10].mxu1 }
 0x1e0   : > { %v13620_v31 = vpop.f32.mrb[18].mxu0  ;;  %v844_v19 = vpack.c.bf16 %v13604_v45, %v13603_v60  ;;  %v815_v57 = vpop.f32.mrb[11].mxu1 }
 0x1e1   : > { %v950_v11 = vpack.c.bf16 %v13620_v31, %v13619_v21  ;;  %v843_v15 = vpack.c.bf16 %v815_v57, %v812_v30  ;;  %v921_v0 = vpop.f32.mrb[19].mxu0 }
 0x1e2   : > { %848 = vst.msk [vmem:[#allocation2 + $0x48] sm:$0xff] %vm415_vm0, %v844_v19  ;;  %v949_v49 = vpack.c.bf16 %v921_v0, %v918_v10  ;;  %v2357_v19 = vld [vmem:[#allocation2] sm:$0xff] }
 0x1e3   : > { %954 = vst.msk [vmem:[#allocation2 + $0x68] sm:$0xff] %vm415_vm0, %v950_v11  ;;  %847 = vst.msk [vmem:[#allocation2 + $0x40] sm:$0xff] %vm415_vm0, %v843_v15 }
 0x1e4   : > { %953 = vst.msk [vmem:[#allocation2 + $0x60] sm:$0xff] %vm415_vm0, %v949_v49 }
 0x1e5   : > { %v13607_v23 = vpop.f32.mrb[12].mxu1 }
 0x1e6   : > { %v13623_v7 = vpop.f32.mrb[20].mxu0  ;;  %v828_v6 = vpop.f32.mrb[13].mxu1 }
 0x1e7   : > { %v934_v37 = vpop.f32.mrb[21].mxu0  ;;  %v13608_v18 = vpop.f32.mrb[14].mxu1 }
 0x1e8   : > { %v13624_v28 = vpop.f32.mrb[22].mxu0  ;;  %v846_v60 = vpack.c.bf16 %v13608_v18, %v13607_v23  ;;  %v831_v45 = vpop.f32.mrb[15].mxu1 }
 0x1e9   : > { %v952_v21 = vpack.c.bf16 %v13624_v28, %v13623_v7  ;;  %v937_v30 = vpop.f32.mrb[23].mxu0  ;;  %v845_v31 = vpack.c.bf16 %v831_v45, %v828_v6  ;;  %v2366_v11 = vld [vmem:[#allocation2 + $0x48] sm:$0xff] }
 0x1ea   : > { %v951_v57 = vpack.c.bf16 %v937_v30, %v934_v37  ;;  %850 = vst.msk [vmem:[#allocation2 + $0x58] sm:$0xff] %vm415_vm0, %v846_v60  ;;  %v2365_v10 = vld [vmem:[#allocation2 + $0x40] sm:$0xff]  ;;  %v2358_v7 = vld [vmem:[#allocation2 + $0x8] sm:$0xff] }
 0x1eb   : > { %956 = vst.msk [vmem:[#allocation2 + $0x78] sm:$0xff] %vm415_vm0, %v952_v21  ;;  %849 = vst.msk [vmem:[#allocation2 + $0x50] sm:$0xff] %vm415_vm0, %v845_v31  ;;  %12831 = vmatprep.subr.bf16.mxu1 %v2365_v10 }
 0x1ec   : > { %955 = vst.msk [vmem:[#allocation2 + $0x70] sm:$0xff] %vm415_vm0, %v951_v57  ;;  %12832 = vmatpush3.bf16.msra.mxu1 %v2357_v19  ;;  %v2359_v57 = vld [vmem:[#allocation2 + $0x10] sm:$0xff] }
 0x1ed   : > { %12833 = vmatprep.subr.bf16.mxu1 %v2366_v11 }
 0x1ee   : > { %v13635_v15 = vpop.f32.mrb[16].mxu1 }
 0x1ef   : > { %v13651_v0 = vpop.f32.mrb[24].mxu0  ;;  %v1024_v49 = vpop.f32.mrb[17].mxu1 }
 0x1f0   : > { %v1130_v23 = vpop.f32.mrb[25].mxu0  ;;  %v13636_v6 = vpop.f32.mrb[18].mxu1  ;;  %12834 = vmatpush3.bf16.msra.mxu1 %v2358_v7 }
 0x1f1   : > { %v13652_v37 = vpop.f32.mrb[26].mxu0  ;;  %v1056_v18 = vpack.c.bf16 %v13636_v6, %v13635_v15  ;;  %v1027_v60 = vpop.f32.mrb[19].mxu1  ;;  %v2368_v10 = vld [vmem:[#allocation2 + $0x58] sm:$0xff] }
 0x1f2   : > { %v1162_v28 = vpack.c.bf16 %v13652_v37, %v13651_v0  ;;  %v1055_v21 = vpack.c.bf16 %v1027_v60, %v1024_v49  ;;  %v1133_v45 = vpop.f32.mrb[27].mxu0  ;;  %v2367_v30 = vld [vmem:[#allocation2 + $0x50] sm:$0xff]  ;;  %v2360_v49 = vld [vmem:[#allocation2 + $0x18] sm:$0xff]  ;;  %v2369_v37 = vld [vmem:[#allocation2 + $0x60] sm:$0xff] }
 0x1f3   : > { %1060 = vst.msk [vmem:[#allocation2 + $0x88] sm:$0xff] %vm415_vm0, %v1056_v18  ;;  %v1161_v31 = vpack.c.bf16 %v1133_v45, %v1130_v23  ;;  %12835 = vmatprep.subr.bf16.mxu1 %v2367_v30  ;;  %v2361_v30 = vld [vmem:[#allocation2 + $0x20] sm:$0xff] }
 0x1f4   : > { %1166 = vst.msk [vmem:[#allocation2 + $0xa8] sm:$0xff] %vm415_vm0, %v1162_v28  ;;  %1059 = vst.msk [vmem:[#allocation2 + $0x80] sm:$0xff] %vm415_vm0, %v1055_v21  ;;  %12836 = vmatpush3.bf16.msra.mxu1 %v2359_v57 }
 0x1f5   : > { %1165 = vst.msk [vmem:[#allocation2 + $0xa0] sm:$0xff] %vm415_vm0, %v1161_v31  ;;  %12837 = vmatprep.subr.bf16.mxu1 %v2368_v10  ;;  %v2370_v31 = vld [vmem:[#allocation2 + $0x68] sm:$0xff] }
 0x1f6   : > { %v13639_v19 = vpop.f32.mrb[20].mxu1 }
 0x1f7   : > { %v13655_v11 = vpop.f32.mrb[28].mxu0  ;;  %v1040_v15 = vpop.f32.mrb[21].mxu1 }
 0x1f8   : > { %v1146_v0 = vpop.f32.mrb[29].mxu0  ;;  %v13640_v7 = vpop.f32.mrb[22].mxu1  ;;  %12838 = vmatpush3.bf16.msra.mxu1 %v2360_v49 }
 0x1f9   : > { %v13656_v6 = vpop.f32.mrb[30].mxu0  ;;  %v1058_v18 = vpack.c.bf16 %v13640_v7, %v13639_v19  ;;  %v1043_v28 = vpop.f32.mrb[23].mxu1  ;;  %12839 = vmatprep.subr.bf16.mxu1 %v2369_v37  ;;  %v2371_v7 = vld [vmem:[#allocation2 + $0x70] sm:$0xff] }
 0x1fa   : > { %v1164_v23 = vpack.c.bf16 %v13656_v6, %v13655_v11  ;;  %v1057_v60 = vpack.c.bf16 %v1043_v28, %v1040_v15  ;;  %v1149_v21 = vpop.f32.mrb[31].mxu0  ;;  %v2362_v11 = vld [vmem:[#allocation2 + $0x28] sm:$0xff] }
 0x1fb   : > { %1062 = vst.msk [vmem:[#allocation2 + $0x98] sm:$0xff] %vm415_vm0, %v1058_v18  ;;  %v1163_v45 = vpack.c.bf16 %v1149_v21, %v1146_v0 }
 0x1fc   : > { %1168 = vst.msk [vmem:[#allocation2 + $0xb8] sm:$0xff] %vm415_vm0, %v1164_v23  ;;  %1061 = vst.msk [vmem:[#allocation2 + $0x90] sm:$0xff] %vm415_vm0, %v1057_v60  ;;  %12840 = vmatpush3.bf16.msra.mxu1 %v2361_v30  ;;  %v2363_v60 = vld [vmem:[#allocation2 + $0x30] sm:$0xff]  ;;  %v2237_v30 = vld [vmem:[%s20788_s4 + $0x40] sm:$0xff] }
 0x1fd   : > { %1167 = vst.msk [vmem:[#allocation2 + $0xb0] sm:$0xff] %vm415_vm0, %v1163_v45  ;;  %12841 = vmatprep.subr.bf16.mxu1 %v2370_v31  ;;  %v2372_v45 = vld [vmem:[#allocation2 + $0x78] sm:$0xff]  ;;  %v2241_v31 = vld [vmem:[%s20788_s4 + $0x60] sm:$0xff] }
 0x1ff   : > { %v13667_v57 = vpop.f32.mrb[24].mxu1 }
 0x200   : > { %v13683_v10 = vpop.f32.mrb[32].mxu0  ;;  %v1236_v19 = vpop.f32.mrb[25].mxu1  ;;  %12842 = vmatpush3.bf16.msra.mxu1 %v2362_v11  ;;  %v2364_v11 = vld [vmem:[#allocation2 + $0x38] sm:$0xff] }
 0x201   : > { %v1342_v49 = vpop.f32.mrb[33].mxu0  ;;  %v13668_v15 = vpop.f32.mrb[26].mxu1  ;;  %12843 = vmatprep.subr.bf16.mxu1 %v2371_v7  ;;  %v11794_v7 = vcombine.high %v2237_v30, %v2241_v31 }
 0x202   : > { %v1268_v6 = vpack.c.bf16 %v13668_v15, %v13667_v57  ;;  %v13684_v37 = vpop.f32.mrb[34].mxu0  ;;  %v1239_v18 = vpop.f32.mrb[27].mxu1 }
 0x203   : > { %v1374_v0 = vpack.c.bf16 %v13684_v37, %v13683_v10  ;;  %v1267_v23 = vpack.c.bf16 %v1239_v18, %v1236_v19  ;;  %v1345_v28 = vpop.f32.mrb[35].mxu0 }
 0x204   : > { %1272 = vst.msk [vmem:[#allocation2 + $0xc8] sm:$0xff] %vm415_vm0, %v1268_v6  ;;  %v1373_v21 = vpack.c.bf16 %v1345_v28, %v1342_v49  ;;  %12844 = vmatpush3.bf16.msra.mxu1 %v2363_v60  ;;  %v20878_v60 = vcombine.low %v15729_v27, %v15734_v22 }
 0x205   : > { %1378 = vst.msk [vmem:[#allocation2 + $0xe8] sm:$0xff] %vm415_vm0, %v1374_v0  ;;  %1271 = vst.msk [vmem:[#allocation2 + $0xc0] sm:$0xff] %vm415_vm0, %v1267_v23  ;;  %12845 = vmatprep.subr.bf16.mxu1 %v2372_v45 }
 0x206   : > { %1377 = vst.msk [vmem:[#allocation2 + $0xe0] sm:$0xff] %vm415_vm0, %v1373_v21 }
 0x207   : > { %v13671_v57 = vpop.f32.mrb[28].mxu1 }
 0x208   : > { %v13687_v10 = vpop.f32.mrb[36].mxu0  ;;  %v1252_v19 = vpop.f32.mrb[29].mxu1  ;;  %12846 = vmatpush3.bf16.msra.mxu1 %v2364_v11  ;;  %v11793_v11 = vcombine.low %v2237_v30, %v2241_v31  ;;  %v2375_v30 = vld [vmem:[#allocation2 + $0x90] sm:$0xff]  ;;  %v2253_v31 = vld [vmem:[%s20788_s4 + $0xc0] sm:$0xff] }
 0x209   : > { %v1358_v49 = vpop.f32.mrb[37].mxu0  ;;  %v13672_v15 = vpop.f32.mrb[30].mxu1 }
 0x20a   : > { %v1270_v6 = vpack.c.bf16 %v13672_v15, %v13671_v57  ;;  %v13688_v37 = vpop.f32.mrb[38].mxu0  ;;  %v1255_v18 = vpop.f32.mrb[31].mxu1  ;;  %v2373_v57 = vld [vmem:[#allocation2 + $0x80] sm:$0xff] }
 0x20b   : > { %v1376_v0 = vpack.c.bf16 %v13688_v37, %v13687_v10  ;;  %v1269_v23 = vpack.c.bf16 %v1255_v18, %v1252_v19  ;;  %v1361_v28 = vpop.f32.mrb[39].mxu0  ;;  %3286 = vmatmul.mubr.bf16.vlgmr.msra.gmra.mrb[64].mxu1 %v20878_v60  ;;  %v2245_v10 = vld [vmem:[%s20788_s4 + $0x80] sm:$0xff]  ;;  %v2382_v27 = vld [vmem:[#allocation2 + $0xc8] sm:$0xff] }
 0x20c   : > { %1274 = vst.msk [vmem:[#allocation2 + $0xd8] sm:$0xff] %vm415_vm0, %v1270_v6  ;;  %v1375_v21 = vpack.c.bf16 %v1361_v28, %v1358_v49  ;;  %v2381_v45 = vld [vmem:[#allocation2 + $0xc0] sm:$0xff]  ;;  %3293 = vmatprep.mubr.bf16.mxu1 %v11794_v7  ;;  %v2374_v37 = vld [vmem:[#allocation2 + $0x88] sm:$0xff] }
 0x20d   : > { %1380 = vst.msk [vmem:[#allocation2 + $0xf8] sm:$0xff] %vm415_vm0, %v1376_v0  ;;  %1273 = vst.msk [vmem:[#allocation2 + $0xd0] sm:$0xff] %vm415_vm0, %v1269_v23  ;;  %12943 = vmatprep.subr.bf16.mxu0 %v2381_v45  ;;  %v2249_v19 = vld [vmem:[%s20788_s4 + $0xa0] sm:$0xff] }
 0x20e   : > { %1379 = vst.msk [vmem:[#allocation2 + $0xf0] sm:$0xff] %vm415_vm0, %v1375_v21  ;;  %12944 = vmatpush3.bf16.msra.mxu0 %v2373_v57  ;;  %v11802_v7 = vcombine.high %v2245_v10, %v2249_v19 }
 0x20f   : > { %12945 = vmatprep.subr.bf16.mxu0 %v2382_v27  ;;  %v2257_v27 = vld [vmem:[%s20788_s4 + $0xe0] sm:$0xff] }
 0x210   : > { %v13699_v22 = vpop.f32.mrb[32].mxu1 }
 0x211   : > { %v13715_v49 = vpop.f32.mrb[40].mxu0  ;;  %v1448_v15 = vpop.f32.mrb[33].mxu1 }
 0x212   : > { %v1554_v6 = vpop.f32.mrb[41].mxu0  ;;  %v13700_v0 = vpop.f32.mrb[34].mxu1  ;;  %12946 = vmatpush3.bf16.msra.mxu0 %v2374_v37  ;;  %v2376_v37 = vld [vmem:[#allocation2 + $0x98] sm:$0xff] }
 0x213   : > { %v1480_v18 = vpack.c.bf16 %v13700_v0, %v13699_v22  ;;  %v13716_v23 = vpop.f32.mrb[42].mxu0  ;;  %v1451_v28 = vpop.f32.mrb[35].mxu1  ;;  %3294 = vmatmul.mubr.bf16.gmra.mrb[68].mxu1 %v11793_v11  ;;  %v2384_v22 = vld [vmem:[#allocation2 + $0xd8] sm:$0xff] }
 0x214   : > { %v1586_v60 = vpack.c.bf16 %v13716_v23, %v13715_v49  ;;  %v1479_v45 = vpack.c.bf16 %v1451_v28, %v1448_v15  ;;  %v1557_v4 = vpop.f32.mrb[43].mxu0  ;;  %v2383_v21 = vld [vmem:[#allocation2 + $0xd0] sm:$0xff]  ;;  %3301 = vmatprep.mubr.bf16.mxu1 %v11802_v7  ;;  %v11810_v7 = vcombine.high %v2253_v31, %v2257_v27 }
 0x215   : > { %1484 = vst.msk [vmem:[#allocation2 + $0x108] sm:$0xff] %vm415_vm0, %v1480_v18  ;;  %v1585_v57 = vpack.c.bf16 %v1557_v4, %v1554_v6  ;;  %12947 = vmatprep.subr.bf16.mxu0 %v2383_v21  ;;  %v11801_v4 = vcombine.low %v2245_v10, %v2249_v19  ;;  %v2385_v18 = vld [vmem:[#allocation2 + $0xe0] sm:$0xff] }
 0x216   : > { %1590 = vst.msk [vmem:[#allocation2 + $0x128] sm:$0xff] %vm415_vm0, %v1586_v60  ;;  %1483 = vst.msk [vmem:[#allocation2 + $0x100] sm:$0xff] %vm415_vm0, %v1479_v45  ;;  %12948 = vmatpush3.bf16.msra.mxu0 %v2375_v30  ;;  %v2377_v19 = vld [vmem:[#allocation2 + $0xa0] sm:$0xff] }
 0x217   : > { %1589 = vst.msk [vmem:[#allocation2 + $0x120] sm:$0xff] %vm415_vm0, %v1585_v57  ;;  %12949 = vmatprep.subr.bf16.mxu0 %v2384_v22  ;;  %v2261_v57 = vld [vmem:[%s20788_s4 + $0x100] sm:$0xff] }
 0x218   : > { %v13703_v11 = vpop.f32.mrb[36].mxu1  ;;  %v2265_v22 = vld [vmem:[%s20788_s4 + $0x120] sm:$0xff] }
 0x219   : > { %v13719_v49 = vpop.f32.mrb[44].mxu0  ;;  %v1464_v15 = vpop.f32.mrb[37].mxu1 }
 0x21a   : > { %v1570_v6 = vpop.f32.mrb[45].mxu0  ;;  %v13704_v0 = vpop.f32.mrb[38].mxu1  ;;  %12950 = vmatpush3.bf16.msra.mxu0 %v2376_v37 }
 0x21b   : > { %v1482_v23 = vpack.c.bf16 %v13704_v0, %v13703_v11  ;;  %v13720_v28 = vpop.f32.mrb[46].mxu0  ;;  %v1467_v60 = vpop.f32.mrb[39].mxu1  ;;  %12951 = vmatprep.subr.bf16.mxu0 %v2385_v18  ;;  %3302 = vmatmul.mubr.bf16.gmra.mrb[72].mxu1 %v11801_v4  ;;  %v2386_v11 = vld [vmem:[#allocation2 + $0xe8] sm:$0xff]  ;;  %v11809_v4 = vcombine.low %v2253_v31, %v2257_v27  ;;  %v2387_v0 = vld [vmem:[#allocation2 + $0xf0] sm:$0xff]  ;;  %v2269_v31 = vld [vmem:[%s20788_s4 + $0x140] sm:$0xff] }
 0x21c   : > { %v1588_v45 = vpack.c.bf16 %v13720_v28, %v13719_v49  ;;  %v1481_v21 = vpack.c.bf16 %v1467_v60, %v1464_v15  ;;  %v1573_v30 = vpop.f32.mrb[47].mxu0  ;;  %3309 = vmatprep.mubr.bf16.mxu1 %v11810_v7  ;;  %v11818_v15 = vcombine.high %v2261_v57, %v2265_v22  ;;  %v2273_v27 = vld [vmem:[%s20788_s4 + $0x160] sm:$0xff] }
 0x21d   : > { %1486 = vst.msk [vmem:[#allocation2 + $0x118] sm:$0xff] %vm415_vm0, %v1482_v23  ;;  %v1587_v10 = vpack.c.bf16 %v1573_v30, %v1570_v6  ;;  %v2378_v6 = vld [vmem:[#allocation2 + $0xa8] sm:$0xff] }
 0x21e   : > { %1592 = vst.msk [vmem:[#allocation2 + $0x138] sm:$0xff] %vm415_vm0, %v1588_v45  ;;  %1485 = vst.msk [vmem:[#allocation2 + $0x110] sm:$0xff] %vm415_vm0, %v1481_v21  ;;  %12952 = vmatpush3.bf16.msra.mxu0 %v2377_v19  ;;  %v2379_v19 = vld [vmem:[#allocation2 + $0xb0] sm:$0xff] }
 0x21f   : > { %1591 = vst.msk [vmem:[#allocation2 + $0x130] sm:$0xff] %vm415_vm0, %v1587_v10  ;;  %12953 = vmatprep.subr.bf16.mxu0 %v2386_v11 }
 0x221   : > { %v13731_v49 = vpop.f32.mrb[40].mxu1 }
 0x222   : > { %v13747_v7 = vpop.f32.mrb[48].mxu0  ;;  %v1660_v37 = vpop.f32.mrb[41].mxu1  ;;  %12954 = vmatpush3.bf16.msra.mxu0 %v2378_v6 }
 0x223   : > { %v1766_v18 = vpop.f32.mrb[49].mxu0  ;;  %v13732_v23 = vpop.f32.mrb[42].mxu1  ;;  %12955 = vmatprep.subr.bf16.mxu0 %v2387_v0  ;;  %3310 = vmatmul.mubr.bf16.gmra.mrb[76].mxu1 %v11809_v4  ;;  %v2388_v4 = vld [vmem:[#allocation2 + $0xf8] sm:$0xff] }
 0x224   : > { %v1692_v28 = vpack.c.bf16 %v13732_v23, %v13731_v49  ;;  %v13748_v60 = vpop.f32.mrb[50].mxu0  ;;  %v1663_v45 = vpop.f32.mrb[43].mxu1  ;;  %3317 = vmatprep.mubr.bf16.mxu1 %v11818_v15  ;;  %v11817_v49 = vcombine.low %v2261_v57, %v2265_v22  ;;  %v2238_v15 = vld [vmem:[%s20788_s4 + $0x48] sm:$0xff] }
 0x225   : > { %v1798_v21 = vpack.c.bf16 %v13748_v60, %v13747_v7  ;;  %v1691_v30 = vpack.c.bf16 %v1663_v45, %v1660_v37  ;;  %v1769_v10 = vpop.f32.mrb[51].mxu0  ;;  %v2242_v7 = vld [vmem:[%s20788_s4 + $0x68] sm:$0xff]  ;;  %v11826_v37 = vcombine.high %v2269_v31, %v2273_v27 }
 0x226   : > { %1696 = vst.msk [vmem:[#allocation2 + $0x148] sm:$0xff] %vm415_vm0, %v1692_v28  ;;  %v1797_v11 = vpack.c.bf16 %v1769_v10, %v1766_v18  ;;  %12956 = vmatpush3.bf16.msra.mxu0 %v2379_v19  ;;  %v2380_v18 = vld [vmem:[#allocation2 + $0xb8] sm:$0xff]  ;;  %v11796_v28 = vcombine.high %v2238_v15, %v2242_v7 }
 0x227   : > { %1802 = vst.msk [vmem:[#allocation2 + $0x168] sm:$0xff] %vm415_vm0, %v1798_v21  ;;  %1695 = vst.msk [vmem:[#allocation2 + $0x140] sm:$0xff] %vm415_vm0, %v1691_v30  ;;  %12957 = vmatprep.subr.bf16.mxu0 %v2388_v4  ;;  %v2277_v4 = vld [vmem:[%s20788_s4 + $0x180] sm:$0xff] }
 0x228   : > { %1801 = vst.msk [vmem:[#allocation2 + $0x160] sm:$0xff] %vm415_vm0, %v1797_v11  ;;  %v20879_v11 = vcombine.low %v15811_v29, %v15821_v1  ;;  %v2389_v29 = vld [vmem:[#allocation2 + $0x100] sm:$0xff]  ;;  %v11825_v1 = vcombine.low %v2269_v31, %v2273_v27  ;;  %v2390_v27 = vld [vmem:[#allocation2 + $0x108] sm:$0xff] }
 0x229   : > { %v13735_v6 = vpop.f32.mrb[44].mxu1 }
 0x22a   : > { %v13751_v0 = vpop.f32.mrb[52].mxu0  ;;  %v1676_v23 = vpop.f32.mrb[45].mxu1  ;;  %12958 = vmatpush3.bf16.msra.mxu0 %v2380_v18  ;;  %v2281_v18 = vld [vmem:[%s20788_s4 + $0x1a0] sm:$0xff] }
 0x22b   : > { %v1782_v60 = vpop.f32.mrb[53].mxu0  ;;  %v13736_v45 = vpop.f32.mrb[46].mxu1  ;;  %3318 = vmatmul.mubr.bf16.gmra.mrb[80].mxu1 %v11817_v49 }
 0x22c   : > { %v1694_v57 = vpack.c.bf16 %v13736_v45, %v13735_v6  ;;  %v13752_v22 = vpop.f32.mrb[54].mxu0  ;;  %v1679_v21 = vpop.f32.mrb[47].mxu1  ;;  %3325 = vmatprep.mubr.bf16.mxu1 %v11826_v37  ;;  %v2246_v37 = vld [vmem:[%s20788_s4 + $0x88] sm:$0xff]  ;;  %v11795_v45 = vcombine.low %v2238_v15, %v2242_v7  ;;  %v2289_v15 = vld [vmem:[%s20788_s4 + $0x1e0] sm:$0xff] }
 0x22d   : > { %v1800_v30 = vpack.c.bf16 %v13752_v22, %v13751_v0  ;;  %v1693_v10 = vpack.c.bf16 %v1679_v21, %v1676_v23  ;;  %v1785_v19 = vpop.f32.mrb[55].mxu0  ;;  %3447 = vmatmul.mubr.bf16.vlgmr.msra.gmra.mrb[72].mxu0 %v20879_v11  ;;  %v2250_v0 = vld [vmem:[%s20788_s4 + $0xa8] sm:$0xff] }
 0x22e   : > { %1698 = vst.msk [vmem:[#allocation2 + $0x158] sm:$0xff] %vm415_vm0, %v1694_v57  ;;  %v1799_v49 = vpack.c.bf16 %v1785_v19, %v1782_v60  ;;  %v2397_v6 = vld [vmem:[#allocation2 + $0x140] sm:$0xff]  ;;  %3454 = vmatprep.mubr.bf16.mxu0 %v11796_v28  ;;  %v2398_v23 = vld [vmem:[#allocation2 + $0x148] sm:$0xff]  ;;  %v11834_v28 = vcombine.high %v2277_v4, %v2281_v18  ;;  %v11804_v22 = vcombine.high %v2246_v37, %v2250_v0 }
 0x22f   : > { %1804 = vst.msk [vmem:[#allocation2 + $0x178] sm:$0xff] %vm415_vm0, %v1800_v30  ;;  %1697 = vst.msk [vmem:[#allocation2 + $0x150] sm:$0xff] %vm415_vm0, %v1693_v10  ;;  %13055 = vmatprep.subr.bf16.mxu1 %v2397_v6 }
 0x230   : > { %1803 = vst.msk [vmem:[#allocation2 + $0x170] sm:$0xff] %vm415_vm0, %v1799_v49  ;;  %13056 = vmatpush3.bf16.msra.mxu1 %v2389_v29  ;;  %v2285_v49 = vld [vmem:[%s20788_s4 + $0x1c0] sm:$0xff] }
 0x231   : > { %13057 = vmatprep.subr.bf16.mxu1 %v2398_v23 }
 0x232   : > { %v13763_v60 = vpop.f32.mrb[48].mxu1 }
 0x233   : > { %v13779_v57 = vpop.f32.mrb[56].mxu0  ;;  %v1872_v21 = vpop.f32.mrb[49].mxu1  ;;  %3326 = vmatmul.mubr.bf16.gmra.mrb[84].mxu1 %v11825_v1 }
 0x234   : > { %v1978_v31 = vpop.f32.mrb[57].mxu0  ;;  %v13764_v30 = vpop.f32.mrb[50].mxu1  ;;  %13058 = vmatpush3.bf16.msra.mxu1 %v2390_v27  ;;  %3333 = vmatprep.mubr.bf16.mxu1 %v11834_v28  ;;  %v2391_v28 = vld [vmem:[#allocation2 + $0x110] sm:$0xff] }
 0x235   : > { %v13780_v10 = vpop.f32.mrb[58].mxu0  ;;  %v1904_v19 = vpack.c.bf16 %v13764_v30, %v13763_v60  ;;  %v1875_v6 = vpop.f32.mrb[51].mxu1  ;;  %3455 = vmatmul.mubr.bf16.gmra.mrb[76].mxu0 %v11795_v45  ;;  %v11833_v60 = vcombine.low %v2277_v4, %v2281_v18  ;;  %v2254_v45 = vld [vmem:[%s20788_s4 + $0xc8] sm:$0xff] }
 0x236   : > { %v2010_v11 = vpack.c.bf16 %v13780_v10, %v13779_v57  ;;  %v1903_v7 = vpack.c.bf16 %v1875_v6, %v1872_v21  ;;  %v1981_v29 = vpop.f32.mrb[59].mxu0  ;;  %v2399_v23 = vld [vmem:[#allocation2 + $0x150] sm:$0xff]  ;;  %3462 = vmatprep.mubr.bf16.mxu0 %v11804_v22  ;;  %v2258_v57 = vld [vmem:[%s20788_s4 + $0xe8] sm:$0xff]  ;;  %v2400_v22 = vld [vmem:[#allocation2 + $0x158] sm:$0xff]  ;;  %v11842_v21 = vcombine.high %v2285_v49, %v2289_v15 }
 0x237   : > { %1908 = vst.msk [vmem:[#allocation2 + $0x188] sm:$0xff] %vm415_vm0, %v1904_v19  ;;  %v2009_v1 = vpack.c.bf16 %v1981_v29, %v1978_v31  ;;  %13059 = vmatprep.subr.bf16.mxu1 %v2399_v23  ;;  %v11803_v31 = vcombine.low %v2246_v37, %v2250_v0  ;;  %v11812_v4 = vcombine.high %v2254_v45, %v2258_v57  ;;  %v2392_v19 = vld [vmem:[#allocation2 + $0x118] sm:$0xff]  ;;  %v2401_v29 = vld [vmem:[#allocation2 + $0x160] sm:$0xff] }
 0x238   : > { %2014 = vst.msk [vmem:[#allocation2 + $0x1a8] sm:$0xff] %vm415_vm0, %v2010_v11  ;;  %1907 = vst.msk [vmem:[#allocation2 + $0x180] sm:$0xff] %vm415_vm0, %v1903_v7  ;;  %13060 = vmatpush3.bf16.msra.mxu1 %v2391_v28  ;;  %v2293_v37 = vld [vmem:[%s20788_s4 + $0x200] sm:$0xff] }
 0x239   : > { %2013 = vst.msk [vmem:[#allocation2 + $0x1a0] sm:$0xff] %vm415_vm0, %v2009_v1  ;;  %13061 = vmatprep.subr.bf16.mxu1 %v2400_v22  ;;  %v2297_v0 = vld [vmem:[%s20788_s4 + $0x220] sm:$0xff] }
 0x23a   : > { %v13767_v27 = vpop.f32.mrb[52].mxu1 }
 0x23b   : > { %v13783_v30 = vpop.f32.mrb[60].mxu0  ;;  %v1888_v18 = vpop.f32.mrb[53].mxu1  ;;  %3334 = vmatmul.mubr.bf16.gmra.mrb[88].mxu1 %v11833_v60 }
 0x23c   : > { %v1994_v10 = vpop.f32.mrb[61].mxu0  ;;  %v13768_v11 = vpop.f32.mrb[54].mxu1  ;;  %13062 = vmatpush3.bf16.msra.mxu1 %v2392_v19  ;;  %3341 = vmatprep.mubr.bf16.mxu1 %v11842_v21  ;;  %v2393_v21 = vld [vmem:[#allocation2 + $0x120] sm:$0xff]  ;;  %v11811_v19 = vcombine.low %v2254_v45, %v2258_v57 }
 0x23d   : > { %v13784_v6 = vpop.f32.mrb[62].mxu0  ;;  %v1906_v7 = vpack.c.bf16 %v13768_v11, %v13767_v27  ;;  %v1891_v28 = vpop.f32.mrb[55].mxu1  ;;  %13063 = vmatprep.subr.bf16.mxu1 %v2401_v29  ;;  %3463 = vmatmul.mubr.bf16.gmra.mrb[80].mxu0 %v11803_v31  ;;  %v11841_v27 = vcombine.low %v2285_v49, %v2289_v15  ;;  %v2262_v31 = vld [vmem:[%s20788_s4 + $0x108] sm:$0xff]  ;;  %v2301_v45 = vld [vmem:[%s20788_s4 + $0x240] sm:$0xff] }
 0x23e   : > { %v2012_v23 = vpack.c.bf16 %v13784_v6, %v13783_v30  ;;  %v1905_v1 = vpack.c.bf16 %v1891_v28, %v1888_v18  ;;  %v1997_v60 = vpop.f32.mrb[63].mxu0  ;;  %3470 = vmatprep.mubr.bf16.mxu0 %v11812_v4  ;;  %v2266_v30 = vld [vmem:[%s20788_s4 + $0x128] sm:$0xff]  ;;  %v11850_v4 = vcombine.high %v2293_v37, %v2297_v0  ;;  %v2305_v57 = vld [vmem:[%s20788_s4 + $0x260] sm:$0xff] }
 0x23f   : > { %1910 = vst.msk [vmem:[#allocation2 + $0x198] sm:$0xff] %vm415_vm0, %v1906_v7  ;;  %v2011_v22 = vpack.c.bf16 %v1997_v60, %v1994_v10  ;;  %v2402_v18 = vld [vmem:[#allocation2 + $0x168] sm:$0xff]  ;;  %v11820_v11 = vcombine.high %v2262_v31, %v2266_v30 }
 0x240   : > { %2016 = vst.msk [vmem:[#allocation2 + $0x1b8] sm:$0xff] %vm415_vm0, %v2012_v23  ;;  %1909 = vst.msk [vmem:[#allocation2 + $0x190] sm:$0xff] %vm415_vm0, %v1905_v1  ;;  %13064 = vmatpush3.bf16.msra.mxu1 %v2393_v21  ;;  %v2394_v6 = vld [vmem:[#allocation2 + $0x128] sm:$0xff]  ;;  %v2403_v23 = vld [vmem:[#allocation2 + $0x170] sm:$0xff] }
 0x241   : > { %2015 = vst.msk [vmem:[#allocation2 + $0x1b0] sm:$0xff] %vm415_vm0, %v2011_v22  ;;  %13065 = vmatprep.subr.bf16.mxu1 %v2402_v18 }
 0x243   : > { %v13795_v10 = vpop.f32.mrb[56].mxu1  ;;  %3342 = vmatmul.mubr.bf16.gmra.mrb[92].mxu1 %v11841_v27 }
 0x244   : > { %v13811_v49 = vpop.f32.mrb[64].mxu0  ;;  %v2084_v15 = vpop.f32.mrb[57].mxu1  ;;  %13066 = vmatpush3.bf16.msra.mxu1 %v2394_v6  ;;  %3349 = vmatprep.mubr.bf16.mxu1 %v11850_v4  ;;  %v2395_v4 = vld [vmem:[#allocation2 + $0x130] sm:$0xff]  ;;  %v2274_v6 = vld [vmem:[%s20788_s4 + $0x168] sm:$0xff] }
 0x245   : > { %v2190_v29 = vpop.f32.mrb[65].mxu0  ;;  %v13796_v7 = vpop.f32.mrb[58].mxu1  ;;  %13067 = vmatprep.subr.bf16.mxu1 %v2403_v23  ;;  %3471 = vmatmul.mubr.bf16.gmra.mrb[84].mxu0 %v11811_v19  ;;  %v2270_v19 = vld [vmem:[%s20788_s4 + $0x148] sm:$0xff]  ;;  %v2396_v23 = vld [vmem:[#allocation2 + $0x138] sm:$0xff] }
 0x246   : > { %v2116_v28 = vpack.c.bf16 %v13796_v7, %v13795_v10  ;;  %v13812_v1 = vpop.f32.mrb[66].mxu0  ;;  %v2087_v60 = vpop.f32.mrb[59].mxu1  ;;  %3478 = vmatprep.mubr.bf16.mxu0 %v11820_v11  ;;  %v11849_v10 = vcombine.low %v2293_v37, %v2297_v0  ;;  %v11858_v11 = vcombine.high %v2301_v45, %v2305_v57  ;;  %v11828_v0 = vcombine.high %v2270_v19, %v2274_v6 }
 0x247   : > { %v2222_v22 = vpack.c.bf16 %v13812_v1, %v13811_v49  ;;  %v2115_v21 = vpack.c.bf16 %v2087_v60, %v2084_v15  ;;  %v2193_v27 = vpop.f32.mrb[67].mxu0  ;;  %v2404_v49 = vld [vmem:[#allocation2 + $0x178] sm:$0xff]  ;;  %v11819_v15 = vcombine.low %v2262_v31, %v2266_v30  ;;  %v2313_v31 = vld [vmem:[%s20788_s4 + $0x2a0] sm:$0xff] }
 0x248   : > { %2120 = vst.msk [vmem:[#allocation2 + $0x1c8] sm:$0xff] %vm415_vm0, %v2116_v28  ;;  %v2221_v18 = vpack.c.bf16 %v2193_v27, %v2190_v29  ;;  %13068 = vmatpush3.bf16.msra.mxu1 %v2395_v4  ;;  %v2309_v27 = vld [vmem:[%s20788_s4 + $0x280] sm:$0xff] }
 0x249   : > { %2226 = vst.msk [vmem:[#allocation2 + $0x1e8] sm:$0xff] %vm415_vm0, %v2222_v22  ;;  %2119 = vst.msk [vmem:[#allocation2 + $0x1c0] sm:$0xff] %vm415_vm0, %v2115_v21  ;;  %13069 = vmatprep.subr.bf16.mxu1 %v2404_v49 }
 0x24a   : > { %2225 = vst.msk [vmem:[#allocation2 + $0x1e0] sm:$0xff] %vm415_vm0, %v2221_v18 }
 0x24b   : > { %v13799_v37 = vpop.f32.mrb[60].mxu1  ;;  %3350 = vmatmul.mubr.bf16.gmra.mrb[96].mxu1 %v11849_v10 }
 0x24c   : > { %v13815_v29 = vpop.f32.mrb[68].mxu0  ;;  %v2100_v7 = vpop.f32.mrb[61].mxu1  ;;  %13070 = vmatpush3.bf16.msra.mxu1 %v2396_v23  ;;  %3357 = vmatprep.mubr.bf16.mxu1 %v11858_v11  ;;  %v11857_v11 = vcombine.low %v2301_v45, %v2305_v57  ;;  %v2278_v23 = vld [vmem:[%s20788_s4 + $0x188] sm:$0xff]  ;;  %v11827_v45 = vcombine.low %v2270_v19, %v2274_v6 }
 0x24d   : > { %v2206_v28 = vpop.f32.mrb[69].mxu0  ;;  %v13800_v1 = vpop.f32.mrb[62].mxu1  ;;  %3479 = vmatmul.mubr.bf16.gmra.mrb[88].mxu0 %v11819_v15  ;;  %v2405_v15 = vld [vmem:[#allocation2 + $0x180] sm:$0xff]  ;;  %v2286_v6 = vld [vmem:[%s20788_s4 + $0x1c8] sm:$0xff] }
 0x24e   : > { %v2118_v60 = vpack.c.bf16 %v13800_v1, %v13799_v37  ;;  %v13816_v22 = vpop.f32.mrb[70].mxu0  ;;  %v2103_v21 = vpop.f32.mrb[63].mxu1  ;;  %3486 = vmatprep.mubr.bf16.mxu0 %v11828_v0  ;;  %v11866_v37 = vcombine.high %v2309_v27, %v2313_v31  ;;  %v2282_v0 = vld [vmem:[%s20788_s4 + $0x1a8] sm:$0xff]  ;;  %v2321_v1 = vld [vmem:[%s20788_s4 + $0x2e0] sm:$0xff] }
 0x24f   : > { %v2224_v30 = vpack.c.bf16 %v13816_v22, %v13815_v29  ;;  %v2117_v18 = vpack.c.bf16 %v2103_v21, %v2100_v7  ;;  %v2209_v4 = vpop.f32.mrb[71].mxu0  ;;  %v2414_v29 = vld [vmem:[#allocation2 + $0x1c8] sm:$0xff]  ;;  %v11836_v57 = vcombine.high %v2278_v23, %v2282_v0  ;;  %v11865_v22 = vcombine.low %v2309_v27, %v2313_v31  ;;  %v2407_v21 = vld [vmem:[#allocation2 + $0x190] sm:$0xff]  ;;  %v2325_v31 = vld [vmem:[%s20788_s4 + $0x300] sm:$0xff] }
 0x250   : > { %2122 = vst.msk [vmem:[#allocation2 + $0x1d8] sm:$0xff] %vm415_vm0, %v2118_v60  ;;  %v2223_v10 = vpack.c.bf16 %v2209_v4, %v2206_v28  ;;  %v2413_v49 = vld [vmem:[#allocation2 + $0x1c0] sm:$0xff]  ;;  %v2406_v7 = vld [vmem:[#allocation2 + $0x188] sm:$0xff]  ;;  %v11835_v4 = vcombine.low %v2278_v23, %v2282_v0 }
 0x251   : > { %2228 = vst.msk [vmem:[#allocation2 + $0x1f8] sm:$0xff] %vm415_vm0, %v2224_v30  ;;  %2121 = vst.msk [vmem:[#allocation2 + $0x1d0] sm:$0xff] %vm415_vm0, %v2117_v18  ;;  %13167 = vmatprep.subr.bf16.mxu0 %v2413_v49  ;;  %v2317_v28 = vld [vmem:[%s20788_s4 + $0x2c0] sm:$0xff]  ;;  %v2290_v30 = vld [vmem:[%s20788_s4 + $0x1e8] sm:$0xff] }
 0x252   : > { %2227 = vst.msk [vmem:[#allocation2 + $0x1f0] sm:$0xff] %vm415_vm0, %v2223_v10  ;;  %13168 = vmatpush3.bf16.msra.mxu0 %v2405_v15  ;;  %v11874_v19 = vcombine.high %v2317_v28, %v2321_v1  ;;  %v11844_v10 = vcombine.high %v2286_v6, %v2290_v30  ;;  %v2408_v49 = vld [vmem:[#allocation2 + $0x198] sm:$0xff]  ;;  %v2417_v27 = vld [vmem:[#allocation2 + $0x1e0] sm:$0xff]  ;;  %v11873_v15 = vcombine.low %v2317_v28, %v2321_v1  ;;  %v2294_v0 = vld [vmem:[%s20788_s4 + $0x208] sm:$0xff] }
 0x253   : > { %13169 = vmatprep.subr.bf16.mxu0 %v2414_v29  ;;  %3358 = vmatmul.mubr.bf16.gmra.mrb[100].mxu1 %v11857_v11  ;;  %v2329_v11 = vld [vmem:[%s20788_s4 + $0x320] sm:$0xff]  ;;  %v2298_v29 = vld [vmem:[%s20788_s4 + $0x228] sm:$0xff] }
 0x254   : > { %3365 = vmatprep.mubr.bf16.mxu1 %v11866_v37  ;;  %v2409_v37 = vld [vmem:[#allocation2 + $0x1a0] sm:$0xff]  ;;  %v11882_v23 = vcombine.high %v2325_v31, %v2329_v11 }
 0x255   : > { %3487 = vmatmul.mubr.bf16.gmra.mrb[92].mxu0 %v11827_v45  ;;  %v2418_v45 = vld [vmem:[#allocation2 + $0x1e8] sm:$0xff]  ;;  %v2333_v1 = vld [vmem:[%s20788_s4 + $0x340] sm:$0xff] }
 0x256   : > { %13170 = vmatpush3.bf16.msra.mxu0 %v2406_v7  ;;  %3494 = vmatprep.mubr.bf16.mxu0 %v11836_v57  ;;  %v11843_v57 = vcombine.low %v2286_v6, %v2290_v30  ;;  %v11852_v7 = vcombine.high %v2294_v0, %v2298_v29  ;;  %v2302_v30 = vld [vmem:[%s20788_s4 + $0x248] sm:$0xff] }
 0x257   : > { %v2416_v18 = vld [vmem:[#allocation2 + $0x1d8] sm:$0xff] }
 0x258   : > { %v2415_v60 = vld [vmem:[#allocation2 + $0x1d0] sm:$0xff] }
 0x259   : > { %13171 = vmatprep.subr.bf16.mxu0 %v2415_v60  ;;  %v2410_v60 = vld [vmem:[#allocation2 + $0x1a8] sm:$0xff]  ;;  %v2419_v28 = vld [vmem:[#allocation2 + $0x1f0] sm:$0xff] }
 0x25a   : > { %13172 = vmatpush3.bf16.msra.mxu0 %v2407_v21  ;;  %v11881_v21 = vcombine.low %v2325_v31, %v2329_v11  ;;  %v2341_v31 = vld [vmem:[%s20788_s4 + $0x380] sm:$0xff] }
 0x25b   : > { %13173 = vmatprep.subr.bf16.mxu0 %v2416_v18  ;;  %3366 = vmatmul.mubr.bf16.gmra.mrb[104].mxu1 %v11865_v22  ;;  %v2337_v22 = vld [vmem:[%s20788_s4 + $0x360] sm:$0xff]  ;;  %v2306_v18 = vld [vmem:[%s20788_s4 + $0x268] sm:$0xff] }
 0x25c   : > { %3373 = vmatprep.mubr.bf16.mxu1 %v11874_v19  ;;  %v2411_v19 = vld [vmem:[#allocation2 + $0x1b0] sm:$0xff]  ;;  %v11890_v6 = vcombine.high %v2333_v1, %v2337_v22  ;;  %v2345_v11 = vld [vmem:[%s20788_s4 + $0x3a0] sm:$0xff] }
 0x25d   : > { %3495 = vmatmul.mubr.bf16.gmra.mrb[96].mxu0 %v11835_v4  ;;  %v2420_v4 = vld [vmem:[#allocation2 + $0x1f8] sm:$0xff] }
 0x25e   : > { %13174 = vmatpush3.bf16.msra.mxu0 %v2408_v49  ;;  %3502 = vmatprep.mubr.bf16.mxu0 %v11844_v10  ;;  %v11851_v10 = vcombine.low %v2294_v0, %v2298_v29  ;;  %v11860_v49 = vcombine.high %v2302_v30, %v2306_v18  ;;  %v2314_v0 = vld [vmem:[%s20788_s4 + $0x2a8] sm:$0xff]  ;;  %v11859_v29 = vcombine.low %v2302_v30, %v2306_v18  ;;  %v2235_v30 = vld [vmem:[%s20788_s4 + $0x30] sm:$0xff] }
 0x25f   : > { %13175 = vmatprep.subr.bf16.mxu0 %v2417_v27  ;;  %v2412_v27 = vld [vmem:[#allocation2 + $0x1b8] sm:$0xff] }
 0x262   : > { %13176 = vmatpush3.bf16.msra.mxu0 %v2409_v37  ;;  %v11898_v37 = vcombine.high %v2341_v31, %v2345_v11 }
 0x263   : > { %13177 = vmatprep.subr.bf16.mxu0 %v2418_v45  ;;  %3374 = vmatmul.mubr.bf16.gmra.mrb[108].mxu1 %v11873_v15  ;;  %v11889_v15 = vcombine.low %v2333_v1, %v2337_v22  ;;  %v2318_v1 = vld [vmem:[%s20788_s4 + $0x2c8] sm:$0xff] }
 0x264   : > { %3381 = vmatprep.mubr.bf16.mxu1 %v11882_v23  ;;  %v2310_v23 = vld [vmem:[%s20788_s4 + $0x288] sm:$0xff] }
 0x265   : > { %3503 = vmatmul.mubr.bf16.gmra.mrb[100].mxu0 %v11843_v57  ;;  %v11868_v45 = vcombine.high %v2310_v23, %v2314_v0  ;;  %v2349_v57 = vld [vmem:[%s20788_s4 + $0x3c0] sm:$0xff]  ;;  %v2322_v22 = vld [vmem:[%s20788_s4 + $0x2e8] sm:$0xff] }
 0x266   : > { %13178 = vmatpush3.bf16.msra.mxu0 %v2410_v60  ;;  %3510 = vmatprep.mubr.bf16.mxu0 %v11852_v7  ;;  %v2353_v7 = vld [vmem:[%s20788_s4 + $0x3e0] sm:$0xff]  ;;  %v11897_v60 = vcombine.low %v2341_v31, %v2345_v11  ;;  %v2239_v11 = vld [vmem:[%s20788_s4 + $0x50] sm:$0xff] }
 0x267   : > { %13179 = vmatprep.subr.bf16.mxu0 %v2419_v28  ;;  %v11906_v28 = vcombine.high %v2349_v57, %v2353_v7  ;;  %v11905_v18 = vcombine.low %v2349_v57, %v2353_v7  ;;  %v2247_v7 = vld [vmem:[%s20788_s4 + $0x90] sm:$0xff] }
 0x26a   : > { %13180 = vmatpush3.bf16.msra.mxu0 %v2411_v19  ;;  %v11876_v19 = vcombine.high %v2318_v1, %v2322_v22 }
 0x26b   : > { %13181 = vmatprep.subr.bf16.mxu0 %v2420_v4  ;;  %3382 = vmatmul.mubr.bf16.gmra.mrb[112].mxu1 %v11881_v21  ;;  %v11867_v21 = vcombine.low %v2310_v23, %v2314_v0  ;;  %v2326_v4 = vld [vmem:[%s20788_s4 + $0x308] sm:$0xff] }
 0x26c   : > { %3389 = vmatprep.mubr.bf16.mxu1 %v11890_v6  ;;  %v2231_v6 = vld [vmem:[%s20788_s4 + $0x10] sm:$0xff]  ;;  %v2334_v23 = vld [vmem:[%s20788_s4 + $0x348] sm:$0xff] }
 0x26d   : > { %3511 = vmatmul.mubr.bf16.gmra.mrb[104].mxu0 %v11851_v10  ;;  %v2330_v10 = vld [vmem:[%s20788_s4 + $0x328] sm:$0xff] }
 0x26e   : > { %13182 = vmatpush3.bf16.msra.mxu0 %v2412_v27  ;;  %3518 = vmatprep.mubr.bf16.mxu0 %v11860_v49  ;;  %v11790_v49 = vcombine.high %v2231_v6, %v2235_v30  ;;  %v11875_v27 = vcombine.low %v2318_v1, %v2322_v22  ;;  %v11884_v31 = vcombine.high %v2326_v4, %v2330_v10  ;;  %v2338_v0 = vld [vmem:[%s20788_s4 + $0x368] sm:$0xff] }
 0x26f   : > { %v11892_v57 = vcombine.high %v2334_v23, %v2338_v0  ;;  %v2342_v1 = vld [vmem:[%s20788_s4 + $0x388] sm:$0xff] }
 0x270   : > { %v2346_v22 = vld [vmem:[%s20788_s4 + $0x3a8] sm:$0xff] }
 0x273   : > { %3390 = vmatmul.mubr.bf16.gmra.mrb[116].mxu1 %v11889_v15  ;;  %v2243_v15 = vld [vmem:[%s20788_s4 + $0x70] sm:$0xff] }
 0x274   : > { %3397 = vmatprep.mubr.bf16.mxu1 %v11898_v37  ;;  %v11789_v37 = vcombine.low %v2231_v6, %v2235_v30  ;;  %v11900_v6 = vcombine.high %v2342_v1, %v2346_v22  ;;  %v2255_v30 = vld [vmem:[%s20788_s4 + $0xd0] sm:$0xff] }
 0x275   : > { %3519 = vmatmul.mubr.bf16.gmra.mrb[108].mxu0 %v11859_v29  ;;  %v11798_v29 = vcombine.high %v2239_v11, %v2243_v15 }
 0x276   : > { %3526 = vmatprep.mubr.bf16.mxu0 %v11868_v45  ;;  %v11883_v45 = vcombine.low %v2326_v4, %v2330_v10  ;;  %v2350_v10 = vld [vmem:[%s20788_s4 + $0x3c8] sm:$0xff] }
 0x27b   : > { %3398 = vmatmul.mubr.bf16.gmra.mrb[120].mxu1 %v11897_v60  ;;  %v2251_v60 = vld [vmem:[%s20788_s4 + $0xb0] sm:$0xff] }
 0x27c   : > { %3405 = vmatprep.mubr.bf16.mxu1 %v11906_v28  ;;  %v11797_v28 = vcombine.low %v2239_v11, %v2243_v15  ;;  %v11805_v4 = vcombine.low %v2247_v7, %v2251_v60  ;;  %v2263_v15 = vld [vmem:[%s20788_s4 + $0x110] sm:$0xff] }
 0x27d   : > { %3527 = vmatmul.mubr.bf16.gmra.mrb[112].mxu0 %v11867_v21  ;;  %v11806_v21 = vcombine.high %v2247_v7, %v2251_v60  ;;  %v2271_v60 = vld [vmem:[%s20788_s4 + $0x150] sm:$0xff] }
 0x27e   : > { %3534 = vmatprep.mubr.bf16.mxu0 %v11876_v19  ;;  %v11891_v19 = vcombine.low %v2334_v23, %v2338_v0 }
 0x283   : > { %3406 = vmatmul.mubr.bf16.gmra.mrb[124].mxu1 %v11905_v18  ;;  %v2259_v18 = vld [vmem:[%s20788_s4 + $0xf0] sm:$0xff] }
 0x284   : > { %3607 = vmatprep.mubr.bf16.mxu1 %v11790_v49  ;;  %v2354_v49 = vld [vmem:[%s20788_s4 + $0x3e8] sm:$0xff]  ;;  %v11813_v23 = vcombine.low %v2255_v30, %v2259_v18 }
 0x285   : > { %3535 = vmatmul.mubr.bf16.gmra.mrb[116].mxu0 %v11875_v27  ;;  %v11814_v27 = vcombine.high %v2255_v30, %v2259_v18  ;;  %v11908_v11 = vcombine.high %v2350_v10, %v2354_v49  ;;  %v2279_v18 = vld [vmem:[%s20788_s4 + $0x190] sm:$0xff] }
 0x286   : > { %3542 = vmatprep.mubr.bf16.mxu0 %v11884_v31  ;;  %v11899_v31 = vcombine.low %v2342_v1, %v2346_v22 }
 0x28b   : > { %3608 = vmatmul.mubr.bf16.vlgmr.msra.gmra.mrb[128].mxu1 %v11789_v37  ;;  %v2267_v37 = vld [vmem:[%s20788_s4 + $0x130] sm:$0xff] }
 0x28c   : > { %3615 = vmatprep.mubr.bf16.mxu1 %v11798_v29  ;;  %v11822_v0 = vcombine.high %v2263_v15, %v2267_v37  ;;  %v2232_v29 = vld [vmem:[%s20788_s4 + $0x18] sm:$0xff]  ;;  %v11821_v1 = vcombine.low %v2263_v15, %v2267_v37  ;;  %v2287_v37 = vld [vmem:[%s20788_s4 + $0x1d0] sm:$0xff] }
 0x28d   : > { %3543 = vmatmul.mubr.bf16.gmra.mrb[120].mxu0 %v11883_v45  ;;  %v2236_v45 = vld [vmem:[%s20788_s4 + $0x38] sm:$0xff] }
 0x28e   : > { %3550 = vmatprep.mubr.bf16.mxu0 %v11892_v57  ;;  %v11907_v57 = vcombine.low %v2350_v10, %v2354_v49  ;;  %v11792_v7 = vcombine.high %v2232_v29, %v2236_v45 }
 0x293   : > { %3616 = vmatmul.mubr.bf16.gmra.mrb[132].mxu1 %v11797_v28  ;;  %v2275_v28 = vld [vmem:[%s20788_s4 + $0x170] sm:$0xff] }
 0x294   : > { %3623 = vmatprep.mubr.bf16.mxu1 %v11806_v21  ;;  %v11830_v22 = vcombine.high %v2271_v60, %v2275_v28  ;;  %v2240_v21 = vld [vmem:[%s20788_s4 + $0x58] sm:$0xff]  ;;  %v11829_v10 = vcombine.low %v2271_v60, %v2275_v28  ;;  %v2295_v28 = vld [vmem:[%s20788_s4 + $0x210] sm:$0xff] }
 0x295   : > { %3551 = vmatmul.mubr.bf16.gmra.mrb[124].mxu0 %v11891_v19  ;;  %v2244_v19 = vld [vmem:[%s20788_s4 + $0x78] sm:$0xff] }
 0x296   : > { %3558 = vmatprep.mubr.bf16.mxu0 %v11900_v6  ;;  %v11791_v6 = vcombine.low %v2232_v29, %v2236_v45  ;;  %v11800_v30 = vcombine.high %v2240_v21, %v2244_v19  ;;  %v2256_v45 = vld [vmem:[%s20788_s4 + $0xd8] sm:$0xff] }
 0x29b   : > { %3624 = vmatmul.mubr.bf16.gmra.mrb[136].mxu1 %v11805_v4  ;;  %v2283_v4 = vld [vmem:[%s20788_s4 + $0x1b0] sm:$0xff] }
 0x29c   : > { %3631 = vmatprep.mubr.bf16.mxu1 %v11814_v27  ;;  %v11838_v49 = vcombine.high %v2279_v18, %v2283_v4  ;;  %v2248_v27 = vld [vmem:[%s20788_s4 + $0x98] sm:$0xff] }
 0x29d   : > { %3559 = vmatmul.mubr.bf16.gmra.mrb[128].mxu0 %v11899_v31  ;;  %v2252_v31 = vld [vmem:[%s20788_s4 + $0xb8] sm:$0xff] }
 0x29e   : > { %3566 = vmatprep.mubr.bf16.mxu0 %v11908_v11  ;;  %v11799_v11 = vcombine.low %v2240_v21, %v2244_v19  ;;  %v11808_v15 = vcombine.high %v2248_v27, %v2252_v31  ;;  %v2264_v19 = vld [vmem:[%s20788_s4 + $0x118] sm:$0xff] }
 0x2a3   : > { %3632 = vmatmul.mubr.bf16.gmra.mrb[140].mxu1 %v11813_v23  ;;  %v2291_v23 = vld [vmem:[%s20788_s4 + $0x1f0] sm:$0xff] }
 0x2a4   : > { %3639 = vmatprep.mubr.bf16.mxu1 %v11822_v0  ;;  %v11837_v0 = vcombine.low %v2279_v18, %v2283_v4  ;;  %v11846_v29 = vcombine.high %v2287_v37, %v2291_v23  ;;  %v2303_v4 = vld [vmem:[%s20788_s4 + $0x250] sm:$0xff] }
 0x2a5   : > { %3567 = vmatmul.mubr.bf16.gmra.mrb[132].mxu0 %v11907_v57  ;;  %v2260_v57 = vld [vmem:[%s20788_s4 + $0xf8] sm:$0xff] }
 0x2a6   : > { %3768 = vmatprep.mubr.bf16.mxu0 %v11792_v7  ;;  %v11807_v7 = vcombine.low %v2248_v27, %v2252_v31  ;;  %v11816_v60 = vcombine.high %v2256_v45, %v2260_v57  ;;  %v2272_v31 = vld [vmem:[%s20788_s4 + $0x158] sm:$0xff] }
 0x2ab   : > { %3640 = vmatmul.mubr.bf16.gmra.mrb[144].mxu1 %v11821_v1  ;;  %v2299_v1 = vld [vmem:[%s20788_s4 + $0x230] sm:$0xff] }
 0x2ac   : > { %3647 = vmatprep.mubr.bf16.mxu1 %v11830_v22  ;;  %v11845_v22 = vcombine.low %v2287_v37, %v2291_v23  ;;  %v11854_v21 = vcombine.high %v2295_v28, %v2299_v1  ;;  %v2311_v23 = vld [vmem:[%s20788_s4 + $0x290] sm:$0xff] }
 0x2ad   : > { %3769 = vmatmul.mubr.bf16.vlgmr.msra.gmra.mrb[136].mxu0 %v11791_v6  ;;  %v2268_v6 = vld [vmem:[%s20788_s4 + $0x138] sm:$0xff] }
 0x2ae   : > { %3776 = vmatprep.mubr.bf16.mxu0 %v11800_v30  ;;  %v11815_v30 = vcombine.low %v2256_v45, %v2260_v57  ;;  %v11824_v18 = vcombine.high %v2264_v19, %v2268_v6  ;;  %v2280_v57 = vld [vmem:[%s20788_s4 + $0x198] sm:$0xff] }
 0x2b3   : > { %3648 = vmatmul.mubr.bf16.gmra.mrb[148].mxu1 %v11829_v10  ;;  %v2307_v10 = vld [vmem:[%s20788_s4 + $0x270] sm:$0xff] }
 0x2b4   : > { %3655 = vmatprep.mubr.bf16.mxu1 %v11838_v49  ;;  %v11853_v49 = vcombine.low %v2295_v28, %v2299_v1  ;;  %v11862_v27 = vcombine.high %v2303_v4, %v2307_v10  ;;  %v2319_v1 = vld [vmem:[%s20788_s4 + $0x2d0] sm:$0xff] }
 0x2b5   : > { %3777 = vmatmul.mubr.bf16.gmra.mrb[140].mxu0 %v11799_v11  ;;  %v2276_v11 = vld [vmem:[%s20788_s4 + $0x178] sm:$0xff] }
 0x2b6   : > { %3784 = vmatprep.mubr.bf16.mxu0 %v11808_v15  ;;  %v11823_v15 = vcombine.low %v2264_v19, %v2268_v6  ;;  %v11832_v37 = vcombine.high %v2272_v31, %v2276_v11  ;;  %v2288_v6 = vld [vmem:[%s20788_s4 + $0x1d8] sm:$0xff] }
 0x2bb   : > { %3656 = vmatmul.mubr.bf16.gmra.mrb[152].mxu1 %v11837_v0  ;;  %v2315_v0 = vld [vmem:[%s20788_s4 + $0x2b0] sm:$0xff] }
 0x2bc   : > { %3663 = vmatprep.mubr.bf16.mxu1 %v11846_v29  ;;  %v11861_v29 = vcombine.low %v2303_v4, %v2307_v10  ;;  %v11870_v45 = vcombine.high %v2311_v23, %v2315_v0  ;;  %v2327_v10 = vld [vmem:[%s20788_s4 + $0x310] sm:$0xff] }
 0x2bd   : > { %3785 = vmatmul.mubr.bf16.gmra.mrb[144].mxu0 %v11807_v7  ;;  %v2284_v7 = vld [vmem:[%s20788_s4 + $0x1b8] sm:$0xff] }
 0x2be   : > { %3792 = vmatprep.mubr.bf16.mxu0 %v11816_v60  ;;  %v11831_v60 = vcombine.low %v2272_v31, %v2276_v11  ;;  %v11840_v28 = vcombine.high %v2280_v57, %v2284_v7 }
 0x2c3   : > { %3664 = vmatmul.mubr.bf16.gmra.mrb[156].mxu1 %v11845_v22  ;;  %v2323_v22 = vld [vmem:[%s20788_s4 + $0x2f0] sm:$0xff] }
 0x2c4   : > { %3671 = vmatprep.mubr.bf16.mxu1 %v11854_v21  ;;  %v11869_v21 = vcombine.low %v2311_v23, %v2315_v0  ;;  %v11878_v19 = vcombine.high %v2319_v1, %v2323_v22  ;;  %v11877_v11 = vcombine.low %v2319_v1, %v2323_v22  ;;  %v2296_v0 = vld [vmem:[%s20788_s4 + $0x218] sm:$0xff]  ;;  %v2339_v1 = vld [vmem:[%s20788_s4 + $0x370] sm:$0xff]  ;;  %v16252_v22 = vpop.permute.xlu0 %5686 }
 0x2c5   : > { %3793 = vmatmul.mubr.bf16.gmra.mrb[148].mxu0 %v11815_v30  ;;  %v2292_v30 = vld [vmem:[%s20788_s4 + $0x1f8] sm:$0xff]  ;;  %20880 = vst [vmem:[#allocation78_spill] sm:$0xff] %v16252_v22 }
 0x2c6   : > { %3800 = vmatprep.mubr.bf16.mxu0 %v11824_v18  ;;  %v11839_v18 = vcombine.low %v2280_v57, %v2284_v7  ;;  %v11848_v4 = vcombine.high %v2288_v6, %v2292_v30  ;;  %v11847_v7 = vcombine.low %v2288_v6, %v2292_v30 }
 0x2cb   : > { %3672 = vmatmul.mubr.bf16.gmra.mrb[160].mxu1 %v11853_v49  ;;  %v2331_v49 = vld [vmem:[%s20788_s4 + $0x330] sm:$0xff] }
 0x2cc   : > { %3679 = vmatprep.mubr.bf16.mxu1 %v11862_v27  ;;  %v11886_v23 = vcombine.high %v2327_v10, %v2331_v49 }
 0x2cd   : > { %3801 = vmatmul.mubr.bf16.gmra.mrb[152].mxu0 %v11823_v15 }
 0x2ce   : > { %3808 = vmatprep.mubr.bf16.mxu0 %v11832_v37 }
 0x2d3   : > { %3680 = vmatmul.mubr.bf16.gmra.mrb[164].mxu1 %v11861_v29  ;;  %v2300_v29 = vld [vmem:[%s20788_s4 + $0x238] sm:$0xff] }
 0x2d4   : > { %3687 = vmatprep.mubr.bf16.mxu1 %v11870_v45 }
 0x2d5   : > { %3809 = vmatmul.mubr.bf16.gmra.mrb[156].mxu0 %v11831_v60  ;;  %v11856_v60 = vcombine.high %v2296_v0, %v2300_v29 }
 0x2d6   : > { %3816 = vmatprep.mubr.bf16.mxu0 %v11840_v28  ;;  %v2335_v28 = vld [vmem:[%s20788_s4 + $0x350] sm:$0xff] }
 0x2d7   : > { %v11894_v30 = vcombine.high %v2335_v28, %v2339_v1 }
 0x2db   : > { %3688 = vmatmul.mubr.bf16.gmra.mrb[168].mxu1 %v11869_v21 }
 0x2dc   : > { %3695 = vmatprep.mubr.bf16.mxu1 %v11878_v19 }
 0x2dd   : > { %3817 = vmatmul.mubr.bf16.gmra.mrb[160].mxu0 %v11839_v18  ;;  %v11885_v18 = vcombine.low %v2327_v10, %v2331_v49  ;;  %v16266_v10 = vpop.permute.xlu1 %5691  ;;  %v2343_v49 = vld [vmem:[%s20788_s4 + $0x390] sm:$0xff] }
 0x2de   : > { %v12847_v27 = vpop.f32.mrb[64].mxu1  ;;  %3824 = vmatprep.mubr.bf16.mxu0 %v11848_v4  ;;  %20882 = vst [vmem:[#allocation80_spill] sm:$0xff] %v16266_v10 }
 0x2df   : > { %v12848_v31 = vpop.f32.mrb[65].mxu1 }
 0x2e0   : > { %v16236_v15 = vadd.f32 %v12848_v31, %v12847_v27  ;;  %v12850_v37 = vpop.f32.mrb[66].mxu1  ;;  %v2304_v27 = vld [vmem:[%s20788_s4 + $0x258] sm:$0xff] }
 0x2e1   : > { %v12851_v45 = vpop.f32.mrb[67].mxu1  ;;  %v2308_v31 = vld [vmem:[%s20788_s4 + $0x278] sm:$0xff] }
 0x2e2   : > { %v16244_v57 = vadd.f32 %v12851_v45, %v12850_v37  ;;  %v11864_v45 = vcombine.high %v2304_v27, %v2308_v31 }
 0x2e3   : > { %3696 = vmatmul.mubr.bf16.gmra.mrb[172].mxu1 %v11877_v11 }
 0x2e4   : > { %3703 = vmatprep.mubr.bf16.mxu1 %v11886_v23  ;;  %v11855_v23 = vcombine.low %v2296_v0, %v2300_v29  ;;  %v11893_v0 = vcombine.low %v2335_v28, %v2339_v1  ;;  %v2351_v1 = vld [vmem:[%s20788_s4 + $0x3d0] sm:$0xff] }
 0x2e5   : > { %3825 = vmatmul.mubr.bf16.gmra.mrb[164].mxu0 %v11847_v7  ;;  %v16264_v7 = vpop.permute.xlu0 %5696 }
 0x2e6   : > { %v12853_v21 = vpop.f32.mrb[68].mxu1  ;;  %3832 = vmatprep.mubr.bf16.mxu0 %v11856_v60  ;;  %20881 = vst [vmem:[#allocation79_spill] sm:$0xff] %v16264_v7  ;;  %v2347_v60 = vld [vmem:[%s20788_s4 + $0x3b0] sm:$0xff]  ;;  %v11863_v7 = vcombine.low %v2304_v27, %v2308_v31 }
 0x2e7   : > { %v12854_v19 = vpop.f32.mrb[69].mxu1 }
 0x2e8   : > { %v16254_v4 = vadd.f32 %v12854_v19, %v12853_v21  ;;  %v12856_v6 = vpop.f32.mrb[70].mxu1 }
 0x2e9   : > { %v12857_v11 = vpop.f32.mrb[71].mxu1  ;;  %v16282_v22 = vpop.permute.xlu0 %5706 }
 0x2ea   : > { %v16262_v37 = vadd.f32 %v12857_v11, %v12856_v6  ;;  %v11902_v6 = vcombine.high %v2343_v49, %v2347_v60  ;;  %v2316_v11 = vld [vmem:[%s20788_s4 + $0x2b8] sm:$0xff]  ;;  %20883 = vst [vmem:[#allocation81_spill] sm:$0xff] %v16282_v22 }
 0x2eb   : > { %3704 = vmatmul.mubr.bf16.gmra.mrb[176].mxu1 %v11885_v18  ;;  %v2324_v22 = vld [vmem:[%s20788_s4 + $0x2f8] sm:$0xff] }
 0x2ec   : > { %3711 = vmatprep.mubr.bf16.mxu1 %v11894_v30  ;;  %v2312_v30 = vld [vmem:[%s20788_s4 + $0x298] sm:$0xff] }
 0x2ed   : > { %3833 = vmatmul.mubr.bf16.gmra.mrb[168].mxu0 %v11855_v23  ;;  %v11872_v28 = vcombine.high %v2312_v30, %v2316_v11 }
 0x2ee   : > { %v12859_v21 = vpop.f32.mrb[72].mxu1  ;;  %3840 = vmatprep.mubr.bf16.mxu0 %v11864_v45  ;;  %v16286_v45 = vpop.permute.xlu1 %5701 }
 0x2ef   : > { %v12860_v19 = vpop.f32.mrb[73].mxu1  ;;  %20884 = vst [vmem:[#allocation82_spill] sm:$0xff] %v16286_v45 }
 0x2f0   : > { %v16274_v29 = vadd.f32 %v12860_v19, %v12859_v21  ;;  %v12862_v18 = vpop.f32.mrb[74].mxu1  ;;  %v2355_v21 = vld [vmem:[%s20788_s4 + $0x3f0] sm:$0xff] }
 0x2f1   : > { %v12863_v10 = vpop.f32.mrb[75].mxu1  ;;  %v11909_v61 = vcombine.low %v2351_v1, %v2355_v21 }
 0x2f2   : > { %v16284_v23 = vadd.f32 %v12863_v10, %v12862_v18  ;;  %v11901_v10 = vcombine.low %v2343_v49, %v2347_v60  ;;  %v16294_v18 = vpop.permute.xlu0 %5716  ;;  %v16304_v45 = vpop.permute.xlu1 %5711  ;;  %v11871_v49 = vcombine.low %v2312_v30, %v2316_v11  ;;  %v2328_v30 = vld [vmem:[%s20788_s4 + $0x318] sm:$0xff] }
 0x2f3   : > { %3712 = vmatmul.mubr.bf16.gmra.mrb[180].mxu1 %v11893_v0  ;;  %20885 = vst [vmem:[#allocation83_spill] sm:$0xff] %v16294_v18  ;;  %v11910_v0 = vcombine.high %v2351_v1, %v2355_v21  ;;  %20886 = vst [vmem:[#allocation84_spill] sm:$0xff] %v16304_v45  ;;  %v2332_v11 = vld [vmem:[%s20788_s4 + $0x338] sm:$0xff] }
 0x2f4   : > { %3719 = vmatprep.mubr.bf16.mxu1 %v11902_v6  ;;  %v2320_v6 = vld [vmem:[%s20788_s4 + $0x2d8] sm:$0xff] }
 0x2f5   : > { %3841 = vmatmul.mubr.bf16.gmra.mrb[172].mxu0 %v11863_v7  ;;  %v11880_v60 = vcombine.high %v2320_v6, %v2324_v22  ;;  %v11879_v21 = vcombine.low %v2320_v6, %v2324_v22 }
 0x2f6   : > { %v12865_v19 = vpop.f32.mrb[76].mxu1  ;;  %3848 = vmatprep.mubr.bf16.mxu0 %v11872_v28 }
 0x2f7   : > { %v12866_v44 = vpop.f32.mrb[77].mxu1 }
 0x2f8   : > { %v16296_v27 = vadd.f32 %v12866_v44, %v12865_v19  ;;  %v12868_v31 = vpop.f32.mrb[78].mxu1  ;;  %v16308_v44 = vpop.permute.xlu0 %5726 }
 0x2f9   : > { %v12869_v7 = vpop.f32.mrb[79].mxu1  ;;  %20887 = vst [vmem:[#allocation85_spill] sm:$0xff] %v16308_v44  ;;  %v16310_v19 = vpop.permute.xlu1 %5721 }
 0x2fa   : > { %v16306_v36 = vadd.f32 %v12869_v7, %v12868_v31  ;;  %20888 = vst [vmem:[#allocation86_spill] sm:$0xff] %v16310_v19 }
 0x2fb   : > { %3720 = vmatmul.mubr.bf16.gmra.mrb[184].mxu1 %v11901_v10 }
 0x2fc   : > { %3727 = vmatprep.mubr.bf16.mxu1 %v11910_v0  ;;  %v3288_v0 = vadd.f32 %v16236_v15, %v14889_v35  ;;  %v16328_v52 = vpop.permute.xlu0 %5736 }
 0x2fd   : > { %3849 = vmatmul.mubr.bf16.gmra.mrb[176].mxu0 %v11871_v49  ;;  %20889 = vst [vmem:[#allocation87_spill] sm:$0xff] %v16328_v52 }
 0x2fe   : > { %v12871_v28 = vpop.f32.mrb[80].mxu1  ;;  %3856 = vmatprep.mubr.bf16.mxu0 %v11880_v60  ;;  %v11888_v60 = vcombine.high %v2328_v30, %v2332_v11 }
 0x2ff   : > { %v12872_v18 = vpop.f32.mrb[81].mxu1 }
 0x300   : > { %v12959_v26 = vpop.f32.mrb[72].mxu0  ;;  %v16312_v14 = vadd.f32 %v12872_v18, %v12871_v28  ;;  %v12874_v45 = vpop.f32.mrb[82].mxu1  ;;  %v3291_v28 = vadd.f32 %v16244_v57, %v14887_v34  ;;  %v2336_v34 = vld [vmem:[%s20788_s4 + $0x358] sm:$0xff] }
 0x301   : > { %v12960_v10 = vpop.f32.mrb[73].mxu0  ;;  %v12875_v31 = vpop.f32.mrb[83].mxu1  ;;  %v2340_v57 = vld [vmem:[%s20788_s4 + $0x378] sm:$0xff] }
 0x302   : > { %v12961_v7 = vadd.f32 %v12960_v10, %v12959_v26  ;;  %v12962_v49 = vpop.f32.mrb[74].mxu0  ;;  %v16322_v1 = vadd.f32 %v12875_v31, %v12874_v45  ;;  %v16332_v26 = vpop.permute.xlu1 %5731  ;;  %v3296_v10 = vadd.f32 %v16254_v4, %v14899_v39 }
 0x303   : > { %v12963_v18 = vpop.f32.mrb[75].mxu0  ;;  %3728 = vmatmul.mubr.bf16.gmra.mrb[188].mxu1 %v11909_v61  ;;  %20890 = vst [vmem:[#allocation88_spill] sm:$0xff] %v16332_v26 }
 0x304   : > { %v16326_v44 = vadd.f32 %v12961_v7, %v3288_v0  ;;  %v12964_v19 = vadd.f32 %v12963_v18, %v12962_v49  ;;  %v11887_v49 = vcombine.low %v2328_v30, %v2332_v11  ;;  %v11896_v18 = vcombine.high %v2336_v34, %v2340_v57 }
 0x305   : > { %3857 = vmatmul.mubr.bf16.gmra.mrb[180].mxu0 %v11879_v21 }
 0x306   : > { %v16330_v56 = vadd.f32 %v12964_v19, %v3291_v28  ;;  %v12877_v35 = vpop.f32.mrb[84].mxu1  ;;  %3864 = vmatprep.mubr.bf16.mxu0 %v11888_v60  ;;  %v3299_v60 = vadd.f32 %v16262_v37, %v14897_v38  ;;  %v16354_v39 = vpop.permute.xlu1 %5741  ;;  %v2344_v38 = vld [vmem:[%s20788_s4 + $0x398] sm:$0xff] }
 0x307   : > { %v12878_v15 = vpop.f32.mrb[85].mxu1  ;;  %20892 = vst [vmem:[#allocation90_spill] sm:$0xff] %v16354_v39  ;;  %v2348_v37 = vld [vmem:[%s20788_s4 + $0x3b8] sm:$0xff] }
 0x308   : > { %v12965_v22 = vpop.f32.mrb[76].mxu0  ;;  %v16334_v45 = vadd.f32 %v12878_v15, %v12877_v35  ;;  %v12880_v61 = vpop.f32.mrb[86].mxu1 }
 0x309   : > { %v12966_v6 = vpop.f32.mrb[77].mxu0  ;;  %v12881_v19 = vpop.f32.mrb[87].mxu1 }
 0x30a   : > { %v12967_v31 = vadd.f32 %v12966_v6, %v12965_v22  ;;  %v12968_v0 = vpop.f32.mrb[78].mxu0  ;;  %v16344_v7 = vadd.f32 %v12881_v19, %v12880_v61  ;;  %v16350_v15 = vpop.permute.xlu0 %5746  ;;  %v3304_v19 = vadd.f32 %v16274_v29, %v14909_v43 }
 0x30b   : > { %v12969_v21 = vpop.f32.mrb[79].mxu0  ;;  %20891 = vst [vmem:[#allocation89_spill] sm:$0xff] %v16350_v15 }
 0x30c   : > { %v16348_v28 = vadd.f32 %v12967_v31, %v3296_v10  ;;  %v12970_v35 = vadd.f32 %v12969_v21, %v12968_v0  ;;  %v11904_v21 = vcombine.high %v2344_v38, %v2348_v37 }
 0x30d   : > { %3865 = vmatmul.mubr.bf16.gmra.mrb[184].mxu0 %v11887_v49 }
 0x30e   : > { %v16352_v26 = vadd.f32 %v12970_v35, %v3299_v60  ;;  %v12883_v52 = vpop.f32.mrb[88].mxu1  ;;  %3872 = vmatprep.mubr.bf16.mxu0 %v11896_v18  ;;  %v3307_v18 = vadd.f32 %v16284_v23, %v14907_v42  ;;  %v16376_v43 = vpop.permute.xlu0 %5756  ;;  %v2352_v42 = vld [vmem:[%s20788_s4 + $0x3d8] sm:$0xff] }
 0x30f   : > { %v12884_v4 = vpop.f32.mrb[89].mxu1  ;;  %20894 = vst [vmem:[#allocation92_spill] sm:$0xff] %v16376_v43  ;;  %v2356_v23 = vld [vmem:[%s20788_s4 + $0x3f8] sm:$0xff] }
 0x310   : > { %v12971_v22 = vpop.f32.mrb[80].mxu0  ;;  %v16356_v30 = vadd.f32 %v12884_v4, %v12883_v52  ;;  %v12886_v11 = vpop.f32.mrb[90].mxu1  ;;  %v11895_v52 = vcombine.low %v2336_v34, %v2340_v57 }
 0x311   : > { %v12972_v61 = vpop.f32.mrb[81].mxu0  ;;  %v12887_v6 = vpop.f32.mrb[91].mxu1 }
 0x312   : > { %v12973_v10 = vadd.f32 %v12972_v61, %v12971_v22  ;;  %v12974_v31 = vpop.f32.mrb[82].mxu0  ;;  %v16366_v0 = vadd.f32 %v12887_v6, %v12886_v11  ;;  %v16372_v4 = vpop.permute.xlu1 %5751  ;;  %v3312_v6 = vadd.f32 %v16296_v27, %v14919_v47 }
 0x313   : > { %v12975_v49 = vpop.f32.mrb[83].mxu0  ;;  %20893 = vst [vmem:[#allocation91_spill] sm:$0xff] %v16372_v4  ;;  %v16398_v47 = vpop.permute.xlu0 %5766 }
 0x314   : > { %v16370_v60 = vadd.f32 %v12973_v10, %v3304_v19  ;;  %v12976_v35 = vadd.f32 %v12975_v49, %v12974_v31  ;;  %v11912_v49 = vcombine.high %v2352_v42, %v2356_v23  ;;  %20896 = vst [vmem:[#allocation94_spill] sm:$0xff] %v16398_v47 }
 0x315   : > { %3873 = vmatmul.mubr.bf16.gmra.mrb[188].mxu0 %v11895_v52 }
 0x316   : > { %v16374_v15 = vadd.f32 %v12976_v35, %v3307_v18  ;;  %v12889_v39 = vpop.f32.mrb[92].mxu1  ;;  %3880 = vmatprep.mubr.bf16.mxu0 %v11904_v21  ;;  %v16390_v21 = vpop.permute.xlu1 %5761  ;;  %v3315_v18 = vadd.f32 %v16306_v36, %v14917_v46  ;;  %v3320_v46 = vadd.f32 %v16312_v14, %v14929_v51 }
 0x317   : > { %v12890_v29 = vpop.f32.mrb[93].mxu1  ;;  %20895 = vst [vmem:[#allocation93_spill] sm:$0xff] %v16390_v21 }
 0x318   : > { %v12977_v22 = vpop.f32.mrb[84].mxu0  ;;  %v16378_v34 = vadd.f32 %v12890_v29, %v12889_v39  ;;  %v12892_v57 = vpop.f32.mrb[94].mxu1  ;;  %v11903_v39 = vcombine.low %v2344_v38, %v2348_v37 }
 0x319   : > { %v12978_v11 = vpop.f32.mrb[85].mxu0  ;;  %v12893_v61 = vpop.f32.mrb[95].mxu1 }
 0x31a   : > { %v12979_v19 = vadd.f32 %v12978_v11, %v12977_v22  ;;  %v12980_v10 = vpop.f32.mrb[86].mxu0  ;;  %v16388_v31 = vadd.f32 %v12893_v61, %v12892_v57  ;;  %v16402_v61 = vpop.permute.xlu1 %5771 }
 0x31b   : > { %v12981_v52 = vpop.f32.mrb[87].mxu0  ;;  %20897 = vst [vmem:[#allocation95_spill] sm:$0xff] %v16402_v61 }
 0x31c   : > { %v16394_v35 = vadd.f32 %v12979_v19, %v3312_v6  ;;  %v12982_v29 = vadd.f32 %v12981_v52, %v12980_v10  ;;  %v11911_v10 = vcombine.low %v2352_v42, %v2356_v23  ;;  %v3323_v52 = vadd.f32 %v16322_v1, %v14927_v50 }
 0x31d   : > { %3881 = vmatmul.mubr.bf16.gmra.mrb[192].mxu0 %v11903_v39  ;;  %v3328_v50 = vadd.f32 %v16334_v45, %v14939_v55 }
 0x31e   : > { %v16396_v4 = vadd.f32 %v12982_v29, %v3315_v18  ;;  %v12895_v43 = vpop.f32.mrb[96].mxu1  ;;  %3888 = vmatprep.mubr.bf16.mxu0 %v11912_v49  ;;  %v16412_v18 = vpop.permute.xlu0 %5776 }
 0x31f   : > { %v12896_v27 = vpop.f32.mrb[97].mxu1  ;;  %20898 = vst [vmem:[#allocation96_spill] sm:$0xff] %v16412_v18  ;;  %v16416_v51 = vpop.permute.xlu1 %5781 }
 0x320   : > { %v12983_v22 = vpop.f32.mrb[88].mxu0  ;;  %v16400_v38 = vadd.f32 %v12896_v27, %v12895_v43  ;;  %v12898_v37 = vpop.f32.mrb[98].mxu1  ;;  %20899 = vst [vmem:[#allocation97_spill] sm:$0xff] %v16416_v51 }
 0x321   : > { %v12984_v57 = vpop.f32.mrb[89].mxu0  ;;  %v12899_v11 = vpop.f32.mrb[99].mxu1 }
 0x322   : > { %v12985_v36 = vadd.f32 %v12984_v57, %v12983_v22  ;;  %v12986_v6 = vpop.f32.mrb[90].mxu0  ;;  %v16406_v19 = vadd.f32 %v12899_v11, %v12898_v37 }
 0x323   : > { %v12987_v39 = vpop.f32.mrb[91].mxu0 }
 0x324   : > { %v16410_v49 = vadd.f32 %v12985_v36, %v3320_v46  ;;  %v12988_v43 = vadd.f32 %v12987_v39, %v12986_v6  ;;  %v16424_v46 = vpop.permute.xlu0 %6053  ;;  %v3331_v6 = vadd.f32 %v16344_v7, %v14937_v54  ;;  %v16430_v39 = vpop.permute.xlu1 %6058  ;;  %v3336_v54 = vadd.f32 %v16356_v30, %v14949_v59 }
 0x325   : > { %3889 = vmatmul.mubr.bf16.gmra.mrb[196].mxu0 %v11911_v10 }
 0x326   : > { %v16414_v29 = vadd.f32 %v12988_v43, %v3323_v52  ;;  %v12901_v27 = vpop.f32.mrb[100].mxu1 }
 0x327   : > { %v12902_v61 = vpop.f32.mrb[101].mxu1 }
 0x328   : > { %v16418_v14 = vadd.f32 %v12902_v61, %v12901_v27  ;;  %v12904_v22 = vpop.f32.mrb[102].mxu1  ;;  %v12989_v42 = vpop.f32.mrb[92].mxu0 }
 0x329   : > { %v12905_v23 = vpop.f32.mrb[103].mxu1  ;;  %v12990_v37 = vpop.f32.mrb[93].mxu0 }
 0x32a   : > { %v16420_v57 = vadd.f32 %v12905_v23, %v12904_v22  ;;  %v12991_v1 = vadd.f32 %v12990_v37, %v12989_v42  ;;  %v12992_v11 = vpop.f32.mrb[94].mxu0  ;;  %v16436_v23 = vpop.permute.xlu0 %6063 }
 0x32b   : > { %v12993_v36 = vpop.f32.mrb[95].mxu0 }
 0x32c   : > { %v16428_v10 = vadd.f32 %v12991_v1, %v3328_v50  ;;  %v12994_v61 = vadd.f32 %v12993_v36, %v12992_v11  ;;  %v16442_v1 = vpop.permute.xlu1 %6068  ;;  %v3339_v36 = vadd.f32 %v16366_v0, %v14947_v58  ;;  %v3344_v58 = vadd.f32 %v16378_v34, %v14959_v63 }
 0x32e   : > { %v12907_v52 = vpop.f32.mrb[104].mxu1  ;;  %v16432_v43 = vadd.f32 %v12994_v61, %v3331_v6 }
 0x32f   : > { %v12908_v27 = vpop.f32.mrb[105].mxu1 }
 0x330   : > { %v16434_v22 = vadd.f32 %v12908_v27, %v12907_v52  ;;  %v12910_v55 = vpop.f32.mrb[106].mxu1  ;;  %v12995_v45 = vpop.f32.mrb[96].mxu0 }
 0x331   : > { %v12911_v42 = vpop.f32.mrb[107].mxu1  ;;  %v12996_v37 = vpop.f32.mrb[97].mxu0 }
 0x332   : > { %v16438_v51 = vadd.f32 %v12911_v42, %v12910_v55  ;;  %v12997_v7 = vadd.f32 %v12996_v37, %v12995_v45  ;;  %v12998_v50 = vpop.f32.mrb[98].mxu0  ;;  %v16450_v55 = vpop.permute.xlu0 %6073 }
 0x333   : > { %v12999_v11 = vpop.f32.mrb[99].mxu0  ;;  %20900 = vst [vmem:[#allocation98_spill] sm:$0xff] %v16450_v55  ;;  %v16454_v37 = vpop.permute.xlu1 %6078 }
 0x334   : > { %v16446_v6 = vadd.f32 %v12997_v7, %v3336_v54  ;;  %v13000_v61 = vadd.f32 %v12999_v11, %v12998_v50  ;;  %20901 = vst [vmem:[#allocation99_spill] sm:$0xff] %v16454_v37  ;;  %v3347_v50 = vadd.f32 %v16388_v31, %v14957_v62  ;;  %v3352_v62 = vadd.f32 %v16400_v38, %v14969_v3 }
 0x336   : > { %v12913_v52 = vpop.f32.mrb[108].mxu1  ;;  %v16448_v27 = vadd.f32 %v13000_v61, %v3339_v36  ;;  %v16464_v36 = vpop.permute.xlu0 %6083 }
 0x337   : > { %v12914_v47 = vpop.f32.mrb[109].mxu1  ;;  %20902 = vst [vmem:[#allocation100_spill] sm:$0xff] %v16464_v36 }
 0x338   : > { %v16452_v42 = vadd.f32 %v12914_v47, %v12913_v52  ;;  %v12916_v59 = vpop.f32.mrb[110].mxu1  ;;  %v13001_v30 = vpop.f32.mrb[100].mxu0 }
 0x339   : > { %v12917_v45 = vpop.f32.mrb[111].mxu1  ;;  %v13002_v18 = vpop.f32.mrb[101].mxu0 }
 0x33a   : > { %v16456_v21 = vadd.f32 %v12917_v45, %v12916_v59  ;;  %v13003_v0 = vadd.f32 %v13002_v18, %v13001_v30  ;;  %v13004_v54 = vpop.f32.mrb[102].mxu0  ;;  %v16468_v59 = vpop.permute.xlu1 %6088 }
 0x33b   : > { %v13005_v7 = vpop.f32.mrb[103].mxu0  ;;  %20903 = vst [vmem:[#allocation101_spill] sm:$0xff] %v16468_v59 }
 0x33c   : > { %v16462_v11 = vadd.f32 %v13003_v0, %v3344_v58  ;;  %v13006_v47 = vadd.f32 %v13005_v7, %v13004_v54  ;;  %v16476_v0 = vpop.permute.xlu0 %6093  ;;  %v3355_v7 = vadd.f32 %v16406_v19, %v14967_v2  ;;  %v3360_v2 = vadd.f32 %v16418_v14, %v14979_v9 }
 0x33d   : > { %20904 = vst [vmem:[#allocation102_spill] sm:$0xff] %v16476_v0 }
 0x33e   : > { %v12919_v61 = vpop.f32.mrb[112].mxu1  ;;  %v16466_v52 = vadd.f32 %v13006_v47, %v3347_v50  ;;  %v16482_v47 = vpop.permute.xlu1 %6098 }
 0x33f   : > { %v12920_v37 = vpop.f32.mrb[113].mxu1  ;;  %20905 = vst [vmem:[#allocation103_spill] sm:$0xff] %v16482_v47 }
 0x340   : > { %v16470_v45 = vadd.f32 %v12920_v37, %v12919_v61  ;;  %v12922_v63 = vpop.f32.mrb[114].mxu1  ;;  %v13007_v34 = vpop.f32.mrb[104].mxu0 }
 0x341   : > { %v12923_v18 = vpop.f32.mrb[115].mxu1  ;;  %v13008_v30 = vpop.f32.mrb[105].mxu0 }
 0x342   : > { %v16472_v55 = vadd.f32 %v12923_v18, %v12922_v63  ;;  %v13009_v31 = vadd.f32 %v13008_v30, %v13007_v34  ;;  %v13010_v58 = vpop.f32.mrb[106].mxu0  ;;  %v16488_v30 = vpop.permute.xlu0 %6103 }
 0x343   : > { %v13011_v54 = vpop.f32.mrb[107].mxu0  ;;  %20906 = vst [vmem:[#allocation104_spill] sm:$0xff] %v16488_v30 }
 0x344   : > { %v16480_v50 = vadd.f32 %v13009_v31, %v3352_v62  ;;  %v13012_v37 = vadd.f32 %v13011_v54, %v13010_v58  ;;  %v16494_v31 = vpop.permute.xlu1 %6108  ;;  %v3363_v54 = vadd.f32 %v16420_v57, %v14977_v8  ;;  %v3368_v8 = vadd.f32 %v16434_v22, %v14989_v13 }
 0x345   : > { %20907 = vst [vmem:[#allocation105_spill] sm:$0xff] %v16494_v31 }
 0x346   : > { %v12925_v61 = vpop.f32.mrb[116].mxu1  ;;  %v16484_v59 = vadd.f32 %v13012_v37, %v3355_v7 }
 0x347   : > { %v12926_v63 = vpop.f32.mrb[117].mxu1 }
 0x348   : > { %v16486_v18 = vadd.f32 %v12926_v63, %v12925_v61  ;;  %v12928_v3 = vpop.f32.mrb[118].mxu1  ;;  %v13013_v38 = vpop.f32.mrb[108].mxu0 }
 0x349   : > { %v12929_v34 = vpop.f32.mrb[119].mxu1  ;;  %v13014_v0 = vpop.f32.mrb[109].mxu0 }
 0x34a   : > { %v16490_v36 = vadd.f32 %v12929_v34, %v12928_v3  ;;  %v13015_v19 = vadd.f32 %v13014_v0, %v13013_v38  ;;  %v13016_v62 = vpop.f32.mrb[110].mxu0  ;;  %v16502_v3 = vpop.permute.xlu0 %6113 }
 0x34b   : > { %v13017_v58 = vpop.f32.mrb[111].mxu0  ;;  %20908 = vst [vmem:[#allocation106_spill] sm:$0xff] %v16502_v3  ;;  %v16506_v38 = vpop.permute.xlu1 %6118 }
 0x34c   : > { %v16498_v7 = vadd.f32 %v13015_v19, %v3360_v2  ;;  %v13018_v37 = vadd.f32 %v13017_v58, %v13016_v62  ;;  %20909 = vst [vmem:[#allocation107_spill] sm:$0xff] %v16506_v38  ;;  %v3371_v62 = vadd.f32 %v16438_v51, %v14987_v12  ;;  %v3376_v12 = vadd.f32 %v16452_v42, %v14999_v17 }
 0x34e   : > { %v12931_v61 = vpop.f32.mrb[120].mxu1  ;;  %v16500_v63 = vadd.f32 %v13018_v37, %v3363_v54  ;;  %v16516_v54 = vpop.permute.xlu0 %6123 }
 0x34f   : > { %v12932_v47 = vpop.f32.mrb[121].mxu1  ;;  %20910 = vst [vmem:[#allocation108_spill] sm:$0xff] %v16516_v54 }
 0x350   : > { %v16504_v34 = vadd.f32 %v12932_v47, %v12931_v61  ;;  %v12934_v9 = vpop.f32.mrb[122].mxu1  ;;  %v13019_v14 = vpop.f32.mrb[112].mxu0 }
 0x351   : > { %v12935_v0 = vpop.f32.mrb[123].mxu1  ;;  %v13020_v31 = vpop.f32.mrb[113].mxu0 }
 0x352   : > { %v16508_v30 = vadd.f32 %v12935_v0, %v12934_v9  ;;  %v13021_v57 = vadd.f32 %v13020_v31, %v13019_v14  ;;  %v13022_v2 = vpop.f32.mrb[114].mxu0  ;;  %v16520_v9 = vpop.permute.xlu1 %6128 }
 0x353   : > { %v13023_v19 = vpop.f32.mrb[115].mxu0  ;;  %20911 = vst [vmem:[#allocation109_spill] sm:$0xff] %v16520_v9 }
 0x354   : > { %v16514_v58 = vadd.f32 %v13021_v57, %v3368_v8  ;;  %v13024_v47 = vadd.f32 %v13023_v19, %v13022_v2  ;;  %v16528_v57 = vpop.permute.xlu0 %6133  ;;  %v3379_v19 = vadd.f32 %v16456_v21, %v14997_v16  ;;  %v3384_v21 = vadd.f32 %v16470_v45, %v15009_v25 }
 0x355   : > { %20912 = vst [vmem:[#allocation110_spill] sm:$0xff] %v16528_v57 }
 0x356   : > { %v12937_v37 = vpop.f32.mrb[124].mxu1  ;;  %v16518_v61 = vadd.f32 %v13024_v47, %v3371_v62  ;;  %v16534_v47 = vpop.permute.xlu1 %6138 }
 0x357   : > { %v12938_v38 = vpop.f32.mrb[125].mxu1  ;;  %20913 = vst [vmem:[#allocation111_spill] sm:$0xff] %v16534_v47 }
 0x358   : > { %v16522_v0 = vadd.f32 %v12938_v38, %v12937_v37  ;;  %v12940_v13 = vpop.f32.mrb[126].mxu1  ;;  %v13025_v22 = vpop.f32.mrb[116].mxu0 }
 0x359   : > { %v12941_v31 = vpop.f32.mrb[127].mxu1  ;;  %v13026_v14 = vpop.f32.mrb[117].mxu0 }
 0x35a   : > { %v16524_v3 = vadd.f32 %v12941_v31, %v12940_v13  ;;  %v13027_v51 = vadd.f32 %v13026_v14, %v13025_v22  ;;  %v13028_v8 = vpop.f32.mrb[118].mxu0  ;;  %v16538_v22 = vpop.permute.xlu0 %6143 }
 0x35b   : > { %v13029_v2 = vpop.f32.mrb[119].mxu0  ;;  %20914 = vst [vmem:[#allocation112_spill] sm:$0xff] %v16538_v22 }
 0x35c   : > { %v16532_v62 = vadd.f32 %v13027_v51, %v3376_v12  ;;  %v13030_v38 = vadd.f32 %v13029_v2, %v13028_v8  ;;  %v16545_v8 = vpop.permute.xlu1 %6148 }
 0x35d   : > { %20915 = vst [vmem:[#allocation113_spill] sm:$0xff] %v16545_v8 }
 0x35e   : > { %v13071_v37 = vpop.f32.mrb[128].mxu1  ;;  %v16536_v9 = vadd.f32 %v13030_v38, %v3379_v19  ;;  %v3387_v38 = vadd.f32 %v16472_v55, %v15007_v24  ;;  %v3392_v55 = vadd.f32 %v16486_v18, %v15019_v33 }
 0x35f   : > { %v13072_v13 = vpop.f32.mrb[129].mxu1 }
 0x360   : > { %v13073_v31 = vadd.f32 %v13072_v13, %v13071_v37  ;;  %v13074_v54 = vpop.f32.mrb[130].mxu1  ;;  %v13031_v17 = vpop.f32.mrb[120].mxu0 }
 0x361   : > { %v13075_v42 = vpop.f32.mrb[131].mxu1  ;;  %v13032_v14 = vpop.f32.mrb[121].mxu0 }
 0x362   : > { %v16541_v57 = vadd.f32 %v13073_v31, %v16326_v44  ;;  %v13076_v16 = vadd.f32 %v13075_v42, %v13074_v54  ;;  %v13033_v12 = vadd.f32 %v13032_v14, %v13031_v17  ;;  %v13034_v51 = vpop.f32.mrb[122].mxu0  ;;  %v16556_v42 = vpop.permute.xlu0 %6153 }
 0x363   : > { %v13035_v2 = vpop.f32.mrb[123].mxu0  ;;  %20916 = vst [vmem:[#allocation114_spill] sm:$0xff] %v16556_v42  ;;  %v16558_v47 = vpop.permute.xlu1 %6158 }
 0x364   : > { %v16548_v19 = vadd.f32 %v13076_v16, %v16330_v56  ;;  %v16552_v37 = vadd.f32 %v13033_v12, %v3384_v21  ;;  %v13036_v13 = vadd.f32 %v13035_v2, %v13034_v51  ;;  %20917 = vst [vmem:[#allocation115_spill] sm:$0xff] %v16558_v47 }
 0x366   : > { %v13077_v44 = vpop.f32.mrb[132].mxu1  ;;  %v16554_v31 = vadd.f32 %v13036_v13, %v3387_v38  ;;  %v3395_v38 = vadd.f32 %v16490_v36, %v15017_v32  ;;  %v3400_v36 = vadd.f32 %v16504_v34, %v15029_v41 }
 0x367   : > { %v13078_v54 = vpop.f32.mrb[133].mxu1 }
 0x368   : > { %v13079_v25 = vadd.f32 %v13078_v54, %v13077_v44  ;;  %v13080_v45 = vpop.f32.mrb[134].mxu1  ;;  %v13037_v17 = vpop.f32.mrb[124].mxu0 }
 0x369   : > { %v13081_v14 = vpop.f32.mrb[135].mxu1  ;;  %v13038_v56 = vpop.f32.mrb[125].mxu0 }
 0x36a   : > { %v16561_v16 = vadd.f32 %v13079_v25, %v16348_v28  ;;  %v13082_v24 = vadd.f32 %v13081_v14, %v13080_v45  ;;  %v13039_v21 = vadd.f32 %v13038_v56, %v13037_v17  ;;  %v13040_v12 = vpop.f32.mrb[126].mxu0  ;;  %v16572_v54 = vpop.permute.xlu0 %6163 }
 0x36b   : > { %v13041_v51 = vpop.f32.mrb[127].mxu0  ;;  %20918 = vst [vmem:[#allocation116_spill] sm:$0xff] %v16572_v54  ;;  %v16576_v14 = vpop.permute.xlu1 %6168 }
 0x36c   : > { %v16566_v2 = vadd.f32 %v13082_v24, %v16352_v26  ;;  %v16570_v13 = vadd.f32 %v13039_v21, %v3392_v55  ;;  %v13042_v44 = vadd.f32 %v13041_v51, %v13040_v12  ;;  %20919 = vst [vmem:[#allocation117_spill] sm:$0xff] %v16576_v14 }
 0x36e   : > { %v13083_v28 = vpop.f32.mrb[136].mxu1  ;;  %v16574_v25 = vadd.f32 %v13042_v44, %v3395_v38  ;;  %v16583_v12 = vpop.permute.xlu0 %6173  ;;  %v3403_v44 = vadd.f32 %v16508_v30, %v15027_v40  ;;  %v3408_v30 = vadd.f32 %v16522_v0, %v15045_v53 }
 0x36f   : > { %v13084_v45 = vpop.f32.mrb[137].mxu1  ;;  %20920 = vst [vmem:[#allocation118_spill] sm:$0xff] %v16583_v12 }
 0x370   : > { %v13085_v33 = vadd.f32 %v13084_v45, %v13083_v28  ;;  %v13086_v18 = vpop.f32.mrb[138].mxu1  ;;  %v13043_v17 = vpop.f32.mrb[128].mxu0 }
 0x371   : > { %v13087_v56 = vpop.f32.mrb[139].mxu1  ;;  %v13044_v26 = vpop.f32.mrb[129].mxu0 }
 0x372   : > { %v16579_v24 = vadd.f32 %v13085_v33, %v16370_v60  ;;  %v13088_v32 = vadd.f32 %v13087_v56, %v13086_v18  ;;  %v13045_v55 = vadd.f32 %v13044_v26, %v13043_v17  ;;  %v13046_v21 = vpop.f32.mrb[130].mxu0  ;;  %v16592_v60 = vpop.permute.xlu1 %6178 }
 0x373   : > { %v13047_v51 = vpop.f32.mrb[131].mxu0  ;;  %20921 = vst [vmem:[#allocation119_spill] sm:$0xff] %v16592_v60  ;;  %v16596_v12 = vpop.permute.xlu0 %6183 }
 0x374   : > { %v16586_v38 = vadd.f32 %v13088_v32, %v16374_v15  ;;  %v16590_v28 = vadd.f32 %v13045_v55, %v3400_v36  ;;  %v13048_v45 = vadd.f32 %v13047_v51, %v13046_v21  ;;  %20922 = vst [vmem:[#allocation120_spill] sm:$0xff] %v16596_v12 }
 0x376   : > { %v13089_v33 = vpop.f32.mrb[140].mxu1  ;;  %v16594_v18 = vadd.f32 %v13048_v45, %v3403_v44  ;;  %v16603_v21 = vpop.permute.xlu1 %6188  ;;  %v3411_v45 = vadd.f32 %v16524_v3, %v15037_v48 }
 0x377   : > { %v13090_v41 = vpop.f32.mrb[141].mxu1  ;;  %20923 = vst [vmem:[#allocation121_spill] sm:$0xff] %v16603_v21 }
 0x378   : > { %v13091_v34 = vadd.f32 %v13090_v41, %v13089_v33  ;;  %v13092_v17 = vpop.f32.mrb[142].mxu1  ;;  %v13049_v56 = vpop.f32.mrb[132].mxu0 }
 0x379   : > { %v13093_v26 = vpop.f32.mrb[143].mxu1  ;;  %v13050_v15 = vpop.f32.mrb[133].mxu0 }
 0x37a   : > { %v16599_v32 = vadd.f32 %v13091_v34, %v16394_v35  ;;  %v13094_v40 = vadd.f32 %v13093_v26, %v13092_v17  ;;  %v13051_v36 = vadd.f32 %v13050_v15, %v13049_v56  ;;  %v13052_v55 = vpop.f32.mrb[134].mxu0  ;;  %v16614_v26 = vpop.permute.xlu0 %6193 }
 0x37b   : > { %v13053_v51 = vpop.f32.mrb[135].mxu0  ;;  %20924 = vst [vmem:[#allocation122_spill] sm:$0xff] %v16614_v26  ;;  %v16616_v60 = vpop.permute.xlu1 %6198 }
 0x37c   : > { %v16606_v44 = vadd.f32 %v13094_v40, %v16396_v4  ;;  %v16610_v33 = vadd.f32 %v13051_v36, %v3408_v30  ;;  %v13054_v41 = vadd.f32 %v13053_v51, %v13052_v55  ;;  %20925 = vst [vmem:[#allocation123_spill] sm:$0xff] %v16616_v60 }
 0x37e   : > { %v13095_v35 = vpop.f32.mrb[144].mxu1  ;;  %v16612_v34 = vadd.f32 %v13054_v41, %v3411_v45  ;;  %v16627_v41 = vpop.permute.xlu0 %6203 }
 0x37f   : > { %v13096_v17 = vpop.f32.mrb[145].mxu1  ;;  %20926 = vst [vmem:[#allocation124_spill] sm:$0xff] %v16627_v41 }
 0x380   : > { %v13097_v53 = vadd.f32 %v13096_v17, %v13095_v35  ;;  %v13098_v0 = vpop.f32.mrb[146].mxu1  ;;  %v13183_v56 = vpop.f32.mrb[136].mxu0 }
 0x381   : > { %v13099_v15 = vpop.f32.mrb[147].mxu1  ;;  %v13184_v40 = vpop.f32.mrb[137].mxu0 }
 0x382   : > { %v16619_v4 = vadd.f32 %v13097_v53, %v16410_v49  ;;  %v13100_v48 = vadd.f32 %v13099_v15, %v13098_v0  ;;  %v13185_v3 = vadd.f32 %v13184_v40, %v13183_v56  ;;  %v13186_v30 = vpop.f32.mrb[138].mxu0  ;;  %v16634_v0 = vpop.permute.xlu1 %6208 }
 0x383   : > { %v13187_v55 = vpop.f32.mrb[139].mxu0  ;;  %20927 = vst [vmem:[#allocation125_spill] sm:$0xff] %v16634_v0 }
 0x384   : > { %v16622_v36 = vadd.f32 %v13100_v48, %v16414_v29  ;;  %v16625_v51 = vadd.f32 %v13185_v3, %v16541_v57  ;;  %v13188_v45 = vadd.f32 %v13187_v55, %v13186_v30 }
 0x386   : > { %v13101_v35 = vpop.f32.mrb[148].mxu1  ;;  %v16630_v17 = vadd.f32 %v13188_v45, %v16548_v19  ;;  %v3897_v49 = vsel %vm415_vm0, %v16625_v51, 0.0  ;;  %v4025_v19 = vmul.f32 %v16625_v51, %v16625_v51 }
 0x387   : > { %v13102_v53 = vpop.f32.mrb[149].mxu1  ;;  %3898 = vadd.xlane.f32.xlu0 %v3897_v49 }
 0x388   : > { %v13103_v29 = vadd.f32 %v13102_v53, %v13101_v35  ;;  %v13104_v56 = vpop.f32.mrb[150].mxu1  ;;  %v13189_v15 = vpop.f32.mrb[140].mxu0  ;;  %v3900_v57 = vsel %vm415_vm0, %v16630_v17, 0.0  ;;  %v4026_v48 = vmul.f32 %v16630_v17, %v16630_v17 }
 0x389   : > { %v13105_v40 = vpop.f32.mrb[151].mxu1  ;;  %v13190_v30 = vpop.f32.mrb[141].mxu0  ;;  %3901 = vadd.xlane.f32.xlu1 %v3900_v57 }
 0x38a   : > { %v16643_v3 = vadd.f32 %v13103_v29, %v16428_v10  ;;  %v13106_v55 = vadd.f32 %v13105_v40, %v13104_v56  ;;  %v13191_v45 = vadd.f32 %v13190_v30, %v13189_v15  ;;  %v13192_v35 = vpop.f32.mrb[142].mxu0  ;;  %v4060_v49 = vsel %vm415_vm0, %v4026_v48, 0.0  ;;  %v16646_v53 = vpop.permute.xlu0 %6480 }
 0x38b   : > { %20928 = vst [vmem:[#allocation126_spill] sm:$0xff] %v16646_v53  ;;  %v13193_v0 = vpop.f32.mrb[143].mxu0  ;;  %4061 = vadd.xlane.f32.xlu0 %v4060_v49  ;;  %v4057_v10 = vsel %vm415_vm0, %v4025_v19, 0.0  ;;  %v16655_v29 = vpop.permute.xlu1 %6485 }
 0x38c   : > { %v16649_v60 = vadd.f32 %v13106_v55, %v16432_v43  ;;  %v16652_v26 = vadd.f32 %v13191_v45, %v16561_v16  ;;  %v13194_v41 = vadd.f32 %v13193_v0, %v13192_v35  ;;  %20929 = vst [vmem:[#allocation127_spill] sm:$0xff] %v16655_v29 }
 0x38d   : > { %4058 = vadd.xlane.f32.xlu1 %v4057_v10 }
 0x38e   : > { %v13107_v56 = vpop.f32.mrb[152].mxu1  ;;  %v16658_v15 = vadd.f32 %v13194_v41, %v16566_v2  ;;  %v3903_v57 = vsel %vm415_vm0, %v16652_v26, 0.0  ;;  %v4027_v40 = vmul.f32 %v16652_v26, %v16652_v26  ;;  %v16665_v55 = vpop.permute.xlu0 %6490 }
 0x38f   : > { %v13108_v43 = vpop.f32.mrb[153].mxu1  ;;  %3904 = vadd.xlane.f32.xlu0 %v3903_v57  ;;  %20930 = vst [vmem:[#allocation128_spill] sm:$0xff] %v16665_v55  ;;  %v16674_v57 = vpop.permute.xlu1 %6495 }
 0x390   : > { %v13109_v16 = vadd.f32 %v13108_v43, %v13107_v56  ;;  %v13110_v48 = vpop.f32.mrb[154].mxu1  ;;  %v13195_v0 = vpop.f32.mrb[144].mxu0  ;;  %v4063_v19 = vsel %vm415_vm0, %v4027_v40, 0.0  ;;  %v3906_v10 = vsel %vm415_vm0, %v16658_v15, 0.0  ;;  %v4028_v56 = vmul.f32 %v16658_v15, %v16658_v15  ;;  %20931 = vst [vmem:[#allocation129_spill] sm:$0xff] %v16674_v57 }
 0x391   : > { %v13111_v30 = vpop.f32.mrb[155].mxu1  ;;  %v13196_v2 = vpop.f32.mrb[145].mxu0  ;;  %4064 = vadd.xlane.f32.xlu1 %v4063_v19 }
 0x392   : > { %v16668_v45 = vadd.f32 %v13109_v16, %v16446_v6  ;;  %v13112_v41 = vadd.f32 %v13111_v30, %v13110_v48  ;;  %v13197_v35 = vadd.f32 %v13196_v2, %v13195_v0  ;;  %v13198_v49 = vpop.f32.mrb[146].mxu0  ;;  %v4066_v30 = vsel %vm415_vm0, %v4028_v56, 0.0  ;;  %v14441_v56 = vld [vmem:[%s20790_s6] sm:$0xff]  }
 0x393   : > { %v13199_v40 = vpop.f32.mrb[147].mxu0  ;;  %3907 = vadd.xlane.f32.xlu0 %v3906_v10  ;;  %13817 = vmatprep.subr.bf16.mxu1 %v14441_v56 }
 0x394   : > { %v16677_v43 = vadd.f32 %v13112_v41, %v16448_v27  ;;  %v16680_v6 = vadd.f32 %v13197_v35, %v16579_v24  ;;  %v13200_v16 = vadd.f32 %v13199_v40, %v13198_v49  ;;  %v16690_v41 = vpop.permute.xlu0 %6500  ;;  %v16692_v40 = vpop.permute.xlu1 %6505  ;;  %13818 = vmatpush3.bf16.msra.mxu1 %v14441_v56 }
 0x395   : > { %20932 = vst [vmem:[#allocation130_spill] sm:$0xff] %v16690_v41  ;;  %20933 = vst [vmem:[#allocation131_spill] sm:$0xff] %v16692_v40 }
 0x396   : > { %v13113_v48 = vpop.f32.mrb[156].mxu1  ;;  %v16683_v0 = vadd.f32 %v13200_v16, %v16586_v38  ;;  %v3909_v19 = vsel %vm415_vm0, %v16680_v6, 0.0  ;;  %v4029_v27 = vmul.f32 %v16680_v6, %v16680_v6 }
 0x397   : > { %v13114_v2 = vpop.f32.mrb[157].mxu1  ;;  %3910 = vadd.xlane.f32.xlu1 %v3909_v19  ;;  %4067 = vadd.xlane.f32.xlu0 %v4066_v30 }
 0x398   : > { %v13115_v24 = vadd.f32 %v13114_v2, %v13113_v48  ;;  %v13116_v35 = vpop.f32.mrb[158].mxu1  ;;  %v13201_v49 = vpop.f32.mrb[148].mxu0  ;;  %v4069_v19 = vsel %vm415_vm0, %v4029_v27, 0.0  ;;  %v3912_v48 = vsel %vm415_vm0, %v16683_v0, 0.0  ;;  %v4030_v30 = vmul.f32 %v16683_v0, %v16683_v0 }
 0x399   : > { %v13117_v10 = vpop.f32.mrb[159].mxu1  ;;  %v13202_v16 = vpop.f32.mrb[149].mxu0 }
 0x39a   : > { %v16695_v38 = vadd.f32 %v13115_v24, %v16462_v11  ;;  %v13118_v29 = vadd.f32 %v13117_v10, %v13116_v35  ;;  %v13203_v57 = vadd.f32 %v13202_v16, %v13201_v49  ;;  %v13204_v53 = vpop.f32.mrb[150].mxu0  ;;  %v16711_v49 = vpop.permute.xlu0 %6510 }
 0x39b   : > { %v13205_v11 = vpop.f32.mrb[151].mxu0  ;;  %4070 = vadd.xlane.f32.xlu1 %v4069_v19  ;;  %3913 = vadd.xlane.f32.xlu0 %v3912_v48  ;;  %20934 = vst [vmem:[#allocation132_spill] sm:$0xff] %v16711_v49 }
 0x39c   : > { %v16706_v2 = vadd.f32 %v13118_v29, %v16466_v52  ;;  %v16709_v24 = vadd.f32 %v13203_v57, %v16599_v32  ;;  %v13206_v35 = vadd.f32 %v13205_v11, %v13204_v53  ;;  %v4072_v52 = vsel %vm415_vm0, %v4030_v30, 0.0  ;;  %v16721_v32 = vpop.permute.xlu1 %6515 }
 0x39d   : > { %20935 = vst [vmem:[#allocation133_spill] sm:$0xff] %v16721_v32 }
 0x39e   : > { %v13119_v27 = vpop.f32.mrb[160].mxu1  ;;  %v16714_v10 = vadd.f32 %v13206_v35, %v16606_v44  ;;  %v3915_v16 = vsel %vm415_vm0, %v16709_v24, 0.0  ;;  %v4031_v19 = vmul.f32 %v16709_v24, %v16709_v24 }
 0x39f   : > { %v13120_v29 = vpop.f32.mrb[161].mxu1  ;;  %3916 = vadd.xlane.f32.xlu1 %v3915_v16  ;;  %4073 = vadd.xlane.f32.xlu0 %v4072_v52  ;;  %v16731_v52 = vpop.permute.xlu0 %6520 }
 0x3a0   : > { %v13121_v53 = vadd.f32 %v13120_v29, %v13119_v27  ;;  %v13122_v57 = vpop.f32.mrb[162].mxu1  ;;  %v13207_v48 = vpop.f32.mrb[152].mxu0  ;;  %v4075_v30 = vsel %vm415_vm0, %v4031_v19, 0.0  ;;  %v3918_v49 = vsel %vm415_vm0, %v16714_v10, 0.0  ;;  %v4032_v16 = vmul.f32 %v16714_v10, %v16714_v10  ;;  %20936 = vst [vmem:[#allocation134_spill] sm:$0xff] %v16731_v52 }
 0x3a1   : > { %v13123_v56 = vpop.f32.mrb[163].mxu1  ;;  %v13208_v11 = vpop.f32.mrb[153].mxu0 }
 0x3a2   : > { %v16724_v44 = vadd.f32 %v13121_v53, %v16480_v50  ;;  %v13124_v35 = vadd.f32 %v13123_v56, %v13122_v57  ;;  %v13209_v40 = vadd.f32 %v13208_v11, %v13207_v48  ;;  %v13210_v41 = vpop.f32.mrb[154].mxu0  ;;  %v16739_v57 = vpop.permute.xlu1 %6525  ;;  %v4078_v11 = vsel %vm415_vm0, %v4032_v16, 0.0 }
 0x3a3   : > { %v13211_v29 = vpop.f32.mrb[155].mxu0  ;;  %4076 = vadd.xlane.f32.xlu1 %v4075_v30  ;;  %3919 = vadd.xlane.f32.xlu0 %v3918_v49  ;;  %20937 = vst [vmem:[#allocation135_spill] sm:$0xff] %v16739_v57  ;;  %v16749_v30 = vpop.permute.xlu0 %6530 }
 0x3a4   : > { %v16734_v27 = vadd.f32 %v13124_v35, %v16484_v59  ;;  %v16737_v50 = vadd.f32 %v13209_v40, %v16619_v4  ;;  %v13212_v53 = vadd.f32 %v13211_v29, %v13210_v41  ;;  %20938 = vst [vmem:[#allocation136_spill] sm:$0xff] %v16749_v30 }
 0x3a6   : > { %v13125_v19 = vpop.f32.mrb[164].mxu1  ;;  %v16742_v48 = vadd.f32 %v13212_v53, %v16622_v36  ;;  %v3921_v56 = vsel %vm415_vm0, %v16737_v50, 0.0  ;;  %v4033_v35 = vmul.f32 %v16737_v50, %v16737_v50 }
 0x3a7   : > { %v13126_v59 = vpop.f32.mrb[165].mxu1  ;;  %3922 = vadd.xlane.f32.xlu1 %v3921_v56  ;;  %4079 = vadd.xlane.f32.xlu0 %v4078_v11  ;;  %v16759_v56 = vpop.permute.xlu1 %6535 }
 0x3a8   : > { %v13127_v4 = vadd.f32 %v13126_v59, %v13125_v19  ;;  %v13128_v40 = vpop.f32.mrb[166].mxu1  ;;  %v13213_v41 = vpop.f32.mrb[156].mxu0  ;;  %v4081_v16 = vsel %vm415_vm0, %v4033_v35, 0.0  ;;  %v3924_v32 = vsel %vm415_vm0, %v16742_v48, 0.0  ;;  %v4034_v19 = vmul.f32 %v16742_v48, %v16742_v48  ;;  %20939 = vst [vmem:[#allocation137_spill] sm:$0xff] %v16759_v56 }
 0x3a9   : > { %v13129_v49 = vpop.f32.mrb[167].mxu1  ;;  %v13214_v29 = vpop.f32.mrb[157].mxu0 }
 0x3aa   : > { %v16752_v36 = vadd.f32 %v13127_v4, %v16498_v7  ;;  %v13130_v53 = vadd.f32 %v13129_v49, %v13128_v40  ;;  %v13215_v57 = vadd.f32 %v13214_v29, %v13213_v41  ;;  %v13216_v52 = vpop.f32.mrb[158].mxu0  ;;  %v4084_v49 = vsel %vm415_vm0, %v4034_v19, 0.0 }
 0x3ab   : > { %v13217_v59 = vpop.f32.mrb[159].mxu0  ;;  %4082 = vadd.xlane.f32.xlu1 %v4081_v16  ;;  %3925 = vadd.xlane.f32.xlu0 %v3924_v32  ;;  %v16780_v16 = vpop.permute.xlu1 %6545 }
 0x3ac   : > { %v16762_v11 = vadd.f32 %v13130_v53, %v16500_v63  ;;  %v16765_v7 = vadd.f32 %v13215_v57, %v16643_v3  ;;  %v13218_v4 = vadd.f32 %v13217_v59, %v13216_v52  ;;  %v16775_v53 = vpop.permute.xlu0 %6540  ;;  %20941 = vst [vmem:[#allocation139_spill] sm:$0xff] %v16780_v16 }
 0x3ad   : > { %20940 = vst [vmem:[#allocation138_spill] sm:$0xff] %v16775_v53 }
 0x3ae   : > { %v13131_v40 = vpop.f32.mrb[168].mxu1  ;;  %v16768_v35 = vadd.f32 %v13218_v4, %v16649_v60  ;;  %v3927_v41 = vsel %vm415_vm0, %v16765_v7, 0.0  ;;  %v4035_v63 = vmul.f32 %v16765_v7, %v16765_v7  ;;  %v14442_v60 = vld [vmem:[%s20790_s6 + $0x8] sm:$0xff]  }
 0x3af   : > { %v13132_v29 = vpop.f32.mrb[169].mxu1  ;;  %3928 = vadd.xlane.f32.xlu1 %v3927_v41  ;;  %4085 = vadd.xlane.f32.xlu0 %v4084_v49 }
 0x3b0   : > { %v13133_v3 = vadd.f32 %v13132_v29, %v13131_v40  ;;  %v13134_v32 = vpop.f32.mrb[170].mxu1  ;;  %v13219_v52 = vpop.f32.mrb[160].mxu0  ;;  %v4087_v41 = vsel %vm415_vm0, %v4035_v63, 0.0  ;;  %v3930_v40 = vsel %vm415_vm0, %v16768_v35, 0.0  ;;  %v4036_v49 = vmul.f32 %v16768_v35, %v16768_v35  ;;  %13851 = vmatprep.subr.bf16.mxu0 %v14442_v60 }
 0x3b1   : > { %v13135_v57 = vpop.f32.mrb[171].mxu1  ;;  %v13220_v59 = vpop.f32.mrb[161].mxu0  ;;  %13852 = vmatpush3.bf16.msra.mxu0 %v14442_v60 }
 0x3b2   : > { %v16783_v19 = vadd.f32 %v13133_v3, %v16514_v58  ;;  %v13136_v4 = vadd.f32 %v13135_v57, %v13134_v32  ;;  %v13221_v56 = vadd.f32 %v13220_v59, %v13219_v52  ;;  %v13222_v30 = vpop.f32.mrb[162].mxu0  ;;  %v16796_v32 = vpop.permute.xlu0 %6550 }
 0x3b3   : > { %v13223_v16 = vpop.f32.mrb[163].mxu0  ;;  %4088 = vadd.xlane.f32.xlu1 %v4087_v41  ;;  %3931 = vadd.xlane.f32.xlu0 %v3930_v40  ;;  %20942 = vst [vmem:[#allocation140_spill] sm:$0xff] %v16796_v32  ;;  %v16806_v41 = vpop.permute.xlu1 %6555 }
 0x3b4   : > { %v16791_v29 = vadd.f32 %v13136_v4, %v16518_v61  ;;  %v16794_v58 = vadd.f32 %v13221_v56, %v16668_v45  ;;  %v13224_v3 = vadd.f32 %v13223_v16, %v13222_v30  ;;  %v4090_v61 = vsel %vm415_vm0, %v4036_v49, 0.0  ;;  %20943 = vst [vmem:[#allocation141_spill] sm:$0xff] %v16806_v41 }
 0x3b6   : > { %v13137_v63 = vpop.f32.mrb[172].mxu1  ;;  %v16799_v52 = vadd.f32 %v13224_v3, %v16677_v43  ;;  %v3933_v57 = vsel %vm415_vm0, %v16794_v58, 0.0  ;;  %v4037_v4 = vmul.f32 %v16794_v58, %v16794_v58 }
 0x3b7   : > { %v13138_v59 = vpop.f32.mrb[173].mxu1  ;;  %3934 = vadd.xlane.f32.xlu1 %v3933_v57  ;;  %4091 = vadd.xlane.f32.xlu0 %v4090_v61  ;;  %v16816_v61 = vpop.permute.xlu0 %6560 }
 0x3b8   : > { %v13139_v45 = vadd.f32 %v13138_v59, %v13137_v63  ;;  %v13140_v30 = vpop.f32.mrb[174].mxu1  ;;  %v13225_v56 = vpop.f32.mrb[164].mxu0  ;;  %v4093_v49 = vsel %vm415_vm0, %v4037_v4, 0.0  ;;  %v3936_v32 = vsel %vm415_vm0, %v16799_v52, 0.0  ;;  %v4038_v57 = vmul.f32 %v16799_v52, %v16799_v52  ;;  %20944 = vst [vmem:[#allocation142_spill] sm:$0xff] %v16816_v61 }
 0x3b9   : > { %v13141_v60 = vpop.f32.mrb[175].mxu1  ;;  %v13226_v16 = vpop.f32.mrb[165].mxu0 }
 0x3ba   : > { %v16809_v43 = vadd.f32 %v13139_v45, %v16532_v62  ;;  %v13142_v40 = vadd.f32 %v13141_v60, %v13140_v30  ;;  %v13227_v3 = vadd.f32 %v13226_v16, %v13225_v56  ;;  %v13228_v53 = vpop.f32.mrb[166].mxu0  ;;  %v16824_v30 = vpop.permute.xlu1 %6565  ;;  %v4096_v16 = vsel %vm415_vm0, %v4038_v57, 0.0 }
 0x3bb   : > { %v13229_v59 = vpop.f32.mrb[167].mxu0  ;;  %4094 = vadd.xlane.f32.xlu1 %v4093_v49  ;;  %3937 = vadd.xlane.f32.xlu0 %v3936_v32  ;;  %20945 = vst [vmem:[#allocation143_spill] sm:$0xff] %v16824_v30  ;;  %v16834_v49 = vpop.permute.xlu0 %6570 }
 0x3bc   : > { %v16819_v63 = vadd.f32 %v13142_v40, %v16536_v9  ;;  %v16822_v62 = vadd.f32 %v13227_v3, %v16695_v38  ;;  %v13230_v45 = vadd.f32 %v13229_v59, %v13228_v53  ;;  %20946 = vst [vmem:[#allocation144_spill] sm:$0xff] %v16834_v49 }
 0x3be   : > { %v13143_v4 = vpop.f32.mrb[176].mxu1  ;;  %v16827_v56 = vadd.f32 %v13230_v45, %v16706_v2  ;;  %v3939_v60 = vsel %vm415_vm0, %v16822_v62, 0.0  ;;  %v4039_v40 = vmul.f32 %v16822_v62, %v16822_v62 }
 0x3bf   : > { %v13144_v9 = vpop.f32.mrb[177].mxu1  ;;  %3940 = vadd.xlane.f32.xlu1 %v3939_v60  ;;  %4097 = vadd.xlane.f32.xlu0 %v4096_v16  ;;  %v16844_v60 = vpop.permute.xlu1 %6575 }
 0x3c0   : > { %v13145_v38 = vadd.f32 %v13144_v9, %v13143_v4  ;;  %v13146_v32 = vpop.f32.mrb[178].mxu1  ;;  %v13231_v53 = vpop.f32.mrb[168].mxu0  ;;  %v4099_v57 = vsel %vm415_vm0, %v4039_v40, 0.0  ;;  %v3942_v41 = vsel %vm415_vm0, %v16827_v56, 0.0  ;;  %v4040_v4 = vmul.f32 %v16827_v56, %v16827_v56  ;;  %20947 = vst [vmem:[#allocation145_spill] sm:$0xff] %v16844_v60 }
 0x3c1   : > { %v13147_v3 = vpop.f32.mrb[179].mxu1  ;;  %v13232_v59 = vpop.f32.mrb[169].mxu0 }
 0x3c2   : > { %v16837_v2 = vadd.f32 %v13145_v38, %v16552_v37  ;;  %v13148_v45 = vadd.f32 %v13147_v3, %v13146_v32  ;;  %v13233_v30 = vadd.f32 %v13232_v59, %v13231_v53  ;;  %v13234_v61 = vpop.f32.mrb[170].mxu0  ;;  %v4102_v3 = vsel %vm415_vm0, %v4040_v4, 0.0 }
 0x3c3   : > { %v13235_v9 = vpop.f32.mrb[171].mxu0  ;;  %4100 = vadd.xlane.f32.xlu1 %v4099_v57  ;;  %3943 = vadd.xlane.f32.xlu0 %v3942_v41  ;;  %v16862_v57 = vpop.permute.xlu1 %6585 }
 0x3c4   : > { %v16847_v16 = vadd.f32 %v13148_v45, %v16554_v31  ;;  %v16850_v37 = vadd.f32 %v13233_v30, %v16724_v44  ;;  %v13236_v38 = vadd.f32 %v13235_v9, %v13234_v61  ;;  %v16860_v45 = vpop.permute.xlu0 %6580  ;;  %20949 = vst [vmem:[#allocation147_spill] sm:$0xff] %v16862_v57 }
 0x3c5   : > { %20948 = vst [vmem:[#allocation146_spill] sm:$0xff] %v16860_v45 }
 0x3c6   : > { %v13149_v32 = vpop.f32.mrb[180].mxu1  ;;  %v16853_v40 = vadd.f32 %v13236_v38, %v16734_v27  ;;  %v3945_v53 = vsel %vm415_vm0, %v16850_v37, 0.0  ;;  %v4041_v31 = vmul.f32 %v16850_v37, %v16850_v37 }
 0x3c7   : > { %v13150_v59 = vpop.f32.mrb[181].mxu1  ;;  %3946 = vadd.xlane.f32.xlu1 %v3945_v53  ;;  %4103 = vadd.xlane.f32.xlu0 %v4102_v3 }
 0x3c8   : > { %v13151_v44 = vadd.f32 %v13150_v59, %v13149_v32  ;;  %v13152_v41 = vpop.f32.mrb[182].mxu1  ;;  %v13237_v61 = vpop.f32.mrb[172].mxu0  ;;  %v4105_v49 = vsel %vm415_vm0, %v4041_v31, 0.0  ;;  %v3948_v45 = vsel %vm415_vm0, %v16853_v40, 0.0  ;;  %v4042_v32 = vmul.f32 %v16853_v40, %v16853_v40 }
 0x3c9   : > { %v13153_v30 = vpop.f32.mrb[183].mxu1  ;;  %v13238_v9 = vpop.f32.mrb[173].mxu0 }
 0x3ca   : > { %v16865_v27 = vadd.f32 %v13151_v44, %v16570_v13  ;;  %v13154_v38 = vadd.f32 %v13153_v30, %v13152_v41  ;;  %v13239_v4 = vadd.f32 %v13238_v9, %v13237_v61  ;;  %v13240_v60 = vpop.f32.mrb[174].mxu0  ;;  %v16878_v41 = vpop.permute.xlu0 %6590  ;;  %v4108_v30 = vsel %vm415_vm0, %v4042_v32, 0.0 }
 0x3cb   : > { %v13241_v3 = vpop.f32.mrb[175].mxu0  ;;  %4106 = vadd.xlane.f32.xlu1 %v4105_v49  ;;  %3949 = vadd.xlane.f32.xlu0 %v3948_v45  ;;  %20950 = vst [vmem:[#allocation148_spill] sm:$0xff] %v16878_v41  ;;  %v16888_v45 = vpop.permute.xlu1 %6595 }
 0x3cc   : > { %v16873_v53 = vadd.f32 %v13154_v38, %v16574_v25  ;;  %v16876_v13 = vadd.f32 %v13239_v4, %v16752_v36  ;;  %v13242_v59 = vadd.f32 %v13241_v3, %v13240_v60  ;;  %20951 = vst [vmem:[#allocation149_spill] sm:$0xff] %v16888_v45 }
 0x3ce   : > { %v13155_v44 = vpop.f32.mrb[184].mxu1  ;;  %v16881_v31 = vadd.f32 %v13242_v59, %v16762_v11  ;;  %v3951_v61 = vsel %vm415_vm0, %v16876_v13, 0.0  ;;  %v4043_v49 = vmul.f32 %v16876_v13, %v16876_v13 }
 0x3cf   : > { %v13156_v25 = vpop.f32.mrb[185].mxu1  ;;  %3952 = vadd.xlane.f32.xlu1 %v3951_v61  ;;  %4109 = vadd.xlane.f32.xlu0 %v4108_v30 }
 0x3d0   : > { %v13157_v36 = vadd.f32 %v13156_v25, %v13155_v44  ;;  %v13158_v60 = vpop.f32.mrb[186].mxu1  ;;  %v13243_v9 = vpop.f32.mrb[176].mxu0  ;;  %v4111_v32 = vsel %vm415_vm0, %v4043_v49, 0.0  ;;  %v3954_v41 = vsel %vm415_vm0, %v16881_v31, 0.0  ;;  %v4044_v61 = vmul.f32 %v16881_v31, %v16881_v31 }
 0x3d1   : > { %v13159_v38 = vpop.f32.mrb[187].mxu1  ;;  %v13244_v4 = vpop.f32.mrb[177].mxu0 }
 0x3d2   : > { %v16891_v11 = vadd.f32 %v13157_v36, %v16590_v28  ;;  %v13160_v3 = vadd.f32 %v13159_v38, %v13158_v60  ;;  %v13245_v59 = vadd.f32 %v13244_v4, %v13243_v9  ;;  %v13246_v57 = vpop.f32.mrb[178].mxu0  ;;  %v16901_v28 = vpop.permute.xlu0 %6600 }
 0x3d3   : > { %v13247_v30 = vpop.f32.mrb[179].mxu0  ;;  %4112 = vadd.xlane.f32.xlu1 %v4111_v32  ;;  %3955 = vadd.xlane.f32.xlu0 %v3954_v41  ;;  %20952 = vst [vmem:[#allocation150_spill] sm:$0xff] %v16901_v28  ;;  %v16906_v49 = vpop.permute.xlu1 %6605 }
 0x3d4   : > { %v16899_v44 = vadd.f32 %v13160_v3, %v16594_v18  ;;  %v16904_v25 = vadd.f32 %v13245_v59, %v16783_v19  ;;  %v13248_v36 = vadd.f32 %v13247_v30, %v13246_v57  ;;  %20953 = vst [vmem:[#allocation151_spill] sm:$0xff] %v16906_v49  ;;  %v4114_v18 = vsel %vm415_vm0, %v4044_v61, 0.0 }
 0x3d6   : > { %v13161_v60 = vpop.f32.mrb[188].mxu1  ;;  %v16909_v9 = vadd.f32 %v13248_v36, %v16791_v29  ;;  %v3957_v38 = vsel %vm415_vm0, %v16904_v25, 0.0  ;;  %v4045_v41 = vmul.f32 %v16904_v25, %v16904_v25  ;;  %v16919_v36 = vpop.permute.xlu0 %6610 }
 0x3d7   : > { %v13162_v4 = vpop.f32.mrb[189].mxu1  ;;  %3958 = vadd.xlane.f32.xlu1 %v3957_v38  ;;  %4115 = vadd.xlane.f32.xlu0 %v4114_v18  ;;  %20954 = vst [vmem:[#allocation152_spill] sm:$0xff] %v16919_v36 }
 0x3d8   : > { %v13163_v19 = vadd.f32 %v13162_v4, %v13161_v60  ;;  %v13164_v3 = vpop.f32.mrb[190].mxu1  ;;  %v13249_v57 = vpop.f32.mrb[180].mxu0  ;;  %v4117_v61 = vsel %vm415_vm0, %v4045_v41, 0.0  ;;  %v3960_v45 = vsel %vm415_vm0, %v16909_v9, 0.0  ;;  %v4046_v60 = vmul.f32 %v16909_v9, %v16909_v9 }
 0x3d9   : > { %v13165_v59 = vpop.f32.mrb[191].mxu1  ;;  %v13250_v29 = vpop.f32.mrb[181].mxu0 }
 0x3da   : > { %v16917_v32 = vadd.f32 %v13163_v19, %v16610_v33  ;;  %v13166_v30 = vadd.f32 %v13165_v59, %v13164_v3  ;;  %v13251_v49 = vadd.f32 %v13250_v29, %v13249_v57  ;;  %v13252_v28 = vpop.f32.mrb[182].mxu0  ;;  %v16929_v33 = vpop.permute.xlu1 %6615  ;;  %v4120_v57 = vsel %vm415_vm0, %v4046_v60, 0.0 }
 0x3db   : > { %v13253_v18 = vpop.f32.mrb[183].mxu0  ;;  %4118 = vadd.xlane.f32.xlu1 %v4117_v61  ;;  %3961 = vadd.xlane.f32.xlu0 %v3960_v45  ;;  %20955 = vst [vmem:[#allocation153_spill] sm:$0xff] %v16929_v33  ;;  %v16942_v45 = vpop.permute.xlu0 %6620 }
 0x3dc   : > { %v16927_v38 = vadd.f32 %v13166_v30, %v16612_v34  ;;  %v16932_v4 = vadd.f32 %v13251_v49, %v16809_v43  ;;  %v13254_v19 = vadd.f32 %v13253_v18, %v13252_v28  ;;  %20956 = vst [vmem:[#allocation154_spill] sm:$0xff] %v16942_v45 }
 0x3de   : > { %v16935_v41 = vadd.f32 %v13254_v19, %v16819_v63  ;;  %v3963_v3 = vsel %vm415_vm0, %v16932_v4, 0.0  ;;  %v4047_v34 = vmul.f32 %v16932_v4, %v16932_v4  ;;  %v16944_v43 = vpop.permute.xlu1 %6625 }
 0x3df   : > { %3964 = vadd.xlane.f32.xlu1 %v3963_v3  ;;  %4121 = vadd.xlane.f32.xlu0 %v4120_v57  ;;  %20957 = vst [vmem:[#allocation155_spill] sm:$0xff] %v16944_v43  ;;  %v16954_v3 = vpop.permute.xlu0 %6630 }
 0x3e0   : > { %v13255_v59 = vpop.f32.mrb[184].mxu0  ;;  %v4123_v63 = vsel %vm415_vm0, %v4047_v34, 0.0  ;;  %v3966_v30 = vsel %vm415_vm0, %v16935_v41, 0.0  ;;  %v4048_v61 = vmul.f32 %v16935_v41, %v16935_v41  ;;  %20958 = vst [vmem:[#allocation156_spill] sm:$0xff] %v16954_v3 }
 0x3e1   : > { %v13256_v29 = vpop.f32.mrb[185].mxu0 }
 0x3e2   : > { %v13257_v28 = vadd.f32 %v13256_v29, %v13255_v59  ;;  %v13258_v49 = vpop.f32.mrb[186].mxu0  ;;  %v4126_v59 = vsel %vm415_vm0, %v4048_v61, 0.0 }
 0x3e3   : > { %v13259_v60 = vpop.f32.mrb[187].mxu0  ;;  %4124 = vadd.xlane.f32.xlu1 %v4123_v63  ;;  %3967 = vadd.xlane.f32.xlu0 %v3966_v30  ;;  %v16964_v63 = vpop.permute.xlu1 %6635 }
 0x3e4   : > { %v16952_v18 = vadd.f32 %v13257_v28, %v16837_v2  ;;  %v13260_v19 = vadd.f32 %v13259_v60, %v13258_v49  ;;  %20959 = vst [vmem:[#allocation157_spill] sm:$0xff] %v16964_v63  ;;  %v16971_v43 = vpop.permute.xlu0 %6907 }
 0x3e5   : > { %20960 = vst [vmem:[#allocation158_spill] sm:$0xff] %v16971_v43 }
 0x3e6   : > { %v16957_v57 = vadd.f32 %v13260_v19, %v16847_v16  ;;  %v3969_v34 = vsel %vm415_vm0, %v16952_v18, 0.0  ;;  %v4049_v29 = vmul.f32 %v16952_v18, %v16952_v18 }
 0x3e7   : > { %3970 = vadd.xlane.f32.xlu1 %v3969_v34  ;;  %4127 = vadd.xlane.f32.xlu0 %v4126_v59  ;;  %v16976_v63 = vpop.permute.xlu1 %6912 }
 0x3e8   : > { %v13261_v2 = vpop.f32.mrb[188].mxu0  ;;  %v4129_v60 = vsel %vm415_vm0, %v4049_v29, 0.0  ;;  %v3972_v16 = vsel %vm415_vm0, %v16957_v57, 0.0  ;;  %v4050_v19 = vmul.f32 %v16957_v57, %v16957_v57  ;;  %20961 = vst [vmem:[#allocation159_spill] sm:$0xff] %v16976_v63 }
 0x3e9   : > { %v13262_v28 = vpop.f32.mrb[189].mxu0 }
 0x3ea   : > { %v13263_v49 = vadd.f32 %v13262_v28, %v13261_v2  ;;  %v13264_v30 = vpop.f32.mrb[190].mxu0  ;;  %v4132_v28 = vsel %vm415_vm0, %v4050_v19, 0.0 }
 0x3eb   : > { %v13265_v61 = vpop.f32.mrb[191].mxu0  ;;  %4130 = vadd.xlane.f32.xlu1 %v4129_v60  ;;  %3973 = vadd.xlane.f32.xlu0 %v3972_v16  ;;  %v16993_v3 = vpop.permute.xlu1 %6922 }
 0x3ec   : > { %v16974_v34 = vadd.f32 %v13263_v49, %v16865_v27  ;;  %v13266_v59 = vadd.f32 %v13265_v61, %v13264_v30  ;;  %v16986_v27 = vpop.permute.xlu0 %6917  ;;  %20963 = vst [vmem:[#allocation161_spill] sm:$0xff] %v16993_v3 }
 0x3ed   : > { %20962 = vst [vmem:[#allocation160_spill] sm:$0xff] %v16986_v27  ;;  %v12169_v27 = vld [vmem:[%s20791_s7 + $0x580] sm:$0xff] }
 0x3ee   : > { %v16979_v2 = vadd.f32 %v13266_v59, %v16873_v53  ;;  %v3975_v29 = vsel %vm415_vm0, %v16974_v34, 0.0  ;;  %v4051_v60 = vmul.f32 %v16974_v34, %v16974_v34 }
 0x3ef   : > { %3976 = vadd.xlane.f32.xlu1 %v3975_v29  ;;  %4133 = vadd.xlane.f32.xlu0 %v4132_v28 }
 0x3f0   : > { %v13267_v16 = vpop.f32.mrb[192].mxu0  ;;  %v4135_v61 = vsel %vm415_vm0, %v4051_v60, 0.0  ;;  %v3978_v53 = vsel %vm415_vm0, %v16979_v2, 0.0  ;;  %v4052_v59 = vmul.f32 %v16979_v2, %v16979_v2 }
 0x3f1   : > { %v13268_v45 = vpop.f32.mrb[193].mxu0 }
 0x3f2   : > { %v13269_v49 = vadd.f32 %v13268_v45, %v13267_v16  ;;  %v13270_v30 = vpop.f32.mrb[194].mxu0  ;;  %v4138_v16 = vsel %vm415_vm0, %v4052_v59, 0.0 }
 0x3f3   : > { %v13271_v19 = vpop.f32.mrb[195].mxu0  ;;  %4136 = vadd.xlane.f32.xlu1 %v4135_v61  ;;  %3979 = vadd.xlane.f32.xlu0 %v3978_v53  ;;  %v17006_v61 = vpop.permute.xlu0 %6927 }
 0x3f4   : > { %v16996_v29 = vadd.f32 %v13269_v49, %v16891_v11  ;;  %v13272_v28 = vadd.f32 %v13271_v19, %v13270_v30  ;;  %20964 = vst [vmem:[#allocation162_spill] sm:$0xff] %v17006_v61  ;;  %v17008_v11 = vpop.permute.xlu1 %6932 }
 0x3f5   : > { %20965 = vst [vmem:[#allocation163_spill] sm:$0xff] %v17008_v11 }
 0x3f6   : > { %v16999_v45 = vadd.f32 %v13272_v28, %v16899_v44  ;;  %v3981_v60 = vsel %vm415_vm0, %v16996_v29, 0.0  ;;  %v4053_v33 = vmul.f32 %v16996_v29, %v16996_v29 }
 0x3f7   : > { %3982 = vadd.xlane.f32.xlu1 %v3981_v60  ;;  %4139 = vadd.xlane.f32.xlu0 %v4138_v16  ;;  %v17018_v61 = vpop.permute.xlu0 %6937 }
 0x3f8   : > { %v13273_v53 = vpop.f32.mrb[196].mxu0  ;;  %v4141_v44 = vsel %vm415_vm0, %v4053_v33, 0.0  ;;  %v3984_v19 = vsel %vm415_vm0, %v16999_v45, 0.0  ;;  %v4054_v59 = vmul.f32 %v16999_v45, %v16999_v45  ;;  %20966 = vst [vmem:[#allocation164_spill] sm:$0xff] %v17018_v61 }
 0x3f9   : > { %v13274_v36 = vpop.f32.mrb[197].mxu0 }
 0x3fa   : > { %v13275_v49 = vadd.f32 %v13274_v36, %v13273_v53  ;;  %v13276_v30 = vpop.f32.mrb[198].mxu0  ;;  %v4144_v53 = vsel %vm415_vm0, %v4054_v59, 0.0 }
 0x3fb   : > { %v13277_v28 = vpop.f32.mrb[199].mxu0  ;;  %4142 = vadd.xlane.f32.xlu1 %v4141_v44  ;;  %3985 = vadd.xlane.f32.xlu0 %v3984_v19  ;;  %v17028_v44 = vpop.permute.xlu1 %6942 }
 0x3fc   : > { %v17016_v60 = vadd.f32 %v13275_v49, %v16917_v32  ;;  %v13278_v16 = vadd.f32 %v13277_v28, %v13276_v30  ;;  %20967 = vst [vmem:[#allocation165_spill] sm:$0xff] %v17028_v44  ;;  %v17035_v30 = vpop.permute.xlu0 %6947 }
 0x3fd   : > { %20968 = vst [vmem:[#allocation166_spill] sm:$0xff] %v17035_v30 }
 0x3fe   : > { %v17021_v36 = vadd.f32 %v13278_v16, %v16927_v38  ;;  %v3987_v33 = vsel %vm415_vm0, %v17016_v60, 0.0  ;;  %v4055_v11 = vmul.f32 %v17016_v60, %v17016_v60 }
 0x3ff   : > { %3988 = vadd.xlane.f32.xlu1 %v3987_v33  ;;  %4145 = vadd.xlane.f32.xlu0 %v4144_v53  ;;  %v17037_v19 = vpop.permute.xlu1 %6952  ;;  %v12168_v33 = vld [vmem:[%s20791_s7 + $0x578] sm:$0xff] }
 0x400   : > { %v4147_v32 = vsel %vm415_vm0, %v4055_v11, 0.0  ;;  %v3990_v49 = vsel %vm415_vm0, %v17021_v36, 0.0  ;;  %v4056_v38 = vmul.f32 %v17021_v36, %v17021_v36  ;;  %20969 = vst [vmem:[#allocation167_spill] sm:$0xff] %v17037_v19  ;;  %v17040_v28 = vpop.permute.xlu0 %6957 }
 0x401   : > { %20970 = vst [vmem:[#allocation168_spill] sm:$0xff] %v17040_v28  ;;  %v12167_v28 = vld [vmem:[%s20791_s7 + $0x570] sm:$0xff] }
 0x402   : > { %v4150_v59 = vsel %vm415_vm0, %v4056_v38, 0.0 }
 0x403   : > { %4148 = vadd.xlane.f32.xlu1 %v4147_v32  ;;  %3991 = vadd.xlane.f32.xlu0 %v3990_v49  ;;  %v17042_v16 = vpop.permute.xlu1 %6962  ;;  %v12170_v49 = vld [vmem:[%s20791_s7 + $0x588] sm:$0xff] }
 0x404   : > { %20971 = vst [vmem:[#allocation169_spill] sm:$0xff] %v17042_v16  ;;  %v17044_v11 = vpop.permute.xlu0 %6967 }
 0x405   : > { %20972 = vst [vmem:[#allocation170_spill] sm:$0xff] %v17044_v11 }
 0x407   : > { %4151 = vadd.xlane.f32.xlu0 %v4150_v59  ;;  %v17049_v53 = vpop.permute.xlu1 %6972 }
 0x408   : > { %20973 = vst [vmem:[#allocation171_spill] sm:$0xff] %v17049_v53 }
 0x414   : > { %6982 = vperm.xlu1 %14371, %v12168_v33   ;;  %v3899_v32 = vpop.xlane.xlu0 %3898  ;;  %v12172_v33 = vld [vmem:[%s20791_s7 + $0x598] sm:$0xff] }
 0x415   : > { %v17054_v59 = vmul.f32 0.0625, %v3899_v32 }
 0x416   : > { %v3902_v38 = vpop.xlane.xlu1 %3901 }
 0x417   : > { %v17056_v19 = vmul.f32 0.0625, %v3902_v38  ;;  %v4185_v32 = vmul.f32 %v17054_v59, %v17054_v59 }
 0x418   : > { %6992 = vperm.xlu1 %14371, %v12170_v49   ;;  %v4062_v16 = vpop.xlane.xlu0 %4061 }
 0x419   : > { %v4186_v11 = vmul.f32 %v17056_v19, %v17056_v19  ;;  %v4154_v30 = vmul.f32 0.0625, %v4062_v16  ;;  %v12174_v16 = vld [vmem:[%s20791_s7 + $0x5a8] sm:$0xff] }
 0x41a   : > { %v4059_v53 = vpop.xlane.xlu1 %4058 }
 0x41b   : > { %v4218_v38 = vsub.f32 %v4154_v30, %v4186_v11  ;;  %v4153_v44 = vmul.f32 0.0625, %v4059_v53 }
 0x41c   : > { %7002 = vperm.xlu1 %14371, %v12172_v33   ;;  %v3905_v49 = vpop.xlane.xlu0 %3904  ;;  %v12176_v33 = vld [vmem:[%s20791_s7 + $0x5b8] sm:$0xff] }
 0x41d   : > { %v4250_v61 = vmax.f32 %v4218_v38, 0.0  ;;  %v4217_v63 = vsub.f32 %v4153_v44, %v4185_v32  ;;  %v17068_v3 = vmul.f32 0.0625, %v3905_v49  ;;  %6977 = vperm.xlu0 %14370, %v12167_v28   ;;  %v12178_v49 = vld [vmem:[%s20791_s7 + $0x5c8] sm:$0xff] }
 0x41e   : > { %v4065_v43 = vpop.xlane.xlu1 %4064 }
 0x41f   : > { %v4314_v55 = vadd.f32 1e-05, %v4250_v61  ;;  %v4249_v21 = vmax.f32 %v4217_v63, 0.0  ;;  %v4187_v30 = vmul.f32 %v17068_v3, %v17068_v3  ;;  %v4155_v11 = vmul.f32 0.0625, %v4065_v43  ;;  %v12171_v63 = vld [vmem:[%s20791_s7 + $0x590] sm:$0xff] }
 0x420   : > { %7012 = vperm.xlu1 %14371, %v12174_v16   ;;  %v3908_v44 = vpop.xlane.xlu0 %3907 }
 0x421   : > { %14457 = vrsqrt.f32 %v4314_v55  ;;  %v4313_v53 = vadd.f32 1e-05, %v4249_v21  ;;  %v17078_v28 = vmul.f32 0.0625, %v3908_v44  ;;  %6987 = vperm.xlu0 %14370, %v12169_v27   ;;  %v4219_v32 = vsub.f32 %v4155_v11, %v4187_v30  ;;  %v12173_v30 = vld [vmem:[%s20791_s7 + $0x5a0] sm:$0xff] }
 0x423   : > { %14459 = vrsqrt.f32 %v4313_v53  ;;  %v4251_v61 = vmax.f32 %v4219_v32, 0.0  ;;  %v4188_v21 = vmul.f32 %v17078_v28, %v17078_v28 }
 0x424   : > { %7022 = vperm.xlu1 %14371, %v12176_v33   ;;  %v3911_v43 = vpop.xlane.xlu1 %3910  ;;  %v4068_v38 = vpop.xlane.xlu0 %4067 }
 0x425   : > { %v17088_v55 = vmul.f32 0.0625, %v3911_v43  ;;  %v4156_v27 = vmul.f32 0.0625, %v4068_v38  ;;  %6997 = vperm.xlu0 %14370, %v12171_v63   ;;  %v4315_v16 = vadd.f32 1e-05, %v4251_v61  ;;  %v12180_v61 = vld [vmem:[%s20791_s7 + $0x5d8] sm:$0xff]  ;;  %v4282_v38 = vsub.f32 %v16630_v17, %v17056_v19 }
 0x427   : > { %v4220_v11 = vsub.f32 %v4156_v27, %v4188_v21  ;;  %14461 = vrsqrt.f32 %v4315_v16  ;;  %v4189_v33 = vmul.f32 %v17088_v55, %v17088_v55  ;;  %v12175_v21 = vld [vmem:[%s20791_s7 + $0x5b0] sm:$0xff] }
 0x428   : > { %7032 = vperm.xlu1 %14371, %v12178_v49   ;;  %v4071_v44 = vpop.xlane.xlu1 %4070  ;;  %v3914_v53 = vpop.xlane.xlu0 %3913 }
 0x429   : > { %v4252_v32 = vmax.f32 %v4220_v11, 0.0  ;;  %v4157_v43 = vmul.f32 0.0625, %v4071_v44  ;;  %v17098_v63 = vmul.f32 0.0625, %v3914_v53  ;;  %7007 = vperm.xlu0 %14370, %v12173_v30   ;;  %v4281_v11 = vsub.f32 %v16625_v51, %v17054_v59  ;;  %v17120_v51 = vld [vmem:[%s20790_s6 + $0x10] sm:$0xff]   ;;  %v17125_v59 = vld [vmem:[%s20790_s6 + $0x18] sm:$0xff]  }
 0x42a   : > { %13885 = vmatprep.subr.bf16.mxu1 %v17120_v51  ;;  %13919 = vmatprep.subr.bf16.mxu0 %v17125_v59 }
 0x42b   : > { %v14458_v27 = vpop.eup %14457  ;;  %v4316_v49 = vadd.f32 1e-05, %v4252_v32  ;;  %v4221_v16 = vsub.f32 %v4157_v43, %v4189_v33  ;;  %v4190_v30 = vmul.f32 %v17098_v63, %v17098_v63  ;;  %v12182_v33 = vld [vmem:[%s20791_s7 + $0x5e8] sm:$0xff] }
 0x42c   : > { %v4378_v44 = vmul.f32 %v14458_v27, %v4282_v38  ;;  %7042 = vperm.xlu1 %14371, %v12180_v61   ;;  %v3917_v53 = vpop.xlane.xlu1 %3916  ;;  %v4074_v12 = vpop.xlane.xlu0 %4073  ;;  %v4283_v27 = vsub.f32 %v16652_v26, %v17068_v3  ;;  %v12179_v26 = vld [vmem:[%s20791_s7 + $0x5d0] sm:$0xff] }
 0x42d   : > { %v14460_v47 = vpop.eup %14459  ;;  %14463 = vrsqrt.f32 %v4316_v49  ;;  %v4253_v17 = vmax.f32 %v4221_v16, 0.0  ;;  %v17112_v19 = vmul.f32 0.0625, %v3917_v53  ;;  %v4158_v14 = vmul.f32 0.0625, %v4074_v12  ;;  %7017 = vperm.xlu0 %14370, %v12175_v21   ;;  %v12177_v12 = vld [vmem:[%s20791_s7 + $0x5c0] sm:$0xff] }
 0x42e   : > { %v4442_v32 = vmul.f32 0.2, %v4378_v44  ;;  %v4377_v43 = vmul.f32 %v14460_v47, %v4281_v11  ;;  %vm4410_vm10 = vcmp.ge.f32.partialorder %v4378_v44, 0.0 }
 0x42f   : > { %v4317_v61 = vadd.f32 1e-05, %v4253_v17  ;;  %v4222_v38 = vsub.f32 %v4158_v14, %v4190_v30  ;;  %v4191_v47 = vmul.f32 %v17112_v19, %v17112_v19  ;;  %v12184_v14 = vld [vmem:[%s20791_s7 + $0x5f8] sm:$0xff] }
 0x430   : > { %vm4409_vm11 = vcmp.ge.f32.partialorder %v4377_v43, 0.0  ;;  %v4441_v21 = vmul.f32 0.2, %v4377_v43  ;;  %7052 = vperm.xlu1 %14371, %v12182_v33   ;;  %v4077_v49 = vpop.xlane.xlu1 %4076  ;;  %v3920_v16 = vpop.xlane.xlu0 %3919  ;;  %v4474_v17 = vsel %vm4410_vm10, %v4378_v44, %v4442_v32  ;;  %v12205_v44 = vld [vmem:[%s20791_s7 + $0x608] sm:$0xff] }
 0x431   : > { %14465 = vrsqrt.f32 %v4317_v61  ;;  %v4254_v11 = vmax.f32 %v4222_v38, 0.0  ;;  %v4159_v53 = vmul.f32 0.0625, %v4077_v49  ;;  %7027 = vperm.xlu0 %14370, %v12177_v12   ;;  %v14462_v30 = vpop.eup %14461  ;;  %v17140_v54 = vmul.f32 0.0625, %v3920_v16 }
 0x432   : > { %v4473_v42 = vsel %vm4409_vm11, %v4377_v43, %v4441_v21  ;;  %v4379_v33 = vmul.f32 %v14462_v30, %v4283_v27  ;;  %v12181_v27 = vld [vmem:[%s20791_s7 + $0x5e0] sm:$0xff] }
 0x433   : > { %v17145_v3 = vpack.c.bf16 %v4474_v17, %v4473_v42  ;;  %v4318_v61 = vadd.f32 1e-05, %v4254_v11  ;;  %v4223_v38 = vsub.f32 %v4159_v53, %v4191_v47  ;;  %v4284_v42 = vsub.f32 %v16658_v15, %v17078_v28 }
 0x434   : > { %7062 = vperm.xlu1 %14371, %v12184_v14   ;;  %v3923_v12 = vpop.xlane.xlu1 %3922  ;;  %v4080_v49 = vpop.xlane.xlu0 %4079  ;;  %v4192_v32 = vmul.f32 %v17140_v54, %v17140_v54  ;;  %v4443_v47 = vmul.f32 0.2, %v4379_v33  ;;  %vm4411_vm12 = vcmp.ge.f32.partialorder %v4379_v33, 0.0 }
 0x435   : > { %14467 = vrsqrt.f32 %v4318_v61  ;;  %v4255_v8 = vmax.f32 %v4223_v38, 0.0  ;;  %7037 = vperm.xlu0 %14370, %v12179_v26   ;;  %13819 = vmatprep.mubr.msk.bf16.mxu1 %vm415_vm0, %v17145_v3  ;;  %v17156_v43 = vmul.f32 0.0625, %v3923_v12  ;;  %v4160_v21 = vmul.f32 0.0625, %v4080_v49  ;;  %v12207_v61 = vld [vmem:[%s20791_s7 + $0x618] sm:$0xff]  ;;  %v12183_v49 = vld [vmem:[%s20791_s7 + $0x5f0] sm:$0xff] }
 0x436   : > { %13853 = vmatprep.mubr.msk.bf16.mxu0 %vm415_vm0, %v17145_v3 }
 0x437   : > { %v14464_v16 = vpop.eup %14463  ;;  %v4319_v11 = vadd.f32 1e-05, %v4255_v8  ;;  %v4224_v14 = vsub.f32 %v4160_v21, %v4192_v32  ;;  %v4193_v30 = vmul.f32 %v17156_v43, %v17156_v43  ;;  %v4285_v8 = vsub.f32 %v16680_v6, %v17088_v55 }
 0x438   : > { %v4380_v53 = vmul.f32 %v14464_v16, %v4284_v42  ;;  %7339 = vperm.xlu1 %14371, %v12205_v44   ;;  %v4083_v15 = vpop.xlane.xlu1 %4082  ;;  %v3926_v28 = vpop.xlane.xlu0 %3925  ;;  %v4475_v42 = vsel %vm4411_vm12, %v4379_v33, %v4443_v47  ;;  %v12209_v33 = vld [vmem:[%s20791_s7 + $0x628] sm:$0xff]  ;;  %v4286_v47 = vsub.f32 %v16683_v0, %v17098_v63 }
 0x439   : > { %14469 = vrsqrt.f32 %v4319_v11  ;;  %v4161_v17 = vmul.f32 0.0625, %v4083_v15  ;;  %v17165_v26 = vmul.f32 0.0625, %v3926_v28  ;;  %7047 = vperm.xlu0 %14370, %v12181_v27   ;;  %v4256_v12 = vmax.f32 %v4224_v14, 0.0 }
 0x43a   : > { %vm4412_vm13 = vcmp.ge.f32.partialorder %v4380_v53, 0.0  ;;  %v4444_v38 = vmul.f32 0.2, %v4380_v53 }
 0x43b   : > { %v14466_v44 = vpop.eup %14465  ;;  %v4225_v32 = vsub.f32 %v4161_v17, %v4193_v30  ;;  %v4320_v16 = vadd.f32 1e-05, %v4256_v12  ;;  %v4194_v11 = vmul.f32 %v17165_v26, %v17165_v26 }
 0x43c   : > { %v4476_v21 = vsel %vm4412_vm13, %v4380_v53, %v4444_v38  ;;  %v4381_v27 = vmul.f32 %v14466_v44, %v4285_v8  ;;  %7349 = vperm.xlu1 %14371, %v12207_v61   ;;  %v3929_v15 = vpop.xlane.xlu1 %3928  ;;  %v4086_v6 = vpop.xlane.xlu0 %4085  ;;  %v12204_v53 = vld [vmem:[%s20791_s7 + $0x600] sm:$0xff]  ;;  %v12211_v44 = vld [vmem:[%s20791_s7 + $0x638] sm:$0xff] }
 0x43d   : > { %v17178_v55 = vpack.c.bf16 %v4476_v21, %v4475_v42  ;;  %v4257_v14 = vmax.f32 %v4225_v32, 0.0  ;;  %v17180_v28 = vmul.f32 0.0625, %v3929_v15  ;;  %v4162_v22 = vmul.f32 0.0625, %v4086_v6  ;;  %7057 = vperm.xlu0 %14370, %v12183_v49  }
 0x43e   : > { %14471 = vrsqrt.f32 %v4320_v16  ;;  %vm4413_vm14 = vcmp.ge.f32.partialorder %v4381_v27, 0.0  ;;  %v4445_v8 = vmul.f32 0.2, %v4381_v27  ;;  %v4287_v42 = vsub.f32 %v16709_v24, %v17112_v19 }
 0x43f   : > { %v14468_v30 = vpop.eup %14467  ;;  %v4321_v17 = vadd.f32 1e-05, %v4257_v14  ;;  %v4226_v61 = vsub.f32 %v4162_v22, %v4194_v11  ;;  %13820 = vmatmul.mubr.msk.bf16.vlgmr.msra.gmra.mrb[192].mxu1 %vm415_vm0, %v17178_v55  ;;  %13854 = vmatmul.mubr.msk.bf16.vlgmr.msra.gmra.mrb[200].mxu0 %vm415_vm0, %v17178_v55  ;;  %v4195_v63 = vmul.f32 %v17180_v28, %v17180_v28 }
 0x440   : > { %v4382_v38 = vmul.f32 %v14468_v30, %v4286_v47  ;;  %7359 = vperm.xlu1 %14371, %v12209_v33   ;;  %v4089_v12 = vpop.xlane.xlu1 %4088  ;;  %v3932_v0 = vpop.xlane.xlu0 %3931  ;;  %13886 = vmatpush3.bf16.msra.mxu1 %v17120_v51  ;;  %v12206_v51 = vld [vmem:[%s20791_s7 + $0x610] sm:$0xff]  ;;  %v4477_v6 = vsel %vm4413_vm14, %v4381_v27, %v4445_v8  ;;  %v12213_v30 = vld [vmem:[%s20791_s7 + $0x648] sm:$0xff]  ;;  %v4288_v8 = vsub.f32 %v16714_v10, %v17140_v54 }
 0x441   : > { %14473 = vrsqrt.f32 %v4321_v17  ;;  %v4258_v49 = vmax.f32 %v4226_v61, 0.0  ;;  %v4163_v22 = vmul.f32 0.0625, %v4089_v12  ;;  %7334 = vperm.xlu0 %14370, %v12204_v53   ;;  %13920 = vmatpush3.bf16.msra.mxu0 %v17125_v59  ;;  %v17203_v21 = vmul.f32 0.0625, %v3932_v0  ;;  %v12208_v61 = vld [vmem:[%s20791_s7 + $0x620] sm:$0xff] }
 0x442   : > { %vm4414_vm15 = vcmp.ge.f32.partialorder %v4382_v38, 0.0  ;;  %v4446_v32 = vmul.f32 0.2, %v4382_v38 }
 0x443   : > { %v14470_v16 = vpop.eup %14469  ;;  %v4322_v11 = vadd.f32 1e-05, %v4258_v49  ;;  %v4227_v15 = vsub.f32 %v4163_v22, %v4195_v63  ;;  %v4196_v17 = vmul.f32 %v17203_v21, %v17203_v21 }
 0x444   : > { %v4478_v14 = vsel %vm4414_vm15, %v4382_v38, %v4446_v32  ;;  %v4383_v33 = vmul.f32 %v14470_v16, %v4287_v42  ;;  %7369 = vperm.xlu1 %14371, %v12211_v44   ;;  %v3935_v59 = vpop.xlane.xlu1 %3934  ;;  %v4092_v47 = vpop.xlane.xlu0 %4091  ;;  %v12215_v32 = vld [vmem:[%s20791_s7 + $0x658] sm:$0xff] }
 0x445   : > { %v17209_v53 = vpack.c.bf16 %v4478_v14, %v4477_v6  ;;  %14475 = vrsqrt.f32 %v4322_v11  ;;  %v4259_v24 = vmax.f32 %v4227_v15, 0.0  ;;  %v17211_v19 = vmul.f32 0.0625, %v3935_v59  ;;  %7344 = vperm.xlu0 %14370, %v12206_v51   ;;  %v12210_v11 = vld [vmem:[%s20791_s7 + $0x630] sm:$0xff] }
 0x446   : > { %v4164_v27 = vmul.f32 0.0625, %v4092_v47  ;;  %vm4415_vm1 = vcmp.ge.f32.partialorder %v4383_v33, 0.0  ;;  %v4447_v0 = vmul.f32 0.2, %v4383_v33  ;;  %v4289_v51 = vsub.f32 %v16737_v50, %v17156_v43 }
 0x447   : > { %v4323_v38 = vadd.f32 1e-05, %v4259_v24  ;;  %13823 = vmatprep.mubr.msk.bf16.mxu1 %vm415_vm0, %v17209_v53  ;;  %13857 = vmatprep.mubr.msk.bf16.mxu0 %vm415_vm0, %v17209_v53  ;;  %v4197_v63 = vmul.f32 %v17211_v19, %v17211_v19 }
 0x448   : > { %v14472_v12 = vpop.eup %14471  ;;  %v4228_v49 = vsub.f32 %v4164_v27, %v4196_v17  ;;  %7379 = vperm.xlu1 %14371, %v12213_v30   ;;  %v4095_v22 = vpop.xlane.xlu1 %4094  ;;  %v4479_v59 = vsel %vm4415_vm1, %v4383_v33, %v4447_v0  ;;  %v12217_v33 = vld [vmem:[%s20791_s7 + $0x668] sm:$0xff]  ;;  %v12212_v0 = vld [vmem:[%s20791_s7 + $0x640] sm:$0xff] }
 0x449   : > { %v3938_v44 = vpop.xlane.xlu0 %3937  ;;  %v4384_v42 = vmul.f32 %v14472_v12, %v4288_v8  ;;  %14477 = vrsqrt.f32 %v4323_v38  ;;  %v4165_v54 = vmul.f32 0.0625, %v4095_v22  ;;  %7354 = vperm.xlu0 %14370, %v12208_v61   ;;  %v4290_v12 = vsub.f32 %v16742_v48, %v17165_v26 }
 0x44a   : > { %v17229_v10 = vmul.f32 0.0625, %v3938_v44  ;;  %v4260_v16 = vmax.f32 %v4228_v49, 0.0 }
 0x44b   : > { %v14474_v15 = vpop.eup %14473  ;;  %vm4416_vm2 = vcmp.ge.f32.partialorder %v4384_v42, 0.0  ;;  %v4448_v6 = vmul.f32 0.2, %v4384_v42  ;;  %v4229_v14 = vsub.f32 %v4165_v54, %v4197_v63 }
 0x44c   : > { %v4385_v47 = vmul.f32 %v14474_v15, %v4289_v51  ;;  %v4324_v24 = vadd.f32 1e-05, %v4260_v16  ;;  %v4198_v30 = vmul.f32 %v17229_v10, %v17229_v10  ;;  %7389 = vperm.xlu1 %14371, %v12215_v32   ;;  %v3941_v17 = vpop.xlane.xlu1 %3940  ;;  %v4291_v16 = vsub.f32 %v16765_v7, %v17180_v28 }
 0x44d   : > { %v4098_v27 = vpop.xlane.xlu0 %4097  ;;  %v4480_v50 = vsel %vm4416_vm2, %v4384_v42, %v4448_v6  ;;  %v4261_v43 = vmax.f32 %v4229_v14, 0.0  ;;  %v17242_v61 = vmul.f32 0.0625, %v3941_v17  ;;  %7364 = vperm.xlu0 %14370, %v12210_v11   ;;  %v12219_v6 = vld [vmem:[%s20791_s7 + $0x678] sm:$0xff]  ;;  %v12214_v14 = vld [vmem:[%s20791_s7 + $0x650] sm:$0xff] }
 0x44e   : > { %v4166_v8 = vmul.f32 0.0625, %v4098_v27  ;;  %v17244_v38 = vpack.c.bf16 %v4480_v50, %v4479_v59  ;;  %14479 = vrsqrt.f32 %v4324_v24  ;;  %vm4417_vm3 = vcmp.ge.f32.partialorder %v4385_v47, 0.0 }
 0x44f   : > { %v14476_v63 = vpop.eup %14475  ;;  %v4325_v49 = vadd.f32 1e-05, %v4261_v43  ;;  %v4449_v44 = vmul.f32 0.2, %v4385_v47  ;;  %v4199_v54 = vmul.f32 %v17242_v61, %v17242_v61 }
 0x450   : > { %20974 = vst [vmem:[#allocation172_spill] sm:$0xff] %v17244_v38  ;;  %v4230_v22 = vsub.f32 %v4166_v8, %v4198_v30  ;;  %v4386_v42 = vmul.f32 %v14476_v63, %v4290_v12  ;;  %13824 = vmatmul.mubr.msk.bf16.gmra.mrb[196].mxu1 %vm415_vm0, %v17244_v38  ;;  %13858 = vmatmul.mubr.msk.bf16.gmra.mrb[204].mxu0 %vm415_vm0, %v17244_v38  ;;  %v4101_v48 = vpop.xlane.xlu1 %4100  ;;  %v12216_v63 = vld [vmem:[%s20791_s7 + $0x660] sm:$0xff] }
 0x451   : > { %v3944_v26 = vpop.xlane.xlu0 %3943  ;;  %14481 = vrsqrt.f32 %v4325_v49  ;;  %7399 = vperm.xlu1 %14371, %v12217_v33   ;;  %v4167_v51 = vmul.f32 0.0625, %v4101_v48  ;;  %7374 = vperm.xlu0 %14370, %v12212_v0   ;;  %v4481_v17 = vsel %vm4417_vm3, %v4385_v47, %v4449_v44  ;;  %v12221_v47 = vld [vmem:[%s20791_s7 + $0x688] sm:$0xff]  ;;  %v4292_v49 = vsub.f32 %v16768_v35, %v17203_v21  ;;  %v17292_v44 = vld [vmem:[%s20790_s6 + $0x20] sm:$0xff]  }
 0x452   : > { %v4262_v32 = vmax.f32 %v4230_v22, 0.0  ;;  %vm4418_vm4 = vcmp.ge.f32.partialorder %v4386_v42, 0.0  ;;  %v4450_v11 = vmul.f32 0.2, %v4386_v42  ;;  %v17262_v15 = vmul.f32 0.0625, %v3944_v26  ;;  %13953 = vmatprep.subr.bf16.mxu1 %v17292_v44 }
 0x453   : > { %v14478_v59 = vpop.eup %14477  ;;  %v4231_v30 = vsub.f32 %v4167_v51, %v4199_v54 }
 0x454   : > { %v4326_v24 = vadd.f32 1e-05, %v4262_v32  ;;  %v4482_v27 = vsel %vm4418_vm4, %v4386_v42, %v4450_v11  ;;  %v4387_v50 = vmul.f32 %v14478_v59, %v4291_v16  ;;  %v3947_v7 = vpop.xlane.xlu1 %3946  ;;  %v4200_v33 = vmul.f32 %v17262_v15, %v17262_v15  ;;  %v17301_v11 = vld [vmem:[%s20790_s6 + $0x28] sm:$0xff]   ;;  %v12223_v59 = vld [vmem:[%s20791_s7 + $0x698] sm:$0xff] }
 0x455   : > { %v4104_v28 = vpop.xlane.xlu0 %4103  ;;  %v17271_v43 = vpack.c.bf16 %v4482_v27, %v4481_v17  ;;  %v4263_v8 = vmax.f32 %v4231_v30, 0.0  ;;  %7409 = vperm.xlu1 %14371, %v12219_v6   ;;  %v17273_v12 = vmul.f32 0.0625, %v3947_v7  ;;  %7384 = vperm.xlu0 %14370, %v12214_v14   ;;  %v4293_v6 = vsub.f32 %v16794_v58, %v17211_v19 }
 0x456   : > { %14483 = vrsqrt.f32 %v4326_v24  ;;  %v4168_v0 = vmul.f32 0.0625, %v4104_v28  ;;  %vm4419_vm5 = vcmp.ge.f32.partialorder %v4387_v50, 0.0  ;;  %v4451_v48 = vmul.f32 0.2, %v4387_v50  ;;  %v12218_v24 = vld [vmem:[%s20791_s7 + $0x670] sm:$0xff]  ;;  %13987 = vmatprep.subr.bf16.mxu0 %v17301_v11 }
 0x457   : > { %20975 = vst [vmem:[#allocation173_spill] sm:$0xff] %v17271_v43  ;;  %v4327_v22 = vadd.f32 1e-05, %v4263_v8  ;;  %13827 = vmatprep.mubr.msk.bf16.mxu1 %vm415_vm0, %v17271_v43  ;;  %13861 = vmatprep.mubr.msk.bf16.mxu0 %vm415_vm0, %v17271_v43  ;;  %v4201_v26 = vmul.f32 %v17273_v12, %v17273_v12 }
 0x458   : > { %v14480_v42 = vpop.eup %14479  ;;  %v4232_v54 = vsub.f32 %v4168_v0, %v4200_v33  ;;  %v4107_v35 = vpop.xlane.xlu1 %4106  ;;  %v4483_v7 = vsel %vm4419_vm5, %v4387_v50, %v4451_v48  ;;  %v12225_v50 = vld [vmem:[%s20791_s7 + $0x6a8] sm:$0xff]  ;;  %v12220_v48 = vld [vmem:[%s20791_s7 + $0x680] sm:$0xff] }
 0x459   : > { %v3950_v21 = vpop.xlane.xlu0 %3949  ;;  %v4388_v32 = vmul.f32 %v14480_v42, %v4292_v49  ;;  %14485 = vrsqrt.f32 %v4327_v22  ;;  %7419 = vperm.xlu1 %14371, %v12221_v47   ;;  %v4169_v51 = vmul.f32 0.0625, %v4107_v35  ;;  %7394 = vperm.xlu0 %14370, %v12216_v63   ;;  %v4294_v42 = vsub.f32 %v16799_v52, %v17229_v10 }
 0x45a   : > { %v17296_v16 = vmul.f32 0.0625, %v3950_v21  ;;  %v4264_v14 = vmax.f32 %v4232_v54, 0.0 }
 0x45b   : > { %v14482_v30 = vpop.eup %14481  ;;  %vm4420_vm6 = vcmp.ge.f32.partialorder %v4388_v32, 0.0  ;;  %v4452_v17 = vmul.f32 0.2, %v4388_v32  ;;  %v4233_v27 = vsub.f32 %v4169_v51, %v4201_v26 }
 0x45c   : > { %v4389_v58 = vmul.f32 %v14482_v30, %v4293_v6  ;;  %v4328_v19 = vadd.f32 1e-05, %v4264_v14  ;;  %v4202_v28 = vmul.f32 %v17296_v16, %v17296_v16  ;;  %v3953_v8 = vpop.xlane.xlu1 %3952 }
 0x45d   : > { %v4110_v33 = vpop.xlane.xlu0 %4109  ;;  %v4484_v0 = vsel %vm4420_vm6, %v4388_v32, %v4452_v17  ;;  %v4265_v47 = vmax.f32 %v4233_v27, 0.0  ;;  %7429 = vperm.xlu1 %14371, %v12223_v59   ;;  %v17316_v63 = vmul.f32 0.0625, %v3953_v8  ;;  %7404 = vperm.xlu0 %14370, %v12218_v24   ;;  %v4295_v59 = vsub.f32 %v16822_v62, %v17242_v61  ;;  %v12227_v17 = vld [vmem:[%s20791_s7 + $0x6b8] sm:$0xff]  ;;  %v12222_v27 = vld [vmem:[%s20791_s7 + $0x690] sm:$0xff] }
 0x45e   : > { %v4170_v49 = vmul.f32 0.0625, %v4110_v33  ;;  %v17318_v22 = vpack.c.bf16 %v4484_v0, %v4483_v7  ;;  %14487 = vrsqrt.f32 %v4328_v19  ;;  %vm4421_vm7 = vcmp.ge.f32.partialorder %v4389_v58, 0.0 }
 0x45f   : > { %v4329_v54 = vadd.f32 1e-05, %v4265_v47  ;;  %v4453_v21 = vmul.f32 0.2, %v4389_v58  ;;  %v4203_v51 = vmul.f32 %v17316_v63, %v17316_v63 }
 0x460   : > { %v14484_v26 = vpop.eup %14483  ;;  %v4234_v35 = vsub.f32 %v4170_v49, %v4202_v28  ;;  %13828 = vmatmul.mubr.msk.bf16.gmra.mrb[200].mxu1 %vm415_vm0, %v17318_v22  ;;  %13862 = vmatmul.mubr.msk.bf16.gmra.mrb[208].mxu0 %vm415_vm0, %v17318_v22  ;;  %v4113_v52 = vpop.xlane.xlu1 %4112 }
 0x461   : > { %v4390_v32 = vmul.f32 %v14484_v26, %v4294_v42  ;;  %v3956_v10 = vpop.xlane.xlu0 %3955  ;;  %14489 = vrsqrt.f32 %v4329_v54  ;;  %7439 = vperm.xlu1 %14371, %v12225_v50   ;;  %v4171_v14 = vmul.f32 0.0625, %v4113_v52  ;;  %7414 = vperm.xlu0 %14370, %v12220_v48   ;;  %v4485_v8 = vsel %vm4421_vm7, %v4389_v58, %v4453_v21  ;;  %v12229_v58 = vld [vmem:[%s20791_s7 + $0x6c8] sm:$0xff]  ;;  %v12224_v26 = vld [vmem:[%s20791_s7 + $0x6a0] sm:$0xff] }
 0x462   : > { %v4266_v6 = vmax.f32 %v4234_v35, 0.0  ;;  %v17336_v30 = vmul.f32 0.0625, %v3956_v10  ;;  %v4296_v54 = vsub.f32 %v16827_v56, %v17262_v15 }
 0x463   : > { %vm4422_vm8 = vcmp.ge.f32.partialorder %v4390_v32, 0.0  ;;  %v4454_v24 = vmul.f32 0.2, %v4390_v32  ;;  %v14486_v7 = vpop.eup %14485  ;;  %v4235_v28 = vsub.f32 %v4171_v14, %v4203_v51 }
 0x464   : > { %v4330_v19 = vadd.f32 1e-05, %v4266_v6  ;;  %v4391_v0 = vmul.f32 %v14486_v7, %v4295_v59  ;;  %v3959_v62 = vpop.xlane.xlu1 %3958  ;;  %v4204_v50 = vmul.f32 %v17336_v30, %v17336_v30  ;;  %v4297_v59 = vsub.f32 %v16850_v37, %v17273_v12 }
 0x465   : > { %v4486_v33 = vsel %vm4422_vm8, %v4390_v32, %v4454_v24  ;;  %v4116_v61 = vpop.xlane.xlu0 %4115  ;;  %v4267_v49 = vmax.f32 %v4235_v28, 0.0  ;;  %7449 = vperm.xlu1 %14371, %v12227_v17   ;;  %v17347_v42 = vmul.f32 0.0625, %v3959_v62  ;;  %7424 = vperm.xlu0 %14370, %v12222_v27   ;;  %v12231_v17 = vld [vmem:[%s20791_s7 + $0x6d8] sm:$0xff]  ;;  %v12226_v27 = vld [vmem:[%s20791_s7 + $0x6b0] sm:$0xff] }
 0x466   : > { %v17345_v47 = vpack.c.bf16 %v4486_v33, %v4485_v8  ;;  %14491 = vrsqrt.f32 %v4330_v19  ;;  %v4172_v48 = vmul.f32 0.0625, %v4116_v61  ;;  %vm4423_vm9 = vcmp.ge.f32.partialorder %v4391_v0, 0.0 }
 0x467   : > { %v4331_v35 = vadd.f32 1e-05, %v4267_v49  ;;  %v4455_v32 = vmul.f32 0.2, %v4391_v0  ;;  %v4205_v52 = vmul.f32 %v17347_v42, %v17347_v42 }
 0x468   : > { %13831 = vmatprep.mubr.msk.bf16.mxu1 %vm415_vm0, %v17345_v47  ;;  %13865 = vmatprep.mubr.msk.bf16.mxu0 %vm415_vm0, %v17345_v47  ;;  %v14488_v21 = vpop.eup %14487  ;;  %v4236_v10 = vsub.f32 %v4172_v48, %v4204_v50  ;;  %v4119_v51 = vpop.xlane.xlu1 %4118 }
 0x469   : > { %v3962_v6 = vpop.xlane.xlu0 %3961  ;;  %v4392_v14 = vmul.f32 %v14488_v21, %v4296_v54  ;;  %14493 = vrsqrt.f32 %v4331_v35  ;;  %7459 = vperm.xlu1 %14371, %v12229_v58   ;;  %v4173_v56 = vmul.f32 0.0625, %v4119_v51  ;;  %7434 = vperm.xlu0 %14370, %v12224_v26   ;;  %v4487_v8 = vsel %vm4423_vm9, %v4391_v0, %v4455_v32  ;;  %v12233_v0 = vld [vmem:[%s20791_s7 + $0x6e8] sm:$0xff]  ;;  %v12228_v35 = vld [vmem:[%s20791_s7 + $0x6c0] sm:$0xff] }
 0x46a   : > { %v17365_v15 = vmul.f32 0.0625, %v3962_v6  ;;  %v4268_v24 = vmax.f32 %v4236_v10, 0.0  ;;  %v4298_v54 = vsub.f32 %v16853_v40, %v17296_v16 }
 0x46b   : > { %v14490_v7 = vpop.eup %14489  ;;  %vm4424_vm10 = vcmp.ge.f32.partialorder %v4392_v14, 0.0  ;;  %v4456_v19 = vmul.f32 0.2, %v4392_v14  ;;  %v4237_v28 = vsub.f32 %v4173_v56, %v4205_v52 }
 0x46c   : > { %v4393_v33 = vmul.f32 %v14490_v7, %v4297_v59  ;;  %v4332_v62 = vadd.f32 1e-05, %v4268_v24  ;;  %v4206_v37 = vmul.f32 %v17365_v15, %v17365_v15  ;;  %v3965_v12 = vpop.xlane.xlu1 %3964  ;;  %v4299_v59 = vsub.f32 %v16876_v13, %v17316_v63  ;;  %v12230_v7 = vld [vmem:[%s20791_s7 + $0x6d0] sm:$0xff] }
 0x46d   : > { %v4122_v61 = vpop.xlane.xlu0 %4121  ;;  %v4488_v49 = vsel %vm4424_vm10, %v4392_v14, %v4456_v19  ;;  %v4269_v50 = vmax.f32 %v4237_v28, 0.0  ;;  %7469 = vperm.xlu1 %14371, %v12231_v17   ;;  %v17378_v48 = vmul.f32 0.0625, %v3965_v12  ;;  %7444 = vperm.xlu0 %14370, %v12226_v27   ;;  %v12235_v27 = vld [vmem:[%s20791_s7 + $0x6f8] sm:$0xff] }
 0x46e   : > { %v4174_v58 = vmul.f32 0.0625, %v4122_v61  ;;  %v17380_v26 = vpack.c.bf16 %v4488_v49, %v4487_v8  ;;  %14495 = vrsqrt.f32 %v4332_v62  ;;  %vm4425_vm11 = vcmp.ge.f32.partialorder %v4393_v33, 0.0 }
 0x46f   : > { %v4333_v32 = vadd.f32 1e-05, %v4269_v50  ;;  %v4457_v10 = vmul.f32 0.2, %v4393_v33  ;;  %v4207_v6 = vmul.f32 %v17378_v48, %v17378_v48 }
 0x470   : > { %v14492_v21 = vpop.eup %14491  ;;  %v4238_v52 = vsub.f32 %v4174_v58, %v4206_v37  ;;  %13832 = vmatmul.mubr.msk.bf16.gmra.mrb[204].mxu1 %vm415_vm0, %v17380_v26  ;;  %13866 = vmatmul.mubr.msk.bf16.gmra.mrb[212].mxu0 %vm415_vm0, %v17380_v26  ;;  %v4125_v40 = vpop.xlane.xlu1 %4124 }
 0x471   : > { %v4394_v51 = vmul.f32 %v14492_v21, %v4298_v54  ;;  %v3968_v16 = vpop.xlane.xlu0 %3967  ;;  %14497 = vrsqrt.f32 %v4333_v32  ;;  %7479 = vperm.xlu1 %14371, %v12233_v0   ;;  %v4175_v56 = vmul.f32 0.0625, %v4125_v40  ;;  %7454 = vperm.xlu0 %14370, %v12228_v35   ;;  %v4489_v62 = vsel %vm4425_vm11, %v4393_v33, %v4457_v10  ;;  %v12256_v33 = vld [vmem:[%s20791_s7 + $0x708] sm:$0xff]  ;;  %v12232_v0 = vld [vmem:[%s20791_s7 + $0x6e0] sm:$0xff] }
 0x472   : > { %v4270_v14 = vmax.f32 %v4238_v52, 0.0  ;;  %v17398_v17 = vmul.f32 0.0625, %v3968_v16  ;;  %v4300_v35 = vsub.f32 %v16881_v31, %v17336_v30 }
 0x473   : > { %vm4426_vm12 = vcmp.ge.f32.partialorder %v4394_v51, 0.0  ;;  %v4458_v24 = vmul.f32 0.2, %v4394_v51  ;;  %v14494_v19 = vpop.eup %14493  ;;  %v4239_v8 = vsub.f32 %v4175_v56, %v4207_v6 }
 0x474   : > { %v4334_v28 = vadd.f32 1e-05, %v4270_v14  ;;  %v4395_v12 = vmul.f32 %v14494_v19, %v4299_v59  ;;  %v3971_v13 = vpop.xlane.xlu1 %3970  ;;  %v4208_v58 = vmul.f32 %v17398_v17, %v17398_v17  ;;  %v4301_v14 = vsub.f32 %v16904_v25, %v17347_v42  ;;  %v12258_v59 = vld [vmem:[%s20791_s7 + $0x718] sm:$0xff] }
 0x475   : > { %v4490_v37 = vsel %vm4426_vm12, %v4394_v51, %v4458_v24  ;;  %v4128_v63 = vpop.xlane.xlu0 %4127  ;;  %v4271_v49 = vmax.f32 %v4239_v8, 0.0  ;;  %7489 = vperm.xlu1 %14371, %v12235_v27   ;;  %v17409_v50 = vmul.f32 0.0625, %v3971_v13  ;;  %7464 = vperm.xlu0 %14370, %v12230_v7   ;;  %v12234_v24 = vld [vmem:[%s20791_s7 + $0x6f0] sm:$0xff]  ;;  %vm11472_vm12 = vcmask 65536  }
 0x476   : > { %v17407_v61 = vpack.c.bf16 %v4490_v37, %v4489_v62  ;;  %14499 = vrsqrt.f32 %v4334_v28  ;;  %v4176_v54 = vmul.f32 0.0625, %v4128_v63  ;;  %vm4427_vm13 = vcmp.ge.f32.partialorder %v4395_v12, 0.0 }
 0x477   : > { %v4335_v21 = vadd.f32 1e-05, %v4271_v49  ;;  %v4459_v52 = vmul.f32 0.2, %v4395_v12  ;;  %v4209_v10 = vmul.f32 %v17409_v50, %v17409_v50 }
 0x478   : > { %13835 = vmatprep.mubr.msk.bf16.mxu1 %vm415_vm0, %v17407_v61  ;;  %13869 = vmatprep.mubr.msk.bf16.mxu0 %vm415_vm0, %v17407_v61  ;;  %v14496_v32 = vpop.eup %14495  ;;  %v4240_v51 = vsub.f32 %v4176_v54, %v4208_v58  ;;  %v4131_v40 = vpop.xlane.xlu1 %4130 }
 0x479   : > { %v3974_v16 = vpop.xlane.xlu0 %3973  ;;  %v4396_v6 = vmul.f32 %v14496_v32, %v4300_v35  ;;  %14501 = vrsqrt.f32 %v4335_v21  ;;  %7766 = vperm.xlu1 %14371, %v12256_v33   ;;  %v4177_v31 = vmul.f32 0.0625, %v4131_v40  ;;  %7474 = vperm.xlu0 %14370, %v12232_v0   ;;  %v4491_v28 = vsel %vm4427_vm13, %v4395_v12, %v4459_v52  ;;  %v12260_v12 = vld [vmem:[%s20791_s7 + $0x728] sm:$0xff]  ;;  %v12255_v0 = vld [vmem:[%s20791_s7 + $0x700] sm:$0xff] }
 0x47a   : > { %v17427_v30 = vmul.f32 0.0625, %v3974_v16  ;;  %v4272_v56 = vmax.f32 %v4240_v51, 0.0  ;;  %v4302_v33 = vsub.f32 %v16909_v9, %v17365_v15 }
 0x47b   : > { %v14498_v27 = vpop.eup %14497  ;;  %vm4428_vm14 = vcmp.ge.f32.partialorder %v4396_v6, 0.0  ;;  %v4460_v7 = vmul.f32 0.2, %v4396_v6  ;;  %v4241_v19 = vsub.f32 %v4177_v31, %v4209_v10 }
 0x47c   : > { %v4397_v8 = vmul.f32 %v14498_v27, %v4301_v14  ;;  %v4336_v62 = vadd.f32 1e-05, %v4272_v56  ;;  %v4210_v25 = vmul.f32 %v17427_v30, %v17427_v30  ;;  %v3977_v42 = vpop.xlane.xlu1 %3976  ;;  %v12262_v56 = vld [vmem:[%s20791_s7 + $0x738] sm:$0xff] }
 0x47d   : > { %v4134_v37 = vpop.xlane.xlu0 %4133  ;;  %v4492_v13 = vsel %vm4428_vm14, %v4396_v6, %v4460_v7  ;;  %v4273_v63 = vmax.f32 %v4241_v19, 0.0  ;;  %7776 = vperm.xlu1 %14371, %v12258_v59   ;;  %v17440_v49 = vmul.f32 0.0625, %v3977_v42  ;;  %7484 = vperm.xlu0 %14370, %v12234_v24   ;;  %v4303_v6 = vsub.f32 %v16932_v4, %v17378_v48  ;;  %v12257_v59 = vld [vmem:[%s20791_s7 + $0x710] sm:$0xff] }
 0x47e   : > { %v4178_v58 = vmul.f32 0.0625, %v4134_v37  ;;  %v17442_v54 = vpack.c.bf16 %v4492_v13, %v4491_v28  ;;  %14503 = vrsqrt.f32 %v4336_v62  ;;  %vm4429_vm15 = vcmp.ge.f32.partialorder %v4397_v8, 0.0 }
 0x47f   : > { %v4337_v21 = vadd.f32 1e-05, %v4273_v63  ;;  %v4461_v52 = vmul.f32 0.2, %v4397_v8  ;;  %v4211_v51 = vmul.f32 %v17440_v49, %v17440_v49 }
 0x480   : > { %v14500_v35 = vpop.eup %14499  ;;  %v4242_v32 = vsub.f32 %v4178_v58, %v4210_v25  ;;  %13836 = vmatmul.mubr.msk.bf16.gmra.mrb[208].mxu1 %vm415_vm0, %v17442_v54  ;;  %13870 = vmatmul.mubr.msk.bf16.gmra.mrb[216].mxu0 %vm415_vm0, %v17442_v54  ;;  %v4137_v9 = vpop.xlane.xlu1 %4136  ;;  %v12259_v58 = vld [vmem:[%s20791_s7 + $0x720] sm:$0xff] }
 0x481   : > { %v4398_v10 = vmul.f32 %v14500_v35, %v4302_v33  ;;  %v3980_v15 = vpop.xlane.xlu0 %3979  ;;  %14505 = vrsqrt.f32 %v4337_v21  ;;  %7786 = vperm.xlu1 %14371, %v12260_v12   ;;  %v4179_v16 = vmul.f32 0.0625, %v4137_v9  ;;  %7761 = vperm.xlu0 %14370, %v12255_v0   ;;  %v4493_v19 = vsel %vm4429_vm15, %v4397_v8, %v4461_v52  ;;  %v12264_v8 = vld [vmem:[%s20791_s7 + $0x748] sm:$0xff] }
 0x482   : > { %v4274_v40 = vmax.f32 %v4242_v32, 0.0  ;;  %v17460_v14 = vmul.f32 0.0625, %v3980_v15  ;;  %v4304_v33 = vsub.f32 %v16935_v41, %v17398_v17  ;;  %v4305_v15 = vsub.f32 %v16952_v18, %v17409_v50 }
 0x483   : > { %vm4430_vm1 = vcmp.ge.f32.partialorder %v4398_v10, 0.0  ;;  %v4462_v31 = vmul.f32 0.2, %v4398_v10  ;;  %v14502_v24 = vpop.eup %14501  ;;  %v4243_v7 = vsub.f32 %v4179_v16, %v4211_v51  ;;  %v12261_v16 = vld [vmem:[%s20791_s7 + $0x730] sm:$0xff] }
 0x484   : > { %v4338_v27 = vadd.f32 1e-05, %v4274_v40  ;;  %v4399_v62 = vmul.f32 %v14502_v24, %v4303_v6  ;;  %v3983_v4 = vpop.xlane.xlu1 %3982  ;;  %v4212_v13 = vmul.f32 %v17460_v14, %v17460_v14  ;;  %v12266_v40 = vld [vmem:[%s20791_s7 + $0x758] sm:$0xff] }
 0x485   : > { %v4494_v28 = vsel %vm4430_vm1, %v4398_v10, %v4462_v31  ;;  %v4140_v48 = vpop.xlane.xlu0 %4139  ;;  %v4275_v42 = vmax.f32 %v4243_v7, 0.0  ;;  %7796 = vperm.xlu1 %14371, %v12262_v56   ;;  %v17471_v37 = vmul.f32 0.0625, %v3983_v4  ;;  %7771 = vperm.xlu0 %14370, %v12257_v59  }
 0x486   : > { %v17469_v25 = vpack.c.bf16 %v4494_v28, %v4493_v19  ;;  %14507 = vrsqrt.f32 %v4338_v27  ;;  %v4180_v63 = vmul.f32 0.0625, %v4140_v48  ;;  %vm4431_vm2 = vcmp.ge.f32.partialorder %v4399_v62, 0.0 }
 0x487   : > { %v4339_v12 = vadd.f32 1e-05, %v4275_v42  ;;  %v4463_v35 = vmul.f32 0.2, %v4399_v62  ;;  %v4213_v21 = vmul.f32 %v17471_v37, %v17471_v37 }
 0x488   : > { %13839 = vmatprep.mubr.msk.bf16.mxu1 %vm415_vm0, %v17469_v25  ;;  %13873 = vmatprep.mubr.msk.bf16.mxu0 %vm415_vm0, %v17469_v25  ;;  %v14504_v0 = vpop.eup %14503  ;;  %v4244_v32 = vsub.f32 %v4180_v63, %v4212_v13  ;;  %v4143_v52 = vpop.xlane.xlu1 %4142  ;;  %v4306_v13 = vsub.f32 %v16957_v57, %v17427_v30  ;;  %v12263_v63 = vld [vmem:[%s20791_s7 + $0x740] sm:$0xff] }
 0x489   : > { %v3986_v10 = vpop.xlane.xlu0 %3985  ;;  %v4400_v9 = vmul.f32 %v14504_v0, %v4304_v33  ;;  %14509 = vrsqrt.f32 %v4339_v12  ;;  %7806 = vperm.xlu1 %14371, %v12264_v8   ;;  %v4181_v41 = vmul.f32 0.0625, %v4143_v52  ;;  %7781 = vperm.xlu0 %14370, %v12259_v58   ;;  %v4495_v59 = vsel %vm4431_vm2, %v4399_v62, %v4463_v35  ;;  %v12268_v62 = vld [vmem:[%s20791_s7 + $0x768] sm:$0xff] }
 0x48a   : > { %v17489_v17 = vmul.f32 0.0625, %v3986_v10  ;;  %v4276_v51 = vmax.f32 %v4244_v32, 0.0  ;;  %v4307_v10 = vsub.f32 %v16974_v34, %v17440_v49 }
 0x48b   : > { %v14506_v6 = vpop.eup %14505  ;;  %vm4432_vm3 = vcmp.ge.f32.partialorder %v4400_v9, 0.0  ;;  %v4464_v31 = vmul.f32 0.2, %v4400_v9  ;;  %v4245_v56 = vsub.f32 %v4181_v41, %v4213_v21  ;;  %v12270_v41 = vld [vmem:[%s20791_s7 + $0x778] sm:$0xff] }
 0x48c   : > { %v4401_v24 = vmul.f32 %v14506_v6, %v4305_v15  ;;  %v4340_v27 = vadd.f32 1e-05, %v4276_v51  ;;  %v4214_v18 = vmul.f32 %v17489_v17, %v17489_v17  ;;  %v3989_v50 = vpop.xlane.xlu1 %3988  ;;  %v12265_v15 = vld [vmem:[%s20791_s7 + $0x750] sm:$0xff] }
 0x48d   : > { %v4146_v7 = vpop.xlane.xlu0 %4145  ;;  %v4496_v19 = vsel %vm4432_vm3, %v4400_v9, %v4464_v31  ;;  %v4277_v28 = vmax.f32 %v4245_v56, 0.0  ;;  %7816 = vperm.xlu1 %14371, %v12266_v40   ;;  %v17502_v4 = vmul.f32 0.0625, %v3989_v50  ;;  %7791 = vperm.xlu0 %14370, %v12261_v16  }
 0x48e   : > { %v4182_v48 = vmul.f32 0.0625, %v4146_v7  ;;  %v17504_v42 = vpack.c.bf16 %v4496_v19, %v4495_v59  ;;  %14511 = vrsqrt.f32 %v4340_v27  ;;  %vm4433_vm4 = vcmp.ge.f32.partialorder %v4401_v24, 0.0  ;;  %v12272_v7 = vld [vmem:[%s20791_s7 + $0x788] sm:$0xff] }
 0x48f   : > { %v4341_v58 = vadd.f32 1e-05, %v4277_v28  ;;  %v4465_v12 = vmul.f32 0.2, %v4401_v24  ;;  %v4215_v35 = vmul.f32 %v17502_v4, %v17502_v4  ;;  %v4308_v19 = vsub.f32 %v16979_v2, %v17460_v14  ;;  %v12274_v14 = vld [vmem:[%s20791_s7 + $0x798] sm:$0xff] }
 0x490   : > { %v14508_v8 = vpop.eup %14507  ;;  %v4246_v33 = vsub.f32 %v4182_v48, %v4214_v18  ;;  %13840 = vmatmul.mubr.msk.bf16.gmra.mrb[212].mxu1 %vm415_vm0, %v17504_v42  ;;  %13874 = vmatmul.mubr.msk.bf16.gmra.mrb[220].mxu0 %vm415_vm0, %v17504_v42  ;;  %v4149_v57 = vpop.xlane.xlu1 %4148  ;;  %v4309_v2 = vsub.f32 %v16996_v29, %v17471_v37  ;;  %v4310_v37 = vsub.f32 %v16999_v45, %v17489_v17 }
 0x491   : > { %v4402_v0 = vmul.f32 %v14508_v8, %v4306_v13  ;;  %v3992_v30 = vpop.xlane.xlu0 %3991  ;;  %14513 = vrsqrt.f32 %v4341_v58  ;;  %7826 = vperm.xlu1 %14371, %v12268_v62   ;;  %v4183_v32 = vmul.f32 0.0625, %v4149_v57  ;;  %7801 = vperm.xlu0 %14370, %v12263_v63   ;;  %v4497_v6 = vsel %vm4433_vm4, %v4401_v24, %v4465_v12  ;;  %v12267_v24 = vld [vmem:[%s20791_s7 + $0x760] sm:$0xff] }
 0x492   : > { %v4278_v21 = vmax.f32 %v4246_v33, 0.0  ;;  %v17520_v52 = vmul.f32 0.0625, %v3992_v30  ;;  %v12269_v33 = vld [vmem:[%s20791_s7 + $0x770] sm:$0xff]  ;;  %v4311_v17 = vsub.f32 %v17016_v60, %v17502_v4  ;;  %v12280_v4 = vld [vmem:[%s20791_s7 + $0x7c8] sm:$0xff] }
 0x493   : > { %vm4434_vm5 = vcmp.ge.f32.partialorder %v4402_v0, 0.0  ;;  %v4466_v9 = vmul.f32 0.2, %v4402_v0  ;;  %v14510_v51 = vpop.eup %14509  ;;  %v4247_v16 = vsub.f32 %v4183_v32, %v4215_v35 }
 0x494   : > { %v4342_v40 = vadd.f32 1e-05, %v4278_v21  ;;  %v4403_v56 = vmul.f32 %v14510_v51, %v4307_v10  ;;  %v4216_v34 = vmul.f32 %v17520_v52, %v17520_v52  ;;  %v17533_v49 = vpop.permute.xlu1 %6982  ;;  %v4312_v60 = vsub.f32 %v17021_v36, %v17520_v52 }
 0x495   : > { %v4498_v31 = vsel %vm4434_vm5, %v4402_v0, %v4466_v9  ;;  %20976 = vst [vmem:[#allocation174_spill] sm:$0xff] %v17533_v49  ;;  %v4152_v59 = vpop.xlane.xlu0 %4151  ;;  %v4279_v18 = vmax.f32 %v4247_v16, 0.0  ;;  %7836 = vperm.xlu1 %14371, %v12270_v41   ;;  %7811 = vperm.xlu0 %14370, %v12265_v15   ;;  %v12276_v9 = vld [vmem:[%s20791_s7 + $0x7a8] sm:$0xff]  ;;  %v12271_v41 = vld [vmem:[%s20791_s7 + $0x780] sm:$0xff] }
 0x496   : > { %v17535_v27 = vpack.c.bf16 %v4498_v31, %v4497_v6  ;;  %14515 = vrsqrt.f32 %v4342_v40  ;;  %v4184_v50 = vmul.f32 0.0625, %v4152_v59  ;;  %v4467_v63 = vmul.f32 0.2, %v4403_v56  ;;  %v12278_v31 = vld [vmem:[%s20791_s7 + $0x7b8] sm:$0xff] }
 0x497   : > { %v4343_v28 = vadd.f32 1e-05, %v4279_v18  ;;  %vm4435_vm6 = vcmp.ge.f32.partialorder %v4403_v56, 0.0 }
 0x498   : > { %v4248_v48 = vsub.f32 %v4184_v50, %v4216_v34  ;;  %13843 = vmatprep.mubr.msk.bf16.mxu1 %vm415_vm0, %v17535_v27  ;;  %13877 = vmatprep.mubr.msk.bf16.mxu0 %vm415_vm0, %v17535_v27  ;;  %v14512_v13 = vpop.eup %14511  ;;  %v17549_v62 = vpop.permute.xlu1 %6992  ;;  %v4499_v32 = vsel %vm4435_vm6, %v4403_v56, %v4467_v63  ;;  %v12273_v56 = vld [vmem:[%s20791_s7 + $0x790] sm:$0xff] }
 0x499   : > { %20977 = vst [vmem:[#allocation175_spill] sm:$0xff] %v17549_v62  ;;  %v4404_v8 = vmul.f32 %v14512_v13, %v4308_v19  ;;  %14517 = vrsqrt.f32 %v4343_v28  ;;  %7846 = vperm.xlu1 %14371, %v12272_v7   ;;  %7821 = vperm.xlu0 %14370, %v12267_v24   ;;  %v12275_v28 = vld [vmem:[%s20791_s7 + $0x7a0] sm:$0xff] }
 0x49a   : > { %v4280_v58 = vmax.f32 %v4248_v48, 0.0 }
 0x49b   : > { %v14514_v12 = vpop.eup %14513  ;;  %vm4436_vm7 = vcmp.ge.f32.partialorder %v4404_v8, 0.0  ;;  %v4468_v0 = vmul.f32 0.2, %v4404_v8 }
 0x49c   : > { %v4344_v35 = vadd.f32 1e-05, %v4280_v58  ;;  %v4405_v57 = vmul.f32 %v14514_v12, %v4309_v2  ;;  %v17559_v30 = vpop.permute.xlu1 %7002  ;;  %v17561_v21 = vpop.permute.xlu0 %6977  ;;  %v12282_v58 = vld [vmem:[%s20791_s7 + $0x7d8] sm:$0xff]  ;;  %v12277_v2 = vld [vmem:[%s20791_s7 + $0x7b0] sm:$0xff] }
 0x49d   : > { %20978 = vst [vmem:[#allocation176_spill] sm:$0xff] %v17559_v30  ;;  %20979 = vst [vmem:[#allocation177_spill] sm:$0xff] %v17561_v21  ;;  %v4500_v10 = vsel %vm4436_vm7, %v4404_v8, %v4468_v0  ;;  %7856 = vperm.xlu1 %14371, %v12274_v14   ;;  %7831 = vperm.xlu0 %14370, %v12269_v33   ;;  %v21121_v30 = vld [vmem:[#allocation27_spill] sm:$0xff] }
 0x49e   : > { %14519 = vrsqrt.f32 %v4344_v35  ;;  %v17563_v29 = vpack.c.bf16 %v4500_v10, %v4499_v32  ;;  %v4469_v51 = vmul.f32 0.2, %v4405_v57  ;;  %vm4437_vm8 = vcmp.ge.f32.partialorder %v4405_v57, 0.0  ;;  %v12279_v32 = vld [vmem:[%s20791_s7 + $0x7c0] sm:$0xff]  ;;  %v21140_v21 = vld [vmem:[#allocation31_spill] sm:$0xff] }
 0x4a0   : > { %v14516_v15 = vpop.eup %14515  ;;  %13844 = vmatmul.mubr.msk.bf16.gmra.mrb[216].mxu1 %vm415_vm0, %v17563_v29  ;;  %13878 = vmatmul.mubr.msk.bf16.gmra.mrb[224].mxu0 %vm415_vm0, %v17563_v29  ;;  %v17577_v16 = vpop.permute.xlu1 %7012  ;;  %v4501_v59 = vsel %vm4437_vm8, %v4405_v57, %v4469_v51  ;;  %v12284_v57 = vld [vmem:[%s20791_s7 + $0x7e8] sm:$0xff] }
 0x4a1   : > { %v4406_v40 = vmul.f32 %v14516_v15, %v4310_v37  ;;  %20980 = vst [vmem:[#allocation178_spill] sm:$0xff] %v17577_v16  ;;  %v17579_v45 = vpop.permute.xlu0 %6987  ;;  %7866 = vperm.xlu1 %14371, %v12276_v9   ;;  %7841 = vperm.xlu0 %14370, %v12271_v41   ;;  %v12286_v9 = vld [vmem:[%s20791_s7 + $0x7f8] sm:$0xff]  ;;  %v12281_v41 = vld [vmem:[%s20791_s7 + $0x7d0] sm:$0xff] }
 0x4a2   : > { %20981 = vst [vmem:[#allocation179_spill] sm:$0xff] %v17579_v45 }
 0x4a3   : > { %vm4438_vm9 = vcmp.ge.f32.partialorder %v4406_v40, 0.0  ;;  %v4470_v6 = vmul.f32 0.2, %v4406_v40  ;;  %v14518_v34 = vpop.eup %14517 }
 0x4a4   : > { %v4407_v50 = vmul.f32 %v14518_v34, %v4311_v17  ;;  %v17589_v7 = vpop.permute.xlu1 %7022  ;;  %v12283_v17 = vld [vmem:[%s20791_s7 + $0x7e0] sm:$0xff] }
 0x4a5   : > { %v4502_v18 = vsel %vm4438_vm9, %v4406_v40, %v4470_v6  ;;  %20982 = vst [vmem:[#allocation180_spill] sm:$0xff] %v17589_v7  ;;  %v17591_v24 = vpop.permute.xlu0 %6997  ;;  %7876 = vperm.xlu1 %14371, %v12278_v31   ;;  %7851 = vperm.xlu0 %14370, %v12273_v56   ;;  %v12307_v40 = vld [vmem:[%s20791_s7 + $0x808] sm:$0xff]  ;;  %v17664_v6 = vld [vmem:[%s20790_s6 + $0x30] sm:$0xff]   ;;  %v17669_v31 = vld [vmem:[%s20790_s6 + $0x38] sm:$0xff]  }
 0x4a6   : > { %20983 = vst [vmem:[#allocation181_spill] sm:$0xff] %v17591_v24  ;;  %v17593_v19 = vpack.c.bf16 %v4502_v18, %v4501_v59  ;;  %v4471_v13 = vmul.f32 0.2, %v4407_v50  ;;  %vm4439_vm10 = vcmp.ge.f32.partialorder %v4407_v50, 0.0  ;;  %v12309_v59 = vld [vmem:[%s20791_s7 + $0x818] sm:$0xff]  ;;  %v12285_v18 = vld [vmem:[%s20791_s7 + $0x7f0] sm:$0xff] }
 0x4a7   : > { %v21105_v7 = vld [vmem:[#allocation23_spill] sm:$0xff] }
 0x4a8   : > { %v14520_v48 = vpop.eup %14519  ;;  %13847 = vmatprep.mubr.msk.bf16.mxu1 %vm415_vm0, %v17593_v19  ;;  %13881 = vmatprep.mubr.msk.bf16.mxu0 %vm415_vm0, %v17593_v19  ;;  %v17607_v8 = vpop.permute.xlu1 %7032  ;;  %v4503_v14 = vsel %vm4439_vm10, %v4407_v50, %v4471_v13  ;;  %v12308_v13 = vld [vmem:[%s20791_s7 + $0x810] sm:$0xff] }
 0x4a9   : > { %v4408_v63 = vmul.f32 %v14520_v48, %v4312_v60  ;;  %20984 = vst [vmem:[#allocation182_spill] sm:$0xff] %v17607_v8  ;;  %v17609_v36 = vpop.permute.xlu0 %7007  ;;  %7886 = vperm.xlu1 %14371, %v12280_v4   ;;  %7861 = vperm.xlu0 %14370, %v12275_v28   ;;  %v12311_v4 = vld [vmem:[%s20791_s7 + $0x828] sm:$0xff]  ;;  %v12313_v48 = vld [vmem:[%s20791_s7 + $0x838] sm:$0xff] }
 0x4aa   : > { %20985 = vst [vmem:[#allocation183_spill] sm:$0xff] %v17609_v36 }
 0x4ab   : > { %vm4440_vm11 = vcmp.ge.f32.partialorder %v4408_v63, 0.0  ;;  %v4472_v52 = vmul.f32 0.2, %v4408_v63 }
 0x4ac   : > { %v17617_v12 = vpop.permute.xlu1 %7042 }
 0x4ad   : > { %v4504_v33 = vsel %vm4440_vm11, %v4408_v63, %v4472_v52  ;;  %20986 = vst [vmem:[#allocation184_spill] sm:$0xff] %v17617_v12  ;;  %v17619_v0 = vpop.permute.xlu0 %7017  ;;  %7896 = vperm.xlu1 %14371, %v12282_v58   ;;  %7871 = vperm.xlu0 %14370, %v12277_v2   ;;  %v12315_v58 = vld [vmem:[%s20791_s7 + $0x848] sm:$0xff]  ;;  %v12310_v2 = vld [vmem:[%s20791_s7 + $0x820] sm:$0xff]  ;;  %v21089_v12 = vld [vmem:[#allocation19_spill] sm:$0xff] }
 0x4ae   : > { %20987 = vst [vmem:[#allocation185_spill] sm:$0xff] %v17619_v0  ;;  %v17621_v35 = vpack.c.bf16 %v4504_v33, %v4503_v14 }
 0x4b0   : > { %13848 = vmatmul.mubr.msk.bf16.gmra.mrb[220].mxu1 %vm415_vm0, %v17621_v35  ;;  %13882 = vmatmul.mubr.msk.bf16.gmra.mrb[228].mxu0 %vm415_vm0, %v17621_v35  ;;  %v17633_v10 = vpop.permute.xlu1 %7052 }
 0x4b1   : > { %20988 = vst [vmem:[#allocation186_spill] sm:$0xff] %v17633_v10  ;;  %13887 = vmatprep.mubr.msk.bf16.mxu1 %vm415_vm0, %v17145_v3  ;;  %13921 = vmatprep.mubr.msk.bf16.mxu0 %vm415_vm0, %v17145_v3  ;;  %v17639_v37 = vpop.permute.xlu0 %7027 }
 0x4b2   : > { %20989 = vst [vmem:[#allocation187_spill] sm:$0xff] %v17639_v37  ;;  %7906 = vperm.xlu1 %14371, %v12284_v57   ;;  %7881 = vperm.xlu0 %14370, %v12279_v32   ;;  %v12317_v57 = vld [vmem:[%s20791_s7 + $0x858] sm:$0xff]  ;;  %v12312_v32 = vld [vmem:[%s20791_s7 + $0x830] sm:$0xff] }
 0x4b4   : > { %v17647_v15 = vpop.permute.xlu1 %7062 }
 0x4b5   : > { %20990 = vst [vmem:[#allocation188_spill] sm:$0xff] %v17647_v15  ;;  %v17649_v51 = vpop.permute.xlu0 %7037  ;;  %v21073_v15 = vld [vmem:[#allocation15_spill] sm:$0xff] }
 0x4b6   : > { %20991 = vst [vmem:[#allocation189_spill] sm:$0xff] %v17649_v51  ;;  %7916 = vperm.xlu1 %14371, %v12286_v9   ;;  %7891 = vperm.xlu0 %14370, %v12281_v41  }
 0x4b8   : > { %13888 = vmatmul.mubr.msk.bf16.vlgmr.msra.gmra.mrb[224].mxu1 %vm415_vm0, %v17178_v55  ;;  %13922 = vmatmul.mubr.msk.bf16.vlgmr.msra.gmra.mrb[232].mxu0 %vm415_vm0, %v17178_v55  ;;  %v17671_v56 = vpop.permute.xlu1 %7339 }
 0x4b9   : > { %20992 = vst [vmem:[#allocation190_spill] sm:$0xff] %v17671_v56  ;;  %13891 = vmatprep.mubr.msk.bf16.mxu1 %vm415_vm0, %v17209_v53  ;;  %13925 = vmatprep.mubr.msk.bf16.mxu0 %vm415_vm0, %v17209_v53  ;;  %v17677_v34 = vpop.permute.xlu0 %7047  ;;  %v21041_v56 = vld [vmem:[#allocation7_spill] sm:$0xff] }
 0x4ba   : > { %20993 = vst [vmem:[#allocation191_spill] sm:$0xff] %v17677_v34  ;;  %8193 = vperm.xlu1 %14371, %v12307_v40   ;;  %7901 = vperm.xlu0 %14370, %v12283_v17   ;;  %v12319_v40 = vld [vmem:[%s20791_s7 + $0x868] sm:$0xff]  ;;  %v12314_v17 = vld [vmem:[%s20791_s7 + $0x840] sm:$0xff] }
 0x4bb   : > { %13954 = vmatpush3.bf16.msra.mxu1 %v17292_v44  ;;  %13988 = vmatpush3.bf16.msra.mxu0 %v17301_v11  ;;  %v12306_v44 = vld [vmem:[%s20791_s7 + $0x800] sm:$0xff] }
 0x4bc   : > { %14021 = vmatprep.subr.bf16.mxu1 %v17664_v6  ;;  %14055 = vmatprep.subr.bf16.mxu0 %v17669_v31  ;;  %v17689_v50 = vpop.permute.xlu1 %7349 }
 0x4bd   : > { %20994 = vst [vmem:[#allocation192_spill] sm:$0xff] %v17689_v50  ;;  %v17691_v60 = vpop.permute.xlu0 %7057 }
 0x4be   : > { %20995 = vst [vmem:[#allocation193_spill] sm:$0xff] %v17691_v60  ;;  %8203 = vperm.xlu1 %14371, %v12309_v59   ;;  %7911 = vperm.xlu0 %14370, %v12285_v18  }
 0x4c0   : > { %13892 = vmatmul.mubr.msk.bf16.gmra.mrb[228].mxu1 %vm415_vm0, %v17244_v38  ;;  %13926 = vmatmul.mubr.msk.bf16.gmra.mrb[236].mxu0 %vm415_vm0, %v17244_v38  ;;  %v17703_v11 = vpop.permute.xlu1 %7359 }
 0x4c1   : > { %20996 = vst [vmem:[#allocation194_spill] sm:$0xff] %v17703_v11  ;;  %13895 = vmatprep.mubr.msk.bf16.mxu1 %vm415_vm0, %v17271_v43  ;;  %13929 = vmatprep.mubr.msk.bf16.mxu0 %vm415_vm0, %v17271_v43  ;;  %v17709_v28 = vpop.permute.xlu0 %7334 }
 0x4c2   : > { %20997 = vst [vmem:[#allocation195_spill] sm:$0xff] %v17709_v28  ;;  %8213 = vperm.xlu1 %14371, %v12311_v4   ;;  %8188 = vperm.xlu0 %14370, %v12306_v44   ;;  %v12321_v4 = vld [vmem:[%s20791_s7 + $0x878] sm:$0xff]  ;;  %v12316_v44 = vld [vmem:[%s20791_s7 + $0x850] sm:$0xff] }
 0x4c4   : > { %v17717_v63 = vpop.permute.xlu1 %7369 }
 0x4c5   : > { %20998 = vst [vmem:[#allocation196_spill] sm:$0xff] %v17717_v63  ;;  %v17719_v52 = vpop.permute.xlu0 %7344 }
 0x4c6   : > { %20999 = vst [vmem:[#allocation197_spill] sm:$0xff] %v17719_v52  ;;  %8223 = vperm.xlu1 %14371, %v12313_v48   ;;  %8198 = vperm.xlu0 %14370, %v12308_v13  }
 0x4c8   : > { %13896 = vmatmul.mubr.msk.bf16.gmra.mrb[232].mxu1 %vm415_vm0, %v17318_v22  ;;  %13930 = vmatmul.mubr.msk.bf16.gmra.mrb[240].mxu0 %vm415_vm0, %v17318_v22  ;;  %v17731_v14 = vpop.permute.xlu1 %7379 }
 0x4c9   : > { %21000 = vst [vmem:[#allocation198_spill] sm:$0xff] %v17731_v14  ;;  %13899 = vmatprep.mubr.msk.bf16.mxu1 %vm415_vm0, %v17345_v47  ;;  %13933 = vmatprep.mubr.msk.bf16.mxu0 %vm415_vm0, %v17345_v47  ;;  %v17737_v33 = vpop.permute.xlu0 %7354  ;;  %v12366_v14 = vld [vmem:[%s20791_s7 + $0x948] sm:$0xff] }
 0x4ca   : > { %21001 = vst [vmem:[#allocation199_spill] sm:$0xff] %v17737_v33  ;;  %8233 = vperm.xlu1 %14371, %v12315_v58   ;;  %8208 = vperm.xlu0 %14370, %v12310_v2   ;;  %v12323_v58 = vld [vmem:[%s20791_s7 + $0x888] sm:$0xff]  ;;  %v12318_v2 = vld [vmem:[%s20791_s7 + $0x860] sm:$0xff] }
 0x4cc   : > { %v17745_v9 = vpop.permute.xlu1 %7389 }
 0x4cd   : > { %21002 = vst [vmem:[#allocation200_spill] sm:$0xff] %v17745_v9  ;;  %v17747_v41 = vpop.permute.xlu0 %7364  ;;  %v12363_v9 = vld [vmem:[%s20791_s7 + $0x930] sm:$0xff] }
 0x4ce   : > { %21003 = vst [vmem:[#allocation201_spill] sm:$0xff] %v17747_v41  ;;  %8243 = vperm.xlu1 %14371, %v12317_v57   ;;  %8218 = vperm.xlu0 %14370, %v12312_v32  }
 0x4d0   : > { %13900 = vmatmul.mubr.msk.bf16.gmra.mrb[236].mxu1 %vm415_vm0, %v17380_v26  ;;  %13934 = vmatmul.mubr.msk.bf16.gmra.mrb[244].mxu0 %vm415_vm0, %v17380_v26  ;;  %v17759_v59 = vpop.permute.xlu1 %7399 }
 0x4d1   : > { %21004 = vst [vmem:[#allocation202_spill] sm:$0xff] %v17759_v59  ;;  %13903 = vmatprep.mubr.msk.bf16.mxu1 %vm415_vm0, %v17407_v61  ;;  %13937 = vmatprep.mubr.msk.bf16.mxu0 %vm415_vm0, %v17407_v61  ;;  %v17765_v18 = vpop.permute.xlu0 %7374 }
 0x4d2   : > { %21005 = vst [vmem:[#allocation203_spill] sm:$0xff] %v17765_v18  ;;  %8253 = vperm.xlu1 %14371, %v12319_v40   ;;  %8228 = vperm.xlu0 %14370, %v12314_v17   ;;  %v12325_v40 = vld [vmem:[%s20791_s7 + $0x898] sm:$0xff]  ;;  %v12320_v17 = vld [vmem:[%s20791_s7 + $0x870] sm:$0xff] }
 0x4d4   : > { %v17773_v48 = vpop.permute.xlu1 %7409 }
 0x4d5   : > { %21006 = vst [vmem:[#allocation204_spill] sm:$0xff] %v17773_v48  ;;  %v17775_v13 = vpop.permute.xlu0 %7384  ;;  %v12336_v48 = vld [vmem:[%s20791_s7 + $0x8f0] sm:$0xff] }
 0x4d6   : > { %21007 = vst [vmem:[#allocation205_spill] sm:$0xff] %v17775_v13  ;;  %8263 = vperm.xlu1 %14371, %v12321_v4   ;;  %8238 = vperm.xlu0 %14370, %v12316_v44   ;;  %v12370_v13 = vld [vmem:[%s20791_s7 + $0x968] sm:$0xff] }
 0x4d8   : > { %13904 = vmatmul.mubr.msk.bf16.gmra.mrb[240].mxu1 %vm415_vm0, %v17442_v54  ;;  %13938 = vmatmul.mubr.msk.bf16.gmra.mrb[248].mxu0 %vm415_vm0, %v17442_v54  ;;  %v17787_v57 = vpop.permute.xlu1 %7419 }
 0x4d9   : > { %21008 = vst [vmem:[#allocation206_spill] sm:$0xff] %v17787_v57  ;;  %13907 = vmatprep.mubr.msk.bf16.mxu1 %vm415_vm0, %v17469_v25  ;;  %13941 = vmatprep.mubr.msk.bf16.mxu0 %vm415_vm0, %v17469_v25  ;;  %v17793_v32 = vpop.permute.xlu0 %7394  ;;  %v12327_v57 = vld [vmem:[%s20791_s7 + $0x8a8] sm:$0xff] }
 0x4da   : > { %21009 = vst [vmem:[#allocation207_spill] sm:$0xff] %v17793_v32  ;;  %8273 = vperm.xlu1 %14371, %v12323_v58   ;;  %8248 = vperm.xlu0 %14370, %v12318_v2   ;;  %v12322_v58 = vld [vmem:[%s20791_s7 + $0x880] sm:$0xff] }
 0x4dc   : > { %v17801_v4 = vpop.permute.xlu1 %7429 }
 0x4dd   : > { %21010 = vst [vmem:[#allocation208_spill] sm:$0xff] %v17801_v4  ;;  %v17803_v44 = vpop.permute.xlu0 %7404  ;;  %v12324_v4 = vld [vmem:[%s20791_s7 + $0x890] sm:$0xff] }
 0x4de   : > { %21011 = vst [vmem:[#allocation209_spill] sm:$0xff] %v17803_v44  ;;  %8283 = vperm.xlu1 %14371, %v12325_v40   ;;  %8258 = vperm.xlu0 %14370, %v12320_v17   ;;  %v12329_v17 = vld [vmem:[%s20791_s7 + $0x8b8] sm:$0xff] }
 0x4e0   : > { %13908 = vmatmul.mubr.msk.bf16.gmra.mrb[244].mxu1 %vm415_vm0, %v17504_v42  ;;  %13942 = vmatmul.mubr.msk.bf16.gmra.mrb[252].mxu0 %vm415_vm0, %v17504_v42  ;;  %v17815_v2 = vpop.permute.xlu1 %7439 }
 0x4e1   : > { %21012 = vst [vmem:[#allocation210_spill] sm:$0xff] %v17815_v2  ;;  %13911 = vmatprep.mubr.msk.bf16.mxu1 %vm415_vm0, %v17535_v27  ;;  %13945 = vmatprep.mubr.msk.bf16.mxu0 %vm415_vm0, %v17535_v27  ;;  %v17821_v40 = vpop.permute.xlu0 %7414 }
 0x4e2   : > { %21013 = vst [vmem:[#allocation211_spill] sm:$0xff] %v17821_v40  ;;  %8293 = vperm.xlu1 %14371, %v12327_v57   ;;  %8268 = vperm.xlu0 %14370, %v12322_v58   ;;  %v12331_v40 = vld [vmem:[%s20791_s7 + $0x8c8] sm:$0xff]  ;;  %v12326_v57 = vld [vmem:[%s20791_s7 + $0x8a0] sm:$0xff] }
 0x4e4   : > { %v17829_v59 = vpop.permute.xlu1 %7449 }
 0x4e5   : > { %21014 = vst [vmem:[#allocation212_spill] sm:$0xff] %v17829_v59  ;;  %v17831_v2 = vpop.permute.xlu0 %7424  ;;  %v12328_v59 = vld [vmem:[%s20791_s7 + $0x8b0] sm:$0xff] }
 0x4e6   : > { %21015 = vst [vmem:[#allocation213_spill] sm:$0xff] %v17831_v2  ;;  %8303 = vperm.xlu1 %14371, %v12329_v17   ;;  %8278 = vperm.xlu0 %14370, %v12324_v4   ;;  %v12333_v17 = vld [vmem:[%s20791_s7 + $0x8d8] sm:$0xff] }
 0x4e8   : > { %13912 = vmatmul.mubr.msk.bf16.gmra.mrb[248].mxu1 %vm415_vm0, %v17563_v29  ;;  %13946 = vmatmul.mubr.msk.bf16.gmra.mrb[0].mxu0 %vm415_vm0, %v17563_v29  ;;  %v17843_v58 = vpop.permute.xlu1 %7459 }
 0x4e9   : > { %21016 = vst [vmem:[#allocation214_spill] sm:$0xff] %v17843_v58  ;;  %13915 = vmatprep.mubr.msk.bf16.mxu1 %vm415_vm0, %v17593_v19  ;;  %13949 = vmatprep.mubr.msk.bf16.mxu0 %vm415_vm0, %v17593_v19  ;;  %v17849_v4 = vpop.permute.xlu0 %7434 }
 0x4ea   : > { %21017 = vst [vmem:[#allocation215_spill] sm:$0xff] %v17849_v4  ;;  %8313 = vperm.xlu1 %14371, %v12331_v40   ;;  %8288 = vperm.xlu0 %14370, %v12326_v57   ;;  %v12335_v4 = vld [vmem:[%s20791_s7 + $0x8e8] sm:$0xff]  ;;  %v12330_v40 = vld [vmem:[%s20791_s7 + $0x8c0] sm:$0xff] }
 0x4ec   : > { %v17857_v2 = vpop.permute.xlu1 %7469 }
 0x4ed   : > { %21018 = vst [vmem:[#allocation216_spill] sm:$0xff] %v17857_v2  ;;  %v17859_v58 = vpop.permute.xlu0 %7444  ;;  %v12332_v2 = vld [vmem:[%s20791_s7 + $0x8d0] sm:$0xff] }
 0x4ee   : > { %21019 = vst [vmem:[#allocation217_spill] sm:$0xff] %v17859_v58  ;;  %8323 = vperm.xlu1 %14371, %v12333_v17   ;;  %8298 = vperm.xlu0 %14370, %v12328_v59   ;;  %v12337_v17 = vld [vmem:[%s20791_s7 + $0x8f8] sm:$0xff] }
 0x4f0   : > { %13916 = vmatmul.mubr.msk.bf16.gmra.mrb[252].mxu1 %vm415_vm0, %v17621_v35  ;;  %13950 = vmatmul.mubr.msk.bf16.gmra.mrb[4].mxu0 %vm415_vm0, %v17621_v35  ;;  %v17871_v57 = vpop.permute.xlu1 %7479 }
 0x4f1   : > { %21020 = vst [vmem:[#allocation218_spill] sm:$0xff] %v17871_v57  ;;  %13955 = vmatprep.mubr.msk.bf16.mxu1 %vm415_vm0, %v17145_v3  ;;  %13989 = vmatprep.mubr.msk.bf16.mxu0 %vm415_vm0, %v17145_v3  ;;  %v17877_v59 = vpop.permute.xlu0 %7454 }
 0x4f2   : > { %21021 = vst [vmem:[#allocation219_spill] sm:$0xff] %v17877_v59  ;;  %8333 = vperm.xlu1 %14371, %v12335_v4   ;;  %8308 = vperm.xlu0 %14370, %v12330_v40   ;;  %v12358_v59 = vld [vmem:[%s20791_s7 + $0x908] sm:$0xff]  ;;  %v12334_v4 = vld [vmem:[%s20791_s7 + $0x8e0] sm:$0xff] }
 0x4f3   : > { %v17902_v40 = vld [vmem:[%s20790_s6 + $0x40] sm:$0xff]  }
 0x4f4   : > { %v17885_v58 = vpop.permute.xlu1 %7489 }
 0x4f5   : > { %21022 = vst [vmem:[#allocation220_spill] sm:$0xff] %v17885_v58  ;;  %v17887_v57 = vpop.permute.xlu0 %7464 }
 0x4f6   : > { %21023 = vst [vmem:[#allocation221_spill] sm:$0xff] %v17887_v57  ;;  %8343 = vperm.xlu1 %14371, %v12337_v17   ;;  %8318 = vperm.xlu0 %14370, %v12332_v2   ;;  %v17907_v2 = vld [vmem:[%s20790_s6 + $0x48] sm:$0xff]   ;;  %v12360_v57 = vld [vmem:[%s20791_s7 + $0x918] sm:$0xff] }
 0x4f8   : > { %13956 = vmatmul.mubr.msk.bf16.vlgmr.msra.gmra.mrb[0].mxu1 %vm415_vm0, %v17178_v55  ;;  %13990 = vmatmul.mubr.msk.bf16.vlgmr.msra.gmra.mrb[8].mxu0 %vm415_vm0, %v17178_v55  ;;  %v17909_v17 = vpop.permute.xlu1 %7766 }
 0x4f9   : > { %21024 = vst [vmem:[#allocation222_spill] sm:$0xff] %v17909_v17  ;;  %13959 = vmatprep.mubr.msk.bf16.mxu1 %vm415_vm0, %v17209_v53  ;;  %13993 = vmatprep.mubr.msk.bf16.mxu0 %vm415_vm0, %v17209_v53  ;;  %v17915_v58 = vpop.permute.xlu0 %7474 }
 0x4fa   : > { %21025 = vst [vmem:[#allocation223_spill] sm:$0xff] %v17915_v58  ;;  %8620 = vperm.xlu1 %14371, %v12358_v59   ;;  %8328 = vperm.xlu0 %14370, %v12334_v4   ;;  %v12362_v4 = vld [vmem:[%s20791_s7 + $0x928] sm:$0xff]  ;;  %v12359_v58 = vld [vmem:[%s20791_s7 + $0x910] sm:$0xff] }
 0x4fb   : > { %14022 = vmatpush3.bf16.msra.mxu1 %v17664_v6  ;;  %14056 = vmatpush3.bf16.msra.mxu0 %v17669_v31  ;;  %v12357_v6 = vld [vmem:[%s20791_s7 + $0x900] sm:$0xff] }
 0x4fc   : > { %14089 = vmatprep.subr.bf16.mxu1 %v17902_v40  ;;  %14123 = vmatprep.subr.bf16.mxu0 %v17907_v2  ;;  %v17927_v32 = vpop.permute.xlu1 %7776 }
 0x4fd   : > { %21026 = vst [vmem:[#allocation224_spill] sm:$0xff] %v17927_v32  ;;  %v17929_v59 = vpop.permute.xlu0 %7484 }
 0x4fe   : > { %21027 = vst [vmem:[#allocation225_spill] sm:$0xff] %v17929_v59  ;;  %8630 = vperm.xlu1 %14371, %v12360_v57   ;;  %8338 = vperm.xlu0 %14370, %v12336_v48   ;;  %v12364_v57 = vld [vmem:[%s20791_s7 + $0x938] sm:$0xff] }
 0x500   : > { %13960 = vmatmul.mubr.msk.bf16.gmra.mrb[4].mxu1 %vm415_vm0, %v17244_v38  ;;  %13994 = vmatmul.mubr.msk.bf16.gmra.mrb[12].mxu0 %vm415_vm0, %v17244_v38  ;;  %v17941_v31 = vpop.permute.xlu1 %7786 }
 0x501   : > { %21028 = vst [vmem:[#allocation226_spill] sm:$0xff] %v17941_v31  ;;  %13963 = vmatprep.mubr.msk.bf16.mxu1 %vm415_vm0, %v17271_v43  ;;  %13997 = vmatprep.mubr.msk.bf16.mxu0 %vm415_vm0, %v17271_v43  ;;  %v17947_v48 = vpop.permute.xlu0 %7761  ;;  %v12372_v31 = vld [vmem:[%s20791_s7 + $0x978] sm:$0xff] }
 0x502   : > { %21029 = vst [vmem:[#allocation227_spill] sm:$0xff] %v17947_v48  ;;  %8640 = vperm.xlu1 %14371, %v12362_v4   ;;  %8615 = vperm.xlu0 %14370, %v12357_v6   ;;  %v12361_v4 = vld [vmem:[%s20791_s7 + $0x920] sm:$0xff] }
 0x504   : > { %v17955_v59 = vpop.permute.xlu1 %7796 }
 0x505   : > { %21030 = vst [vmem:[#allocation228_spill] sm:$0xff] %v17955_v59  ;;  %v17957_v44 = vpop.permute.xlu0 %7771 }
 0x506   : > { %21031 = vst [vmem:[#allocation229_spill] sm:$0xff] %v17957_v44  ;;  %8650 = vperm.xlu1 %14371, %v12364_v57   ;;  %8625 = vperm.xlu0 %14370, %v12359_v58   ;;  %v12368_v57 = vld [vmem:[%s20791_s7 + $0x958] sm:$0xff] }
 0x507   : > { %v21057_v44 = vld [vmem:[#allocation11_spill] sm:$0xff] }
 0x508   : > { %13964 = vmatmul.mubr.msk.bf16.gmra.mrb[8].mxu1 %vm415_vm0, %v17318_v22  ;;  %13998 = vmatmul.mubr.msk.bf16.gmra.mrb[16].mxu0 %vm415_vm0, %v17318_v22  ;;  %v17969_v6 = vpop.permute.xlu1 %7806 }
 0x509   : > { %21032 = vst [vmem:[#allocation230_spill] sm:$0xff] %v17969_v6  ;;  %13967 = vmatprep.mubr.msk.bf16.mxu1 %vm415_vm0, %v17345_v47  ;;  %14001 = vmatprep.mubr.msk.bf16.mxu0 %vm415_vm0, %v17345_v47  ;;  %v17975_v58 = vpop.permute.xlu0 %7781 }
 0x50a   : > { %21033 = vst [vmem:[#allocation231_spill] sm:$0xff] %v17975_v58  ;;  %8660 = vperm.xlu1 %14371, %v12366_v14   ;;  %8635 = vperm.xlu0 %14370, %v12361_v4   ;;  %v12365_v14 = vld [vmem:[%s20791_s7 + $0x940] sm:$0xff] }
 0x50c   : > { %v17983_v18 = vpop.permute.xlu1 %7816 }
 0x50d   : > { %21034 = vst [vmem:[#allocation232_spill] sm:$0xff] %v17983_v18  ;;  %v17985_v6 = vpop.permute.xlu0 %7791 }
 0x50e   : > { %21035 = vst [vmem:[#allocation233_spill] sm:$0xff] %v17985_v6  ;;  %8670 = vperm.xlu1 %14371, %v12368_v57   ;;  %8645 = vperm.xlu0 %14370, %v12363_v9   ;;  %v21038_v6 = vld [vmem:[#allocation4_spill] sm:$0xff] }
 0x510   : > { %13968 = vmatmul.mubr.msk.bf16.gmra.mrb[12].mxu1 %vm415_vm0, %v17380_v26  ;;  %14002 = vmatmul.mubr.msk.bf16.gmra.mrb[20].mxu0 %vm415_vm0, %v17380_v26  ;;  %v17997_v4 = vpop.permute.xlu1 %7826 }
 0x511   : > { %21036 = vst [vmem:[#allocation234_spill] sm:$0xff] %v17997_v4  ;;  %13971 = vmatprep.mubr.msk.bf16.mxu1 %vm415_vm0, %v17407_v61  ;;  %14005 = vmatprep.mubr.msk.bf16.mxu0 %vm415_vm0, %v17407_v61  ;;  %v18003_v9 = vpop.permute.xlu0 %7801  ;;  %v12367_v4 = vld [vmem:[%s20791_s7 + $0x950] sm:$0xff] }
 0x512   : > { %21037 = vst [vmem:[#allocation235_spill] sm:$0xff] %v18003_v9  ;;  %8680 = vperm.xlu1 %14371, %v12370_v13   ;;  %8655 = vperm.xlu0 %14370, %v12365_v14   ;;  %v13821_v57 = vpop.f32.mrb[192].mxu1  ;;  %v13855_v18 = vpop.f32.mrb[200].mxu0  ;;  %v21039_v13 = vld [vmem:[#allocation34_spill] sm:$0xff] }
 0x513   : > { %v4932_v11 = vmul.f32 %v13821_v57, %v15063_v5  ;;  %v5359_v59 = vmul.f32 %v13855_v18, %v15460_v20  ;;  %v4611_v58 = vpop.f32.mrb[193].mxu1  ;;  %v5037_v63 = vpop.f32.mrb[201].mxu0  ;;  %v21043_v20 = vld [vmem:[#allocation38_spill] sm:$0xff] }
 0x514   : > { %v4930_v9 = vmul.f32 %v21038_v6, %v4611_v58  ;;  %v5357_v14 = vmul.f32 %v21039_v13, %v5037_v63  ;;  %v18015_v33 = vpop.permute.xlu1 %7836  ;;  %v13822_v41 = vpop.f32.mrb[194].mxu1  ;;  %v12374_v63 = vld [vmem:[%s20791_s7 + $0x988] sm:$0xff]  ;;  %v12376_v13 = vld [vmem:[%s20791_s7 + $0x998] sm:$0xff] }
 0x515   : > { %21040 = vst [vmem:[#allocation4_spill] sm:$0xff] %v18015_v33  ;;  %v18017_v17 = vadd.f32 %v5359_v59, %v4932_v11  ;;  %v4933_v32 = vmul.f32 %v13822_v41, %v21041_v56  ;;  %v13856_v48 = vpop.f32.mrb[202].mxu0  ;;  %v18020_v50 = vpop.permute.xlu0 %7811  ;;  %v12369_v11 = vld [vmem:[%s20791_s7 + $0x960] sm:$0xff]  ;;  %v21044_v59 = vld [vmem:[#allocation5_spill] sm:$0xff] }
 0x516   : > { %8690 = vperm.xlu1 %14371, %v12372_v31   ;;  %21042 = vst [vmem:[#allocation34_spill] sm:$0xff] %v18020_v50  ;;  %8665 = vperm.xlu0 %14370, %v12367_v4   ;;  %v18022_v5 = vadd.f32 %v5357_v14, %v4930_v9  ;;  %v5360_v18 = vmul.f32 %v13856_v48, %v21043_v20  ;;  %v4614_v57 = vpop.f32.mrb[195].mxu1  ;;  %v5040_v6 = vpop.f32.mrb[203].mxu0  ;;  %v21045_v41 = vld [vmem:[#allocation36_spill] sm:$0xff] }
 0x517   : > { %v4931_v56 = vmul.f32 %v21044_v59, %v4614_v57  ;;  %v5358_v31 = vmul.f32 %v21045_v41, %v5040_v6  ;;  %v12373_v57 = vld [vmem:[%s20791_s7 + $0x980] sm:$0xff]  ;;  %v12375_v59 = vld [vmem:[%s20791_s7 + $0x990] sm:$0xff] }
 0x518   : > { %13972 = vmatmul.mubr.msk.bf16.gmra.mrb[16].mxu1 %vm415_vm0, %v17442_v54  ;;  %14006 = vmatmul.mubr.msk.bf16.gmra.mrb[24].mxu0 %vm415_vm0, %v17442_v54  ;;  %v18037_v48 = vadd.f32 %v5360_v18, %v4933_v32  ;;  %v18039_v58 = vpop.permute.xlu1 %7846  ;;  %v12371_v32 = vld [vmem:[%s20791_s7 + $0x970] sm:$0xff]  ;;  %v12378_v18 = vld [vmem:[%s20791_s7 + $0x9a8] sm:$0xff] }
 0x519   : > { %21046 = vst [vmem:[#allocation7_spill] sm:$0xff] %v18039_v58  ;;  %13975 = vmatprep.mubr.msk.bf16.mxu1 %vm415_vm0, %v17469_v25  ;;  %14009 = vmatprep.mubr.msk.bf16.mxu0 %vm415_vm0, %v17469_v25  ;;  %v18045_v4 = vadd.f32 %v5358_v31, %v4931_v56  ;;  %v18047_v9 = vpop.permute.xlu0 %7821  ;;  %v21052_v31 = vld [vmem:[#allocation8_spill] sm:$0xff] }
 0x51a   : > { %8700 = vperm.xlu1 %14371, %v12374_v63   ;;  %21047 = vst [vmem:[#allocation38_spill] sm:$0xff] %v18047_v9  ;;  %8675 = vperm.xlu0 %14370, %v12369_v11   ;;  %v12380_v11 = vld [vmem:[%s20791_s7 + $0x9b8] sm:$0xff] }
 0x51c   : > { %v18055_v14 = vpop.permute.xlu1 %7856 }
 0x51d   : > { %21048 = vst [vmem:[#allocation5_spill] sm:$0xff] %v18055_v14  ;;  %v18057_v20 = vpop.permute.xlu0 %7831 }
 0x51e   : > { %8710 = vperm.xlu1 %14371, %v12376_v13   ;;  %21049 = vst [vmem:[#allocation36_spill] sm:$0xff] %v18057_v20  ;;  %8685 = vperm.xlu0 %14370, %v12371_v32   ;;  %v21053_v32 = vld [vmem:[#allocation39_spill] sm:$0xff] }
 0x520   : > { %13976 = vmatmul.mubr.msk.bf16.gmra.mrb[20].mxu1 %vm415_vm0, %v17504_v42  ;;  %14010 = vmatmul.mubr.msk.bf16.gmra.mrb[28].mxu0 %vm415_vm0, %v17504_v42  ;;  %v18069_v6 = vpop.permute.xlu1 %7866 }
 0x521   : > { %21050 = vst [vmem:[#allocation236_spill] sm:$0xff] %v18069_v6  ;;  %13979 = vmatprep.mubr.msk.bf16.mxu1 %vm415_vm0, %v17535_v27  ;;  %14013 = vmatprep.mubr.msk.bf16.mxu0 %vm415_vm0, %v17535_v27  ;;  %v18075_v63 = vpop.permute.xlu0 %7841 }
 0x522   : > { %8720 = vperm.xlu1 %14371, %v12378_v18   ;;  %21051 = vst [vmem:[#allocation237_spill] sm:$0xff] %v18075_v63  ;;  %8695 = vperm.xlu0 %14370, %v12373_v57   ;;  %v21054_v18 = vld [vmem:[#allocation6_spill] sm:$0xff]  ;;  %v21055_v63 = vld [vmem:[#allocation37_spill] sm:$0xff] }
 0x523   : > { %v13825_v56 = vpop.f32.mrb[196].mxu1  ;;  %v13859_v41 = vpop.f32.mrb[204].mxu0 }
 0x524   : > { %v4936_v13 = vmul.f32 %v13825_v56, %v21052_v31  ;;  %v5363_v6 = vmul.f32 %v13859_v41, %v21053_v32  ;;  %v4627_v58 = vpop.f32.mrb[197].mxu1  ;;  %v5053_v14 = vpop.f32.mrb[205].mxu0  ;;  %v12382_v56 = vld [vmem:[%s20791_s7 + $0x9c8] sm:$0xff]  ;;  %v21061_v41 = vld [vmem:[#allocation40_spill] sm:$0xff] }
 0x525   : > { %v4934_v33 = vmul.f32 %v21054_v18, %v4627_v58  ;;  %v5361_v57 = vmul.f32 %v21055_v63, %v5053_v14  ;;  %v18087_v9 = vpop.permute.xlu1 %7876  ;;  %v13826_v20 = vpop.f32.mrb[198].mxu1  ;;  %v12377_v58 = vld [vmem:[%s20791_s7 + $0x9a0] sm:$0xff]  ;;  %v21059_v63 = vld [vmem:[#allocation42_spill] sm:$0xff]  ;;  %v12384_v18 = vld [vmem:[%s20791_s7 + $0x9d8] sm:$0xff] }
 0x526   : > { %8730 = vperm.xlu1 %14371, %v12380_v11   ;;  %21056 = vst [vmem:[#allocation8_spill] sm:$0xff] %v18087_v9  ;;  %8705 = vperm.xlu0 %14370, %v12375_v59   ;;  %v18089_v50 = vadd.f32 %v5363_v6, %v4936_v13  ;;  %v4937_v28 = vmul.f32 %v13826_v20, %v21057_v44  ;;  %v13860_v52 = vpop.f32.mrb[206].mxu0  ;;  %v18092_v10 = vpop.permute.xlu0 %7851  ;;  %v21060_v44 = vld [vmem:[#allocation9_spill] sm:$0xff] }
 0x527   : > { %21058 = vst [vmem:[#allocation39_spill] sm:$0xff] %v18092_v10  ;;  %v18100_v14 = vadd.f32 %v5361_v57, %v4934_v33  ;;  %v5364_v11 = vmul.f32 %v13860_v52, %v21059_v63  ;;  %v4630_v59 = vpop.f32.mrb[199].mxu1  ;;  %v5056_v6 = vpop.f32.mrb[207].mxu0  ;;  %v12379_v57 = vld [vmem:[%s20791_s7 + $0x9b0] sm:$0xff]  ;;  %v21071_v9 = vld [vmem:[#allocation41_spill] sm:$0xff] }
 0x528   : > { %13980 = vmatmul.mubr.msk.bf16.gmra.mrb[24].mxu1 %vm415_vm0, %v17563_v29  ;;  %14014 = vmatmul.mubr.msk.bf16.gmra.mrb[32].mxu0 %vm415_vm0, %v17563_v29  ;;  %v4935_v20 = vmul.f32 %v21060_v44, %v4630_v59  ;;  %v5362_v31 = vmul.f32 %v21061_v41, %v5056_v6  ;;  %v12388_v6 = vld [vmem:[%s20791_s7 + $0x9f8] sm:$0xff]  ;;  %v12383_v44 = vld [vmem:[%s20791_s7 + $0x9d0] sm:$0xff] }
 0x529   : > { %13983 = vmatprep.mubr.msk.bf16.mxu1 %vm415_vm0, %v17593_v19  ;;  %14017 = vmatprep.mubr.msk.bf16.mxu0 %vm415_vm0, %v17593_v19  ;;  %v18113_v33 = vadd.f32 %v5364_v11, %v4937_v28  ;;  %v18115_v52 = vpop.permute.xlu1 %7886 }
 0x52a   : > { %8740 = vperm.xlu1 %14371, %v12382_v56   ;;  %21062 = vst [vmem:[#allocation6_spill] sm:$0xff] %v18115_v52  ;;  %8715 = vperm.xlu0 %14370, %v12377_v58   ;;  %v18117_v13 = vadd.f32 %v5362_v31, %v4935_v20  ;;  %v18119_v32 = vpop.permute.xlu0 %7861  ;;  %v12386_v56 = vld [vmem:[%s20791_s7 + $0x9e8] sm:$0xff]  ;;  %v12381_v58 = vld [vmem:[%s20791_s7 + $0x9c0] sm:$0xff] }
 0x52b   : > { %21063 = vst [vmem:[#allocation37_spill] sm:$0xff] %v18119_v32  ;;  %v21068_v31 = vld [vmem:[#allocation12_spill] sm:$0xff] }
 0x52d   : > { %v18127_v63 = vpop.permute.xlu1 %7896 }
 0x52e   : > { %8750 = vperm.xlu1 %14371, %v12384_v18   ;;  %21064 = vst [vmem:[#allocation11_spill] sm:$0xff] %v18127_v63  ;;  %8725 = vperm.xlu0 %14370, %v12379_v57   ;;  %v18129_v28 = vpop.permute.xlu0 %7871  ;;  %v21069_v57 = vld [vmem:[#allocation43_spill] sm:$0xff] }
 0x52f   : > { %21065 = vst [vmem:[#allocation42_spill] sm:$0xff] %v18129_v28 }
 0x530   : > { %13984 = vmatmul.mubr.msk.bf16.gmra.mrb[28].mxu1 %vm415_vm0, %v17621_v35  ;;  %14018 = vmatmul.mubr.msk.bf16.gmra.mrb[36].mxu0 %vm415_vm0, %v17621_v35 }
 0x531   : > { %14023 = vmatprep.mubr.msk.bf16.mxu1 %vm415_vm0, %v17145_v3  ;;  %14057 = vmatprep.mubr.msk.bf16.mxu0 %vm415_vm0, %v17145_v3  ;;  %v18145_v11 = vpop.permute.xlu1 %7906 }
 0x532   : > { %8760 = vperm.xlu1 %14371, %v12386_v56   ;;  %21066 = vst [vmem:[#allocation9_spill] sm:$0xff] %v18145_v11  ;;  %8735 = vperm.xlu0 %14370, %v12381_v58   ;;  %v18147_v59 = vpop.permute.xlu0 %7881  ;;  %v21070_v11 = vld [vmem:[#allocation10_spill] sm:$0xff] }
 0x533   : > { %21067 = vst [vmem:[#allocation40_spill] sm:$0xff] %v18147_v59  ;;  %v13829_v20 = vpop.f32.mrb[200].mxu1  ;;  %v13863_v41 = vpop.f32.mrb[208].mxu0 }
 0x534   : > { %v4940_v18 = vmul.f32 %v13829_v20, %v21068_v31  ;;  %v5367_v52 = vmul.f32 %v13863_v41, %v21069_v57  ;;  %v4643_v56 = vpop.f32.mrb[201].mxu1  ;;  %v5069_v63 = vpop.f32.mrb[209].mxu0  ;;  %v12409_v20 = vld [vmem:[%s20791_s7 + $0xa08] sm:$0xff]  ;;  %v21077_v41 = vld [vmem:[#allocation44_spill] sm:$0xff] }
 0x535   : > { %v4938_v58 = vmul.f32 %v21070_v11, %v4643_v56  ;;  %v5365_v59 = vmul.f32 %v21071_v9, %v5069_v63  ;;  %v18159_v32 = vpop.permute.xlu1 %7916  ;;  %v13830_v28 = vpop.f32.mrb[202].mxu1  ;;  %v12385_v9 = vld [vmem:[%s20791_s7 + $0x9e0] sm:$0xff]  ;;  %v21075_v11 = vld [vmem:[#allocation46_spill] sm:$0xff] }
 0x536   : > { %8770 = vperm.xlu1 %14371, %v12388_v6   ;;  %21072 = vst [vmem:[#allocation12_spill] sm:$0xff] %v18159_v32  ;;  %8745 = vperm.xlu0 %14370, %v12383_v44   ;;  %v18161_v10 = vadd.f32 %v5367_v52, %v4940_v18  ;;  %v4941_v34 = vmul.f32 %v13830_v28, %v21073_v15  ;;  %v13864_v60 = vpop.f32.mrb[210].mxu0  ;;  %v18164_v8 = vpop.permute.xlu0 %7891  ;;  %v18182_v15 = vld [vmem:[%s20790_s6 + $0x50] sm:$0xff]   ;;  %v18187_v28 = vld [vmem:[%s20790_s6 + $0x58] sm:$0xff]   ;;  %v21087_v32 = vld [vmem:[#allocation45_spill] sm:$0xff] }
 0x537   : > { %21074 = vst [vmem:[#allocation43_spill] sm:$0xff] %v18164_v8  ;;  %v18172_v63 = vadd.f32 %v5365_v59, %v4938_v58  ;;  %v5368_v6 = vmul.f32 %v13864_v60, %v21075_v11  ;;  %v4646_v44 = vpop.f32.mrb[203].mxu1  ;;  %v5072_v52 = vpop.f32.mrb[211].mxu0  ;;  %v21076_v59 = vld [vmem:[#allocation13_spill] sm:$0xff]  ;;  %v12411_v11 = vld [vmem:[%s20791_s7 + $0xa18] sm:$0xff] }
 0x538   : > { %14024 = vmatmul.mubr.msk.bf16.vlgmr.msra.gmra.mrb[32].mxu1 %vm415_vm0, %v17178_v55  ;;  %14058 = vmatmul.mubr.msk.bf16.vlgmr.msra.gmra.mrb[40].mxu0 %vm415_vm0, %v17178_v55  ;;  %v4939_v60 = vmul.f32 %v21076_v59, %v4646_v44  ;;  %v5366_v31 = vmul.f32 %v21077_v41, %v5072_v52  ;;  %v12387_v44 = vld [vmem:[%s20791_s7 + $0x9f0] sm:$0xff]  ;;  %v12415_v52 = vld [vmem:[%s20791_s7 + $0xa38] sm:$0xff] }
 0x539   : > { %14027 = vmatprep.mubr.msk.bf16.mxu1 %vm415_vm0, %v17209_v53  ;;  %14061 = vmatprep.mubr.msk.bf16.mxu0 %vm415_vm0, %v17209_v53  ;;  %v18195_v18 = vadd.f32 %v5368_v6, %v4941_v34  ;;  %v18197_v57 = vpop.permute.xlu1 %8193  ;;  %v12410_v59 = vld [vmem:[%s20791_s7 + $0xa10] sm:$0xff] }
 0x53a   : > { %9047 = vperm.xlu1 %14371, %v12409_v20   ;;  %21078 = vst [vmem:[#allocation10_spill] sm:$0xff] %v18197_v57  ;;  %8755 = vperm.xlu0 %14370, %v12385_v9   ;;  %v18199_v56 = vadd.f32 %v5366_v31, %v4939_v60  ;;  %v18201_v58 = vpop.permute.xlu0 %7901  ;;  %v12413_v9 = vld [vmem:[%s20791_s7 + $0xa28] sm:$0xff]  ;;  %v21084_v31 = vld [vmem:[#allocation16_spill] sm:$0xff] }
 0x53b   : > { %21079 = vst [vmem:[#allocation41_spill] sm:$0xff] %v18201_v58  ;;  %14090 = vmatpush3.bf16.msra.mxu1 %v17902_v40  ;;  %14124 = vmatpush3.bf16.msra.mxu0 %v17907_v2  ;;  %v12408_v40 = vld [vmem:[%s20791_s7 + $0xa00] sm:$0xff] }
 0x53c   : > { %14157 = vmatprep.subr.bf16.mxu1 %v18182_v15  ;;  %14191 = vmatprep.subr.bf16.mxu0 %v18187_v28 }
 0x53d   : > { %v18213_v34 = vpop.permute.xlu1 %8203 }
 0x53e   : > { %9057 = vperm.xlu1 %14371, %v12411_v11   ;;  %21080 = vst [vmem:[#allocation15_spill] sm:$0xff] %v18213_v34  ;;  %8765 = vperm.xlu0 %14370, %v12387_v44   ;;  %v18215_v20 = vpop.permute.xlu0 %7911  ;;  %v21085_v44 = vld [vmem:[#allocation47_spill] sm:$0xff] }
 0x53f   : > { %21081 = vst [vmem:[#allocation46_spill] sm:$0xff] %v18215_v20 }
 0x540   : > { %14028 = vmatmul.mubr.msk.bf16.gmra.mrb[36].mxu1 %vm415_vm0, %v17244_v38  ;;  %14062 = vmatmul.mubr.msk.bf16.gmra.mrb[44].mxu0 %vm415_vm0, %v17244_v38 }
 0x541   : > { %14031 = vmatprep.mubr.msk.bf16.mxu1 %vm415_vm0, %v17271_v43  ;;  %14065 = vmatprep.mubr.msk.bf16.mxu0 %vm415_vm0, %v17271_v43  ;;  %v18231_v2 = vpop.permute.xlu1 %8213 }
 0x542   : > { %9067 = vperm.xlu1 %14371, %v12413_v9   ;;  %21082 = vst [vmem:[#allocation13_spill] sm:$0xff] %v18231_v2  ;;  %9042 = vperm.xlu0 %14370, %v12408_v40   ;;  %v18233_v6 = vpop.permute.xlu0 %8188  ;;  %v21086_v2 = vld [vmem:[#allocation14_spill] sm:$0xff] }
 0x543   : > { %21083 = vst [vmem:[#allocation44_spill] sm:$0xff] %v18233_v6  ;;  %v13833_v60 = vpop.f32.mrb[204].mxu1  ;;  %v13867_v41 = vpop.f32.mrb[212].mxu0 }
 0x544   : > { %v4944_v11 = vmul.f32 %v13833_v60, %v21084_v31  ;;  %v5371_v57 = vmul.f32 %v13867_v41, %v21085_v44  ;;  %v4659_v9 = vpop.f32.mrb[205].mxu1  ;;  %v5085_v34 = vpop.f32.mrb[213].mxu0  ;;  %v12417_v60 = vld [vmem:[%s20791_s7 + $0xa48] sm:$0xff]  ;;  %v21093_v41 = vld [vmem:[#allocation48_spill] sm:$0xff] }
 0x545   : > { %v4942_v40 = vmul.f32 %v21086_v2, %v4659_v9  ;;  %v5369_v6 = vmul.f32 %v21087_v32, %v5085_v34  ;;  %v18245_v58 = vpop.permute.xlu1 %8223  ;;  %v13834_v20 = vpop.f32.mrb[206].mxu1  ;;  %v12412_v32 = vld [vmem:[%s20791_s7 + $0xa20] sm:$0xff]  ;;  %v21091_v2 = vld [vmem:[#allocation50_spill] sm:$0xff]  ;;  %v12419_v9 = vld [vmem:[%s20791_s7 + $0xa58] sm:$0xff] }
 0x546   : > { %9077 = vperm.xlu1 %14371, %v12415_v52   ;;  %21088 = vst [vmem:[#allocation16_spill] sm:$0xff] %v18245_v58  ;;  %9052 = vperm.xlu0 %14370, %v12410_v59   ;;  %v18247_v8 = vadd.f32 %v5371_v57, %v4944_v11  ;;  %v4945_v37 = vmul.f32 %v13834_v20, %v21089_v12  ;;  %v13868_v51 = vpop.f32.mrb[214].mxu0  ;;  %v18250_v16 = vpop.permute.xlu0 %8198  ;;  %v21092_v12 = vld [vmem:[#allocation17_spill] sm:$0xff] }
 0x547   : > { %21090 = vst [vmem:[#allocation47_spill] sm:$0xff] %v18250_v16  ;;  %v18258_v34 = vadd.f32 %v5369_v6, %v4942_v40  ;;  %v5372_v52 = vmul.f32 %v13868_v51, %v21091_v2  ;;  %v4662_v59 = vpop.f32.mrb[207].mxu1  ;;  %v5088_v57 = vpop.f32.mrb[215].mxu0  ;;  %v12414_v40 = vld [vmem:[%s20791_s7 + $0xa30] sm:$0xff]  ;;  %v21103_v58 = vld [vmem:[#allocation49_spill] sm:$0xff] }
 0x548   : > { %14032 = vmatmul.mubr.msk.bf16.gmra.mrb[40].mxu1 %vm415_vm0, %v17318_v22  ;;  %14066 = vmatmul.mubr.msk.bf16.gmra.mrb[48].mxu0 %vm415_vm0, %v17318_v22  ;;  %v4943_v20 = vmul.f32 %v21092_v12, %v4662_v59  ;;  %v5370_v31 = vmul.f32 %v21093_v41, %v5088_v57  ;;  %v12423_v57 = vld [vmem:[%s20791_s7 + $0xa78] sm:$0xff]  ;;  %v12418_v12 = vld [vmem:[%s20791_s7 + $0xa50] sm:$0xff] }
 0x549   : > { %14035 = vmatprep.mubr.msk.bf16.mxu1 %vm415_vm0, %v17345_v47  ;;  %14069 = vmatprep.mubr.msk.bf16.mxu0 %vm415_vm0, %v17345_v47  ;;  %v18271_v6 = vadd.f32 %v5372_v52, %v4945_v37  ;;  %v18273_v51 = vpop.permute.xlu1 %8233 }
 0x54a   : > { %9087 = vperm.xlu1 %14371, %v12417_v60   ;;  %21094 = vst [vmem:[#allocation14_spill] sm:$0xff] %v18273_v51  ;;  %9062 = vperm.xlu0 %14370, %v12412_v32   ;;  %v18275_v11 = vadd.f32 %v5370_v31, %v4943_v20  ;;  %v18277_v44 = vpop.permute.xlu0 %8208  ;;  %v12421_v60 = vld [vmem:[%s20791_s7 + $0xa68] sm:$0xff]  ;;  %v12416_v32 = vld [vmem:[%s20791_s7 + $0xa40] sm:$0xff] }
 0x54b   : > { %21095 = vst [vmem:[#allocation45_spill] sm:$0xff] %v18277_v44  ;;  %v21100_v31 = vld [vmem:[#allocation20_spill] sm:$0xff] }
 0x54d   : > { %v18285_v2 = vpop.permute.xlu1 %8243 }
 0x54e   : > { %9097 = vperm.xlu1 %14371, %v12419_v9   ;;  %21096 = vst [vmem:[#allocation19_spill] sm:$0xff] %v18285_v2  ;;  %9072 = vperm.xlu0 %14370, %v12414_v40   ;;  %v18287_v37 = vpop.permute.xlu0 %8218  ;;  %v21101_v40 = vld [vmem:[#allocation51_spill] sm:$0xff] }
 0x54f   : > { %21097 = vst [vmem:[#allocation50_spill] sm:$0xff] %v18287_v37 }
 0x550   : > { %14036 = vmatmul.mubr.msk.bf16.gmra.mrb[44].mxu1 %vm415_vm0, %v17380_v26  ;;  %14070 = vmatmul.mubr.msk.bf16.gmra.mrb[52].mxu0 %vm415_vm0, %v17380_v26 }
 0x551   : > { %14039 = vmatprep.mubr.msk.bf16.mxu1 %vm415_vm0, %v17407_v61  ;;  %14073 = vmatprep.mubr.msk.bf16.mxu0 %vm415_vm0, %v17407_v61  ;;  %v18303_v52 = vpop.permute.xlu1 %8253 }
 0x552   : > { %9107 = vperm.xlu1 %14371, %v12421_v60   ;;  %21098 = vst [vmem:[#allocation17_spill] sm:$0xff] %v18303_v52  ;;  %9082 = vperm.xlu0 %14370, %v12416_v32   ;;  %v18305_v59 = vpop.permute.xlu0 %8228  ;;  %v21102_v52 = vld [vmem:[#allocation18_spill] sm:$0xff] }
 0x553   : > { %21099 = vst [vmem:[#allocation48_spill] sm:$0xff] %v18305_v59  ;;  %v13837_v20 = vpop.f32.mrb[208].mxu1  ;;  %v13871_v41 = vpop.f32.mrb[216].mxu0 }
 0x554   : > { %v4948_v9 = vmul.f32 %v13837_v20, %v21100_v31  ;;  %v5375_v51 = vmul.f32 %v13871_v41, %v21101_v40  ;;  %v4675_v60 = vpop.f32.mrb[209].mxu1  ;;  %v5101_v2 = vpop.f32.mrb[217].mxu0  ;;  %v12425_v20 = vld [vmem:[%s20791_s7 + $0xa88] sm:$0xff]  ;;  %v21109_v41 = vld [vmem:[#allocation52_spill] sm:$0xff] }
 0x555   : > { %v4946_v32 = vmul.f32 %v21102_v52, %v4675_v60  ;;  %v5373_v59 = vmul.f32 %v21103_v58, %v5101_v2  ;;  %v18317_v44 = vpop.permute.xlu1 %8263  ;;  %v13838_v37 = vpop.f32.mrb[210].mxu1  ;;  %v12420_v58 = vld [vmem:[%s20791_s7 + $0xa60] sm:$0xff]  ;;  %v21107_v52 = vld [vmem:[#allocation54_spill] sm:$0xff]  ;;  %v12427_v60 = vld [vmem:[%s20791_s7 + $0xa98] sm:$0xff] }
 0x556   : > { %9117 = vperm.xlu1 %14371, %v12423_v57   ;;  %21104 = vst [vmem:[#allocation20_spill] sm:$0xff] %v18317_v44  ;;  %9092 = vperm.xlu0 %14370, %v12418_v12   ;;  %v18319_v16 = vadd.f32 %v5375_v51, %v4948_v9  ;;  %v4949_v36 = vmul.f32 %v13838_v37, %v21105_v7  ;;  %v13872_v0 = vpop.f32.mrb[218].mxu0  ;;  %v18322_v62 = vpop.permute.xlu0 %8238  ;;  %v21108_v7 = vld [vmem:[#allocation21_spill] sm:$0xff] }
 0x557   : > { %21106 = vst [vmem:[#allocation51_spill] sm:$0xff] %v18322_v62  ;;  %v18330_v2 = vadd.f32 %v5373_v59, %v4946_v32  ;;  %v5376_v57 = vmul.f32 %v13872_v0, %v21107_v52  ;;  %v4678_v12 = vpop.f32.mrb[211].mxu1  ;;  %v5104_v51 = vpop.f32.mrb[219].mxu0  ;;  %v12422_v32 = vld [vmem:[%s20791_s7 + $0xa70] sm:$0xff]  ;;  %v21119_v44 = vld [vmem:[#allocation53_spill] sm:$0xff] }
 0x558   : > { %14040 = vmatmul.mubr.msk.bf16.gmra.mrb[48].mxu1 %vm415_vm0, %v17442_v54  ;;  %14074 = vmatmul.mubr.msk.bf16.gmra.mrb[56].mxu0 %vm415_vm0, %v17442_v54  ;;  %v4947_v37 = vmul.f32 %v21108_v7, %v4678_v12  ;;  %v5374_v31 = vmul.f32 %v21109_v41, %v5104_v51  ;;  %v12431_v51 = vld [vmem:[%s20791_s7 + $0xab8] sm:$0xff]  ;;  %v12426_v7 = vld [vmem:[%s20791_s7 + $0xa90] sm:$0xff] }
 0x559   : > { %14043 = vmatprep.mubr.msk.bf16.mxu1 %vm415_vm0, %v17469_v25  ;;  %14077 = vmatprep.mubr.msk.bf16.mxu0 %vm415_vm0, %v17469_v25  ;;  %v18343_v59 = vadd.f32 %v5376_v57, %v4949_v36  ;;  %v18345_v0 = vpop.permute.xlu1 %8273 }
 0x55a   : > { %9127 = vperm.xlu1 %14371, %v12425_v20   ;;  %21110 = vst [vmem:[#allocation18_spill] sm:$0xff] %v18345_v0  ;;  %9102 = vperm.xlu0 %14370, %v12420_v58   ;;  %v18347_v9 = vadd.f32 %v5374_v31, %v4947_v37  ;;  %v18349_v40 = vpop.permute.xlu0 %8248  ;;  %v12429_v20 = vld [vmem:[%s20791_s7 + $0xaa8] sm:$0xff]  ;;  %v12424_v58 = vld [vmem:[%s20791_s7 + $0xa80] sm:$0xff] }
 0x55b   : > { %21111 = vst [vmem:[#allocation49_spill] sm:$0xff] %v18349_v40  ;;  %v21116_v31 = vld [vmem:[#allocation24_spill] sm:$0xff] }
 0x55d   : > { %v18357_v52 = vpop.permute.xlu1 %8283 }
 0x55e   : > { %9137 = vperm.xlu1 %14371, %v12427_v60   ;;  %21112 = vst [vmem:[#allocation23_spill] sm:$0xff] %v18357_v52  ;;  %9112 = vperm.xlu0 %14370, %v12422_v32   ;;  %v18359_v36 = vpop.permute.xlu0 %8258  ;;  %v21117_v32 = vld [vmem:[#allocation55_spill] sm:$0xff] }
 0x55f   : > { %21113 = vst [vmem:[#allocation54_spill] sm:$0xff] %v18359_v36 }
 0x560   : > { %14044 = vmatmul.mubr.msk.bf16.gmra.mrb[52].mxu1 %vm415_vm0, %v17504_v42  ;;  %14078 = vmatmul.mubr.msk.bf16.gmra.mrb[60].mxu0 %vm415_vm0, %v17504_v42 }
 0x561   : > { %14047 = vmatprep.mubr.msk.bf16.mxu1 %vm415_vm0, %v17535_v27  ;;  %14081 = vmatprep.mubr.msk.bf16.mxu0 %vm415_vm0, %v17535_v27  ;;  %v18375_v57 = vpop.permute.xlu1 %8293 }
 0x562   : > { %9147 = vperm.xlu1 %14371, %v12429_v20   ;;  %21114 = vst [vmem:[#allocation21_spill] sm:$0xff] %v18375_v57  ;;  %9122 = vperm.xlu0 %14370, %v12424_v58   ;;  %v18377_v12 = vpop.permute.xlu0 %8268  ;;  %v21118_v57 = vld [vmem:[#allocation22_spill] sm:$0xff] }
 0x563   : > { %21115 = vst [vmem:[#allocation52_spill] sm:$0xff] %v18377_v12  ;;  %v13841_v37 = vpop.f32.mrb[212].mxu1  ;;  %v13875_v41 = vpop.f32.mrb[220].mxu0 }
 0x564   : > { %v4952_v60 = vmul.f32 %v13841_v37, %v21116_v31  ;;  %v5379_v0 = vmul.f32 %v13875_v41, %v21117_v32  ;;  %v4691_v20 = vpop.f32.mrb[213].mxu1  ;;  %v5117_v52 = vpop.f32.mrb[221].mxu0  ;;  %v12433_v37 = vld [vmem:[%s20791_s7 + $0xac8] sm:$0xff]  ;;  %v21126_v41 = vld [vmem:[#allocation56_spill] sm:$0xff] }
 0x565   : > { %v4950_v58 = vmul.f32 %v21118_v57, %v4691_v20  ;;  %v5377_v12 = vmul.f32 %v21119_v44, %v5117_v52  ;;  %v18389_v40 = vpop.permute.xlu1 %8303  ;;  %v13842_v36 = vpop.f32.mrb[214].mxu1  ;;  %v12428_v44 = vld [vmem:[%s20791_s7 + $0xaa0] sm:$0xff]  ;;  %v21124_v57 = vld [vmem:[#allocation58_spill] sm:$0xff]  ;;  %v12435_v20 = vld [vmem:[%s20791_s7 + $0xad8] sm:$0xff] }
 0x566   : > { %9157 = vperm.xlu1 %14371, %v12431_v51   ;;  %21120 = vst [vmem:[#allocation24_spill] sm:$0xff] %v18389_v40  ;;  %9132 = vperm.xlu0 %14370, %v12426_v7   ;;  %v18391_v62 = vadd.f32 %v5379_v0, %v4952_v60  ;;  %v4953_v45 = vmul.f32 %v13842_v36, %v21121_v30  ;;  %v13876_v24 = vpop.f32.mrb[222].mxu0  ;;  %v18394_v49 = vpop.permute.xlu0 %8278  ;;  %v21125_v30 = vld [vmem:[#allocation25_spill] sm:$0xff] }
 0x567   : > { %21122 = vst [vmem:[#allocation55_spill] sm:$0xff] %v18394_v49  ;;  %v18402_v52 = vadd.f32 %v5377_v12, %v4950_v58  ;;  %v5380_v51 = vmul.f32 %v13876_v24, %v21124_v57  ;;  %v4694_v7 = vpop.f32.mrb[215].mxu1  ;;  %v5120_v0 = vpop.f32.mrb[223].mxu0  ;;  %v12430_v58 = vld [vmem:[%s20791_s7 + $0xab0] sm:$0xff]  ;;  %v21138_v40 = vld [vmem:[#allocation57_spill] sm:$0xff] }
 0x568   : > { %14048 = vmatmul.mubr.msk.bf16.gmra.mrb[56].mxu1 %vm415_vm0, %v17563_v29  ;;  %14082 = vmatmul.mubr.msk.bf16.gmra.mrb[64].mxu0 %vm415_vm0, %v17563_v29  ;;  %v4951_v36 = vmul.f32 %v21125_v30, %v4694_v7  ;;  %v5378_v31 = vmul.f32 %v21126_v41, %v5120_v0  ;;  %v12439_v0 = vld [vmem:[%s20791_s7 + $0xaf8] sm:$0xff]  ;;  %v12434_v30 = vld [vmem:[%s20791_s7 + $0xad0] sm:$0xff] }
 0x569   : > { %21123 = vst [vmem:[#allocation22_spill] sm:$0xff] %v18402_v52  ;;  %14051 = vmatprep.mubr.msk.bf16.mxu1 %vm415_vm0, %v17593_v19  ;;  %14085 = vmatprep.mubr.msk.bf16.mxu0 %vm415_vm0, %v17593_v19  ;;  %v18415_v12 = vadd.f32 %v5380_v51, %v4953_v45  ;;  %v18417_v24 = vpop.permute.xlu1 %8313 }
 0x56a   : > { %9167 = vperm.xlu1 %14371, %v12433_v37   ;;  %21128 = vst [vmem:[#allocation27_spill] sm:$0xff] %v18417_v24  ;;  %9142 = vperm.xlu0 %14370, %v12428_v44   ;;  %v18419_v60 = vadd.f32 %v5378_v31, %v4951_v36  ;;  %v18421_v32 = vpop.permute.xlu0 %8288  ;;  %v12437_v37 = vld [vmem:[%s20791_s7 + $0xae8] sm:$0xff]  ;;  %v12432_v44 = vld [vmem:[%s20791_s7 + $0xac0] sm:$0xff] }
 0x56b   : > { %21127 = vst [vmem:[#allocation53_spill] sm:$0xff] %v18415_v12  ;;  %21130 = vst [vmem:[#allocation25_spill] sm:$0xff] %v18421_v32  ;;  %v21135_v31 = vld [vmem:[#allocation28_spill] sm:$0xff] }
 0x56c   : > { %21129 = vst [vmem:[#allocation58_spill] sm:$0xff] %v18419_v60 }
 0x56d   : > { %v18429_v57 = vpop.permute.xlu1 %8323 }
 0x56e   : > { %9177 = vperm.xlu1 %14371, %v12435_v20   ;;  %21131 = vst [vmem:[#allocation56_spill] sm:$0xff] %v18429_v57  ;;  %9152 = vperm.xlu0 %14370, %v12430_v58   ;;  %v18431_v45 = vpop.permute.xlu0 %8298  ;;  %v21136_v58 = vld [vmem:[#allocation59_spill] sm:$0xff] }
 0x56f   : > { %21132 = vst [vmem:[#allocation238_spill] sm:$0xff] %v18431_v45 }
 0x570   : > { %14052 = vmatmul.mubr.msk.bf16.gmra.mrb[60].mxu1 %vm415_vm0, %v17621_v35  ;;  %14086 = vmatmul.mubr.msk.bf16.gmra.mrb[68].mxu0 %vm415_vm0, %v17621_v35 }
 0x571   : > { %14091 = vmatprep.mubr.msk.bf16.mxu1 %vm415_vm0, %v17145_v3  ;;  %14125 = vmatprep.mubr.msk.bf16.mxu0 %vm415_vm0, %v17145_v3  ;;  %v18447_v51 = vpop.permute.xlu1 %8333 }
 0x572   : > { %9187 = vperm.xlu1 %14371, %v12437_v37   ;;  %21133 = vst [vmem:[#allocation239_spill] sm:$0xff] %v18447_v51  ;;  %9162 = vperm.xlu0 %14370, %v12432_v44   ;;  %v18449_v7 = vpop.permute.xlu0 %8308  ;;  %v21137_v51 = vld [vmem:[#allocation26_spill] sm:$0xff] }
 0x573   : > { %21134 = vst [vmem:[#allocation240_spill] sm:$0xff] %v18449_v7  ;;  %v13845_v36 = vpop.f32.mrb[216].mxu1  ;;  %v13879_v41 = vpop.f32.mrb[224].mxu0 }
 0x574   : > { %v4956_v20 = vmul.f32 %v13845_v36, %v21135_v31  ;;  %v5383_v24 = vmul.f32 %v13879_v41, %v21136_v58  ;;  %v4707_v37 = vpop.f32.mrb[217].mxu1  ;;  %v5133_v57 = vpop.f32.mrb[225].mxu0  ;;  %v12460_v36 = vld [vmem:[%s20791_s7 + $0xb08] sm:$0xff]  ;;  %v21144_v41 = vld [vmem:[#allocation60_spill] sm:$0xff] }
 0x575   : > { %v4954_v44 = vmul.f32 %v21137_v51, %v4707_v37  ;;  %v5381_v7 = vmul.f32 %v21138_v40, %v5133_v57  ;;  %v18461_v32 = vpop.permute.xlu1 %8343  ;;  %v13846_v45 = vpop.f32.mrb[218].mxu1  ;;  %v12436_v40 = vld [vmem:[%s20791_s7 + $0xae0] sm:$0xff]  ;;  %v21142_v51 = vld [vmem:[#allocation62_spill] sm:$0xff] }
 0x576   : > { %9197 = vperm.xlu1 %14371, %v12439_v0   ;;  %21139 = vst [vmem:[#allocation28_spill] sm:$0xff] %v18461_v32  ;;  %9172 = vperm.xlu0 %14370, %v12434_v30   ;;  %v18463_v49 = vadd.f32 %v5383_v24, %v4956_v20  ;;  %v4957_v60 = vmul.f32 %v13846_v45, %v21140_v21  ;;  %v13880_v12 = vpop.f32.mrb[226].mxu0  ;;  %v18466_v52 = vpop.permute.xlu0 %8318  ;;  %v18484_v21 = vld [vmem:[%s20790_s6 + $0x60] sm:$0xff]   ;;  %v18489_v45 = vld [vmem:[%s20790_s6 + $0x68] sm:$0xff]   ;;  %v21154_v32 = vld [vmem:[#allocation63_spill] sm:$0xff] }
 0x577   : > { %21141 = vst [vmem:[#allocation59_spill] sm:$0xff] %v18466_v52  ;;  %v18474_v57 = vadd.f32 %v5381_v7, %v4954_v44  ;;  %v5384_v0 = vmul.f32 %v13880_v12, %v21142_v51  ;;  %v4710_v30 = vpop.f32.mrb[219].mxu1  ;;  %v5136_v24 = vpop.f32.mrb[227].mxu0  ;;  %v21143_v7 = vld [vmem:[#allocation29_spill] sm:$0xff]  ;;  %v12462_v51 = vld [vmem:[%s20791_s7 + $0xb18] sm:$0xff] }
 0x578   : > { %14092 = vmatmul.mubr.msk.bf16.vlgmr.msra.gmra.mrb[64].mxu1 %vm415_vm0, %v17178_v55  ;;  %14126 = vmatmul.mubr.msk.bf16.vlgmr.msra.gmra.mrb[72].mxu0 %vm415_vm0, %v17178_v55  ;;  %v4955_v12 = vmul.f32 %v21143_v7, %v4710_v30  ;;  %v5382_v31 = vmul.f32 %v21144_v41, %v5136_v24  ;;  %v12438_v30 = vld [vmem:[%s20791_s7 + $0xaf0] sm:$0xff]  ;;  %v12466_v7 = vld [vmem:[%s20791_s7 + $0xb38] sm:$0xff]  ;;  %v21153_v41 = vld [vmem:[#allocation32_spill] sm:$0xff] }
 0x579   : > { %14095 = vmatprep.mubr.msk.bf16.mxu1 %vm415_vm0, %v17209_v53  ;;  %14129 = vmatprep.mubr.msk.bf16.mxu0 %vm415_vm0, %v17209_v53  ;;  %v18497_v20 = vadd.f32 %v5384_v0, %v4957_v60  ;;  %v18499_v58 = vpop.permute.xlu1 %8620 }
 0x57a   : > { %9474 = vperm.xlu1 %14371, %v12460_v36   ;;  %21146 = vst [vmem:[#allocation57_spill] sm:$0xff] %v18499_v58  ;;  %9182 = vperm.xlu0 %14370, %v12436_v40   ;;  %v18501_v37 = vadd.f32 %v5382_v31, %v4955_v12  ;;  %v18503_v44 = vpop.permute.xlu0 %8328  ;;  %v12464_v40 = vld [vmem:[%s20791_s7 + $0xb28] sm:$0xff]  ;;  %v12461_v12 = vld [vmem:[%s20791_s7 + $0xb10] sm:$0xff] }
 0x57b   : > { %21145 = vst [vmem:[#allocation26_spill] sm:$0xff] %v18497_v20  ;;  %21148 = vst [vmem:[#allocation62_spill] sm:$0xff] %v18503_v44  ;;  %14158 = vmatpush3.bf16.msra.mxu1 %v18182_v15  ;;  %14192 = vmatpush3.bf16.msra.mxu0 %v18187_v28  ;;  %v12459_v15 = vld [vmem:[%s20791_s7 + $0xb00] sm:$0xff]  ;;  %v21155_v44 = vld [vmem:[#allocation30_spill] sm:$0xff] }
 0x57c   : > { %21147 = vst [vmem:[#allocation31_spill] sm:$0xff] %v18501_v37  ;;  %14225 = vmatprep.subr.bf16.mxu1 %v18484_v21  ;;  %14259 = vmatprep.subr.bf16.mxu0 %v18489_v45 }
 0x57d   : > { %v18515_v60 = vpop.permute.xlu1 %8630 }
 0x57e   : > { %9484 = vperm.xlu1 %14371, %v12462_v51   ;;  %21149 = vst [vmem:[#allocation29_spill] sm:$0xff] %v18515_v60  ;;  %9192 = vperm.xlu0 %14370, %v12438_v30   ;;  %v18517_v36 = vpop.permute.xlu0 %8338 }
 0x57f   : > { %21150 = vst [vmem:[#allocation60_spill] sm:$0xff] %v18517_v36 }
 0x580   : > { %14096 = vmatmul.mubr.msk.bf16.gmra.mrb[68].mxu1 %vm415_vm0, %v17244_v38  ;;  %14130 = vmatmul.mubr.msk.bf16.gmra.mrb[76].mxu0 %vm415_vm0, %v17244_v38 }
 0x581   : > { %14099 = vmatprep.mubr.msk.bf16.mxu1 %vm415_vm0, %v17271_v43  ;;  %14133 = vmatprep.mubr.msk.bf16.mxu0 %vm415_vm0, %v17271_v43  ;;  %v18533_v28 = vpop.permute.xlu1 %8640 }
 0x582   : > { %9494 = vperm.xlu1 %14371, %v12464_v40   ;;  %21151 = vst [vmem:[#allocation241_spill] sm:$0xff] %v18533_v28  ;;  %9469 = vperm.xlu0 %14370, %v12459_v15   ;;  %v18535_v0 = vpop.permute.xlu0 %8615  ;;  %v21156_v28 = vld [vmem:[#allocation61_spill] sm:$0xff] }
 0x583   : > { %21152 = vst [vmem:[#allocation242_spill] sm:$0xff] %v18535_v0  ;;  %v13849_v24 = vpop.f32.mrb[220].mxu1  ;;  %v13883_v51 = vpop.f32.mrb[228].mxu0  ;;  %v21158_v0 = vld [vmem:[#allocation35_spill] sm:$0xff] }
 0x584   : > { %v4960_v31 = vmul.f32 %v13849_v24, %v21153_v41  ;;  %v4723_v30 = vpop.f32.mrb[221].mxu1  ;;  %v5387_v40 = vmul.f32 %v13883_v51, %v21154_v32  ;;  %v5149_v15 = vpop.f32.mrb[229].mxu0  ;;  %v21159_v24 = vld [vmem:[#allocation66_spill] sm:$0xff] }
 0x585   : > { %v4958_v36 = vmul.f32 %v21155_v44, %v4723_v30  ;;  %v13850_v52 = vpop.f32.mrb[222].mxu1  ;;  %v5385_v58 = vmul.f32 %v21156_v28, %v5149_v15  ;;  %v18547_v60 = vpop.permute.xlu1 %8650  ;;  %v12468_v44 = vld [vmem:[%s20791_s7 + $0xb48] sm:$0xff]  ;;  %v12463_v28 = vld [vmem:[%s20791_s7 + $0xb20] sm:$0xff]  ;;  %v12465_v15 = vld [vmem:[%s20791_s7 + $0xb30] sm:$0xff] }
 0x586   : > { %9504 = vperm.xlu1 %14371, %v12466_v7   ;;  %21157 = vst [vmem:[#allocation32_spill] sm:$0xff] %v18547_v60  ;;  %v4961_v37 = vmul.f32 %v13850_v52, %v21158_v0  ;;  %v13884_v43 = vpop.f32.mrb[230].mxu0  ;;  %9479 = vperm.xlu0 %14370, %v12461_v12   ;;  %v18550_v38 = vadd.f32 %v5387_v40, %v4960_v31  ;;  %v18553_v20 = vpop.permute.xlu0 %8625  ;;  %v21161_v52 = vld [vmem:[#allocation33_spill] sm:$0xff]  ;;  %v21162_v31 = vld [vmem:[#allocation64_spill] sm:$0xff]  ;;  %v21169_v60 = vld [vmem:[#allocation70_spill] sm:$0xff] }
 0x587   : > { %v5388_v41 = vmul.f32 %v13884_v43, %v21159_v24  ;;  %21160 = vst [vmem:[#allocation63_spill] sm:$0xff] %v18553_v20  ;;  %v4726_v32 = vpop.f32.mrb[223].mxu1  ;;  %v18561_v7 = vadd.f32 %v5385_v58, %v4958_v36  ;;  %v5152_v12 = vpop.f32.mrb[231].mxu0  ;;  %v21166_v24 = vld [vmem:[#allocation67_spill] sm:$0xff] }
 0x588   : > { %v4959_v0 = vmul.f32 %v21161_v52, %v4726_v32  ;;  %14100 = vmatmul.mubr.msk.bf16.gmra.mrb[72].mxu1 %vm415_vm0, %v17318_v22  ;;  %14134 = vmatmul.mubr.msk.bf16.gmra.mrb[80].mxu0 %vm415_vm0, %v17318_v22  ;;  %v5386_v51 = vmul.f32 %v21162_v31, %v5152_v12  ;;  %v21167_v52 = vld [vmem:[#allocation65_spill] sm:$0xff] }
 0x589   : > { %v18568_v43 = vadd.f32 %v5388_v41, %v4961_v37  ;;  %14103 = vmatprep.mubr.msk.bf16.mxu1 %vm415_vm0, %v17345_v47  ;;  %14137 = vmatprep.mubr.msk.bf16.mxu0 %vm415_vm0, %v17345_v47  ;;  %v18575_v58 = vpop.permute.xlu1 %8660  ;;  %v12470_v37 = vld [vmem:[%s20791_s7 + $0xb58] sm:$0xff] }
 0x58a   : > { %9514 = vperm.xlu1 %14371, %v12468_v44   ;;  %21163 = vst [vmem:[#allocation30_spill] sm:$0xff] %v18575_v58  ;;  %9489 = vperm.xlu0 %14370, %v12463_v28   ;;  %v18577_v36 = vadd.f32 %v5386_v51, %v4959_v0  ;;  %v18579_v30 = vpop.permute.xlu0 %8635 }
 0x58b   : > { %21165 = vst [vmem:[#allocation35_spill] sm:$0xff] %v18579_v30  ;;  %v13889_v40 = vpop.f32.mrb[224].mxu1  ;;  %v13923_v32 = vpop.f32.mrb[232].mxu0 }
 0x58c   : > { %21164 = vst [vmem:[#allocation61_spill] sm:$0xff] %v18577_v36  ;;  %v5786_v41 = vmul.f32 %v13889_v40, %v21166_v24  ;;  %v5464_v44 = vpop.f32.mrb[225].mxu1  ;;  %v5891_v28 = vpop.f32.mrb[233].mxu0  ;;  %v6213_v51 = vmul.f32 %v13923_v32, %v16436_v23  ;;  %v12472_v23 = vld [vmem:[%s20791_s7 + $0xb68] sm:$0xff] }
 0x58d   : > { %v5784_v12 = vmul.f32 %v21167_v52, %v5464_v44  ;;  %v13890_v0 = vpop.f32.mrb[226].mxu1  ;;  %v18591_v58 = vpop.permute.xlu1 %8670  ;;  %v6211_v40 = vmul.f32 %v16424_v46, %v5891_v28  ;;  %v12469_v28 = vld [vmem:[%s20791_s7 + $0xb50] sm:$0xff] }
 0x58e   : > { %v5818_v31 = vadd.f32 %v5786_v41, %v18017_v17  ;;  %9524 = vperm.xlu1 %14371, %v12470_v37   ;;  %21168 = vst [vmem:[#allocation66_spill] sm:$0xff] %v18591_v58  ;;  %v5787_v30 = vmul.f32 %v13890_v0, %v21169_v60  ;;  %v13924_v20 = vpop.f32.mrb[234].mxu0  ;;  %9499 = vperm.xlu0 %14370, %v12465_v15   ;;  %v18597_v44 = vpop.permute.xlu0 %8645  ;;  %v12467_v17 = vld [vmem:[%s20791_s7 + $0xb40] sm:$0xff] }
 0x58f   : > { %v5816_v36 = vadd.f32 %v5784_v12, %v18022_v5  ;;  %v6214_v24 = vmul.f32 %v13924_v20, %v16442_v1  ;;  %21170 = vst [vmem:[#allocation33_spill] sm:$0xff] %v18597_v44  ;;  %v5467_v52 = vpop.f32.mrb[227].mxu1  ;;  %v21171_v5 = vld [vmem:[#allocation68_spill] sm:$0xff]  ;;  %v5894_v46 = vpop.f32.mrb[235].mxu0  ;;  %v12474_v12 = vld [vmem:[%s20791_s7 + $0xb78] sm:$0xff] }
 0x590   : > { %v18605_v60 = vadd.f32 %v6213_v51, %v5818_v31  ;;  %v5819_v37 = vadd.f32 %v5787_v30, %v18037_v48  ;;  %v5785_v15 = vmul.f32 %v21171_v5, %v5467_v52  ;;  %14104 = vmatmul.mubr.msk.bf16.gmra.mrb[76].mxu1 %vm415_vm0, %v17380_v26  ;;  %14138 = vmatmul.mubr.msk.bf16.gmra.mrb[84].mxu0 %vm415_vm0, %v17380_v26 }
 0x591   : > { %v18613_v1 = vadd.f32 %v6211_v40, %v5816_v36  ;;  %14107 = vmatprep.mubr.msk.bf16.mxu1 %vm415_vm0, %v17407_v61  ;;  %14141 = vmatprep.mubr.msk.bf16.mxu0 %vm415_vm0, %v17407_v61  ;;  %v6212_v30 = vmul.f32 %v16430_v39, %v5894_v46  ;;  %v18623_v41 = vpop.permute.xlu1 %8680  ;;  %v21175_v40 = vld [vmem:[#allocation69_spill] sm:$0xff]  ;;  %v21178_v46 = vld [vmem:[#allocation74_spill] sm:$0xff] }
 0x592   : > { %v18619_v20 = vadd.f32 %v6214_v24, %v5819_v37  ;;  %v5817_v48 = vadd.f32 %v5785_v15, %v18045_v4  ;;  %9534 = vperm.xlu1 %14371, %v12472_v23   ;;  %21172 = vst [vmem:[#allocation64_spill] sm:$0xff] %v18623_v41  ;;  %9509 = vperm.xlu0 %14370, %v12467_v17   ;;  %v18625_v32 = vpop.permute.xlu0 %8655  ;;  %v21174_v4 = vld [vmem:[#allocation71_spill] sm:$0xff]  ;;  %v21176_v37 = vld [vmem:[#allocation100_spill] sm:$0xff] }
 0x593   : > { %21173 = vst [vmem:[#allocation67_spill] sm:$0xff] %v18625_v32  ;;  %v13893_v36 = vpop.f32.mrb[228].mxu1  ;;  %v13927_v39 = vpop.f32.mrb[236].mxu0 }
 0x594   : > { %v18633_v0 = vadd.f32 %v6212_v30, %v5817_v48  ;;  %v5790_v31 = vmul.f32 %v13893_v36, %v21174_v4  ;;  %v5480_v51 = vpop.f32.mrb[229].mxu1  ;;  %v5907_v52 = vpop.f32.mrb[237].mxu0  ;;  %v6217_v5 = vmul.f32 %v13927_v39, %v21176_v37  ;;  %v21179_v30 = vld [vmem:[#allocation98_spill] sm:$0xff]  ;;  %v21180_v4 = vld [vmem:[#allocation101_spill] sm:$0xff] }
 0x595   : > { %v5788_v24 = vmul.f32 %v21175_v40, %v5480_v51  ;;  %v13894_v23 = vpop.f32.mrb[230].mxu1  ;;  %v18639_v15 = vpop.permute.xlu1 %8690  ;;  %v6215_v36 = vmul.f32 %v21179_v30, %v5907_v52 }
 0x596   : > { %v5822_v17 = vadd.f32 %v5790_v31, %v18089_v50  ;;  %9544 = vperm.xlu1 %14371, %v12474_v12   ;;  %21177 = vst [vmem:[#allocation65_spill] sm:$0xff] %v18639_v15  ;;  %v5791_v41 = vmul.f32 %v13894_v23, %v21178_v46  ;;  %v13928_v58 = vpop.f32.mrb[238].mxu0  ;;  %9519 = vperm.xlu0 %14370, %v12469_v28   ;;  %v18645_v51 = vpop.permute.xlu0 %8665  ;;  %v12476_v50 = vld [vmem:[%s20791_s7 + $0xb88] sm:$0xff]  ;;  %v12471_v12 = vld [vmem:[%s20791_s7 + $0xb60] sm:$0xff]  ;;  %v12478_v46 = vld [vmem:[%s20791_s7 + $0xb98] sm:$0xff] }
 0x597   : > { %v5820_v48 = vadd.f32 %v5788_v24, %v18100_v14  ;;  %v6218_v32 = vmul.f32 %v13928_v58, %v21180_v4  ;;  %21181 = vst [vmem:[#allocation70_spill] sm:$0xff] %v18645_v51  ;;  %v5483_v40 = vpop.f32.mrb[231].mxu1  ;;  %v21182_v14 = vld [vmem:[#allocation72_spill] sm:$0xff]  ;;  %v5910_v24 = vpop.f32.mrb[239].mxu0 }
 0x598   : > { %v18653_v31 = vadd.f32 %v6217_v5, %v5822_v17  ;;  %v5823_v28 = vadd.f32 %v5791_v41, %v18113_v33  ;;  %v5789_v39 = vmul.f32 %v21182_v14, %v5483_v40  ;;  %14108 = vmatmul.mubr.msk.bf16.gmra.mrb[80].mxu1 %vm415_vm0, %v17442_v54  ;;  %14142 = vmatmul.mubr.msk.bf16.gmra.mrb[88].mxu0 %vm415_vm0, %v17442_v54  ;;  %v21183_v41 = vld [vmem:[#allocation99_spill] sm:$0xff]  ;;  %v21187_v40 = vld [vmem:[#allocation73_spill] sm:$0xff] }
 0x599   : > { %v18661_v58 = vadd.f32 %v6215_v36, %v5820_v48  ;;  %14111 = vmatprep.mubr.msk.bf16.mxu1 %vm415_vm0, %v17469_v25  ;;  %14145 = vmatprep.mubr.msk.bf16.mxu0 %vm415_vm0, %v17469_v25  ;;  %v6216_v23 = vmul.f32 %v21183_v41, %v5910_v24  ;;  %v18671_v17 = vpop.permute.xlu1 %8700 }
 0x59a   : > { %v18667_v52 = vadd.f32 %v6218_v32, %v5823_v28  ;;  %v5821_v33 = vadd.f32 %v5789_v39, %v18117_v13  ;;  %9554 = vperm.xlu1 %14371, %v12476_v50   ;;  %21184 = vst [vmem:[#allocation68_spill] sm:$0xff] %v18671_v17  ;;  %9529 = vperm.xlu0 %14370, %v12471_v12   ;;  %v18673_v37 = vpop.permute.xlu0 %8675  ;;  %v12473_v32 = vld [vmem:[%s20791_s7 + $0xb70] sm:$0xff]  ;;  %v21186_v13 = vld [vmem:[#allocation75_spill] sm:$0xff]  ;;  %v21188_v39 = vld [vmem:[#allocation104_spill] sm:$0xff] }
 0x59b   : > { %21185 = vst [vmem:[#allocation71_spill] sm:$0xff] %v18673_v37  ;;  %v13897_v5 = vpop.f32.mrb[232].mxu1  ;;  %v13931_v36 = vpop.f32.mrb[240].mxu0  ;;  %v21190_v17 = vld [vmem:[#allocation77_spill] sm:$0xff] }
 0x59c   : > { %v18681_v48 = vadd.f32 %v6216_v23, %v5821_v33  ;;  %v5794_v30 = vmul.f32 %v13897_v5, %v21186_v13  ;;  %v5496_v4 = vpop.f32.mrb[233].mxu1  ;;  %v5923_v12 = vpop.f32.mrb[241].mxu0  ;;  %v6221_v24 = vmul.f32 %v13931_v36, %v21188_v39  ;;  %v21191_v23 = vld [vmem:[#allocation102_spill] sm:$0xff]  ;;  %v21192_v13 = vld [vmem:[#allocation105_spill] sm:$0xff] }
 0x59d   : > { %v5792_v50 = vmul.f32 %v21187_v40, %v5496_v4  ;;  %v13898_v28 = vpop.f32.mrb[234].mxu1  ;;  %v18687_v41 = vpop.permute.xlu1 %8710  ;;  %v6219_v5 = vmul.f32 %v21191_v23, %v5923_v12 }
 0x59e   : > { %v5826_v14 = vadd.f32 %v5794_v30, %v18161_v10  ;;  %9564 = vperm.xlu1 %14371, %v12478_v46   ;;  %21189 = vst [vmem:[#allocation69_spill] sm:$0xff] %v18687_v41  ;;  %v5795_v15 = vmul.f32 %v13898_v28, %v21190_v17  ;;  %v13932_v37 = vpop.f32.mrb[242].mxu0  ;;  %9539 = vperm.xlu0 %14370, %v12473_v32   ;;  %v18693_v4 = vpop.permute.xlu0 %8685  ;;  %v12480_v10 = vld [vmem:[%s20791_s7 + $0xba8] sm:$0xff]  ;;  %v12475_v46 = vld [vmem:[%s20791_s7 + $0xb80] sm:$0xff] }
 0x59f   : > { %v5824_v33 = vadd.f32 %v5792_v50, %v18172_v63  ;;  %v6222_v51 = vmul.f32 %v13932_v37, %v21192_v13  ;;  %21193 = vst [vmem:[#allocation100_spill] sm:$0xff] %v18693_v4  ;;  %v5499_v40 = vpop.f32.mrb[235].mxu1  ;;  %v21194_v63 = vld [vmem:[#allocation76_spill] sm:$0xff]  ;;  %v5926_v36 = vpop.f32.mrb[243].mxu0 }
 0x5a0   : > { %v18701_v17 = vadd.f32 %v6221_v24, %v5826_v14  ;;  %v5827_v32 = vadd.f32 %v5795_v15, %v18195_v18  ;;  %v5793_v30 = vmul.f32 %v21194_v63, %v5499_v40  ;;  %14112 = vmatmul.mubr.msk.bf16.gmra.mrb[84].mxu1 %vm415_vm0, %v17504_v42  ;;  %14146 = vmatmul.mubr.msk.bf16.gmra.mrb[92].mxu0 %vm415_vm0, %v17504_v42  ;;  %v21195_v15 = vld [vmem:[#allocation103_spill] sm:$0xff]  ;;  %v21199_v40 = vld [vmem:[#allocation78_spill] sm:$0xff] }
 0x5a1   : > { %v18709_v37 = vadd.f32 %v6219_v5, %v5824_v33  ;;  %14115 = vmatprep.mubr.msk.bf16.mxu1 %vm415_vm0, %v17535_v27  ;;  %14149 = vmatprep.mubr.msk.bf16.mxu0 %vm415_vm0, %v17535_v27  ;;  %v6220_v12 = vmul.f32 %v21195_v15, %v5926_v36  ;;  %v18719_v28 = vpop.permute.xlu1 %8720  ;;  %v12482_v24 = vld [vmem:[%s20791_s7 + $0xbb8] sm:$0xff] }
 0x5a2   : > { %v18715_v50 = vadd.f32 %v6222_v51, %v5827_v32  ;;  %v5825_v18 = vadd.f32 %v5793_v30, %v18199_v56  ;;  %9574 = vperm.xlu1 %14371, %v12480_v10   ;;  %21196 = vst [vmem:[#allocation74_spill] sm:$0xff] %v18719_v28  ;;  %9549 = vperm.xlu0 %14370, %v12475_v46   ;;  %v18721_v14 = vpop.permute.xlu0 %8695  ;;  %v12477_v51 = vld [vmem:[%s20791_s7 + $0xb90] sm:$0xff]  ;;  %v21198_v56 = vld [vmem:[#allocation79_spill] sm:$0xff]  ;;  %v21200_v30 = vld [vmem:[#allocation108_spill] sm:$0xff] }
 0x5a3   : > { %21197 = vst [vmem:[#allocation98_spill] sm:$0xff] %v18721_v14  ;;  %v13901_v39 = vpop.f32.mrb[236].mxu1  ;;  %v13935_v5 = vpop.f32.mrb[244].mxu0  ;;  %v21202_v28 = vld [vmem:[#allocation82_spill] sm:$0xff] }
 0x5a4   : > { %v18729_v33 = vadd.f32 %v6220_v12, %v5825_v18  ;;  %v5798_v23 = vmul.f32 %v13901_v39, %v21198_v56  ;;  %v5512_v13 = vpop.f32.mrb[237].mxu1  ;;  %v5939_v46 = vpop.f32.mrb[245].mxu0  ;;  %v6225_v36 = vmul.f32 %v13935_v5, %v21200_v30  ;;  %v21203_v12 = vld [vmem:[#allocation106_spill] sm:$0xff]  ;;  %v21204_v56 = vld [vmem:[#allocation109_spill] sm:$0xff] }
 0x5a5   : > { %v5796_v10 = vmul.f32 %v21199_v40, %v5512_v13  ;;  %v13902_v32 = vpop.f32.mrb[238].mxu1  ;;  %v18735_v15 = vpop.permute.xlu1 %8730  ;;  %v6223_v39 = vmul.f32 %v21203_v12, %v5939_v46 }
 0x5a6   : > { %v5830_v63 = vadd.f32 %v5798_v23, %v18247_v8  ;;  %9584 = vperm.xlu1 %14371, %v12482_v24   ;;  %21201 = vst [vmem:[#allocation101_spill] sm:$0xff] %v18735_v15  ;;  %v5799_v41 = vmul.f32 %v13902_v32, %v21202_v28  ;;  %v13936_v14 = vpop.f32.mrb[246].mxu0  ;;  %9559 = vperm.xlu0 %14370, %v12477_v51   ;;  %v18741_v13 = vpop.permute.xlu0 %8705  ;;  %v12484_v8 = vld [vmem:[%s20791_s7 + $0xbc8] sm:$0xff]  ;;  %v12479_v24 = vld [vmem:[%s20791_s7 + $0xba0] sm:$0xff] }
 0x5a7   : > { %v5828_v18 = vadd.f32 %v5796_v10, %v18258_v34  ;;  %v6226_v4 = vmul.f32 %v13936_v14, %v21204_v56  ;;  %21205 = vst [vmem:[#allocation72_spill] sm:$0xff] %v18741_v13  ;;  %v5515_v40 = vpop.f32.mrb[239].mxu1  ;;  %v21206_v34 = vld [vmem:[#allocation80_spill] sm:$0xff]  ;;  %v5942_v5 = vpop.f32.mrb[247].mxu0 }
 0x5a8   : > { %v18749_v28 = vadd.f32 %v6225_v36, %v5830_v63  ;;  %v5831_v51 = vadd.f32 %v5799_v41, %v18271_v6  ;;  %v5797_v23 = vmul.f32 %v21206_v34, %v5515_v40  ;;  %14116 = vmatmul.mubr.msk.bf16.gmra.mrb[88].mxu1 %vm415_vm0, %v17563_v29  ;;  %14150 = vmatmul.mubr.msk.bf16.gmra.mrb[96].mxu0 %vm415_vm0, %v17563_v29  ;;  %v21207_v41 = vld [vmem:[#allocation107_spill] sm:$0xff]  ;;  %v21211_v40 = vld [vmem:[#allocation81_spill] sm:$0xff] }
 0x5a9   : > { %v18757_v14 = vadd.f32 %v6223_v39, %v5828_v18  ;;  %14119 = vmatprep.mubr.msk.bf16.mxu1 %vm415_vm0, %v17593_v19  ;;  %14153 = vmatprep.mubr.msk.bf16.mxu0 %vm415_vm0, %v17593_v19  ;;  %v6224_v46 = vmul.f32 %v21207_v41, %v5942_v5  ;;  %v18767_v32 = vpop.permute.xlu1 %8740  ;;  %v12486_v36 = vld [vmem:[%s20791_s7 + $0xbd8] sm:$0xff] }
 0x5aa   : > { %v18763_v10 = vadd.f32 %v6226_v4, %v5831_v51  ;;  %v5829_v6 = vadd.f32 %v5797_v23, %v18275_v11  ;;  %9594 = vperm.xlu1 %14371, %v12484_v8   ;;  %21208 = vst [vmem:[#allocation99_spill] sm:$0xff] %v18767_v32  ;;  %9569 = vperm.xlu0 %14370, %v12479_v24   ;;  %v18769_v63 = vpop.permute.xlu0 %8715  ;;  %v12481_v4 = vld [vmem:[%s20791_s7 + $0xbb0] sm:$0xff]  ;;  %v21210_v11 = vld [vmem:[#allocation83_spill] sm:$0xff]  ;;  %v21212_v23 = vld [vmem:[#allocation112_spill] sm:$0xff] }
 0x5ab   : > { %21209 = vst [vmem:[#allocation75_spill] sm:$0xff] %v18769_v63  ;;  %v13905_v30 = vpop.f32.mrb[240].mxu1  ;;  %v13939_v39 = vpop.f32.mrb[248].mxu0  ;;  %v21214_v32 = vld [vmem:[#allocation86_spill] sm:$0xff] }
 0x5ac   : > { %v18777_v18 = vadd.f32 %v6224_v46, %v5829_v6  ;;  %v5802_v12 = vmul.f32 %v13905_v30, %v21210_v11  ;;  %v5528_v56 = vpop.f32.mrb[241].mxu1  ;;  %v5955_v24 = vpop.f32.mrb[249].mxu0  ;;  %v6229_v5 = vmul.f32 %v13939_v39, %v21212_v23  ;;  %v21215_v46 = vld [vmem:[#allocation110_spill] sm:$0xff]  ;;  %v21216_v11 = vld [vmem:[#allocation113_spill] sm:$0xff] }
 0x5ad   : > { %v5800_v8 = vmul.f32 %v21211_v40, %v5528_v56  ;;  %v13906_v51 = vpop.f32.mrb[242].mxu1  ;;  %v18783_v41 = vpop.permute.xlu1 %8750  ;;  %v6227_v30 = vmul.f32 %v21215_v46, %v5955_v24 }
 0x5ae   : > { %v5834_v34 = vadd.f32 %v5802_v12, %v18319_v16  ;;  %9604 = vperm.xlu1 %14371, %v12486_v36   ;;  %21213 = vst [vmem:[#allocation73_spill] sm:$0xff] %v18783_v41  ;;  %v5803_v15 = vmul.f32 %v13906_v51, %v21214_v32  ;;  %v13940_v63 = vpop.f32.mrb[250].mxu0  ;;  %9579 = vperm.xlu0 %14370, %v12481_v4   ;;  %v18789_v56 = vpop.permute.xlu0 %8725  ;;  %v12488_v16 = vld [vmem:[%s20791_s7 + $0xbe8] sm:$0xff]  ;;  %v12483_v36 = vld [vmem:[%s20791_s7 + $0xbc0] sm:$0xff] }
 0x5af   : > { %v5832_v6 = vadd.f32 %v5800_v8, %v18330_v2  ;;  %v6230_v13 = vmul.f32 %v13940_v63, %v21216_v11  ;;  %21217 = vst [vmem:[#allocation104_spill] sm:$0xff] %v18789_v56  ;;  %v5531_v40 = vpop.f32.mrb[243].mxu1  ;;  %v21218_v2 = vld [vmem:[#allocation84_spill] sm:$0xff]  ;;  %v5958_v39 = vpop.f32.mrb[251].mxu0  ;;  %v21229_v56 = vld [vmem:[#allocation117_spill] sm:$0xff] }
 0x5b0   : > { %v18797_v32 = vadd.f32 %v6229_v5, %v5834_v34  ;;  %v5835_v4 = vadd.f32 %v5803_v15, %v18343_v59  ;;  %v5801_v12 = vmul.f32 %v21218_v2, %v5531_v40  ;;  %14120 = vmatmul.mubr.msk.bf16.gmra.mrb[92].mxu1 %vm415_vm0, %v17621_v35  ;;  %14154 = vmatmul.mubr.msk.bf16.gmra.mrb[100].mxu0 %vm415_vm0, %v17621_v35  ;;  %v21219_v15 = vld [vmem:[#allocation111_spill] sm:$0xff]  ;;  %v21223_v40 = vld [vmem:[#allocation85_spill] sm:$0xff] }
 0x5b1   : > { %v18805_v63 = vadd.f32 %v6227_v30, %v5832_v6  ;;  %14159 = vmatprep.mubr.msk.bf16.mxu1 %vm415_vm0, %v17145_v3  ;;  %14193 = vmatprep.mubr.msk.bf16.mxu0 %vm415_vm0, %v17145_v3  ;;  %v6228_v24 = vmul.f32 %v21219_v15, %v5958_v39  ;;  %v18815_v51 = vpop.permute.xlu1 %8760  ;;  %v12490_v5 = vld [vmem:[%s20791_s7 + $0xbf8] sm:$0xff] }
 0x5b2   : > { %v18811_v8 = vadd.f32 %v6230_v13, %v5835_v4  ;;  %v5833_v59 = vadd.f32 %v5801_v12, %v18347_v9  ;;  %9614 = vperm.xlu1 %14371, %v12488_v16   ;;  %21220 = vst [vmem:[#allocation77_spill] sm:$0xff] %v18815_v51  ;;  %9589 = vperm.xlu0 %14370, %v12483_v36   ;;  %v18817_v34 = vpop.permute.xlu0 %8735  ;;  %v12485_v13 = vld [vmem:[%s20791_s7 + $0xbd0] sm:$0xff]  ;;  %v21222_v9 = vld [vmem:[#allocation87_spill] sm:$0xff]  ;;  %v21224_v12 = vld [vmem:[#allocation116_spill] sm:$0xff] }
 0x5b3   : > { %21221 = vst [vmem:[#allocation102_spill] sm:$0xff] %v18817_v34  ;;  %v13909_v23 = vpop.f32.mrb[244].mxu1  ;;  %v13943_v30 = vpop.f32.mrb[252].mxu0  ;;  %v21226_v51 = vld [vmem:[#allocation90_spill] sm:$0xff] }
 0x5b4   : > { %v18825_v6 = vadd.f32 %v6228_v24, %v5833_v59  ;;  %v5806_v46 = vmul.f32 %v13909_v23, %v21222_v9  ;;  %v5544_v11 = vpop.f32.mrb[245].mxu1  ;;  %v5971_v36 = vpop.f32.mrb[253].mxu0  ;;  %v6233_v39 = vmul.f32 %v13943_v30, %v21224_v12  ;;  %v21227_v59 = vld [vmem:[#allocation22_spill] sm:$0xff]  ;;  %v21232_v30 = vld [vmem:[#allocation88_spill] sm:$0xff] }
 0x5b5   : > { %v5804_v16 = vmul.f32 %v21223_v40, %v5544_v11  ;;  %v13910_v4 = vpop.f32.mrb[246].mxu1  ;;  %v18831_v15 = vpop.permute.xlu1 %8770  ;;  %v21228_v23 = vld [vmem:[#allocation114_spill] sm:$0xff] }
 0x5b6   : > { %v5838_v2 = vadd.f32 %v5806_v46, %v18391_v62  ;;  %9624 = vperm.xlu1 %14371, %v12490_v5   ;;  %21225 = vst [vmem:[#allocation105_spill] sm:$0xff] %v18831_v15  ;;  %v5807_v41 = vmul.f32 %v13910_v4, %v21226_v51  ;;  %v13944_v34 = vpop.f32.mrb[254].mxu0  ;;  %9599 = vperm.xlu0 %14370, %v12485_v13   ;;  %v18837_v11 = vpop.permute.xlu0 %8745  ;;  %v12511_v62 = vld [vmem:[%s20791_s7 + $0xc08] sm:$0xff]  ;;  %v12487_v5 = vld [vmem:[%s20791_s7 + $0xbe0] sm:$0xff] }
 0x5b7   : > { %v5836_v24 = vadd.f32 %v5804_v16, %v21227_v59  ;;  %v6231_v9 = vmul.f32 %v21228_v23, %v5971_v36  ;;  %v6234_v44 = vmul.f32 %v13944_v34, %v21229_v56  ;;  %21230 = vst [vmem:[#allocation76_spill] sm:$0xff] %v18837_v11  ;;  %v5547_v40 = vpop.f32.mrb[247].mxu1  ;;  %v21231_v13 = vld [vmem:[#allocation53_spill] sm:$0xff]  ;;  %v5974_v36 = vpop.f32.mrb[255].mxu0  ;;  %v18856_v56 = vld [vmem:[%s20790_s6 + $0x70] sm:$0xff]   ;;  %v18861_v34 = vld [vmem:[%s20790_s6 + $0x78] sm:$0xff]  }
 0x5b8   : > { %v18845_v51 = vadd.f32 %v6233_v39, %v5838_v2  ;;  %v5839_v46 = vadd.f32 %v5807_v41, %v21231_v13  ;;  %v5805_v16 = vmul.f32 %v21232_v30, %v5547_v40  ;;  %14160 = vmatmul.mubr.msk.bf16.vlgmr.msra.gmra.mrb[96].mxu1 %vm415_vm0, %v17178_v55  ;;  %14194 = vmatmul.mubr.msk.bf16.vlgmr.msra.gmra.mrb[104].mxu0 %vm415_vm0, %v17178_v55  ;;  %v21235_v2 = vld [vmem:[#allocation58_spill] sm:$0xff]  ;;  %v21236_v39 = vld [vmem:[#allocation115_spill] sm:$0xff]  ;;  %v21241_v15 = vld [vmem:[#allocation120_spill] sm:$0xff] }
 0x5b9   : > { %21233 = vst [vmem:[#allocation103_spill] sm:$0xff] %v18856_v56  ;;  %21234 = vst [vmem:[#allocation79_spill] sm:$0xff] %v18861_v34  ;;  %v18863_v41 = vadd.f32 %v6231_v9, %v5836_v24  ;;  %14163 = vmatprep.mubr.msk.bf16.mxu1 %vm415_vm0, %v17209_v53  ;;  %14197 = vmatprep.mubr.msk.bf16.mxu0 %vm415_vm0, %v17209_v53  ;;  %v6232_v59 = vmul.f32 %v21236_v39, %v5974_v36  ;;  %v18873_v23 = vpop.permute.xlu1 %9047  ;;  %v12513_v9 = vld [vmem:[%s20791_s7 + $0xc18] sm:$0xff] }
 0x5ba   : > { %v18869_v4 = vadd.f32 %v6234_v44, %v5839_v46  ;;  %v5837_v12 = vadd.f32 %v5805_v16, %v21235_v2  ;;  %9901 = vperm.xlu1 %14371, %v12511_v62   ;;  %21237 = vst [vmem:[#allocation78_spill] sm:$0xff] %v18873_v23  ;;  %9609 = vperm.xlu0 %14370, %v12487_v5   ;;  %v18875_v40 = vpop.permute.xlu0 %8755  ;;  %v12489_v44 = vld [vmem:[%s20791_s7 + $0xbf0] sm:$0xff]  ;;  %v21239_v62 = vld [vmem:[#allocation92_spill] sm:$0xff]  ;;  %v21240_v16 = vld [vmem:[#allocation89_spill] sm:$0xff] }
 0x5bb   : > { %21238 = vst [vmem:[#allocation108_spill] sm:$0xff] %v18875_v40  ;;  %v13913_v24 = vpop.f32.mrb[248].mxu1  ;;  %14226 = vmatpush3.bf16.msra.mxu1 %v18484_v21  ;;  %14260 = vmatpush3.bf16.msra.mxu0 %v18489_v45  ;;  %v13947_v5 = vpop.f32.mrb[0].mxu0  ;;  %v21244_v40 = vld [vmem:[#allocation118_spill] sm:$0xff] }
 0x5bc   : > { %v18885_v13 = vadd.f32 %v6232_v59, %v5837_v12  ;;  %v5810_v46 = vmul.f32 %v13913_v24, %v21239_v62  ;;  %v5560_v30 = vpop.f32.mrb[249].mxu1  ;;  %14293 = vmatprep.subr.bf16.mxu1 %v18856_v56  ;;  %14327 = vmatprep.subr.bf16.mxu0 %v18861_v34  ;;  %v5987_v2 = vpop.f32.mrb[1].mxu0  ;;  %v6237_v21 = vmul.f32 %v13947_v5, %v21241_v15  ;;  %v21243_v12 = vld [vmem:[#allocation93_spill] sm:$0xff]  ;;  %v12510_v15 = vld [vmem:[%s20791_s7 + $0xc00] sm:$0xff] }
 0x5bd   : > { %v5808_v36 = vmul.f32 %v21240_v16, %v5560_v30  ;;  %v13914_v39 = vpop.f32.mrb[250].mxu1  ;;  %v18893_v45 = vpop.permute.xlu1 %9057  ;;  %v6235_v11 = vmul.f32 %v21244_v40, %v5987_v2  ;;  %v21245_v34 = vld [vmem:[#allocation121_spill] sm:$0xff] }
 0x5be   : > { %v5842_v23 = vadd.f32 %v5810_v46, %v18463_v49  ;;  %9911 = vperm.xlu1 %14371, %v12513_v9   ;;  %21242 = vst [vmem:[#allocation82_spill] sm:$0xff] %v18893_v45  ;;  %v5811_v59 = vmul.f32 %v13914_v39, %v21243_v12  ;;  %v13948_v24 = vpop.f32.mrb[2].mxu0  ;;  %9619 = vperm.xlu0 %14370, %v12489_v44   ;;  %v18899_v30 = vpop.permute.xlu0 %8765  ;;  %v12515_v49 = vld [vmem:[%s20791_s7 + $0xc28] sm:$0xff]  ;;  %v21247_v44 = vld [vmem:[#allocation26_spill] sm:$0xff]  ;;  %v21252_v39 = vld [vmem:[#allocation31_spill] sm:$0xff] }
 0x5bf   : > { %v5840_v62 = vadd.f32 %v5808_v36, %v18474_v57  ;;  %v6238_v56 = vmul.f32 %v13948_v24, %v21245_v34  ;;  %21246 = vst [vmem:[#allocation106_spill] sm:$0xff] %v18899_v30  ;;  %v5563_v16 = vpop.f32.mrb[251].mxu1  ;;  %v21248_v57 = vld [vmem:[#allocation91_spill] sm:$0xff]  ;;  %v5990_v40 = vpop.f32.mrb[3].mxu0  ;;  %v21249_v36 = vld [vmem:[#allocation172_spill] sm:$0xff]  ;;  %v21250_v2 = vld [vmem:[#allocation173_spill] sm:$0xff] }
 0x5c0   : > { %v18907_v9 = vadd.f32 %v6237_v21, %v5842_v23  ;;  %v5843_v46 = vadd.f32 %v5811_v59, %v21247_v44  ;;  %v5809_v5 = vmul.f32 %v21248_v57, %v5563_v16  ;;  %14164 = vmatmul.mubr.msk.bf16.gmra.mrb[100].mxu1 %vm415_vm0, %v21249_v36  ;;  %14198 = vmatmul.mubr.msk.bf16.gmra.mrb[108].mxu0 %vm415_vm0, %v21249_v36  ;;  %v21253_v12 = vld [vmem:[#allocation119_spill] sm:$0xff]  ;;  %v21259_v45 = vld [vmem:[#allocation124_spill] sm:$0xff] }
 0x5c1   : > { %v18915_v34 = vadd.f32 %v6235_v11, %v5840_v62  ;;  %14167 = vmatprep.mubr.msk.bf16.mxu1 %vm415_vm0, %v21250_v2  ;;  %14201 = vmatprep.mubr.msk.bf16.mxu0 %vm415_vm0, %v21250_v2  ;;  %v6236_v59 = vmul.f32 %v21253_v12, %v5990_v40  ;;  %v18925_v24 = vpop.permute.xlu1 %9067  ;;  %v12517_v62 = vld [vmem:[%s20791_s7 + $0xc38] sm:$0xff]  ;;  %v21258_v40 = vld [vmem:[#allocation94_spill] sm:$0xff]  ;;  %v21261_v2 = vld [vmem:[#allocation97_spill] sm:$0xff] }
 0x5c2   : > { %v18921_v23 = vadd.f32 %v6238_v56, %v5843_v46  ;;  %v5841_v21 = vadd.f32 %v5809_v5, %v21252_v39  ;;  %9921 = vperm.xlu1 %14371, %v12515_v49   ;;  %21254 = vst [vmem:[#allocation80_spill] sm:$0xff] %v18925_v24  ;;  %9896 = vperm.xlu0 %14370, %v12510_v15   ;;  %v18927_v16 = vpop.permute.xlu0 %9042  ;;  %v12512_v56 = vld [vmem:[%s20791_s7 + $0xc10] sm:$0xff]  ;;  %v21257_v46 = vld [vmem:[#allocation96_spill] sm:$0xff] }
 0x5c3   : > { %21255 = vst [vmem:[#allocation107_spill] sm:$0xff] %v18927_v16  ;;  %v13917_v11 = vpop.f32.mrb[252].mxu1  ;;  %v13951_v5 = vpop.f32.mrb[4].mxu0 }
 0x5c4   : > { %21251 = vst [vmem:[#allocation109_spill] sm:$0xff] %v18921_v23  ;;  %v18935_v44 = vadd.f32 %v6236_v59, %v5841_v21  ;;  %v5814_v57 = vmul.f32 %v13917_v11, %v21257_v46  ;;  %v5576_v49 = vpop.f32.mrb[253].mxu1  ;;  %v6003_v15 = vpop.f32.mrb[5].mxu0  ;;  %v6241_v16 = vmul.f32 %v13951_v5, %v21259_v45  ;;  %v21262_v59 = vld [vmem:[#allocation122_spill] sm:$0xff]  ;;  %v21263_v46 = vld [vmem:[#allocation125_spill] sm:$0xff]  ;;  %v12514_v45 = vld [vmem:[%s20791_s7 + $0xc20] sm:$0xff] }
 0x5c5   : > { %v5812_v39 = vmul.f32 %v21258_v40, %v5576_v49  ;;  %v13918_v12 = vpop.f32.mrb[254].mxu1  ;;  %v18941_v30 = vpop.permute.xlu1 %9077  ;;  %v6239_v11 = vmul.f32 %v21262_v59, %v6003_v15 }
 0x5c6   : > { %21256 = vst [vmem:[#allocation83_spill] sm:$0xff] %v18935_v44  ;;  %v5846_v24 = vadd.f32 %v5814_v57, %v18550_v38  ;;  %9931 = vperm.xlu1 %14371, %v12517_v62   ;;  %21260 = vst [vmem:[#allocation81_spill] sm:$0xff] %v18941_v30  ;;  %v5815_v36 = vmul.f32 %v13918_v12, %v21261_v2  ;;  %v13952_v23 = vpop.f32.mrb[6].mxu0  ;;  %9906 = vperm.xlu0 %14370, %v12512_v56   ;;  %v18947_v49 = vpop.permute.xlu0 %9052  ;;  %v12519_v38 = vld [vmem:[%s20791_s7 + $0xc48] sm:$0xff] }
 0x5c7   : > { %v5844_v21 = vadd.f32 %v5812_v39, %v18561_v7  ;;  %v6242_v44 = vmul.f32 %v13952_v23, %v21263_v46  ;;  %21264 = vst [vmem:[#allocation112_spill] sm:$0xff] %v18947_v49  ;;  %v5579_v40 = vpop.f32.mrb[255].mxu1  ;;  %v21265_v7 = vld [vmem:[#allocation95_spill] sm:$0xff]  ;;  %v6006_v57 = vpop.f32.mrb[7].mxu0  ;;  %v21275_v30 = vld [vmem:[#allocation129_spill] sm:$0xff] }
 0x5c8   : > { %v18955_v2 = vadd.f32 %v6241_v16, %v5846_v24  ;;  %v5847_v62 = vadd.f32 %v5815_v36, %v18568_v43  ;;  %v5813_v56 = vmul.f32 %v21265_v7, %v5579_v40  ;;  %14168 = vmatmul.mubr.msk.bf16.gmra.mrb[104].mxu1 %vm415_vm0, %v17318_v22  ;;  %14202 = vmatmul.mubr.msk.bf16.gmra.mrb[112].mxu0 %vm415_vm0, %v17318_v22  ;;  %v21266_v43 = vld [vmem:[#allocation61_spill] sm:$0xff]  ;;  %v21267_v16 = vld [vmem:[#allocation123_spill] sm:$0xff] }
 0x5c9   : > { %v18963_v23 = vadd.f32 %v6239_v11, %v5844_v21  ;;  %14171 = vmatprep.mubr.msk.bf16.mxu1 %vm415_vm0, %v17345_v47  ;;  %14205 = vmatprep.mubr.msk.bf16.mxu0 %vm415_vm0, %v17345_v47  ;;  %v6240_v5 = vmul.f32 %v21267_v16, %v6006_v57  ;;  %v18973_v39 = vpop.permute.xlu1 %9087  ;;  %v12521_v21 = vld [vmem:[%s20791_s7 + $0xc58] sm:$0xff]  ;;  %v21271_v11 = vld [vmem:[#allocation128_spill] sm:$0xff] }
 0x5ca   : > { %v18969_v24 = vadd.f32 %v6242_v44, %v5847_v62  ;;  %v5845_v36 = vadd.f32 %v5813_v56, %v21266_v43  ;;  %9941 = vperm.xlu1 %14371, %v12519_v38   ;;  %21268 = vst [vmem:[#allocation86_spill] sm:$0xff] %v18973_v39  ;;  %9916 = vperm.xlu0 %14370, %v12514_v45   ;;  %v18975_v15 = vpop.permute.xlu0 %9062  ;;  %v12516_v44 = vld [vmem:[%s20791_s7 + $0xc30] sm:$0xff]  ;;  %v21273_v43 = vld [vmem:[#allocation160_spill] sm:$0xff] }
 0x5cb   : > { %21269 = vst [vmem:[#allocation110_spill] sm:$0xff] %v18975_v15  ;;  %v13957_v12 = vpop.f32.mrb[0].mxu1  ;;  %v13991_v40 = vpop.f32.mrb[8].mxu0  ;;  %v21272_v62 = vld [vmem:[#allocation126_spill] sm:$0xff] }
 0x5cc   : > { %v18983_v59 = vadd.f32 %v6240_v5, %v5845_v36  ;;  %v6640_v46 = vmul.f32 %v13957_v12, %v21271_v11  ;;  %v6318_v38 = vpop.f32.mrb[1].mxu1  ;;  %v6745_v45 = vpop.f32.mrb[9].mxu0  ;;  %v7067_v16 = vmul.f32 %v13991_v40, %v21273_v43  ;;  %v21276_v5 = vld [vmem:[#allocation158_spill] sm:$0xff]  ;;  %v21277_v11 = vld [vmem:[#allocation161_spill] sm:$0xff] }
 0x5cd   : > { %v6638_v7 = vmul.f32 %v21272_v62, %v6318_v38  ;;  %v13958_v56 = vpop.f32.mrb[2].mxu1  ;;  %v18989_v39 = vpop.permute.xlu1 %9097  ;;  %v7065_v12 = vmul.f32 %v21276_v5, %v6745_v45 }
 0x5ce   : > { %21270 = vst [vmem:[#allocation113_spill] sm:$0xff] %v18983_v59  ;;  %v6672_v57 = vadd.f32 %v6640_v46, %v18605_v60  ;;  %9951 = vperm.xlu1 %14371, %v12521_v21   ;;  %21274 = vst [vmem:[#allocation84_spill] sm:$0xff] %v18989_v39  ;;  %v6641_v15 = vmul.f32 %v13958_v56, %v21275_v30  ;;  %v13992_v49 = vpop.f32.mrb[10].mxu0  ;;  %9926 = vperm.xlu0 %14370, %v12516_v44   ;;  %v18995_v38 = vpop.permute.xlu0 %9072  ;;  %v12523_v60 = vld [vmem:[%s20791_s7 + $0xc68] sm:$0xff]  ;;  %v12518_v21 = vld [vmem:[%s20791_s7 + $0xc40] sm:$0xff] }
 0x5cf   : > { %v6670_v36 = vadd.f32 %v6638_v7, %v18613_v1  ;;  %v7068_v59 = vmul.f32 %v13992_v49, %v21277_v11  ;;  %21278 = vst [vmem:[#allocation111_spill] sm:$0xff] %v18995_v38  ;;  %v6321_v62 = vpop.f32.mrb[3].mxu1  ;;  %v21279_v1 = vld [vmem:[#allocation127_spill] sm:$0xff]  ;;  %v6748_v40 = vpop.f32.mrb[11].mxu0 }
 0x5d0   : > { %v19003_v30 = vadd.f32 %v7067_v16, %v6672_v57  ;;  %v6673_v44 = vadd.f32 %v6641_v15, %v18619_v20  ;;  %v6639_v46 = vmul.f32 %v21279_v1, %v6321_v62  ;;  %14172 = vmatmul.mubr.msk.bf16.gmra.mrb[108].mxu1 %vm415_vm0, %v17380_v26  ;;  %14206 = vmatmul.mubr.msk.bf16.gmra.mrb[116].mxu0 %vm415_vm0, %v17380_v26  ;;  %v21280_v15 = vld [vmem:[#allocation159_spill] sm:$0xff]  ;;  %v21284_v62 = vld [vmem:[#allocation130_spill] sm:$0xff] }
 0x5d1   : > { %v19011_v49 = vadd.f32 %v7065_v12, %v6670_v36  ;;  %14175 = vmatprep.mubr.msk.bf16.mxu1 %vm415_vm0, %v17407_v61  ;;  %14209 = vmatprep.mubr.msk.bf16.mxu0 %vm415_vm0, %v17407_v61  ;;  %v7066_v45 = vmul.f32 %v21280_v15, %v6748_v40  ;;  %v19021_v56 = vpop.permute.xlu1 %9107  ;;  %v12525_v16 = vld [vmem:[%s20791_s7 + $0xc78] sm:$0xff] }
 0x5d2   : > { %v19017_v7 = vadd.f32 %v7068_v59, %v6673_v44  ;;  %v6671_v20 = vadd.f32 %v6639_v46, %v18633_v0  ;;  %9961 = vperm.xlu1 %14371, %v12523_v60   ;;  %21281 = vst [vmem:[#allocation87_spill] sm:$0xff] %v19021_v56  ;;  %9936 = vperm.xlu0 %14370, %v12518_v21   ;;  %v19023_v57 = vpop.permute.xlu0 %9082  ;;  %v12520_v59 = vld [vmem:[%s20791_s7 + $0xc50] sm:$0xff]  ;;  %v21283_v0 = vld [vmem:[#allocation132_spill] sm:$0xff]  ;;  %v21287_v56 = vld [vmem:[#allocation133_spill] sm:$0xff] }
 0x5d3   : > { %21282 = vst [vmem:[#allocation85_spill] sm:$0xff] %v19023_v57  ;;  %v13961_v43 = vpop.f32.mrb[4].mxu1  ;;  %v13995_v12 = vpop.f32.mrb[12].mxu0  ;;  %v21285_v46 = vld [vmem:[#allocation164_spill] sm:$0xff] }
 0x5d4   : > { %v19031_v36 = vadd.f32 %v7066_v45, %v6671_v20  ;;  %v6644_v5 = vmul.f32 %v13961_v43, %v21283_v0  ;;  %v6334_v11 = vpop.f32.mrb[5].mxu1  ;;  %v6761_v21 = vpop.f32.mrb[13].mxu0  ;;  %v7071_v40 = vmul.f32 %v13995_v12, %v21285_v46  ;;  %v21288_v45 = vld [vmem:[#allocation162_spill] sm:$0xff]  ;;  %v21289_v0 = vld [vmem:[#allocation165_spill] sm:$0xff] }
 0x5d5   : > { %v6642_v60 = vmul.f32 %v21284_v62, %v6334_v11  ;;  %v13962_v44 = vpop.f32.mrb[6].mxu1  ;;  %v19037_v15 = vpop.permute.xlu1 %9117  ;;  %v7069_v43 = vmul.f32 %v21288_v45, %v6761_v21 }
 0x5d6   : > { %v6676_v1 = vadd.f32 %v6644_v5, %v18653_v31  ;;  %9971 = vperm.xlu1 %14371, %v12525_v16   ;;  %21286 = vst [vmem:[#allocation116_spill] sm:$0xff] %v19037_v15  ;;  %v6645_v39 = vmul.f32 %v13962_v44, %v21287_v56  ;;  %v13996_v57 = vpop.f32.mrb[14].mxu0  ;;  %9946 = vperm.xlu0 %14370, %v12520_v59   ;;  %v19043_v11 = vpop.permute.xlu0 %9092  ;;  %v12527_v31 = vld [vmem:[%s20791_s7 + $0xc88] sm:$0xff]  ;;  %v12522_v16 = vld [vmem:[%s20791_s7 + $0xc60] sm:$0xff] }
 0x5d7   : > { %v6674_v20 = vadd.f32 %v6642_v60, %v18661_v58  ;;  %v7072_v38 = vmul.f32 %v13996_v57, %v21289_v0  ;;  %21290 = vst [vmem:[#allocation90_spill] sm:$0xff] %v19043_v11  ;;  %v6337_v62 = vpop.f32.mrb[7].mxu1  ;;  %v21291_v58 = vld [vmem:[#allocation131_spill] sm:$0xff]  ;;  %v6764_v12 = vpop.f32.mrb[15].mxu0 }
 0x5d8   : > { %v19051_v56 = vadd.f32 %v7071_v40, %v6676_v1  ;;  %v6677_v59 = vadd.f32 %v6645_v39, %v18667_v52  ;;  %v6643_v5 = vmul.f32 %v21291_v58, %v6337_v62  ;;  %14176 = vmatmul.mubr.msk.bf16.gmra.mrb[112].mxu1 %vm415_vm0, %v17442_v54  ;;  %14210 = vmatmul.mubr.msk.bf16.gmra.mrb[120].mxu0 %vm415_vm0, %v17442_v54  ;;  %v21292_v39 = vld [vmem:[#allocation163_spill] sm:$0xff]  ;;  %v21296_v62 = vld [vmem:[#allocation134_spill] sm:$0xff] }
 0x5d9   : > { %v19059_v57 = vadd.f32 %v7069_v43, %v6674_v20  ;;  %14179 = vmatprep.mubr.msk.bf16.mxu1 %vm415_vm0, %v17469_v25  ;;  %14213 = vmatprep.mubr.msk.bf16.mxu0 %vm415_vm0, %v17469_v25  ;;  %v7070_v21 = vmul.f32 %v21292_v39, %v6764_v12  ;;  %v19069_v44 = vpop.permute.xlu1 %9127  ;;  %v12529_v40 = vld [vmem:[%s20791_s7 + $0xc98] sm:$0xff] }
 0x5da   : > { %v19065_v60 = vadd.f32 %v7072_v38, %v6677_v59  ;;  %v6675_v52 = vadd.f32 %v6643_v5, %v18681_v48  ;;  %9981 = vperm.xlu1 %14371, %v12527_v31   ;;  %21293 = vst [vmem:[#allocation22_spill] sm:$0xff] %v19069_v44  ;;  %9956 = vperm.xlu0 %14370, %v12522_v16   ;;  %v19071_v1 = vpop.permute.xlu0 %9102  ;;  %v12524_v38 = vld [vmem:[%s20791_s7 + $0xc70] sm:$0xff]  ;;  %v21295_v48 = vld [vmem:[#allocation136_spill] sm:$0xff]  ;;  %v21299_v44 = vld [vmem:[#allocation137_spill] sm:$0xff] }
 0x5db   : > { %21294 = vst [vmem:[#allocation114_spill] sm:$0xff] %v19071_v1  ;;  %v13965_v46 = vpop.f32.mrb[8].mxu1  ;;  %v13999_v43 = vpop.f32.mrb[16].mxu0  ;;  %v21297_v5 = vld [vmem:[#allocation168_spill] sm:$0xff] }
 0x5dc   : > { %v19079_v20 = vadd.f32 %v7070_v21, %v6675_v52  ;;  %v6648_v45 = vmul.f32 %v13965_v46, %v21295_v48  ;;  %v6350_v0 = vpop.f32.mrb[9].mxu1  ;;  %v6777_v16 = vpop.f32.mrb[17].mxu0  ;;  %v7075_v12 = vmul.f32 %v13999_v43, %v21297_v5  ;;  %v21300_v21 = vld [vmem:[#allocation166_spill] sm:$0xff]  ;;  %v21301_v48 = vld [vmem:[#allocation169_spill] sm:$0xff] }
 0x5dd   : > { %v6646_v31 = vmul.f32 %v21296_v62, %v6350_v0  ;;  %v13966_v59 = vpop.f32.mrb[10].mxu1  ;;  %v19085_v39 = vpop.permute.xlu1 %9137  ;;  %v7073_v46 = vmul.f32 %v21300_v21, %v6777_v16 }
 0x5de   : > { %v6680_v58 = vadd.f32 %v6648_v45, %v18701_v17  ;;  %9991 = vperm.xlu1 %14371, %v12529_v40   ;;  %21298 = vst [vmem:[#allocation117_spill] sm:$0xff] %v19085_v39  ;;  %v6649_v15 = vmul.f32 %v13966_v59, %v21299_v44  ;;  %v14000_v1 = vpop.f32.mrb[18].mxu0  ;;  %9966 = vperm.xlu0 %14370, %v12524_v38   ;;  %v19091_v0 = vpop.permute.xlu0 %9112  ;;  %v12531_v17 = vld [vmem:[%s20791_s7 + $0xca8] sm:$0xff]  ;;  %v12526_v40 = vld [vmem:[%s20791_s7 + $0xc80] sm:$0xff] }
 0x5df   : > { %v6678_v52 = vadd.f32 %v6646_v31, %v18709_v37  ;;  %v7076_v11 = vmul.f32 %v14000_v1, %v21301_v48  ;;  %21302 = vst [vmem:[#allocation53_spill] sm:$0xff] %v19091_v0  ;;  %v6353_v62 = vpop.f32.mrb[11].mxu1  ;;  %v21303_v37 = vld [vmem:[#allocation135_spill] sm:$0xff]  ;;  %v6780_v43 = vpop.f32.mrb[19].mxu0 }
 0x5e0   : > { %v19099_v44 = vadd.f32 %v7075_v12, %v6680_v58  ;;  %v6681_v38 = vadd.f32 %v6649_v15, %v18715_v50  ;;  %v6647_v45 = vmul.f32 %v21303_v37, %v6353_v62  ;;  %14180 = vmatmul.mubr.msk.bf16.gmra.mrb[116].mxu1 %vm415_vm0, %v17504_v42  ;;  %14214 = vmatmul.mubr.msk.bf16.gmra.mrb[124].mxu0 %vm415_vm0, %v17504_v42  ;;  %v21304_v15 = vld [vmem:[#allocation167_spill] sm:$0xff]  ;;  %v21308_v62 = vld [vmem:[#allocation138_spill] sm:$0xff] }
 0x5e1   : > { %v19107_v1 = vadd.f32 %v7073_v46, %v6678_v52  ;;  %14183 = vmatprep.mubr.msk.bf16.mxu1 %vm415_vm0, %v17535_v27  ;;  %14217 = vmatprep.mubr.msk.bf16.mxu0 %vm415_vm0, %v17535_v27  ;;  %v7074_v16 = vmul.f32 %v21304_v15, %v6780_v43  ;;  %v19117_v59 = vpop.permute.xlu1 %9147  ;;  %v12533_v12 = vld [vmem:[%s20791_s7 + $0xcb8] sm:$0xff] }
 0x5e2   : > { %v19113_v31 = vadd.f32 %v7076_v11, %v6681_v38  ;;  %v6679_v50 = vadd.f32 %v6647_v45, %v18729_v33  ;;  %10001 = vperm.xlu1 %14371, %v12531_v17   ;;  %21305 = vst [vmem:[#allocation88_spill] sm:$0xff] %v19117_v59  ;;  %9976 = vperm.xlu0 %14370, %v12526_v40   ;;  %v19119_v58 = vpop.permute.xlu0 %9122  ;;  %v12528_v11 = vld [vmem:[%s20791_s7 + $0xc90] sm:$0xff]  ;;  %v21307_v33 = vld [vmem:[#allocation140_spill] sm:$0xff]  ;;  %v21309_v45 = vld [vmem:[#allocation177_spill] sm:$0xff] }
 0x5e3   : > { %21306 = vst [vmem:[#allocation58_spill] sm:$0xff] %v19119_v58  ;;  %v13969_v5 = vpop.f32.mrb[12].mxu1  ;;  %v14003_v46 = vpop.f32.mrb[20].mxu0  ;;  %v21311_v59 = vld [vmem:[#allocation141_spill] sm:$0xff] }
 0x5e4   : > { %v19127_v52 = vadd.f32 %v7074_v16, %v6679_v50  ;;  %v6652_v21 = vmul.f32 %v13969_v5, %v21307_v33  ;;  %v6366_v48 = vpop.f32.mrb[13].mxu1  ;;  %v6793_v40 = vpop.f32.mrb[21].mxu0  ;;  %v7079_v43 = vmul.f32 %v14003_v46, %v21309_v45  ;;  %v21312_v16 = vld [vmem:[#allocation170_spill] sm:$0xff] }
 0x5e5   : > { %v6650_v17 = vmul.f32 %v21308_v62, %v6366_v48  ;;  %v13970_v38 = vpop.f32.mrb[14].mxu1  ;;  %v19133_v15 = vpop.permute.xlu1 %9157  ;;  %v7077_v5 = vmul.f32 %v21312_v16, %v6793_v40  ;;  %v21313_v33 = vld [vmem:[#allocation174_spill] sm:$0xff] }
 0x5e6   : > { %v6684_v37 = vadd.f32 %v6652_v21, %v18749_v28  ;;  %10011 = vperm.xlu1 %14371, %v12533_v12   ;;  %21310 = vst [vmem:[#allocation115_spill] sm:$0xff] %v19133_v15  ;;  %v6653_v39 = vmul.f32 %v13970_v38, %v21311_v59  ;;  %v14004_v58 = vpop.f32.mrb[22].mxu0  ;;  %9986 = vperm.xlu0 %14370, %v12528_v11   ;;  %v19139_v48 = vpop.permute.xlu0 %9132  ;;  %v12535_v28 = vld [vmem:[%s20791_s7 + $0xcc8] sm:$0xff]  ;;  %v12530_v12 = vld [vmem:[%s20791_s7 + $0xca0] sm:$0xff] }
 0x5e7   : > { %v6682_v50 = vadd.f32 %v6650_v17, %v18757_v14  ;;  %v7080_v0 = vmul.f32 %v14004_v58, %v21313_v33  ;;  %21314 = vst [vmem:[#allocation92_spill] sm:$0xff] %v19139_v48  ;;  %v6369_v62 = vpop.f32.mrb[15].mxu1  ;;  %v21315_v14 = vld [vmem:[#allocation139_spill] sm:$0xff]  ;;  %v6796_v46 = vpop.f32.mrb[23].mxu0 }
 0x5e8   : > { %v19147_v59 = vadd.f32 %v7079_v43, %v6684_v37  ;;  %v6685_v11 = vadd.f32 %v6653_v39, %v18763_v10  ;;  %v6651_v21 = vmul.f32 %v21315_v14, %v6369_v62  ;;  %14184 = vmatmul.mubr.msk.bf16.gmra.mrb[120].mxu1 %vm415_vm0, %v17563_v29  ;;  %14218 = vmatmul.mubr.msk.bf16.gmra.mrb[128].mxu0 %vm415_vm0, %v17563_v29  ;;  %v21316_v39 = vld [vmem:[#allocation171_spill] sm:$0xff]  ;;  %v21320_v62 = vld [vmem:[#allocation142_spill] sm:$0xff] }
 0x5e9   : > { %v19155_v58 = vadd.f32 %v7077_v5, %v6682_v50  ;;  %14187 = vmatprep.mubr.msk.bf16.mxu1 %vm415_vm0, %v17593_v19  ;;  %14221 = vmatprep.mubr.msk.bf16.mxu0 %vm415_vm0, %v17593_v19  ;;  %v7078_v40 = vmul.f32 %v21316_v39, %v6796_v46  ;;  %v19165_v38 = vpop.permute.xlu1 %9167  ;;  %v12537_v43 = vld [vmem:[%s20791_s7 + $0xcd8] sm:$0xff] }
 0x5ea   : > { %v19161_v17 = vadd.f32 %v7080_v0, %v6685_v11  ;;  %v6683_v10 = vadd.f32 %v6651_v21, %v18777_v18  ;;  %10021 = vperm.xlu1 %14371, %v12535_v28   ;;  %21317 = vst [vmem:[#allocation89_spill] sm:$0xff] %v19165_v38  ;;  %9996 = vperm.xlu0 %14370, %v12530_v12   ;;  %v19167_v37 = vpop.permute.xlu0 %9142  ;;  %v12532_v0 = vld [vmem:[%s20791_s7 + $0xcb0] sm:$0xff]  ;;  %v21319_v18 = vld [vmem:[#allocation144_spill] sm:$0xff]  ;;  %v21321_v21 = vld [vmem:[#allocation181_spill] sm:$0xff] }
 0x5eb   : > { %21318 = vst [vmem:[#allocation120_spill] sm:$0xff] %v19167_v37  ;;  %v13973_v45 = vpop.f32.mrb[16].mxu1  ;;  %v14007_v5 = vpop.f32.mrb[24].mxu0  ;;  %v21323_v38 = vld [vmem:[#allocation145_spill] sm:$0xff] }
 0x5ec   : > { %v19175_v50 = vadd.f32 %v7078_v40, %v6683_v10  ;;  %v6656_v16 = vmul.f32 %v13973_v45, %v21319_v18  ;;  %v6382_v33 = vpop.f32.mrb[17].mxu1  ;;  %v6809_v12 = vpop.f32.mrb[25].mxu0  ;;  %v7083_v46 = vmul.f32 %v14007_v5, %v21321_v21  ;;  %v21324_v40 = vld [vmem:[#allocation179_spill] sm:$0xff]  ;;  %v21325_v18 = vld [vmem:[#allocation176_spill] sm:$0xff] }
 0x5ed   : > { %v6654_v28 = vmul.f32 %v21320_v62, %v6382_v33  ;;  %v13974_v11 = vpop.f32.mrb[18].mxu1  ;;  %v19181_v39 = vpop.permute.xlu1 %9177  ;;  %v7081_v45 = vmul.f32 %v21324_v40, %v6809_v12 }
 0x5ee   : > { %v6688_v14 = vadd.f32 %v6656_v16, %v18797_v32  ;;  %10031 = vperm.xlu1 %14371, %v12537_v43   ;;  %21322 = vst [vmem:[#allocation93_spill] sm:$0xff] %v19181_v39  ;;  %v6657_v15 = vmul.f32 %v13974_v11, %v21323_v38  ;;  %v14008_v37 = vpop.f32.mrb[26].mxu0  ;;  %10006 = vperm.xlu0 %14370, %v12532_v0   ;;  %v19187_v33 = vpop.permute.xlu0 %9152  ;;  %v12539_v32 = vld [vmem:[%s20791_s7 + $0xce8] sm:$0xff]  ;;  %v12534_v43 = vld [vmem:[%s20791_s7 + $0xcc0] sm:$0xff] }
 0x5ef   : > { %v6686_v10 = vadd.f32 %v6654_v28, %v18805_v63  ;;  %v7084_v48 = vmul.f32 %v14008_v37, %v21325_v18  ;;  %21326 = vst [vmem:[#allocation118_spill] sm:$0xff] %v19187_v33  ;;  %v6385_v62 = vpop.f32.mrb[19].mxu1  ;;  %v21327_v63 = vld [vmem:[#allocation143_spill] sm:$0xff]  ;;  %v6812_v5 = vpop.f32.mrb[27].mxu0 }
 0x5f0   : > { %v19195_v38 = vadd.f32 %v7083_v46, %v6688_v14  ;;  %v6689_v0 = vadd.f32 %v6657_v15, %v18811_v8  ;;  %v6655_v16 = vmul.f32 %v21327_v63, %v6385_v62  ;;  %14188 = vmatmul.mubr.msk.bf16.gmra.mrb[124].mxu1 %vm415_vm0, %v17621_v35  ;;  %14222 = vmatmul.mubr.msk.bf16.gmra.mrb[132].mxu0 %vm415_vm0, %v17621_v35  ;;  %v21328_v15 = vld [vmem:[#allocation175_spill] sm:$0xff]  ;;  %v21332_v62 = vld [vmem:[#allocation146_spill] sm:$0xff] }
 0x5f1   : > { %v19203_v37 = vadd.f32 %v7081_v45, %v6686_v10  ;;  %14227 = vmatprep.mubr.msk.bf16.mxu1 %vm415_vm0, %v17145_v3  ;;  %14261 = vmatprep.mubr.msk.bf16.mxu0 %vm415_vm0, %v17145_v3  ;;  %v7082_v12 = vmul.f32 %v21328_v15, %v6812_v5  ;;  %v19213_v11 = vpop.permute.xlu1 %9187  ;;  %v12541_v46 = vld [vmem:[%s20791_s7 + $0xcf8] sm:$0xff] }
 0x5f2   : > { %v19209_v28 = vadd.f32 %v7084_v48, %v6689_v0  ;;  %v6687_v8 = vadd.f32 %v6655_v16, %v18825_v6  ;;  %10041 = vperm.xlu1 %14371, %v12539_v32   ;;  %21329 = vst [vmem:[#allocation121_spill] sm:$0xff] %v19213_v11  ;;  %10016 = vperm.xlu0 %14370, %v12534_v43   ;;  %v19215_v14 = vpop.permute.xlu0 %9162  ;;  %v12536_v48 = vld [vmem:[%s20791_s7 + $0xcd0] sm:$0xff]  ;;  %v21331_v6 = vld [vmem:[#allocation148_spill] sm:$0xff]  ;;  %v21333_v16 = vld [vmem:[#allocation185_spill] sm:$0xff] }
 0x5f3   : > { %21330 = vst [vmem:[#allocation26_spill] sm:$0xff] %v19215_v14  ;;  %v13977_v21 = vpop.f32.mrb[20].mxu1  ;;  %v14011_v45 = vpop.f32.mrb[28].mxu0  ;;  %v21335_v11 = vld [vmem:[#allocation149_spill] sm:$0xff] }
 0x5f4   : > { %v19223_v10 = vadd.f32 %v7082_v12, %v6687_v8  ;;  %v6660_v40 = vmul.f32 %v13977_v21, %v21331_v6  ;;  %v6398_v18 = vpop.f32.mrb[21].mxu1  ;;  %v6825_v43 = vpop.f32.mrb[29].mxu0  ;;  %v7087_v5 = vmul.f32 %v14011_v45, %v21333_v16  ;;  %v21336_v12 = vld [vmem:[#allocation183_spill] sm:$0xff]  ;;  %v21337_v6 = vld [vmem:[#allocation180_spill] sm:$0xff] }
 0x5f5   : > { %v6658_v32 = vmul.f32 %v21332_v62, %v6398_v18  ;;  %v13978_v0 = vpop.f32.mrb[22].mxu1  ;;  %v19229_v15 = vpop.permute.xlu1 %9197  ;;  %v7085_v21 = vmul.f32 %v21336_v12, %v6825_v43 }
 0x5f6   : > { %v6692_v63 = vadd.f32 %v6660_v40, %v18845_v51  ;;  %10051 = vperm.xlu1 %14371, %v12541_v46   ;;  %21334 = vst [vmem:[#allocation91_spill] sm:$0xff] %v19229_v15  ;;  %v6661_v39 = vmul.f32 %v13978_v0, %v21335_v11  ;;  %v14012_v14 = vpop.f32.mrb[30].mxu0  ;;  %10026 = vperm.xlu0 %14370, %v12536_v48   ;;  %v19235_v18 = vpop.permute.xlu0 %9172  ;;  %v12562_v51 = vld [vmem:[%s20791_s7 + $0xd08] sm:$0xff]  ;;  %v12538_v46 = vld [vmem:[%s20791_s7 + $0xce0] sm:$0xff] }
 0x5f7   : > { %v6690_v8 = vadd.f32 %v6658_v32, %v18863_v41  ;;  %v7088_v33 = vmul.f32 %v14012_v14, %v21337_v6  ;;  %21338 = vst [vmem:[#allocation31_spill] sm:$0xff] %v19235_v18  ;;  %v6401_v62 = vpop.f32.mrb[23].mxu1  ;;  %v21339_v41 = vld [vmem:[#allocation147_spill] sm:$0xff]  ;;  %v6828_v45 = vpop.f32.mrb[31].mxu0 }
 0x5f8   : > { %v19243_v11 = vadd.f32 %v7087_v5, %v6692_v63  ;;  %v6693_v48 = vadd.f32 %v6661_v39, %v18869_v4  ;;  %v6659_v40 = vmul.f32 %v21339_v41, %v6401_v62  ;;  %14228 = vmatmul.mubr.msk.bf16.vlgmr.msra.gmra.mrb[128].mxu1 %vm415_vm0, %v17178_v55  ;;  %14262 = vmatmul.mubr.msk.bf16.vlgmr.msra.gmra.mrb[136].mxu0 %vm415_vm0, %v17178_v55  ;;  %v21340_v39 = vld [vmem:[#allocation178_spill] sm:$0xff]  ;;  %v12564_v5 = vld [vmem:[%s20791_s7 + $0xd18] sm:$0xff] }
 0x5f9   : > { %v19251_v14 = vadd.f32 %v7085_v21, %v6690_v8  ;;  %14231 = vmatprep.mubr.msk.bf16.mxu1 %vm415_vm0, %v17209_v53  ;;  %14265 = vmatprep.mubr.msk.bf16.mxu0 %vm415_vm0, %v17209_v53  ;;  %v7086_v43 = vmul.f32 %v21340_v39, %v6828_v45  ;;  %v19261_v0 = vpop.permute.xlu1 %9474  ;;  %v21343_v8 = vld [vmem:[#allocation103_spill] sm:$0xff]  ;;  %v21345_v21 = vld [vmem:[#allocation152_spill] sm:$0xff]  ;;  %v21347_v39 = vld [vmem:[#allocation189_spill] sm:$0xff] }
 0x5fa   : > { %v19257_v32 = vadd.f32 %v7088_v33, %v6693_v48  ;;  %v6691_v4 = vadd.f32 %v6659_v40, %v18885_v13  ;;  %10328 = vperm.xlu1 %14371, %v12562_v51   ;;  %21341 = vst [vmem:[#allocation119_spill] sm:$0xff] %v19261_v0  ;;  %10036 = vperm.xlu0 %14370, %v12538_v46   ;;  %v19263_v63 = vpop.permute.xlu0 %9182  ;;  %v12540_v33 = vld [vmem:[%s20791_s7 + $0xcf0] sm:$0xff]  ;;  %v21344_v13 = vld [vmem:[#allocation79_spill] sm:$0xff] }
 0x5fb   : > { %21342 = vst [vmem:[#allocation96_spill] sm:$0xff] %v19263_v63  ;;  %v13981_v16 = vpop.f32.mrb[24].mxu1  ;;  %14294 = vmatpush3.bf16.msra.mxu1 %v21343_v8  ;;  %14328 = vmatpush3.bf16.msra.mxu0 %v21344_v13  ;;  %v14015_v62 = vpop.f32.mrb[32].mxu0  ;;  %v21346_v46 = vld [vmem:[#allocation150_spill] sm:$0xff]  ;;  %v21349_v8 = vld [vmem:[#allocation153_spill] sm:$0xff] }
 0x5fc   : > { %v19273_v12 = vadd.f32 %v7086_v43, %v6691_v4  ;;  %v6664_v6 = vmul.f32 %v13981_v16, %v21345_v21  ;;  %v6414_v51 = vpop.f32.mrb[25].mxu1  ;;  %v6841_v41 = vpop.f32.mrb[33].mxu0  ;;  %v7091_v15 = vmul.f32 %v14015_v62, %v21347_v39  ;;  %v21350_v43 = vld [vmem:[#allocation187_spill] sm:$0xff]  ;;  %v21351_v21 = vld [vmem:[#allocation184_spill] sm:$0xff] }
 0x5fd   : > { %v6662_v48 = vmul.f32 %v21346_v46, %v6414_v51  ;;  %v13982_v40 = vpop.f32.mrb[26].mxu1  ;;  %v19279_v63 = vpop.permute.xlu1 %9484  ;;  %v7089_v16 = vmul.f32 %v21350_v43, %v6841_v41 }
 0x5fe   : > { %v6696_v45 = vadd.f32 %v6664_v6, %v18907_v9  ;;  %10338 = vperm.xlu1 %14371, %v12564_v5   ;;  %21348 = vst [vmem:[#allocation94_spill] sm:$0xff] %v19279_v63  ;;  %v6665_v18 = vmul.f32 %v13982_v40, %v21349_v8  ;;  %v14016_v13 = vpop.f32.mrb[34].mxu0  ;;  %10046 = vperm.xlu0 %14370, %v12540_v33   ;;  %v19285_v51 = vpop.permute.xlu0 %9192  ;;  %v12566_v9 = vld [vmem:[%s20791_s7 + $0xd28] sm:$0xff]  ;;  %v12561_v5 = vld [vmem:[%s20791_s7 + $0xd00] sm:$0xff] }
 0x5ff   : > { %v6694_v4 = vadd.f32 %v6662_v48, %v18915_v34  ;;  %v7092_v0 = vmul.f32 %v14016_v13, %v21351_v21  ;;  %21352 = vst [vmem:[#allocation124_spill] sm:$0xff] %v19285_v51  ;;  %v6417_v46 = vpop.f32.mrb[27].mxu1  ;;  %v21353_v33 = vld [vmem:[#allocation109_spill] sm:$0xff]  ;;  %v21354_v34 = vld [vmem:[#allocation151_spill] sm:$0xff]  ;;  %v6844_v41 = vpop.f32.mrb[35].mxu0  ;;  %v21355_v40 = vld [vmem:[#allocation172_spill] sm:$0xff] }
 0x600   : > { %v19293_v6 = vadd.f32 %v7091_v15, %v6696_v45  ;;  %v6697_v62 = vadd.f32 %v6665_v18, %v21353_v33  ;;  %v6663_v48 = vmul.f32 %v21354_v34, %v6417_v46  ;;  %14232 = vmatmul.mubr.msk.bf16.gmra.mrb[132].mxu1 %vm415_vm0, %v21355_v40  ;;  %14266 = vmatmul.mubr.msk.bf16.gmra.mrb[140].mxu0 %vm415_vm0, %v21355_v40  ;;  %v21356_v8 = vld [vmem:[#allocation173_spill] sm:$0xff]  ;;  %v21358_v18 = vld [vmem:[#allocation83_spill] sm:$0xff]  ;;  %v21359_v13 = vld [vmem:[#allocation182_spill] sm:$0xff] }
 0x601   : > { %v19301_v39 = vadd.f32 %v7089_v16, %v6694_v4  ;;  %14235 = vmatprep.mubr.msk.bf16.mxu1 %vm415_vm0, %v21356_v8  ;;  %14269 = vmatprep.mubr.msk.bf16.mxu0 %vm415_vm0, %v21356_v8  ;;  %v7090_v43 = vmul.f32 %v21359_v13, %v6844_v41  ;;  %v19311_v21 = vpop.permute.xlu1 %9494  ;;  %v12568_v16 = vld [vmem:[%s20791_s7 + $0xd38] sm:$0xff]  ;;  %v21364_v41 = vld [vmem:[#allocation154_spill] sm:$0xff]  ;;  %v21367_v8 = vld [vmem:[#allocation157_spill] sm:$0xff] }
 0x602   : > { %v19307_v15 = vadd.f32 %v7092_v0, %v6697_v62  ;;  %v6695_v45 = vadd.f32 %v6663_v48, %v21358_v18  ;;  %10348 = vperm.xlu1 %14371, %v12566_v9   ;;  %21360 = vst [vmem:[#allocation122_spill] sm:$0xff] %v19311_v21  ;;  %10323 = vperm.xlu0 %14370, %v12561_v5   ;;  %v19313_v46 = vpop.permute.xlu0 %9469  ;;  %v12563_v0 = vld [vmem:[%s20791_s7 + $0xd10] sm:$0xff]  ;;  %v21363_v62 = vld [vmem:[#allocation156_spill] sm:$0xff]  ;;  %v21365_v21 = vld [vmem:[#allocation193_spill] sm:$0xff] }
 0x603   : > { %21361 = vst [vmem:[#allocation125_spill] sm:$0xff] %v19313_v46  ;;  %v13985_v4 = vpop.f32.mrb[28].mxu1  ;;  %v14019_v48 = vpop.f32.mrb[36].mxu0 }
 0x604   : > { %21357 = vst [vmem:[#allocation97_spill] sm:$0xff] %v19307_v15  ;;  %v19321_v33 = vadd.f32 %v7090_v43, %v6695_v45  ;;  %v6668_v34 = vmul.f32 %v13985_v4, %v21363_v62  ;;  %v6430_v9 = vpop.f32.mrb[29].mxu1  ;;  %v6857_v5 = vpop.f32.mrb[37].mxu0  ;;  %v7095_v63 = vmul.f32 %v14019_v48, %v21365_v21  ;;  %v21368_v43 = vld [vmem:[#allocation191_spill] sm:$0xff]  ;;  %v21369_v62 = vld [vmem:[#allocation188_spill] sm:$0xff] }
 0x605   : > { %v6666_v18 = vmul.f32 %v21364_v41, %v6430_v9  ;;  %v13986_v13 = vpop.f32.mrb[30].mxu1  ;;  %v19327_v46 = vpop.permute.xlu1 %9504  ;;  %v7093_v4 = vmul.f32 %v21368_v43, %v6857_v5  ;;  %v12565_v21 = vld [vmem:[%s20791_s7 + $0xd20] sm:$0xff] }
 0x606   : > { %21362 = vst [vmem:[#allocation95_spill] sm:$0xff] %v19321_v33  ;;  %v6700_v51 = vadd.f32 %v6668_v34, %v18955_v2  ;;  %10358 = vperm.xlu1 %14371, %v12568_v16   ;;  %21366 = vst [vmem:[#allocation61_spill] sm:$0xff] %v19327_v46  ;;  %v6669_v40 = vmul.f32 %v13986_v13, %v21367_v8  ;;  %v14020_v15 = vpop.f32.mrb[38].mxu0  ;;  %10333 = vperm.xlu0 %14370, %v12563_v0   ;;  %v19333_v9 = vpop.permute.xlu0 %9479  ;;  %v12570_v2 = vld [vmem:[%s20791_s7 + $0xd48] sm:$0xff]  ;;  %v21381_v46 = vld [vmem:[#allocation192_spill] sm:$0xff] }
 0x607   : > { %v6698_v45 = vadd.f32 %v6666_v18, %v18963_v23  ;;  %v7096_v33 = vmul.f32 %v14020_v15, %v21369_v62  ;;  %21370 = vst [vmem:[#allocation123_spill] sm:$0xff] %v19333_v9  ;;  %v6433_v41 = vpop.f32.mrb[31].mxu1  ;;  %v21371_v23 = vld [vmem:[#allocation155_spill] sm:$0xff]  ;;  %v6860_v34 = vpop.f32.mrb[39].mxu0 }
 0x608   : > { %v19341_v8 = vadd.f32 %v7095_v63, %v6700_v51  ;;  %v6701_v16 = vadd.f32 %v6669_v40, %v18969_v24  ;;  %v6667_v0 = vmul.f32 %v21371_v23, %v6433_v41  ;;  %14236 = vmatmul.mubr.msk.bf16.gmra.mrb[136].mxu1 %vm415_vm0, %v17318_v22  ;;  %14270 = vmatmul.mubr.msk.bf16.gmra.mrb[144].mxu0 %vm415_vm0, %v17318_v22  ;;  %v21372_v24 = vld [vmem:[#allocation113_spill] sm:$0xff]  ;;  %v21373_v40 = vld [vmem:[#allocation186_spill] sm:$0xff] }
 0x609   : > { %v19349_v15 = vadd.f32 %v7093_v4, %v6698_v45  ;;  %14239 = vmatprep.mubr.msk.bf16.mxu1 %vm415_vm0, %v17345_v47  ;;  %14273 = vmatprep.mubr.msk.bf16.mxu0 %vm415_vm0, %v17345_v47  ;;  %v7094_v48 = vmul.f32 %v21373_v40, %v6860_v34  ;;  %v19359_v18 = vpop.permute.xlu1 %9514  ;;  %v12572_v45 = vld [vmem:[%s20791_s7 + $0xd58] sm:$0xff]  ;;  %v21377_v4 = vld [vmem:[#allocation197_spill] sm:$0xff] }
 0x60a   : > { %v19355_v63 = vadd.f32 %v7096_v33, %v6701_v16  ;;  %v6699_v51 = vadd.f32 %v6667_v0, %v21372_v24  ;;  %10368 = vperm.xlu1 %14371, %v12570_v2   ;;  %21374 = vst [vmem:[#allocation128_spill] sm:$0xff] %v19359_v18  ;;  %10343 = vperm.xlu0 %14370, %v12565_v21   ;;  %v19361_v5 = vpop.permute.xlu0 %9489  ;;  %v12567_v33 = vld [vmem:[%s20791_s7 + $0xd30] sm:$0xff]  ;;  %v21378_v16 = vld [vmem:[#allocation195_spill] sm:$0xff]  ;;  %v21379_v24 = vld [vmem:[#allocation229_spill] sm:$0xff] }
 0x60b   : > { %21375 = vst [vmem:[#allocation126_spill] sm:$0xff] %v19361_v5  ;;  %v14025_v13 = vpop.f32.mrb[32].mxu1  ;;  %v14059_v41 = vpop.f32.mrb[40].mxu0 }
 0x60c   : > { %v19369_v43 = vadd.f32 %v7094_v48, %v6699_v51  ;;  %v7494_v62 = vmul.f32 %v14025_v13, %v21377_v4  ;;  %v7172_v2 = vpop.f32.mrb[33].mxu1  ;;  %v7599_v21 = vpop.f32.mrb[41].mxu0  ;;  %v7921_v40 = vmul.f32 %v14059_v41, %v21379_v24  ;;  %v21382_v48 = vld [vmem:[#allocation227_spill] sm:$0xff]  ;;  %v21383_v4 = vld [vmem:[#allocation224_spill] sm:$0xff] }
 0x60d   : > { %v7492_v23 = vmul.f32 %v21378_v16, %v7172_v2  ;;  %v14026_v0 = vpop.f32.mrb[34].mxu1  ;;  %v19375_v18 = vpop.permute.xlu1 %9524  ;;  %v7919_v13 = vmul.f32 %v21382_v48, %v7599_v21 }
 0x60e   : > { %21376 = vst [vmem:[#allocation160_spill] sm:$0xff] %v19369_v43  ;;  %v7526_v34 = vadd.f32 %v7494_v62, %v19003_v30  ;;  %10378 = vperm.xlu1 %14371, %v12572_v45   ;;  %21380 = vst [vmem:[#allocation129_spill] sm:$0xff] %v19375_v18  ;;  %v7495_v5 = vmul.f32 %v14026_v0, %v21381_v46  ;;  %v14060_v9 = vpop.f32.mrb[42].mxu0  ;;  %10353 = vperm.xlu0 %14370, %v12567_v33   ;;  %v19381_v2 = vpop.permute.xlu0 %9499  ;;  %v12574_v30 = vld [vmem:[%s20791_s7 + $0xd68] sm:$0xff]  ;;  %v12569_v45 = vld [vmem:[%s20791_s7 + $0xd40] sm:$0xff] }
 0x60f   : > { %v7524_v51 = vadd.f32 %v7492_v23, %v19011_v49  ;;  %v7922_v43 = vmul.f32 %v14060_v9, %v21383_v4  ;;  %21384 = vst [vmem:[#allocation158_spill] sm:$0xff] %v19381_v2  ;;  %v7175_v16 = vpop.f32.mrb[35].mxu1  ;;  %v21385_v49 = vld [vmem:[#allocation190_spill] sm:$0xff]  ;;  %v7602_v41 = vpop.f32.mrb[43].mxu0 }
 0x610   : > { %v19389_v46 = vadd.f32 %v7921_v40, %v7526_v34  ;;  %v7527_v33 = vadd.f32 %v7495_v5, %v19017_v7  ;;  %v7493_v62 = vmul.f32 %v21385_v49, %v7175_v16  ;;  %14240 = vmatmul.mubr.msk.bf16.gmra.mrb[140].mxu1 %vm415_vm0, %v17380_v26  ;;  %14274 = vmatmul.mubr.msk.bf16.gmra.mrb[148].mxu0 %vm415_vm0, %v17380_v26  ;;  %v21386_v5 = vld [vmem:[#allocation222_spill] sm:$0xff]  ;;  %v12576_v40 = vld [vmem:[%s20791_s7 + $0xd78] sm:$0xff] }
 0x611   : > { %v19397_v9 = vadd.f32 %v7919_v13, %v7524_v51  ;;  %14243 = vmatprep.mubr.msk.bf16.mxu1 %vm415_vm0, %v17407_v61  ;;  %14277 = vmatprep.mubr.msk.bf16.mxu0 %vm415_vm0, %v17407_v61  ;;  %v7920_v21 = vmul.f32 %v21386_v5, %v7602_v41  ;;  %v19407_v0 = vpop.permute.xlu1 %9534  ;;  %v21390_v16 = vld [vmem:[#allocation199_spill] sm:$0xff] }
 0x612   : > { %v19403_v23 = vadd.f32 %v7922_v43, %v7527_v33  ;;  %v7525_v7 = vadd.f32 %v7493_v62, %v19031_v36  ;;  %10388 = vperm.xlu1 %14371, %v12574_v30   ;;  %21387 = vst [vmem:[#allocation161_spill] sm:$0xff] %v19407_v0  ;;  %10363 = vperm.xlu0 %14370, %v12569_v45   ;;  %v19409_v34 = vpop.permute.xlu0 %9509  ;;  %v12571_v43 = vld [vmem:[%s20791_s7 + $0xd50] sm:$0xff]  ;;  %v21389_v36 = vld [vmem:[#allocation201_spill] sm:$0xff]  ;;  %v21393_v0 = vld [vmem:[#allocation196_spill] sm:$0xff] }
 0x613   : > { %21388 = vst [vmem:[#allocation127_spill] sm:$0xff] %v19409_v34  ;;  %v14029_v24 = vpop.f32.mrb[36].mxu1  ;;  %v14063_v13 = vpop.f32.mrb[44].mxu0  ;;  %v21391_v62 = vld [vmem:[#allocation233_spill] sm:$0xff] }
 0x614   : > { %v19417_v51 = vadd.f32 %v7920_v21, %v7525_v7  ;;  %v7498_v48 = vmul.f32 %v14029_v24, %v21389_v36  ;;  %v7188_v4 = vpop.f32.mrb[37].mxu1  ;;  %v7615_v45 = vpop.f32.mrb[45].mxu0  ;;  %v7925_v41 = vmul.f32 %v14063_v13, %v21391_v62  ;;  %v21394_v21 = vld [vmem:[#allocation231_spill] sm:$0xff]  ;;  %v21395_v36 = vld [vmem:[#allocation228_spill] sm:$0xff] }
 0x615   : > { %v7496_v30 = vmul.f32 %v21390_v16, %v7188_v4  ;;  %v14030_v33 = vpop.f32.mrb[38].mxu1  ;;  %v19423_v5 = vpop.permute.xlu1 %9544  ;;  %v7923_v24 = vmul.f32 %v21394_v21, %v7615_v45 }
 0x616   : > { %v7530_v49 = vadd.f32 %v7498_v48, %v19051_v56  ;;  %10398 = vperm.xlu1 %14371, %v12576_v40   ;;  %21392 = vst [vmem:[#allocation159_spill] sm:$0xff] %v19423_v5  ;;  %v7499_v18 = vmul.f32 %v14030_v33, %v21393_v0  ;;  %v14064_v34 = vpop.f32.mrb[46].mxu0  ;;  %10373 = vperm.xlu0 %14370, %v12571_v43   ;;  %v19429_v4 = vpop.permute.xlu0 %9519  ;;  %v12578_v56 = vld [vmem:[%s20791_s7 + $0xd88] sm:$0xff]  ;;  %v12573_v40 = vld [vmem:[%s20791_s7 + $0xd60] sm:$0xff] }
 0x617   : > { %v7528_v7 = vadd.f32 %v7496_v30, %v19059_v57  ;;  %v7926_v2 = vmul.f32 %v14064_v34, %v21395_v36  ;;  %21396 = vst [vmem:[#allocation132_spill] sm:$0xff] %v19429_v4  ;;  %v7191_v16 = vpop.f32.mrb[39].mxu1  ;;  %v21397_v57 = vld [vmem:[#allocation194_spill] sm:$0xff]  ;;  %v7618_v13 = vpop.f32.mrb[47].mxu0 }
 0x618   : > { %v19437_v0 = vadd.f32 %v7925_v41, %v7530_v49  ;;  %v7531_v43 = vadd.f32 %v7499_v18, %v19065_v60  ;;  %v7497_v48 = vmul.f32 %v21397_v57, %v7191_v16  ;;  %14244 = vmatmul.mubr.msk.bf16.gmra.mrb[144].mxu1 %vm415_vm0, %v17442_v54  ;;  %14278 = vmatmul.mubr.msk.bf16.gmra.mrb[152].mxu0 %vm415_vm0, %v17442_v54  ;;  %v21398_v18 = vld [vmem:[#allocation226_spill] sm:$0xff]  ;;  %v12580_v41 = vld [vmem:[%s20791_s7 + $0xd98] sm:$0xff] }
 0x619   : > { %v19445_v34 = vadd.f32 %v7923_v24, %v7528_v7  ;;  %14247 = vmatprep.mubr.msk.bf16.mxu1 %vm415_vm0, %v17469_v25  ;;  %14281 = vmatprep.mubr.msk.bf16.mxu0 %vm415_vm0, %v17469_v25  ;;  %v7924_v45 = vmul.f32 %v21398_v18, %v7618_v13  ;;  %v19455_v33 = vpop.permute.xlu1 %9554  ;;  %v21402_v16 = vld [vmem:[#allocation203_spill] sm:$0xff] }
 0x61a   : > { %v19451_v30 = vadd.f32 %v7926_v2, %v7531_v43  ;;  %v7529_v60 = vadd.f32 %v7497_v48, %v19079_v20  ;;  %10408 = vperm.xlu1 %14371, %v12578_v56   ;;  %21399 = vst [vmem:[#allocation130_spill] sm:$0xff] %v19455_v33  ;;  %10383 = vperm.xlu0 %14370, %v12573_v40   ;;  %v19457_v49 = vpop.permute.xlu0 %9529  ;;  %v12575_v2 = vld [vmem:[%s20791_s7 + $0xd70] sm:$0xff]  ;;  %v21401_v20 = vld [vmem:[#allocation205_spill] sm:$0xff]  ;;  %v21405_v33 = vld [vmem:[#allocation200_spill] sm:$0xff] }
 0x61b   : > { %21400 = vst [vmem:[#allocation164_spill] sm:$0xff] %v19457_v49  ;;  %v14033_v62 = vpop.f32.mrb[40].mxu1  ;;  %v14067_v24 = vpop.f32.mrb[48].mxu0  ;;  %v21403_v48 = vld [vmem:[#allocation34_spill] sm:$0xff] }
 0x61c   : > { %v19465_v7 = vadd.f32 %v7924_v45, %v7529_v60  ;;  %v7502_v21 = vmul.f32 %v14033_v62, %v21401_v20  ;;  %v7204_v36 = vpop.f32.mrb[41].mxu1  ;;  %v7631_v40 = vpop.f32.mrb[49].mxu0  ;;  %v7929_v13 = vmul.f32 %v14067_v24, %v21403_v48  ;;  %v21406_v45 = vld [vmem:[#allocation235_spill] sm:$0xff]  ;;  %v21407_v20 = vld [vmem:[#allocation232_spill] sm:$0xff] }
 0x61d   : > { %v7500_v56 = vmul.f32 %v21402_v16, %v7204_v36  ;;  %v14034_v43 = vpop.f32.mrb[42].mxu1  ;;  %v19471_v18 = vpop.permute.xlu1 %9564  ;;  %v7927_v62 = vmul.f32 %v21406_v45, %v7631_v40 }
 0x61e   : > { %v7534_v57 = vadd.f32 %v7502_v21, %v19099_v44  ;;  %10418 = vperm.xlu1 %14371, %v12580_v41   ;;  %21404 = vst [vmem:[#allocation133_spill] sm:$0xff] %v19471_v18  ;;  %v7503_v5 = vmul.f32 %v14034_v43, %v21405_v33  ;;  %v14068_v49 = vpop.f32.mrb[50].mxu0  ;;  %10393 = vperm.xlu0 %14370, %v12575_v2   ;;  %v19477_v36 = vpop.permute.xlu0 %9539  ;;  %v12582_v44 = vld [vmem:[%s20791_s7 + $0xda8] sm:$0xff]  ;;  %v12577_v41 = vld [vmem:[%s20791_s7 + $0xd80] sm:$0xff] }
 0x61f   : > { %v7532_v60 = vadd.f32 %v7500_v56, %v19107_v1  ;;  %v7930_v4 = vmul.f32 %v14068_v49, %v21407_v20  ;;  %21408 = vst [vmem:[#allocation162_spill] sm:$0xff] %v19477_v36  ;;  %v7207_v16 = vpop.f32.mrb[43].mxu1  ;;  %v21409_v1 = vld [vmem:[#allocation198_spill] sm:$0xff]  ;;  %v7634_v24 = vpop.f32.mrb[51].mxu0 }
 0x620   : > { %v19485_v33 = vadd.f32 %v7929_v13, %v7534_v57  ;;  %v7535_v2 = vadd.f32 %v7503_v5, %v19113_v31  ;;  %v7501_v21 = vmul.f32 %v21409_v1, %v7207_v16  ;;  %14248 = vmatmul.mubr.msk.bf16.gmra.mrb[148].mxu1 %vm415_vm0, %v17504_v42  ;;  %14282 = vmatmul.mubr.msk.bf16.gmra.mrb[156].mxu0 %vm415_vm0, %v17504_v42  ;;  %v21410_v5 = vld [vmem:[#allocation230_spill] sm:$0xff]  ;;  %v12584_v13 = vld [vmem:[%s20791_s7 + $0xdb8] sm:$0xff] }
 0x621   : > { %v19493_v49 = vadd.f32 %v7927_v62, %v7532_v60  ;;  %14251 = vmatprep.mubr.msk.bf16.mxu1 %vm415_vm0, %v17535_v27  ;;  %14285 = vmatprep.mubr.msk.bf16.mxu0 %vm415_vm0, %v17535_v27  ;;  %v7928_v40 = vmul.f32 %v21410_v5, %v7634_v24  ;;  %v19503_v43 = vpop.permute.xlu1 %9574  ;;  %v21414_v16 = vld [vmem:[#allocation207_spill] sm:$0xff] }
 0x622   : > { %v19499_v56 = vadd.f32 %v7930_v4, %v7535_v2  ;;  %v7533_v31 = vadd.f32 %v7501_v21, %v19127_v52  ;;  %10428 = vperm.xlu1 %14371, %v12582_v44   ;;  %21411 = vst [vmem:[#allocation165_spill] sm:$0xff] %v19503_v43  ;;  %10403 = vperm.xlu0 %14370, %v12577_v41   ;;  %v19505_v57 = vpop.permute.xlu0 %9549  ;;  %v12579_v4 = vld [vmem:[%s20791_s7 + $0xd90] sm:$0xff]  ;;  %v21413_v52 = vld [vmem:[#allocation209_spill] sm:$0xff]  ;;  %v21415_v21 = vld [vmem:[#allocation36_spill] sm:$0xff] }
 0x623   : > { %21412 = vst [vmem:[#allocation131_spill] sm:$0xff] %v19505_v57  ;;  %v14037_v48 = vpop.f32.mrb[44].mxu1  ;;  %v14071_v62 = vpop.f32.mrb[52].mxu0  ;;  %v21417_v43 = vld [vmem:[#allocation204_spill] sm:$0xff] }
 0x624   : > { %v19513_v60 = vadd.f32 %v7928_v40, %v7533_v31  ;;  %v7506_v45 = vmul.f32 %v14037_v48, %v21413_v52  ;;  %v7220_v20 = vpop.f32.mrb[45].mxu1  ;;  %v7647_v41 = vpop.f32.mrb[53].mxu0  ;;  %v7933_v24 = vmul.f32 %v14071_v62, %v21415_v21  ;;  %v21418_v40 = vld [vmem:[#allocation38_spill] sm:$0xff]  ;;  %v21419_v52 = vld [vmem:[#allocation4_spill] sm:$0xff] }
 0x625   : > { %v7504_v44 = vmul.f32 %v21414_v16, %v7220_v20  ;;  %v14038_v2 = vpop.f32.mrb[46].mxu1  ;;  %v19519_v5 = vpop.permute.xlu1 %9584  ;;  %v7931_v48 = vmul.f32 %v21418_v40, %v7647_v41 }
 0x626   : > { %v7538_v1 = vadd.f32 %v7506_v45, %v19147_v59  ;;  %10438 = vperm.xlu1 %14371, %v12584_v13   ;;  %21416 = vst [vmem:[#allocation163_spill] sm:$0xff] %v19519_v5  ;;  %v7507_v18 = vmul.f32 %v14038_v2, %v21417_v43  ;;  %v14072_v57 = vpop.f32.mrb[54].mxu0  ;;  %10413 = vperm.xlu0 %14370, %v12579_v4   ;;  %v19525_v20 = vpop.permute.xlu0 %9559  ;;  %v12586_v59 = vld [vmem:[%s20791_s7 + $0xdc8] sm:$0xff]  ;;  %v12581_v13 = vld [vmem:[%s20791_s7 + $0xda0] sm:$0xff] }
 0x627   : > { %v7536_v31 = vadd.f32 %v7504_v44, %v19155_v58  ;;  %v7934_v36 = vmul.f32 %v14072_v57, %v21419_v52  ;;  %21420 = vst [vmem:[#allocation136_spill] sm:$0xff] %v19525_v20  ;;  %v7223_v16 = vpop.f32.mrb[47].mxu1  ;;  %v21421_v58 = vld [vmem:[#allocation202_spill] sm:$0xff]  ;;  %v7650_v62 = vpop.f32.mrb[55].mxu0 }
 0x628   : > { %v19533_v43 = vadd.f32 %v7933_v24, %v7538_v1  ;;  %v7539_v4 = vadd.f32 %v7507_v18, %v19161_v17  ;;  %v7505_v45 = vmul.f32 %v21421_v58, %v7223_v16  ;;  %14252 = vmatmul.mubr.msk.bf16.gmra.mrb[152].mxu1 %vm415_vm0, %v17563_v29  ;;  %14286 = vmatmul.mubr.msk.bf16.gmra.mrb[160].mxu0 %vm415_vm0, %v17563_v29  ;;  %v21422_v18 = vld [vmem:[#allocation234_spill] sm:$0xff]  ;;  %v12588_v24 = vld [vmem:[%s20791_s7 + $0xdd8] sm:$0xff] }
 0x629   : > { %v19541_v57 = vadd.f32 %v7931_v48, %v7536_v31  ;;  %14255 = vmatprep.mubr.msk.bf16.mxu1 %vm415_vm0, %v17593_v19  ;;  %14289 = vmatprep.mubr.msk.bf16.mxu0 %vm415_vm0, %v17593_v19  ;;  %v7932_v41 = vmul.f32 %v21422_v18, %v7650_v62  ;;  %v19551_v2 = vpop.permute.xlu1 %9594  ;;  %v21426_v16 = vld [vmem:[#allocation211_spill] sm:$0xff] }
 0x62a   : > { %v19547_v44 = vadd.f32 %v7934_v36, %v7539_v4  ;;  %v7537_v17 = vadd.f32 %v7505_v45, %v19175_v50  ;;  %10448 = vperm.xlu1 %14371, %v12586_v59   ;;  %21423 = vst [vmem:[#allocation134_spill] sm:$0xff] %v19551_v2  ;;  %10423 = vperm.xlu0 %14370, %v12581_v13   ;;  %v19553_v1 = vpop.permute.xlu0 %9569  ;;  %v12583_v36 = vld [vmem:[%s20791_s7 + $0xdb0] sm:$0xff]  ;;  %v21425_v50 = vld [vmem:[#allocation213_spill] sm:$0xff]  ;;  %v21427_v45 = vld [vmem:[#allocation39_spill] sm:$0xff] }
 0x62b   : > { %21424 = vst [vmem:[#allocation168_spill] sm:$0xff] %v19553_v1  ;;  %v14041_v21 = vpop.f32.mrb[48].mxu1  ;;  %v14075_v48 = vpop.f32.mrb[56].mxu0  ;;  %v21429_v2 = vld [vmem:[#allocation208_spill] sm:$0xff] }
 0x62c   : > { %v19561_v31 = vadd.f32 %v7932_v41, %v7537_v17  ;;  %v7510_v40 = vmul.f32 %v14041_v21, %v21425_v50  ;;  %v7236_v52 = vpop.f32.mrb[49].mxu1  ;;  %v7663_v13 = vpop.f32.mrb[57].mxu0  ;;  %v7937_v62 = vmul.f32 %v14075_v48, %v21427_v45  ;;  %v21430_v41 = vld [vmem:[#allocation237_spill] sm:$0xff] }
 0x62d   : > { %v7508_v59 = vmul.f32 %v21426_v16, %v7236_v52  ;;  %v14042_v4 = vpop.f32.mrb[50].mxu1  ;;  %v19567_v18 = vpop.permute.xlu1 %9604  ;;  %v7935_v21 = vmul.f32 %v21430_v41, %v7663_v13  ;;  %v21431_v50 = vld [vmem:[#allocation5_spill] sm:$0xff] }
 0x62e   : > { %v7542_v58 = vadd.f32 %v7510_v40, %v19195_v38  ;;  %10458 = vperm.xlu1 %14371, %v12588_v24   ;;  %21428 = vst [vmem:[#allocation137_spill] sm:$0xff] %v19567_v18  ;;  %v7511_v5 = vmul.f32 %v14042_v4, %v21429_v2  ;;  %v14076_v1 = vpop.f32.mrb[58].mxu0  ;;  %10433 = vperm.xlu0 %14370, %v12583_v36   ;;  %v19573_v52 = vpop.permute.xlu0 %9579  ;;  %v12590_v38 = vld [vmem:[%s20791_s7 + $0xde8] sm:$0xff]  ;;  %v12585_v24 = vld [vmem:[%s20791_s7 + $0xdc0] sm:$0xff] }
 0x62f   : > { %v7540_v17 = vadd.f32 %v7508_v59, %v19203_v37  ;;  %v7938_v20 = vmul.f32 %v14076_v1, %v21431_v50  ;;  %v7239_v16 = vpop.f32.mrb[51].mxu1  ;;  %v21432_v37 = vld [vmem:[#allocation206_spill] sm:$0xff]  ;;  %v7666_v48 = vpop.f32.mrb[59].mxu0  ;;  %v21437_v50 = vld [vmem:[#allocation215_spill] sm:$0xff] }
 0x630   : > { %v19581_v2 = vadd.f32 %v7937_v62, %v7542_v58  ;;  %v7543_v36 = vadd.f32 %v7511_v5, %v19209_v28  ;;  %v7509_v40 = vmul.f32 %v21432_v37, %v7239_v16  ;;  %14256 = vmatmul.mubr.msk.bf16.gmra.mrb[156].mxu1 %vm415_vm0, %v17621_v35  ;;  %14290 = vmatmul.mubr.msk.bf16.gmra.mrb[164].mxu0 %vm415_vm0, %v17621_v35  ;;  %v21433_v5 = vld [vmem:[#allocation7_spill] sm:$0xff]  ;;  %v21438_v37 = vld [vmem:[#allocation42_spill] sm:$0xff] }
 0x631   : > { %v19589_v1 = vadd.f32 %v7935_v21, %v7540_v17  ;;  %14295 = vmatprep.mubr.msk.bf16.mxu1 %vm415_vm0, %v17145_v3  ;;  %14329 = vmatprep.mubr.msk.bf16.mxu0 %vm415_vm0, %v17145_v3  ;;  %v7936_v13 = vmul.f32 %v21433_v5, %v7666_v48  ;;  %v19599_v4 = vpop.permute.xlu1 %9614  ;;  %v12592_v62 = vld [vmem:[%s20791_s7 + $0xdf8] sm:$0xff]  ;;  %v12587_v3 = vld [vmem:[%s20791_s7 + $0xdd0] sm:$0xff]  ;;  %v21440_v5 = vld [vmem:[#allocation212_spill] sm:$0xff] }
 0x632   : > { %v19595_v59 = vadd.f32 %v7938_v20, %v7543_v36  ;;  %v7541_v28 = vadd.f32 %v7509_v40, %v19223_v10  ;;  %10468 = vperm.xlu1 %14371, %v12590_v38   ;;  %21434 = vst [vmem:[#allocation166_spill] sm:$0xff] %v19599_v4  ;;  %10443 = vperm.xlu0 %14370, %v12585_v24   ;;  %v19601_v58 = vpop.permute.xlu0 %9589  ;;  %v21436_v10 = vld [vmem:[#allocation217_spill] sm:$0xff] }
 0x633   : > { %21435 = vst [vmem:[#allocation169_spill] sm:$0xff] %v19601_v58  ;;  %v14045_v45 = vpop.f32.mrb[52].mxu1  ;;  %v14079_v41 = vpop.f32.mrb[60].mxu0 }
 0x634   : > { %v19609_v20 = vadd.f32 %v7936_v13, %v7541_v28  ;;  %v7514_v17 = vmul.f32 %v14045_v45, %v21436_v10  ;;  %v7252_v21 = vpop.f32.mrb[53].mxu1  ;;  %v7679_v38 = vpop.f32.mrb[61].mxu0  ;;  %v7941_v40 = vmul.f32 %v14079_v41, %v21438_v37  ;;  %v21441_v13 = vld [vmem:[#allocation37_spill] sm:$0xff]  ;;  %v21442_v10 = vld [vmem:[#allocation8_spill] sm:$0xff] }
 0x635   : > { %v7512_v16 = vmul.f32 %v21437_v50, %v7252_v21  ;;  %v14046_v24 = vpop.f32.mrb[54].mxu1  ;;  %v19615_v48 = vpop.permute.xlu1 %9624  ;;  %v7939_v45 = vmul.f32 %v21441_v13, %v7679_v38 }
 0x636   : > { %v7546_v36 = vadd.f32 %v7514_v17, %v19243_v11  ;;  %10478 = vperm.xlu1 %14371, %v12592_v62   ;;  %21439 = vst [vmem:[#allocation135_spill] sm:$0xff] %v19615_v48  ;;  %v7515_v4 = vmul.f32 %v14046_v24, %v21440_v5  ;;  %v14080_v18 = vpop.f32.mrb[62].mxu0  ;;  %10453 = vperm.xlu0 %14370, %v12587_v3   ;;  %v19621_v21 = vpop.permute.xlu0 %9599  ;;  %v12613_v11 = vld [vmem:[%s20791_s7 + $0xe08] sm:$0xff]  ;;  %v12589_v62 = vld [vmem:[%s20791_s7 + $0xde0] sm:$0xff] }
 0x637   : > { %v7544_v28 = vadd.f32 %v7512_v16, %v19251_v14  ;;  %v7942_v58 = vmul.f32 %v14080_v18, %v21442_v10  ;;  %21443 = vst [vmem:[#allocation167_spill] sm:$0xff] %v19621_v21  ;;  %v7255_v50 = vpop.f32.mrb[55].mxu1  ;;  %v21444_v14 = vld [vmem:[#allocation210_spill] sm:$0xff]  ;;  %v7682_v16 = vpop.f32.mrb[63].mxu0 }
 0x638   : > { %v19629_v17 = vadd.f32 %v7941_v40, %v7546_v36  ;;  %v7547_v3 = vadd.f32 %v7515_v4, %v19257_v32  ;;  %v7513_v41 = vmul.f32 %v21444_v14, %v7255_v50  ;;  %14296 = vmatmul.mubr.msk.bf16.vlgmr.msra.gmra.mrb[160].mxu1 %vm415_vm0, %v17178_v55  ;;  %14330 = vmatmul.mubr.msk.bf16.vlgmr.msra.gmra.mrb[168].mxu0 %vm415_vm0, %v17178_v55  ;;  %v21445_v4 = vld [vmem:[#allocation236_spill] sm:$0xff]  ;;  %v12615_v40 = vld [vmem:[%s20791_s7 + $0xe18] sm:$0xff] }
 0x639   : > { %v19637_v18 = vadd.f32 %v7939_v45, %v7544_v28  ;;  %14299 = vmatprep.mubr.msk.bf16.mxu1 %vm415_vm0, %v17209_v53  ;;  %14333 = vmatprep.mubr.msk.bf16.mxu0 %vm415_vm0, %v17209_v53  ;;  %v7940_v24 = vmul.f32 %v21445_v4, %v7682_v16  ;;  %v19647_v36 = vpop.permute.xlu1 %9901  ;;  %v12591_v53 = vld [vmem:[%s20791_s7 + $0xdf0] sm:$0xff]  ;;  %v21449_v45 = vld [vmem:[#allocation219_spill] sm:$0xff]  ;;  %v21452_v16 = vld [vmem:[#allocation216_spill] sm:$0xff] }
 0x63a   : > { %v19643_v38 = vadd.f32 %v7942_v58, %v7547_v3  ;;  %v7545_v32 = vadd.f32 %v7513_v41, %v19273_v12  ;;  %10755 = vperm.xlu1 %14371, %v12613_v11   ;;  %21446 = vst [vmem:[#allocation140_spill] sm:$0xff] %v19647_v36  ;;  %10463 = vperm.xlu0 %14370, %v12589_v62   ;;  %v19649_v37 = vpop.permute.xlu0 %9609  ;;  %v21448_v12 = vld [vmem:[#allocation221_spill] sm:$0xff]  ;;  %v21450_v3 = vld [vmem:[#allocation43_spill] sm:$0xff] }
 0x63b   : > { %21447 = vst [vmem:[#allocation138_spill] sm:$0xff] %v19649_v37  ;;  %v14049_v55 = vpop.f32.mrb[56].mxu1  ;;  %v14083_v28 = vpop.f32.mrb[64].mxu0 }
 0x63c   : > { %v19657_v58 = vadd.f32 %v7940_v24, %v7545_v32  ;;  %v7518_v5 = vmul.f32 %v14049_v55, %v21448_v12  ;;  %v7268_v13 = vpop.f32.mrb[57].mxu1  ;;  %v7695_v50 = vpop.f32.mrb[65].mxu0  ;;  %v7945_v14 = vmul.f32 %v14083_v28, %v21450_v3  ;;  %v21453_v24 = vld [vmem:[#allocation40_spill] sm:$0xff]  ;;  %v21454_v12 = vld [vmem:[#allocation11_spill] sm:$0xff]  ;;  %v21459_v3 = vld [vmem:[#allocation173_spill] sm:$0xff] }
 0x63d   : > { %v7516_v10 = vmul.f32 %v21449_v45, %v7268_v13  ;;  %v14050_v11 = vpop.f32.mrb[58].mxu1  ;;  %v19663_v41 = vpop.permute.xlu1 %9911  ;;  %v7943_v55 = vmul.f32 %v21453_v24, %v7695_v50 }
 0x63e   : > { %v7550_v62 = vadd.f32 %v7518_v5, %v19293_v6  ;;  %10765 = vperm.xlu1 %14371, %v12615_v40   ;;  %21451 = vst [vmem:[#allocation177_spill] sm:$0xff] %v19663_v41  ;;  %v7519_v4 = vmul.f32 %v14050_v11, %v21452_v16  ;;  %v14084_v36 = vpop.f32.mrb[66].mxu0  ;;  %10473 = vperm.xlu0 %14370, %v12591_v53   ;;  %v19669_v13 = vpop.permute.xlu0 %9619  ;;  %v12617_v6 = vld [vmem:[%s20791_s7 + $0xe28] sm:$0xff]  ;;  %v12612_v40 = vld [vmem:[%s20791_s7 + $0xe00] sm:$0xff] }
 0x63f   : > { %v7548_v32 = vadd.f32 %v7516_v10, %v19301_v39  ;;  %v7946_v48 = vmul.f32 %v14084_v36, %v21454_v12  ;;  %21455 = vst [vmem:[#allocation141_spill] sm:$0xff] %v19669_v13  ;;  %v7271_v45 = vpop.f32.mrb[59].mxu1  ;;  %v21456_v53 = vld [vmem:[#allocation97_spill] sm:$0xff]  ;;  %v21457_v39 = vld [vmem:[#allocation214_spill] sm:$0xff]  ;;  %v7698_v50 = vpop.f32.mrb[67].mxu0  ;;  %v21458_v11 = vld [vmem:[#allocation172_spill] sm:$0xff] }
 0x640   : > { %v19677_v5 = vadd.f32 %v7945_v14, %v7550_v62  ;;  %v7551_v28 = vadd.f32 %v7519_v4, %v21456_v53  ;;  %v7517_v10 = vmul.f32 %v21457_v39, %v7271_v45  ;;  %14300 = vmatmul.mubr.msk.bf16.gmra.mrb[164].mxu1 %vm415_vm0, %v21458_v11  ;;  %14334 = vmatmul.mubr.msk.bf16.gmra.mrb[172].mxu0 %vm415_vm0, %v21458_v11  ;;  %v21460_v14 = vld [vmem:[#allocation95_spill] sm:$0xff]  ;;  %v21461_v4 = vld [vmem:[#allocation6_spill] sm:$0xff] }
 0x641   : > { %v19685_v36 = vadd.f32 %v7943_v55, %v7548_v32  ;;  %14303 = vmatprep.mubr.msk.bf16.mxu1 %vm415_vm0, %v21459_v3  ;;  %14337 = vmatprep.mubr.msk.bf16.mxu0 %vm415_vm0, %v21459_v3  ;;  %v7944_v24 = vmul.f32 %v21461_v4, %v7698_v50  ;;  %v19695_v12 = vpop.permute.xlu1 %9921  ;;  %v12619_v55 = vld [vmem:[%s20791_s7 + $0xe38] sm:$0xff]  ;;  %v21466_v4 = vld [vmem:[#allocation46_spill] sm:$0xff] }
 0x642   : > { %v19691_v62 = vadd.f32 %v7946_v48, %v7551_v28  ;;  %v7549_v16 = vadd.f32 %v7517_v10, %v21460_v14  ;;  %10775 = vperm.xlu1 %14371, %v12617_v6   ;;  %21462 = vst [vmem:[#allocation170_spill] sm:$0xff] %v19695_v12  ;;  %10750 = vperm.xlu0 %14370, %v12612_v40   ;;  %v19697_v45 = vpop.permute.xlu0 %9896  ;;  %v12614_v48 = vld [vmem:[%s20791_s7 + $0xe10] sm:$0xff]  ;;  %v21464_v28 = vld [vmem:[#allocation225_spill] sm:$0xff]  ;;  %v21465_v50 = vld [vmem:[#allocation223_spill] sm:$0xff] }
 0x643   : > { %21463 = vst [vmem:[#allocation174_spill] sm:$0xff] %v19697_v45  ;;  %v14053_v32 = vpop.f32.mrb[60].mxu1  ;;  %v14087_v10 = vpop.f32.mrb[68].mxu0  ;;  %v21468_v45 = vld [vmem:[#allocation220_spill] sm:$0xff] }
 0x644   : > { %v19705_v53 = vadd.f32 %v7944_v24, %v7549_v16  ;;  %v7522_v39 = vmul.f32 %v14053_v32, %v21464_v28  ;;  %v7284_v6 = vpop.f32.mrb[61].mxu1  ;;  %v7711_v40 = vpop.f32.mrb[69].mxu0  ;;  %v7949_v12 = vmul.f32 %v14087_v10, %v21466_v4  ;;  %v21469_v24 = vld [vmem:[#allocation41_spill] sm:$0xff]  ;;  %v21470_v28 = vld [vmem:[#allocation12_spill] sm:$0xff]  ;;  %v12623_v4 = vld [vmem:[%s20791_s7 + $0xe58] sm:$0xff] }
 0x645   : > { %v7520_v11 = vmul.f32 %v21465_v50, %v7284_v6  ;;  %v14054_v3 = vpop.f32.mrb[62].mxu1  ;;  %v19711_v41 = vpop.permute.xlu1 %9931  ;;  %v7947_v32 = vmul.f32 %v21469_v24, %v7711_v40 }
 0x646   : > { %v7554_v14 = vadd.f32 %v7522_v39, %v19341_v8  ;;  %10785 = vperm.xlu1 %14371, %v12619_v55   ;;  %21467 = vst [vmem:[#allocation139_spill] sm:$0xff] %v19711_v41  ;;  %v7523_v37 = vmul.f32 %v14054_v3, %v21468_v45  ;;  %v14088_v13 = vpop.f32.mrb[70].mxu0  ;;  %10760 = vperm.xlu0 %14370, %v12614_v48   ;;  %v19717_v6 = vpop.permute.xlu0 %9906  ;;  %v12621_v8 = vld [vmem:[%s20791_s7 + $0xe48] sm:$0xff]  ;;  %v12616_v55 = vld [vmem:[%s20791_s7 + $0xe20] sm:$0xff] }
 0x647   : > { %v7552_v16 = vadd.f32 %v7520_v11, %v19349_v15  ;;  %v7950_v21 = vmul.f32 %v14088_v13, %v21470_v28  ;;  %v7287_v50 = vpop.f32.mrb[63].mxu1  ;;  %v21471_v15 = vld [vmem:[#allocation218_spill] sm:$0xff]  ;;  %v7714_v10 = vpop.f32.mrb[71].mxu0  ;;  %v21473_v11 = vld [vmem:[#allocation9_spill] sm:$0xff] }
 0x648   : > { %v19725_v45 = vadd.f32 %v7949_v12, %v7554_v14  ;;  %v7555_v48 = vadd.f32 %v7523_v37, %v19355_v63  ;;  %v7521_v39 = vmul.f32 %v21471_v15, %v7287_v50  ;;  %14304 = vmatmul.mubr.msk.bf16.gmra.mrb[168].mxu1 %vm415_vm0, %v17318_v22  ;;  %14338 = vmatmul.mubr.msk.bf16.gmra.mrb[176].mxu0 %vm415_vm0, %v17318_v22  ;;  %v21472_v63 = vld [vmem:[#allocation160_spill] sm:$0xff] }
 0x649   : > { %v19733_v13 = vadd.f32 %v7947_v32, %v7552_v16  ;;  %14307 = vmatprep.mubr.msk.bf16.mxu1 %vm415_vm0, %v17345_v47  ;;  %14341 = vmatprep.mubr.msk.bf16.mxu0 %vm415_vm0, %v17345_v47  ;;  %v7948_v40 = vmul.f32 %v21473_v11, %v7714_v10  ;;  %v19743_v3 = vpop.permute.xlu1 %9941  ;;  %v12618_v47 = vld [vmem:[%s20791_s7 + $0xe30] sm:$0xff]  ;;  %v21476_v16 = vld [vmem:[#allocation47_spill] sm:$0xff]  ;;  %v21477_v50 = vld [vmem:[#allocation44_spill] sm:$0xff] }
 0x64a   : > { %v19739_v12 = vadd.f32 %v7950_v21, %v7555_v48  ;;  %v7553_v37 = vadd.f32 %v7521_v39, %v21472_v63  ;;  %10795 = vperm.xlu1 %14371, %v12621_v8   ;;  %21474 = vst [vmem:[#allocation171_spill] sm:$0xff] %v19743_v3  ;;  %10770 = vperm.xlu0 %14370, %v12616_v55   ;;  %v19745_v14 = vpop.permute.xlu0 %9916  ;;  %v21478_v39 = vld [vmem:[#allocation63_spill] sm:$0xff] }
 0x64b   : > { %21475 = vst [vmem:[#allocation144_spill] sm:$0xff] %v19745_v14  ;;  %v14093_v22 = vpop.f32.mrb[64].mxu1  ;;  %v14127_v32 = vpop.f32.mrb[72].mxu0  ;;  %v21480_v11 = vld [vmem:[#allocation15_spill] sm:$0xff] }
 0x64c   : > { %v19753_v21 = vadd.f32 %v7948_v40, %v7553_v37  ;;  %v8348_v24 = vmul.f32 %v14093_v22, %v21476_v16  ;;  %v8026_v28 = vpop.f32.mrb[65].mxu1  ;;  %v8453_v55 = vpop.f32.mrb[73].mxu0  ;;  %v8775_v10 = vmul.f32 %v14127_v32, %v21478_v39  ;;  %v21481_v40 = vld [vmem:[#allocation242_spill] sm:$0xff]  ;;  %v21482_v16 = vld [vmem:[#allocation29_spill] sm:$0xff] }
 0x64d   : > { %v8346_v8 = vmul.f32 %v21477_v50, %v8026_v28  ;;  %v14094_v48 = vpop.f32.mrb[66].mxu1  ;;  %v19759_v63 = vpop.permute.xlu1 %9951  ;;  %v8773_v22 = vmul.f32 %v21481_v40, %v8453_v55 }
 0x64e   : > { %v8380_v15 = vadd.f32 %v8348_v24, %v19389_v46  ;;  %10805 = vperm.xlu1 %14371, %v12623_v4   ;;  %21479 = vst [vmem:[#allocation142_spill] sm:$0xff] %v19759_v63  ;;  %v8349_v3 = vmul.f32 %v14094_v48, %v21480_v11  ;;  %v14128_v41 = vpop.f32.mrb[74].mxu0  ;;  %10780 = vperm.xlu0 %14370, %v12618_v47   ;;  %v19765_v28 = vpop.permute.xlu0 %9926  ;;  %v12625_v46 = vld [vmem:[%s20791_s7 + $0xe68] sm:$0xff]  ;;  %v12620_v4 = vld [vmem:[%s20791_s7 + $0xe40] sm:$0xff] }
 0x64f   : > { %v8378_v37 = vadd.f32 %v8346_v8, %v19397_v9  ;;  %v8776_v14 = vmul.f32 %v14128_v41, %v21482_v16  ;;  %v8029_v50 = vpop.f32.mrb[67].mxu1  ;;  %v21483_v9 = vld [vmem:[#allocation10_spill] sm:$0xff]  ;;  %v8456_v8 = vpop.f32.mrb[75].mxu0 }
 0x650   : > { %v19773_v24 = vadd.f32 %v8775_v10, %v8380_v15  ;;  %v8381_v47 = vadd.f32 %v8349_v3, %v19403_v23  ;;  %v8347_v32 = vmul.f32 %v21483_v9, %v8029_v50  ;;  %14308 = vmatmul.mubr.msk.bf16.gmra.mrb[172].mxu1 %vm415_vm0, %v17380_v26  ;;  %14342 = vmatmul.mubr.msk.bf16.gmra.mrb[180].mxu0 %vm415_vm0, %v17380_v26  ;;  %v21484_v3 = vld [vmem:[#allocation57_spill] sm:$0xff]  ;;  %v12627_v10 = vld [vmem:[%s20791_s7 + $0xe78] sm:$0xff] }
 0x651   : > { %v19781_v41 = vadd.f32 %v8773_v22, %v8378_v37  ;;  %14311 = vmatprep.mubr.msk.bf16.mxu1 %vm415_vm0, %v17407_v61  ;;  %14345 = vmatprep.mubr.msk.bf16.mxu0 %vm415_vm0, %v17407_v61  ;;  %v8774_v48 = vmul.f32 %v21484_v3, %v8456_v8  ;;  %v19791_v15 = vpop.permute.xlu1 %9961  ;;  %v12622_v61 = vld [vmem:[%s20791_s7 + $0xe50] sm:$0xff]  ;;  %v21488_v22 = vld [vmem:[#allocation45_spill] sm:$0xff]  ;;  %v21491_v8 = vld [vmem:[#allocation16_spill] sm:$0xff] }
 0x652   : > { %v19787_v55 = vadd.f32 %v8776_v14, %v8381_v47  ;;  %v8379_v23 = vadd.f32 %v8347_v32, %v19417_v51  ;;  %10815 = vperm.xlu1 %14371, %v12625_v46   ;;  %21485 = vst [vmem:[#allocation181_spill] sm:$0xff] %v19791_v15  ;;  %10790 = vperm.xlu0 %14370, %v12620_v4   ;;  %v19793_v39 = vpop.permute.xlu0 %9936  ;;  %v21487_v51 = vld [vmem:[#allocation50_spill] sm:$0xff]  ;;  %v21489_v47 = vld [vmem:[#allocation33_spill] sm:$0xff] }
 0x653   : > { %21486 = vst [vmem:[#allocation145_spill] sm:$0xff] %v19793_v39  ;;  %v14097_v26 = vpop.f32.mrb[68].mxu1  ;;  %v14131_v37 = vpop.f32.mrb[76].mxu0 }
 0x654   : > { %v19801_v14 = vadd.f32 %v8774_v48, %v8379_v23  ;;  %v8352_v11 = vmul.f32 %v14097_v26, %v21487_v51  ;;  %v8042_v40 = vpop.f32.mrb[69].mxu1  ;;  %v8469_v50 = vpop.f32.mrb[77].mxu0  ;;  %v8779_v9 = vmul.f32 %v14131_v37, %v21489_v47  ;;  %v21492_v48 = vld [vmem:[#allocation35_spill] sm:$0xff]  ;;  %v21493_v51 = vld [vmem:[#allocation32_spill] sm:$0xff] }
 0x655   : > { %v8350_v16 = vmul.f32 %v21488_v22, %v8042_v40  ;;  %v14098_v46 = vpop.f32.mrb[70].mxu1  ;;  %v19807_v32 = vpop.permute.xlu1 %9971  ;;  %v8777_v26 = vmul.f32 %v21492_v48, %v8469_v50 }
 0x656   : > { %v8384_v4 = vadd.f32 %v8352_v11, %v19437_v0  ;;  %10825 = vperm.xlu1 %14371, %v12627_v10   ;;  %21490 = vst [vmem:[#allocation179_spill] sm:$0xff] %v19807_v32  ;;  %v8353_v3 = vmul.f32 %v14098_v46, %v21491_v8  ;;  %v14132_v15 = vpop.f32.mrb[78].mxu0  ;;  %10800 = vperm.xlu0 %14370, %v12622_v61   ;;  %v19813_v40 = vpop.permute.xlu0 %9946  ;;  %v12629_v0 = vld [vmem:[%s20791_s7 + $0xe88] sm:$0xff]  ;;  %v12624_v10 = vld [vmem:[%s20791_s7 + $0xe60] sm:$0xff]  ;;  %v12631_v8 = vld [vmem:[%s20791_s7 + $0xe98] sm:$0xff] }
 0x657   : > { %v8382_v23 = vadd.f32 %v8350_v16, %v19445_v34  ;;  %v8780_v63 = vmul.f32 %v14132_v15, %v21493_v51  ;;  %v8045_v22 = vpop.f32.mrb[71].mxu1  ;;  %v21494_v34 = vld [vmem:[#allocation13_spill] sm:$0xff]  ;;  %v8472_v16 = vpop.f32.mrb[79].mxu0 }
 0x658   : > { %v19821_v11 = vadd.f32 %v8779_v9, %v8384_v4  ;;  %v8385_v61 = vadd.f32 %v8353_v3, %v19451_v30  ;;  %v8351_v37 = vmul.f32 %v21494_v34, %v8045_v22  ;;  %14312 = vmatmul.mubr.msk.bf16.gmra.mrb[176].mxu1 %vm415_vm0, %v17442_v54  ;;  %14346 = vmatmul.mubr.msk.bf16.gmra.mrb[184].mxu0 %vm415_vm0, %v17442_v54  ;;  %v21495_v46 = vld [vmem:[#allocation241_spill] sm:$0xff] }
 0x659   : > { %v19829_v15 = vadd.f32 %v8777_v26, %v8382_v23  ;;  %14315 = vmatprep.mubr.msk.bf16.mxu1 %vm415_vm0, %v17469_v25  ;;  %14349 = vmatprep.mubr.msk.bf16.mxu0 %vm415_vm0, %v17469_v25  ;;  %v8778_v4 = vmul.f32 %v21495_v46, %v8472_v16  ;;  %v19839_v47 = vpop.permute.xlu1 %9981  ;;  %v12626_v25 = vld [vmem:[%s20791_s7 + $0xe70] sm:$0xff]  ;;  %v21499_v26 = vld [vmem:[#allocation48_spill] sm:$0xff]  ;;  %v21502_v16 = vld [vmem:[#allocation19_spill] sm:$0xff] }
 0x65a   : > { %v19835_v50 = vadd.f32 %v8780_v63, %v8385_v61  ;;  %v8383_v30 = vadd.f32 %v8351_v37, %v19465_v7  ;;  %10835 = vperm.xlu1 %14371, %v12629_v0   ;;  %21496 = vst [vmem:[#allocation176_spill] sm:$0xff] %v19839_v47  ;;  %10810 = vperm.xlu0 %14370, %v12624_v10   ;;  %v19841_v9 = vpop.permute.xlu0 %9956  ;;  %v21498_v7 = vld [vmem:[#allocation51_spill] sm:$0xff]  ;;  %v21500_v61 = vld [vmem:[#allocation70_spill] sm:$0xff] }
 0x65b   : > { %21497 = vst [vmem:[#allocation143_spill] sm:$0xff] %v19841_v9  ;;  %v14101_v54 = vpop.f32.mrb[72].mxu1  ;;  %v14135_v23 = vpop.f32.mrb[80].mxu0 }
 0x65c   : > { %v19849_v63 = vadd.f32 %v8778_v4, %v8383_v30  ;;  %v8356_v3 = vmul.f32 %v14101_v54, %v21498_v7  ;;  %v8058_v48 = vpop.f32.mrb[73].mxu1  ;;  %v8485_v22 = vpop.f32.mrb[81].mxu0  ;;  %v8783_v34 = vmul.f32 %v14135_v23, %v21500_v61  ;;  %v21503_v4 = vld [vmem:[#allocation67_spill] sm:$0xff]  ;;  %v21504_v7 = vld [vmem:[#allocation66_spill] sm:$0xff] }
 0x65d   : > { %v8354_v51 = vmul.f32 %v21499_v26, %v8058_v48  ;;  %v14102_v0 = vpop.f32.mrb[74].mxu1  ;;  %v19855_v37 = vpop.permute.xlu1 %9991  ;;  %v8781_v54 = vmul.f32 %v21503_v4, %v8485_v22 }
 0x65e   : > { %v8388_v10 = vadd.f32 %v8356_v3, %v19485_v33  ;;  %10845 = vperm.xlu1 %14371, %v12631_v8   ;;  %21501 = vst [vmem:[#allocation175_spill] sm:$0xff] %v19855_v37  ;;  %v8357_v46 = vmul.f32 %v14102_v0, %v21502_v16  ;;  %v14136_v47 = vpop.f32.mrb[82].mxu0  ;;  %10820 = vperm.xlu0 %14370, %v12626_v25   ;;  %v19861_v48 = vpop.permute.xlu0 %9966  ;;  %v12633_v33 = vld [vmem:[%s20791_s7 + $0xea8] sm:$0xff]  ;;  %v12628_v8 = vld [vmem:[%s20791_s7 + $0xe80] sm:$0xff]  ;;  %v21507_v0 = vld [vmem:[#allocation30_spill] sm:$0xff] }
 0x65f   : > { %v8386_v30 = vadd.f32 %v8354_v51, %v19493_v49  ;;  %v8784_v32 = vmul.f32 %v14136_v47, %v21504_v7  ;;  %21505 = vst [vmem:[#allocation148_spill] sm:$0xff] %v19861_v48  ;;  %v8061_v26 = vpop.f32.mrb[75].mxu1  ;;  %v21506_v49 = vld [vmem:[#allocation14_spill] sm:$0xff]  ;;  %v8488_v51 = vpop.f32.mrb[83].mxu0  ;;  %v12635_v16 = vld [vmem:[%s20791_s7 + $0xeb8] sm:$0xff] }
 0x660   : > { %v19869_v3 = vadd.f32 %v8783_v34, %v8388_v10  ;;  %v8389_v25 = vadd.f32 %v8357_v46, %v19499_v56  ;;  %v8355_v23 = vmul.f32 %v21506_v49, %v8061_v26  ;;  %14316 = vmatmul.mubr.msk.bf16.gmra.mrb[180].mxu1 %vm415_vm0, %v17504_v42  ;;  %14350 = vmatmul.mubr.msk.bf16.gmra.mrb[188].mxu0 %vm415_vm0, %v17504_v42 }
 0x661   : > { %v19877_v47 = vadd.f32 %v8781_v54, %v8386_v30  ;;  %14319 = vmatprep.mubr.msk.bf16.mxu1 %vm415_vm0, %v17535_v27  ;;  %14353 = vmatprep.mubr.msk.bf16.mxu0 %vm415_vm0, %v17535_v27  ;;  %v8782_v10 = vmul.f32 %v21507_v0, %v8488_v51  ;;  %v19887_v61 = vpop.permute.xlu1 %10001  ;;  %v12630_v27 = vld [vmem:[%s20791_s7 + $0xe90] sm:$0xff]  ;;  %v21511_v54 = vld [vmem:[#allocation49_spill] sm:$0xff]  ;;  %v21514_v51 = vld [vmem:[#allocation20_spill] sm:$0xff] }
 0x662   : > { %v19883_v22 = vadd.f32 %v8784_v32, %v8389_v25  ;;  %v8387_v56 = vadd.f32 %v8355_v23, %v19513_v60  ;;  %10855 = vperm.xlu1 %14371, %v12633_v33   ;;  %21508 = vst [vmem:[#allocation146_spill] sm:$0xff] %v19887_v61  ;;  %10830 = vperm.xlu0 %14370, %v12628_v8   ;;  %v19889_v34 = vpop.permute.xlu0 %9976  ;;  %v21510_v60 = vld [vmem:[#allocation54_spill] sm:$0xff]  ;;  %v21512_v25 = vld [vmem:[#allocation100_spill] sm:$0xff] }
 0x663   : > { %21509 = vst [vmem:[#allocation185_spill] sm:$0xff] %v19889_v34  ;;  %v14105_v42 = vpop.f32.mrb[76].mxu1  ;;  %v14139_v30 = vpop.f32.mrb[84].mxu0 }
 0x664   : > { %v19897_v32 = vadd.f32 %v8782_v10, %v8387_v56  ;;  %v8360_v46 = vmul.f32 %v14105_v42, %v21510_v60  ;;  %v8074_v4 = vpop.f32.mrb[77].mxu1  ;;  %v8501_v26 = vpop.f32.mrb[85].mxu0  ;;  %v8787_v49 = vmul.f32 %v14139_v30, %v21512_v25  ;;  %v21515_v10 = vld [vmem:[#allocation71_spill] sm:$0xff]  ;;  %v21516_v60 = vld [vmem:[#allocation65_spill] sm:$0xff] }
 0x665   : > { %v8358_v7 = vmul.f32 %v21511_v54, %v8074_v4  ;;  %v14106_v33 = vpop.f32.mrb[78].mxu1  ;;  %v19903_v23 = vpop.permute.xlu1 %10011  ;;  %v8785_v42 = vmul.f32 %v21515_v10, %v8501_v26 }
 0x666   : > { %v8392_v8 = vadd.f32 %v8360_v46, %v19533_v43  ;;  %10865 = vperm.xlu1 %14371, %v12635_v16   ;;  %21513 = vst [vmem:[#allocation149_spill] sm:$0xff] %v19903_v23  ;;  %v8361_v0 = vmul.f32 %v14106_v33, %v21514_v51  ;;  %v14140_v61 = vpop.f32.mrb[86].mxu0  ;;  %10840 = vperm.xlu0 %14370, %v12630_v27   ;;  %v19909_v4 = vpop.permute.xlu0 %9986  ;;  %v12637_v43 = vld [vmem:[%s20791_s7 + $0xec8] sm:$0xff]  ;;  %v12632_v16 = vld [vmem:[%s20791_s7 + $0xea0] sm:$0xff]  ;;  %v12639_v51 = vld [vmem:[%s20791_s7 + $0xed8] sm:$0xff] }
 0x667   : > { %v8390_v56 = vadd.f32 %v8358_v7, %v19541_v57  ;;  %v8788_v37 = vmul.f32 %v14140_v61, %v21516_v60  ;;  %21517 = vst [vmem:[#allocation183_spill] sm:$0xff] %v19909_v4  ;;  %v8077_v54 = vpop.f32.mrb[79].mxu1  ;;  %v21518_v57 = vld [vmem:[#allocation17_spill] sm:$0xff]  ;;  %v8504_v7 = vpop.f32.mrb[87].mxu0  ;;  %v21519_v33 = vld [vmem:[#allocation64_spill] sm:$0xff] }
 0x668   : > { %v19917_v46 = vadd.f32 %v8787_v49, %v8392_v8  ;;  %v8393_v27 = vadd.f32 %v8361_v0, %v19547_v44  ;;  %v8359_v30 = vmul.f32 %v21518_v57, %v8077_v54  ;;  %14320 = vmatmul.mubr.msk.bf16.gmra.mrb[184].mxu1 %vm415_vm0, %v17563_v29  ;;  %14354 = vmatmul.mubr.msk.bf16.gmra.mrb[192].mxu0 %vm415_vm0, %v17563_v29 }
 0x669   : > { %v19925_v61 = vadd.f32 %v8785_v42, %v8390_v56  ;;  %14323 = vmatprep.mubr.msk.bf16.mxu1 %vm415_vm0, %v17593_v19  ;;  %14357 = vmatprep.mubr.msk.bf16.mxu0 %vm415_vm0, %v17593_v19  ;;  %v8786_v8 = vmul.f32 %v21519_v33, %v8504_v7  ;;  %v19935_v25 = vpop.permute.xlu1 %10021  ;;  %v12634_v19 = vld [vmem:[%s20791_s7 + $0xeb0] sm:$0xff]  ;;  %v21523_v42 = vld [vmem:[#allocation52_spill] sm:$0xff]  ;;  %v21526_v7 = vld [vmem:[#allocation23_spill] sm:$0xff] }
 0x66a   : > { %v19931_v26 = vadd.f32 %v8788_v37, %v8393_v27  ;;  %v8391_v44 = vadd.f32 %v8359_v30, %v19561_v31  ;;  %10875 = vperm.xlu1 %14371, %v12637_v43   ;;  %21520 = vst [vmem:[#allocation180_spill] sm:$0xff] %v19935_v25  ;;  %10850 = vperm.xlu0 %14370, %v12632_v16   ;;  %v19937_v49 = vpop.permute.xlu0 %9996  ;;  %v21522_v31 = vld [vmem:[#allocation55_spill] sm:$0xff]  ;;  %v21524_v27 = vld [vmem:[#allocation72_spill] sm:$0xff] }
 0x66b   : > { %21521 = vst [vmem:[#allocation147_spill] sm:$0xff] %v19937_v49  ;;  %v14109_v29 = vpop.f32.mrb[80].mxu1  ;;  %v14143_v56 = vpop.f32.mrb[88].mxu0 }
 0x66c   : > { %v19945_v37 = vadd.f32 %v8786_v8, %v8391_v44  ;;  %v8364_v0 = vmul.f32 %v14109_v29, %v21522_v31  ;;  %v8090_v10 = vpop.f32.mrb[81].mxu1  ;;  %v8517_v54 = vpop.f32.mrb[89].mxu0  ;;  %v8791_v57 = vmul.f32 %v14143_v56, %v21524_v27  ;;  %v21527_v8 = vld [vmem:[#allocation98_spill] sm:$0xff]  ;;  %v21528_v31 = vld [vmem:[#allocation69_spill] sm:$0xff]  ;;  %v21531_v27 = vld [vmem:[#allocation68_spill] sm:$0xff] }
 0x66d   : > { %v8362_v60 = vmul.f32 %v21523_v42, %v8090_v10  ;;  %v14110_v43 = vpop.f32.mrb[82].mxu1  ;;  %v19951_v30 = vpop.permute.xlu1 %10031  ;;  %v8789_v29 = vmul.f32 %v21527_v8, %v8517_v54 }
 0x66e   : > { %v8396_v16 = vadd.f32 %v8364_v0, %v19581_v2  ;;  %10885 = vperm.xlu1 %14371, %v12639_v51   ;;  %21525 = vst [vmem:[#allocation178_spill] sm:$0xff] %v19951_v30  ;;  %v8365_v33 = vmul.f32 %v14110_v43, %v21526_v7  ;;  %v14144_v25 = vpop.f32.mrb[90].mxu0  ;;  %10860 = vperm.xlu0 %14370, %v12634_v19   ;;  %v19957_v10 = vpop.permute.xlu0 %10006  ;;  %v12664_v2 = vld [vmem:[%s20791_s7 + $0xf08] sm:$0xff]  ;;  %v12636_v51 = vld [vmem:[%s20791_s7 + $0xec0] sm:$0xff] }
 0x66f   : > { %v8394_v44 = vadd.f32 %v8362_v60, %v19589_v1  ;;  %v8792_v23 = vmul.f32 %v14144_v25, %v21528_v31  ;;  %21529 = vst [vmem:[#allocation103_spill] sm:$0xff] %v19957_v10  ;;  %v8093_v42 = vpop.f32.mrb[83].mxu1  ;;  %v21530_v1 = vld [vmem:[#allocation18_spill] sm:$0xff]  ;;  %v8520_v60 = vpop.f32.mrb[91].mxu0  ;;  %v21535_v31 = vld [vmem:[#allocation25_spill] sm:$0xff] }
 0x670   : > { %v19965_v0 = vadd.f32 %v8791_v57, %v8396_v16  ;;  %v8397_v19 = vadd.f32 %v8365_v33, %v19595_v59  ;;  %v8363_v56 = vmul.f32 %v21530_v1, %v8093_v42  ;;  %14324 = vmatmul.mubr.msk.bf16.gmra.mrb[188].mxu1 %vm415_vm0, %v17621_v35  ;;  %14358 = vmatmul.mubr.msk.bf16.gmra.mrb[196].mxu0 %vm415_vm0, %v17621_v35  ;;  %v12666_v33 = vld [vmem:[%s20791_s7 + $0xf18] sm:$0xff]  ;;  %v12638_v35 = vld [vmem:[%s20791_s7 + $0xed0] sm:$0xff]  ;;  %v21536_v1 = vld [vmem:[#allocation104_spill] sm:$0xff]  ;;  %vm11399_vm0 = vcmask 72704  }
 0x671   : > { %v19973_v25 = vadd.f32 %v8789_v29, %v8394_v44  ;;  %v8790_v16 = vmul.f32 %v21531_v27, %v8520_v60  ;;  %v19979_v57 = vpop.permute.xlu1 %10041  ;;  %v21538_v27 = vld [vmem:[#allocation24_spill] sm:$0xff] }
 0x672   : > { %v19975_v54 = vadd.f32 %v8792_v23, %v8397_v19  ;;  %v8395_v43 = vadd.f32 %v8363_v56, %v19609_v20  ;;  %11182 = vperm.xlu1 %14371, %v12664_v2   ;;  %21532 = vst [vmem:[#allocation79_spill] sm:$0xff] %v19979_v57  ;;  %10870 = vperm.xlu0 %14370, %v12636_v51   ;;  %v19981_v59 = vpop.permute.xlu0 %10016  ;;  %v21534_v20 = vld [vmem:[#allocation238_spill] sm:$0xff] }
 0x673   : > { %21533 = vst [vmem:[#allocation152_spill] sm:$0xff] %v19981_v59  ;;  %v14113_v7 = vpop.f32.mrb[84].mxu1  ;;  %v14147_v8 = vpop.f32.mrb[92].mxu0 }
 0x674   : > { %v19989_v23 = vadd.f32 %v8790_v16, %v8395_v43  ;;  %v8368_v44 = vmul.f32 %v14113_v7, %v21534_v20  ;;  %v8106_v29 = vpop.f32.mrb[85].mxu1  ;;  %v8533_v2 = vpop.f32.mrb[93].mxu0  ;;  %v8795_v56 = vmul.f32 %v14147_v8, %v21536_v1  ;;  %v21539_v16 = vld [vmem:[#allocation75_spill] sm:$0xff] }
 0x675   : > { %v8366_v42 = vmul.f32 %v21535_v31, %v8106_v29  ;;  %v14114_v51 = vpop.f32.mrb[86].mxu1  ;;  %v19995_v60 = vpop.permute.xlu1 %10051  ;;  %v8793_v7 = vmul.f32 %v21539_v16, %v8533_v2  ;;  %v21543_v16 = vld [vmem:[#allocation74_spill] sm:$0xff] }
 0x676   : > { %v8400_v19 = vadd.f32 %v8368_v44, %v19629_v17  ;;  %11192 = vperm.xlu1 %14371, %v12666_v33   ;;  %21537 = vst [vmem:[#allocation150_spill] sm:$0xff] %v19995_v60  ;;  %v8369_v57 = vmul.f32 %v14114_v51, %v21538_v27  ;;  %v14148_v30 = vpop.f32.mrb[94].mxu0  ;;  %10880 = vperm.xlu0 %14370, %v12638_v35   ;;  %v20000_v20 = vpop.permute.xlu0 %10026  ;;  %v12668_v17 = vld [vmem:[%s20791_s7 + $0xf28] sm:$0xff]  ;;  %v12663_v33 = vld [vmem:[%s20791_s7 + $0xf00] sm:$0xff] }
 0x677   : > { %v8398_v43 = vadd.f32 %v8366_v42, %v19637_v18  ;;  %21540 = vst [vmem:[#allocation189_spill] sm:$0xff] %v20000_v20  ;;  %v8109_v29 = vpop.f32.mrb[87].mxu1  ;;  %v21541_v35 = vld [vmem:[#allocation101_spill] sm:$0xff]  ;;  %v8536_v2 = vpop.f32.mrb[95].mxu0 }
 0x678   : > { %v20008_v44 = vadd.f32 %v8795_v56, %v8400_v19  ;;  %v8401_v8 = vadd.f32 %v8369_v57, %v19643_v38  ;;  %v8796_v31 = vmul.f32 %v14148_v30, %v21541_v35  ;;  %v21542_v18 = vld [vmem:[#allocation21_spill] sm:$0xff]  ;;  %v8794_v60 = vmul.f32 %v21543_v16, %v8536_v2  ;;  %v12670_v30 = vld [vmem:[%s20791_s7 + $0xf38] sm:$0xff]  ;;  %v12665_v57 = vld [vmem:[%s20791_s7 + $0xf10] sm:$0xff] }
 0x679   : > { %v8367_v42 = vmul.f32 %v21542_v18, %v8109_v29  ;;  %v20013_v51 = vadd.f32 %v8793_v7, %v8398_v43  ;;  %v20019_v59 = vpop.permute.xlu1 %10328  ;;  %v21547_v18 = vld [vmem:[#allocation76_spill] sm:$0xff] }
 0x67a   : > { %v20015_v1 = vadd.f32 %v8796_v31, %v8401_v8  ;;  %11202 = vperm.xlu1 %14371, %v12668_v17   ;;  %11177 = vperm.xlu0 %14370, %v12663_v33   ;;  %v20021_v19 = vpop.permute.xlu0 %10036  ;;  %v21546_v17 = vld [vmem:[#allocation240_spill] sm:$0xff] }
 0x67b   : > { %v8399_v27 = vadd.f32 %v8367_v42, %v19657_v58  ;;  %21544 = vst [vmem:[#allocation153_spill] sm:$0xff] %v20021_v19  ;;  %v14117_v38 = vpop.f32.mrb[88].mxu1  ;;  %v21545_v58 = vld [vmem:[#allocation59_spill] sm:$0xff]  ;;  %v14151_v7 = vpop.f32.mrb[96].mxu0  ;;  %v21548_v16 = vld [vmem:[#allocation56_spill] sm:$0xff] }
 0x67c   : > { %v8372_v43 = vmul.f32 %v14117_v38, %v21545_v58  ;;  %v8122_v29 = vpop.f32.mrb[89].mxu1  ;;  %v8549_v33 = vpop.f32.mrb[97].mxu0  ;;  %v8799_v42 = vmul.f32 %v14151_v7, %v21547_v18 }
 0x67d   : > { %v20029_v56 = vadd.f32 %v8794_v60, %v8399_v27  ;;  %v8370_v8 = vmul.f32 %v21546_v17, %v8122_v29  ;;  %v14118_v35 = vpop.f32.mrb[90].mxu1  ;;  %v20035_v2 = vpop.permute.xlu1 %10338  ;;  %v21549_v27 = vld [vmem:[#allocation102_spill] sm:$0xff] }
 0x67e   : > { %v8404_v31 = vadd.f32 %v8372_v43, %v19677_v5  ;;  %11212 = vperm.xlu1 %14371, %v12670_v30   ;;  %v8373_v19 = vmul.f32 %v14118_v35, %v21548_v16  ;;  %v14152_v20 = vpop.f32.mrb[98].mxu0  ;;  %11187 = vperm.xlu0 %14370, %v12665_v57   ;;  %v8797_v38 = vmul.f32 %v21549_v27, %v8549_v33  ;;  %v20040_v58 = vpop.permute.xlu0 %10046  ;;  %v12672_v5 = vld [vmem:[%s20791_s7 + $0xf48] sm:$0xff]  ;;  %v12667_v30 = vld [vmem:[%s20791_s7 + $0xf20] sm:$0xff]  ;;  %v21553_v27 = vld [vmem:[#allocation99_spill] sm:$0xff] }
 0x67f   : > { %v8402_v60 = vadd.f32 %v8370_v8, %v19685_v36  ;;  %21550 = vst [vmem:[#allocation187_spill] sm:$0xff] %v20040_v58  ;;  %v8125_v29 = vpop.f32.mrb[91].mxu1  ;;  %v21551_v57 = vld [vmem:[#allocation73_spill] sm:$0xff]  ;;  %v21552_v36 = vld [vmem:[#allocation27_spill] sm:$0xff]  ;;  %v8552_v33 = vpop.f32.mrb[99].mxu0 }
 0x680   : > { %v20048_v43 = vadd.f32 %v8799_v42, %v8404_v31  ;;  %v8405_v7 = vadd.f32 %v8373_v19, %v19691_v62  ;;  %v8800_v17 = vmul.f32 %v14152_v20, %v21551_v57  ;;  %v8371_v8 = vmul.f32 %v21552_v36, %v8125_v29  ;;  %v12674_v20 = vld [vmem:[%s20791_s7 + $0xf58] sm:$0xff]  ;;  %v12669_v19 = vld [vmem:[%s20791_s7 + $0xf30] sm:$0xff] }
 0x681   : > { %v20053_v35 = vadd.f32 %v8797_v38, %v8402_v60  ;;  %v8798_v58 = vmul.f32 %v21553_v27, %v8552_v33  ;;  %v20059_v49 = vpop.permute.xlu1 %10348  ;;  %v21556_v36 = vld [vmem:[#allocation106_spill] sm:$0xff]  ;;  %v21557_v27 = vld [vmem:[#allocation28_spill] sm:$0xff] }
 0x682   : > { %v20055_v18 = vadd.f32 %v8800_v17, %v8405_v7  ;;  %v8403_v16 = vadd.f32 %v8371_v8, %v19705_v53  ;;  %11222 = vperm.xlu1 %14371, %v12672_v5   ;;  %11197 = vperm.xlu0 %14370, %v12667_v30   ;;  %v20061_v31 = vpop.permute.xlu0 %10323  ;;  %v21554_v53 = vld [vmem:[#allocation60_spill] sm:$0xff]  ;;  %v21555_v5 = vld [vmem:[#allocation62_spill] sm:$0xff] }
 0x683   : > { %v14121_v62 = vpop.f32.mrb[92].mxu1  ;;  %v14155_v38 = vpop.f32.mrb[100].mxu0 }
 0x684   : > { %v20069_v42 = vadd.f32 %v8798_v58, %v8403_v16  ;;  %v8376_v60 = vmul.f32 %v14121_v62, %v21554_v53  ;;  %v8138_v29 = vpop.f32.mrb[93].mxu1  ;;  %v8565_v30 = vpop.f32.mrb[101].mxu0  ;;  %v8803_v8 = vmul.f32 %v14155_v38, %v21556_v36  ;;  %v21558_v16 = vld [vmem:[#allocation108_spill] sm:$0xff] }
 0x685   : > { %v8374_v7 = vmul.f32 %v21555_v5, %v8138_v29  ;;  %v14122_v57 = vpop.f32.mrb[94].mxu1  ;;  %v20075_v33 = vpop.permute.xlu1 %10358  ;;  %v8801_v62 = vmul.f32 %v21558_v16, %v8565_v30  ;;  %v21561_v16 = vld [vmem:[#allocation77_spill] sm:$0xff] }
 0x686   : > { %v8408_v17 = vadd.f32 %v8376_v60, %v19725_v45  ;;  %11232 = vperm.xlu1 %14371, %v12674_v20   ;;  %v8377_v10 = vmul.f32 %v14122_v57, %v21557_v27  ;;  %v14156_v34 = vpop.f32.mrb[102].mxu0  ;;  %11207 = vperm.xlu0 %14370, %v12669_v19   ;;  %v20080_v53 = vpop.permute.xlu0 %10333  ;;  %v12676_v45 = vld [vmem:[%s20791_s7 + $0xf68] sm:$0xff]  ;;  %v12671_v20 = vld [vmem:[%s20791_s7 + $0xf40] sm:$0xff] }
 0x687   : > { %v8406_v58 = vadd.f32 %v8374_v7, %v19733_v13  ;;  %v8141_v29 = vpop.f32.mrb[95].mxu1  ;;  %v21559_v19 = vld [vmem:[#allocation105_spill] sm:$0xff]  ;;  %v21560_v13 = vld [vmem:[#allocation239_spill] sm:$0xff]  ;;  %v8568_v30 = vpop.f32.mrb[103].mxu0 }
 0x688   : > { %v20088_v60 = vadd.f32 %v8803_v8, %v8408_v17  ;;  %v8409_v38 = vadd.f32 %v8377_v10, %v19739_v12  ;;  %v8804_v5 = vmul.f32 %v14156_v34, %v21559_v19  ;;  %v8375_v7 = vmul.f32 %v21560_v13, %v8141_v29  ;;  %v12678_v34 = vld [vmem:[%s20791_s7 + $0xf78] sm:$0xff]  ;;  %v12673_v10 = vld [vmem:[%s20791_s7 + $0xf50] sm:$0xff] }
 0x689   : > { %v20093_v57 = vadd.f32 %v8801_v62, %v8406_v58  ;;  %v8802_v4 = vmul.f32 %v21561_v16, %v8568_v30  ;;  %v20099_v9 = vpop.permute.xlu1 %10368  ;;  %v21565_v13 = vld [vmem:[#allocation123_spill] sm:$0xff]  ;;  %v21567_v16 = vld [vmem:[#allocation82_spill] sm:$0xff] }
 0x68a   : > { %v20095_v36 = vadd.f32 %v8804_v5, %v8409_v38  ;;  %v8407_v27 = vadd.f32 %v8375_v7, %v19753_v21  ;;  %11242 = vperm.xlu1 %14371, %v12676_v45   ;;  %21562 = vst [vmem:[#allocation184_spill] sm:$0xff] %v20099_v9  ;;  %11217 = vperm.xlu0 %14370, %v12671_v20   ;;  %v20101_v17 = vpop.permute.xlu0 %10343  ;;  %v21563_v21 = vld [vmem:[#allocation112_spill] sm:$0xff]  ;;  %v21564_v45 = vld [vmem:[#allocation107_spill] sm:$0xff] }
 0x68b   : > { %v14161_v12 = vpop.f32.mrb[96].mxu1  ;;  %v14195_v62 = vpop.f32.mrb[104].mxu0 }
 0x68c   : > { %v20109_v8 = vadd.f32 %v8802_v4, %v8407_v27  ;;  %v9202_v58 = vmul.f32 %v14161_v12, %v21563_v21  ;;  %v8880_v29 = vpop.f32.mrb[97].mxu1  ;;  %v9307_v20 = vpop.f32.mrb[105].mxu0  ;;  %v9629_v7 = vmul.f32 %v14195_v62, %v21565_v13  ;;  %v21568_v27 = vld [vmem:[#allocation125_spill] sm:$0xff] }
 0x68d   : > { %v9200_v38 = vmul.f32 %v21564_v45, %v8880_v29  ;;  %v14162_v19 = vpop.f32.mrb[98].mxu1  ;;  %v20115_v30 = vpop.permute.xlu1 %10378  ;;  %v9627_v12 = vmul.f32 %v21568_v27, %v9307_v20  ;;  %v21571_v27 = vld [vmem:[#allocation119_spill] sm:$0xff] }
 0x68e   : > { %v9234_v5 = vadd.f32 %v9202_v58, %v19773_v24  ;;  %11252 = vperm.xlu1 %14371, %v12678_v34   ;;  %21566 = vst [vmem:[#allocation109_spill] sm:$0xff] %v20115_v30  ;;  %v9203_v48 = vmul.f32 %v14162_v19, %v21567_v16  ;;  %v14196_v9 = vpop.f32.mrb[106].mxu0  ;;  %11227 = vperm.xlu0 %14370, %v12673_v10   ;;  %v20120_v21 = vpop.permute.xlu0 %10353  ;;  %v12680_v24 = vld [vmem:[%s20791_s7 + $0xf88] sm:$0xff]  ;;  %v12675_v34 = vld [vmem:[%s20791_s7 + $0xf60] sm:$0xff]  ;;  %v21569_v10 = vld [vmem:[#allocation94_spill] sm:$0xff] }
 0x68f   : > { %v9232_v4 = vadd.f32 %v9200_v38, %v19781_v41  ;;  %v8883_v29 = vpop.f32.mrb[99].mxu1  ;;  %v9630_v45 = vmul.f32 %v14196_v9, %v21569_v10  ;;  %v21570_v41 = vld [vmem:[#allocation78_spill] sm:$0xff]  ;;  %v9310_v20 = vpop.f32.mrb[107].mxu0  ;;  %v12682_v9 = vld [vmem:[%s20791_s7 + $0xf98] sm:$0xff] }
 0x690   : > { %v20128_v58 = vadd.f32 %v9629_v7, %v9234_v5  ;;  %v9235_v62 = vadd.f32 %v9203_v48, %v19787_v55  ;;  %v9201_v38 = vmul.f32 %v21570_v41, %v8883_v29  ;;  %v9628_v30 = vmul.f32 %v21571_v27, %v9310_v20  ;;  %v12677_v48 = vld [vmem:[%s20791_s7 + $0xf70] sm:$0xff]  ;;  %v21578_v27 = vld [vmem:[#allocation81_spill] sm:$0xff] }
 0x691   : > { %v20133_v19 = vadd.f32 %v9627_v12, %v9232_v4  ;;  %v20139_v39 = vpop.permute.xlu1 %10388  ;;  %v21576_v41 = vld [vmem:[#allocation158_spill] sm:$0xff] }
 0x692   : > { %v20135_v13 = vadd.f32 %v9630_v45, %v9235_v62  ;;  %v9233_v16 = vadd.f32 %v9201_v38, %v19801_v14  ;;  %11262 = vperm.xlu1 %14371, %v12680_v24   ;;  %21572 = vst [vmem:[#allocation151_spill] sm:$0xff] %v20139_v39  ;;  %11237 = vperm.xlu0 %14370, %v12675_v34   ;;  %v20141_v5 = vpop.permute.xlu0 %10363  ;;  %v21574_v14 = vld [vmem:[#allocation111_spill] sm:$0xff]  ;;  %v21575_v24 = vld [vmem:[#allocation110_spill] sm:$0xff] }
 0x693   : > { %21573 = vst [vmem:[#allocation83_spill] sm:$0xff] %v20141_v5  ;;  %v14165_v55 = vpop.f32.mrb[100].mxu1  ;;  %v14199_v12 = vpop.f32.mrb[108].mxu0 }
 0x694   : > { %v20149_v7 = vadd.f32 %v9628_v30, %v9233_v16  ;;  %v9206_v4 = vmul.f32 %v14165_v55, %v21574_v14  ;;  %v8896_v29 = vpop.f32.mrb[101].mxu1  ;;  %v9323_v34 = vpop.f32.mrb[109].mxu0  ;;  %v9633_v38 = vmul.f32 %v14199_v12, %v21576_v41  ;;  %v21579_v16 = vld [vmem:[#allocation126_spill] sm:$0xff] }
 0x695   : > { %v9204_v62 = vmul.f32 %v21575_v24, %v8896_v29  ;;  %v14166_v10 = vpop.f32.mrb[102].mxu1  ;;  %v20155_v20 = vpop.permute.xlu1 %10398  ;;  %v9631_v55 = vmul.f32 %v21579_v16, %v9323_v34  ;;  %v21583_v16 = vld [vmem:[#allocation122_spill] sm:$0xff] }
 0x696   : > { %v9238_v45 = vadd.f32 %v9206_v4, %v19821_v11  ;;  %11272 = vperm.xlu1 %14371, %v12682_v9   ;;  %21577 = vst [vmem:[#allocation182_spill] sm:$0xff] %v20155_v20  ;;  %v9207_v39 = vmul.f32 %v14166_v10, %v21578_v27  ;;  %v14200_v5 = vpop.f32.mrb[110].mxu0  ;;  %11247 = vperm.xlu0 %14370, %v12677_v48   ;;  %v20160_v14 = vpop.permute.xlu0 %10373  ;;  %v12684_v11 = vld [vmem:[%s20791_s7 + $0xfa8] sm:$0xff]  ;;  %v12679_v9 = vld [vmem:[%s20791_s7 + $0xf80] sm:$0xff] }
 0x697   : > { %v9236_v30 = vadd.f32 %v9204_v62, %v19829_v15  ;;  %21580 = vst [vmem:[#allocation156_spill] sm:$0xff] %v20160_v14  ;;  %v8899_v29 = vpop.f32.mrb[103].mxu1  ;;  %v21581_v48 = vld [vmem:[#allocation61_spill] sm:$0xff]  ;;  %v21582_v15 = vld [vmem:[#allocation80_spill] sm:$0xff]  ;;  %v9326_v34 = vpop.f32.mrb[111].mxu0 }
 0x698   : > { %v20168_v4 = vadd.f32 %v9633_v38, %v9238_v45  ;;  %v9239_v12 = vadd.f32 %v9207_v39, %v19835_v50  ;;  %v9634_v24 = vmul.f32 %v14200_v5, %v21581_v48  ;;  %v9205_v62 = vmul.f32 %v21582_v15, %v8899_v29  ;;  %v12686_v50 = vld [vmem:[%s20791_s7 + $0xfb8] sm:$0xff]  ;;  %v12681_v5 = vld [vmem:[%s20791_s7 + $0xf90] sm:$0xff]  ;;  %v21588_v15 = vld [vmem:[#allocation132_spill] sm:$0xff] }
 0x699   : > { %v20173_v10 = vadd.f32 %v9631_v55, %v9236_v30  ;;  %v9632_v20 = vmul.f32 %v21583_v16, %v9326_v34  ;;  %v20179_v14 = vpop.permute.xlu1 %10408  ;;  %v21590_v16 = vld [vmem:[#allocation84_spill] sm:$0xff] }
 0x69a   : > { %v20175_v41 = vadd.f32 %v9634_v24, %v9239_v12  ;;  %v9237_v27 = vadd.f32 %v9205_v62, %v19849_v63  ;;  %11282 = vperm.xlu1 %14371, %v12684_v11   ;;  %21584 = vst [vmem:[#allocation154_spill] sm:$0xff] %v20179_v14  ;;  %11257 = vperm.xlu0 %14370, %v12679_v9   ;;  %v20181_v45 = vpop.permute.xlu0 %10383  ;;  %v21586_v63 = vld [vmem:[#allocation90_spill] sm:$0xff]  ;;  %v21587_v11 = vld [vmem:[#allocation85_spill] sm:$0xff] }
 0x69b   : > { %21585 = vst [vmem:[#allocation193_spill] sm:$0xff] %v20181_v45  ;;  %v14169_v39 = vpop.f32.mrb[104].mxu1  ;;  %v14203_v55 = vpop.f32.mrb[112].mxu0 }
 0x69c   : > { %v20189_v38 = vadd.f32 %v9632_v20, %v9237_v27  ;;  %v9210_v30 = vmul.f32 %v14169_v39, %v21586_v63  ;;  %v8912_v29 = vpop.f32.mrb[105].mxu1  ;;  %v9339_v9 = vpop.f32.mrb[113].mxu0  ;;  %v9637_v62 = vmul.f32 %v14203_v55, %v21588_v15  ;;  %v21591_v27 = vld [vmem:[#allocation127_spill] sm:$0xff] }
 0x69d   : > { %v9208_v12 = vmul.f32 %v21587_v11, %v8912_v29  ;;  %v14170_v48 = vpop.f32.mrb[106].mxu1  ;;  %v20195_v34 = vpop.permute.xlu1 %10418  ;;  %v9635_v39 = vmul.f32 %v21591_v27, %v9339_v9  ;;  %v21595_v27 = vld [vmem:[#allocation128_spill] sm:$0xff] }
 0x69e   : > { %v9242_v24 = vadd.f32 %v9210_v30, %v19869_v3  ;;  %11292 = vperm.xlu1 %14371, %v12686_v50   ;;  %21589 = vst [vmem:[#allocation157_spill] sm:$0xff] %v20195_v34  ;;  %v9211_v14 = vmul.f32 %v14170_v48, %v21590_v16  ;;  %v14204_v45 = vpop.f32.mrb[114].mxu0  ;;  %11267 = vperm.xlu0 %14370, %v12681_v5   ;;  %v20200_v63 = vpop.permute.xlu0 %10393  ;;  %v12688_v3 = vld [vmem:[%s20791_s7 + $0xfc8] sm:$0xff]  ;;  %v12683_v50 = vld [vmem:[%s20791_s7 + $0xfa0] sm:$0xff] }
 0x69f   : > { %v9240_v20 = vadd.f32 %v9208_v12, %v19877_v47  ;;  %21592 = vst [vmem:[#allocation191_spill] sm:$0xff] %v20200_v63  ;;  %v8915_v29 = vpop.f32.mrb[107].mxu1  ;;  %v21593_v5 = vld [vmem:[#allocation129_spill] sm:$0xff]  ;;  %v21594_v47 = vld [vmem:[#allocation86_spill] sm:$0xff]  ;;  %v9342_v9 = vpop.f32.mrb[115].mxu0 }
 0x6a0   : > { %v20208_v30 = vadd.f32 %v9637_v62, %v9242_v24  ;;  %v9243_v55 = vadd.f32 %v9211_v14, %v19883_v22  ;;  %v9638_v11 = vmul.f32 %v14204_v45, %v21593_v5  ;;  %v9209_v12 = vmul.f32 %v21594_v47, %v8915_v29  ;;  %v12640_v14 = vld [vmem:[%s20791_s7 + $0xee0] sm:$0xff]  ;;  %v12685_v45 = vld [vmem:[%s20791_s7 + $0xfb0] sm:$0xff] }
 0x6a1   : > { %v20213_v48 = vadd.f32 %v9635_v39, %v9240_v20  ;;  %v9636_v34 = vmul.f32 %v21595_v27, %v9342_v9  ;;  %v20219_v63 = vpop.permute.xlu1 %10428  ;;  %v21600_v47 = vld [vmem:[#allocation162_spill] sm:$0xff]  ;;  %v21602_v27 = vld [vmem:[#allocation116_spill] sm:$0xff] }
 0x6a2   : > { %v20215_v15 = vadd.f32 %v9638_v11, %v9243_v55  ;;  %v9241_v16 = vadd.f32 %v9209_v12, %v19897_v32  ;;  %11302 = vperm.xlu1 %14371, %v12688_v3   ;;  %21596 = vst [vmem:[#allocation188_spill] sm:$0xff] %v20219_v63  ;;  %11277 = vperm.xlu0 %14370, %v12683_v50   ;;  %v20221_v24 = vpop.permute.xlu0 %10403  ;;  %v21598_v32 = vld [vmem:[#allocation53_spill] sm:$0xff]  ;;  %v21599_v3 = vld [vmem:[#allocation114_spill] sm:$0xff] }
 0x6a3   : > { %21597 = vst [vmem:[#allocation155_spill] sm:$0xff] %v20221_v24  ;;  %v14173_v22 = vpop.f32.mrb[108].mxu1  ;;  %v14207_v39 = vpop.f32.mrb[116].mxu0 }
 0x6a4   : > { %v20229_v62 = vadd.f32 %v9636_v34, %v9241_v16  ;;  %v9214_v20 = vmul.f32 %v14173_v22, %v21598_v32  ;;  %v8928_v29 = vpop.f32.mrb[109].mxu1  ;;  %v9355_v50 = vpop.f32.mrb[117].mxu0  ;;  %v9641_v12 = vmul.f32 %v14207_v39, %v21600_v47  ;;  %v21603_v16 = vld [vmem:[#allocation164_spill] sm:$0xff] }
 0x6a5   : > { %v9212_v55 = vmul.f32 %v21599_v3, %v8928_v29  ;;  %v14174_v5 = vpop.f32.mrb[110].mxu1  ;;  %v20235_v9 = vpop.permute.xlu1 %10438  ;;  %v9639_v22 = vmul.f32 %v21603_v16, %v9355_v50  ;;  %v21607_v16 = vld [vmem:[#allocation161_spill] sm:$0xff] }
 0x6a6   : > { %v9246_v11 = vadd.f32 %v9214_v20, %v19917_v46  ;;  %10890 = vperm.xlu1 %14371, %v12640_v14   ;;  %21601 = vst [vmem:[#allocation113_spill] sm:$0xff] %v20235_v9  ;;  %v9215_v63 = vmul.f32 %v14174_v5, %v21602_v27  ;;  %v14208_v24 = vpop.f32.mrb[118].mxu0  ;;  %11287 = vperm.xlu0 %14370, %v12685_v45   ;;  %v20240_v32 = vpop.permute.xlu0 %10413  ;;  %v12641_v46 = vld [vmem:[%s20791_s7 + $0xee8] sm:$0xff]  ;;  %v12687_v14 = vld [vmem:[%s20791_s7 + $0xfc0] sm:$0xff]  ;;  %v21605_v45 = vld [vmem:[#allocation159_spill] sm:$0xff] }
 0x6a7   : > { %v9244_v34 = vadd.f32 %v9212_v55, %v19925_v61  ;;  %21604 = vst [vmem:[#allocation186_spill] sm:$0xff] %v20240_v32  ;;  %v8931_v29 = vpop.f32.mrb[111].mxu1  ;;  %v9642_v3 = vmul.f32 %v14208_v24, %v21605_v45  ;;  %v21606_v61 = vld [vmem:[#allocation87_spill] sm:$0xff]  ;;  %v9358_v50 = vpop.f32.mrb[119].mxu0  ;;  %v12689_v24 = vld [vmem:[%s20791_s7 + $0xfd0] sm:$0xff] }
 0x6a8   : > { %v20248_v20 = vadd.f32 %v9641_v12, %v9246_v11  ;;  %v9247_v39 = vadd.f32 %v9215_v63, %v19931_v26  ;;  %v9213_v55 = vmul.f32 %v21606_v61, %v8931_v29  ;;  %v9640_v9 = vmul.f32 %v21607_v16, %v9358_v50  ;;  %v12642_v63 = vld [vmem:[%s20791_s7 + $0xef0] sm:$0xff]  ;;  %v21612_v61 = vld [vmem:[#allocation136_spill] sm:$0xff]  ;;  %v21614_v16 = vld [vmem:[#allocation117_spill] sm:$0xff] }
 0x6a9   : > { %v20253_v5 = vadd.f32 %v9639_v22, %v9244_v34  ;;  %v20259_v32 = vpop.permute.xlu1 %10448 }
 0x6aa   : > { %v20255_v47 = vadd.f32 %v9642_v3, %v9247_v39  ;;  %v9245_v27 = vadd.f32 %v9213_v55, %v19945_v37  ;;  %10895 = vperm.xlu1 %14371, %v12641_v46   ;;  %21608 = vst [vmem:[#allocation197_spill] sm:$0xff] %v20259_v32  ;;  %11297 = vperm.xlu0 %14370, %v12687_v14   ;;  %v20261_v11 = vpop.permute.xlu0 %10423  ;;  %v21610_v37 = vld [vmem:[#allocation92_spill] sm:$0xff]  ;;  %v21611_v46 = vld [vmem:[#allocation58_spill] sm:$0xff] }
 0x6ab   : > { %21609 = vst [vmem:[#allocation195_spill] sm:$0xff] %v20261_v11  ;;  %v14177_v26 = vpop.f32.mrb[112].mxu1  ;;  %v14211_v22 = vpop.f32.mrb[120].mxu0 }
 0x6ac   : > { %v20269_v12 = vadd.f32 %v9640_v9, %v9245_v27  ;;  %v9218_v34 = vmul.f32 %v14177_v26, %v21610_v37  ;;  %v8944_v29 = vpop.f32.mrb[113].mxu1  ;;  %v9371_v14 = vpop.f32.mrb[121].mxu0  ;;  %v9645_v55 = vmul.f32 %v14211_v22, %v21612_v61  ;;  %v21615_v27 = vld [vmem:[#allocation131_spill] sm:$0xff] }
 0x6ad   : > { %v9216_v39 = vmul.f32 %v21611_v46, %v8944_v29  ;;  %v14178_v45 = vpop.f32.mrb[114].mxu1  ;;  %v20275_v50 = vpop.permute.xlu1 %10458  ;;  %v9643_v26 = vmul.f32 %v21615_v27, %v9371_v14  ;;  %v21619_v27 = vld [vmem:[#allocation130_spill] sm:$0xff] }
 0x6ae   : > { %v9250_v3 = vadd.f32 %v9218_v34, %v19965_v0  ;;  %10900 = vperm.xlu1 %14371, %v12642_v63   ;;  %21613 = vst [vmem:[#allocation229_spill] sm:$0xff] %v20275_v50  ;;  %v9219_v32 = vmul.f32 %v14178_v45, %v21614_v16  ;;  %v14212_v11 = vpop.f32.mrb[122].mxu0  ;;  %11307 = vperm.xlu0 %14370, %v12689_v24   ;;  %v20280_v37 = vpop.permute.xlu0 %10433  ;;  %v12643_v0 = vld [vmem:[%s20791_s7 + $0xef8] sm:$0xff]  ;;  %v21617_v24 = vld [vmem:[#allocation133_spill] sm:$0xff] }
 0x6af   : > { %v9248_v9 = vadd.f32 %v9216_v39, %v19973_v25  ;;  %21616 = vst [vmem:[#allocation192_spill] sm:$0xff] %v20280_v37  ;;  %v8947_v29 = vpop.f32.mrb[115].mxu1  ;;  %v12690_v63 = vld [vmem:[%s20791_s7 + $0xfd8] sm:$0xff]  ;;  %v9646_v46 = vmul.f32 %v14212_v11, %v21617_v24  ;;  %v21618_v25 = vld [vmem:[#allocation22_spill] sm:$0xff]  ;;  %v9374_v14 = vpop.f32.mrb[123].mxu0  ;;  %v12691_v11 = vld [vmem:[%s20791_s7 + $0xfe0] sm:$0xff] }
 0x6b0   : > { %v20288_v34 = vadd.f32 %v9645_v55, %v9250_v3  ;;  %v9251_v22 = vadd.f32 %v9219_v32, %v19975_v54  ;;  %v9217_v39 = vmul.f32 %v21618_v25, %v8947_v29  ;;  %v9644_v50 = vmul.f32 %v21619_v27, %v9374_v14  ;;  %v12694_v32 = vld [vmem:[%s20791_s7 + $0xff8] sm:$0xff] }
 0x6b1   : > { %v20293_v45 = vadd.f32 %v9643_v26, %v9248_v9  ;;  %v20299_v37 = vpop.permute.xlu1 %10468  ;;  %v21625_v14 = vld [vmem:[#allocation115_spill] sm:$0xff] }
 0x6b2   : > { %v20295_v61 = vadd.f32 %v9646_v46, %v9251_v22  ;;  %v9249_v16 = vadd.f32 %v9217_v39, %v19989_v23  ;;  %10905 = vperm.xlu1 %14371, %v12643_v0   ;;  %21620 = vst [vmem:[#allocation227_spill] sm:$0xff] %v20299_v37  ;;  %11312 = vperm.xlu0 %14370, %v12690_v63   ;;  %v20301_v3 = vpop.permute.xlu0 %10443  ;;  %v21622_v23 = vld [vmem:[#allocation118_spill] sm:$0xff]  ;;  %v21623_v0 = vld [vmem:[#allocation120_spill] sm:$0xff] }
 0x6b3   : > { %21621 = vst [vmem:[#allocation224_spill] sm:$0xff] %v20301_v3  ;;  %v14181_v54 = vpop.f32.mrb[116].mxu1  ;;  %v14215_v26 = vpop.f32.mrb[124].mxu0 }
 0x6b4   : > { %v20309_v55 = vadd.f32 %v9644_v50, %v9249_v16  ;;  %v9222_v9 = vmul.f32 %v14181_v54, %v21622_v23  ;;  %v8960_v29 = vpop.f32.mrb[117].mxu1  ;;  %v9387_v63 = vpop.f32.mrb[125].mxu0  ;;  %v9649_v25 = vmul.f32 %v14215_v26, %v19573_v52  ;;  %v21626_v16 = vld [vmem:[#allocation168_spill] sm:$0xff] }
 0x6b5   : > { %v9220_v22 = vmul.f32 %v21623_v0, %v8960_v29  ;;  %v14182_v24 = vpop.f32.mrb[118].mxu1  ;;  %v20315_v39 = vpop.permute.xlu1 %10478  ;;  %v9647_v54 = vmul.f32 %v21626_v16, %v9387_v63  ;;  %v21629_v0 = vld [vmem:[#allocation88_spill] sm:$0xff]  ;;  %v21630_v63 = vld [vmem:[#allocation165_spill] sm:$0xff] }
 0x6b6   : > { %v9254_v46 = vadd.f32 %v9222_v9, %v20008_v44  ;;  %11332 = vperm.xlu1 %14371, %v12694_v32   ;;  %21624 = vst [vmem:[#allocation190_spill] sm:$0xff] %v20315_v39  ;;  %v9223_v27 = vmul.f32 %v14182_v24, %v21625_v14  ;;  %v14216_v37 = vpop.f32.mrb[126].mxu0  ;;  %11317 = vperm.xlu0 %14370, %v12691_v11   ;;  %v20320_v23 = vpop.permute.xlu0 %10453  ;;  %v12692_v44 = vld [vmem:[%s20791_s7 + $0xfe8] sm:$0xff]  ;;  %v21628_v32 = vld [vmem:[#allocation163_spill] sm:$0xff] }
 0x6b7   : > { %v9252_v50 = vadd.f32 %v9220_v22, %v20013_v51  ;;  %21627 = vst [vmem:[#allocation222_spill] sm:$0xff] %v20320_v23  ;;  %v8963_v29 = vpop.f32.mrb[119].mxu1  ;;  %v9650_v26 = vmul.f32 %v14216_v37, %v21628_v32  ;;  %v9390_v11 = vpop.f32.mrb[127].mxu0 }
 0x6b8   : > { %v20325_v9 = vadd.f32 %v9649_v25, %v9254_v46  ;;  %v9255_v52 = vadd.f32 %v9223_v27, %v20015_v1  ;;  %v9221_v24 = vmul.f32 %v21629_v0, %v8963_v29  ;;  %v9648_v16 = vmul.f32 %v21630_v63, %v9390_v11  ;;  %v12693_v1 = vld [vmem:[%s20791_s7 + $0xff0] sm:$0xff]  ;;  %v21633_v27 = vld [vmem:[#allocation31_spill] sm:$0xff]  ;;  %v21637_v63 = vld [vmem:[#allocation93_spill] sm:$0xff] }
 0x6b9   : > { %v20330_v14 = vadd.f32 %v9647_v54, %v9252_v50  ;;  %v20336_v39 = vpop.permute.xlu1 %10755 }
 0x6ba   : > { %v20332_v51 = vadd.f32 %v9650_v26, %v9255_v52  ;;  %v9253_v22 = vadd.f32 %v9221_v24, %v20029_v56  ;;  %21631 = vst [vmem:[#allocation201_spill] sm:$0xff] %v20336_v39  ;;  %11322 = vperm.xlu0 %14370, %v12692_v44   ;;  %v20338_v46 = vpop.permute.xlu0 %10463  ;;  %v21634_v52 = vld [vmem:[#allocation26_spill] sm:$0xff]  ;;  %v21635_v44 = vld [vmem:[#allocation167_spill] sm:$0xff] }
 0x6bb   : > { %21632 = vst [vmem:[#allocation199_spill] sm:$0xff] %v20338_v46  ;;  %v14185_v25 = vpop.f32.mrb[120].mxu1  ;;  %v14219_v54 = vpop.f32.mrb[128].mxu0 }
 0x6bc   : > { %v20343_v37 = vadd.f32 %v9648_v16, %v9253_v22  ;;  %v9226_v50 = vmul.f32 %v14185_v25, %v21633_v27  ;;  %v8976_v29 = vpop.f32.mrb[121].mxu1  ;;  %v9403_v32 = vpop.f32.mrb[129].mxu0  ;;  %v9653_v24 = vmul.f32 %v14219_v54, %v21635_v44  ;;  %v21638_v16 = vld [vmem:[#allocation169_spill] sm:$0xff] }
 0x6bd   : > { %v9224_v56 = vmul.f32 %v21634_v52, %v8976_v29  ;;  %v14186_v26 = vpop.f32.mrb[122].mxu1  ;;  %v20349_v11 = vpop.permute.xlu1 %10765  ;;  %v9651_v25 = vmul.f32 %v21638_v16, %v9403_v32  ;;  %v21640_v54 = vld [vmem:[#allocation89_spill] sm:$0xff]  ;;  %v21645_v16 = vld [vmem:[#allocation96_spill] sm:$0xff] }
 0x6be   : > { %v9258_v0 = vadd.f32 %v9226_v50, %v20048_v43  ;;  %21636 = vst [vmem:[#allocation233_spill] sm:$0xff] %v20349_v11  ;;  %v9227_v39 = vmul.f32 %v14186_v26, %v21637_v63  ;;  %v14220_v46 = vpop.f32.mrb[130].mxu0  ;;  %11327 = vperm.xlu0 %14370, %v12693_v1   ;;  %v20354_v27 = vpop.permute.xlu0 %10473  ;;  %v21639_v43 = vld [vmem:[#allocation137_spill] sm:$0xff]  ;;  %v21641_v1 = vld [vmem:[#allocation134_spill] sm:$0xff] }
 0x6bf   : > { %v9256_v22 = vadd.f32 %v9224_v56, %v20053_v35  ;;  %v8979_v3 = vpop.f32.mrb[123].mxu1  ;;  %v9654_v50 = vmul.f32 %v14220_v46, %v21639_v43  ;;  %v9406_v11 = vpop.f32.mrb[131].mxu0 }
 0x6c0   : > { %v20356_v29 = vadd.f32 %v9653_v24, %v9258_v0  ;;  %v9259_v52 = vadd.f32 %v9227_v39, %v20055_v18  ;;  %v9225_v44 = vmul.f32 %v21640_v54, %v8979_v3  ;;  %v9652_v56 = vmul.f32 %v21641_v1, %v9406_v11  ;;  %v21644_v18 = vld [vmem:[#allocation124_spill] sm:$0xff]  ;;  %v21648_v54 = vld [vmem:[#allocation91_spill] sm:$0xff] }
 0x6c1   : > { %v20361_v23 = vadd.f32 %v9651_v25, %v9256_v22  ;;  %v20367_v32 = vpop.permute.xlu1 %10775 }
 0x6c2   : > { %v20363_v26 = vadd.f32 %v9654_v50, %v9259_v52  ;;  %v9257_v35 = vadd.f32 %v9225_v44, %v20069_v42  ;;  %21642 = vst [vmem:[#allocation196_spill] sm:$0xff] %v20367_v32  ;;  %v20369_v63 = vpop.permute.xlu0 %10750  ;;  %v21646_v42 = vld [vmem:[#allocation141_spill] sm:$0xff] }
 0x6c3   : > { %21643 = vst [vmem:[#allocation231_spill] sm:$0xff] %v20369_v63  ;;  %v14189_v0 = vpop.f32.mrb[124].mxu1  ;;  %v14223_v46 = vpop.f32.mrb[132].mxu0 }
 0x6c4   : > { %v20371_v24 = vadd.f32 %v9652_v56, %v9257_v35  ;;  %v9230_v39 = vmul.f32 %v14189_v0, %v21644_v18  ;;  %v8992_v3 = vpop.f32.mrb[125].mxu1  ;;  %v9419_v25 = vpop.f32.mrb[133].mxu0  ;;  %v9657_v50 = vmul.f32 %v14223_v46, %v21646_v42  ;;  %v21649_v56 = vld [vmem:[#allocation138_spill] sm:$0xff] }
 0x6c5   : > { %v9228_v22 = vmul.f32 %v21645_v16, %v8992_v3  ;;  %v14190_v52 = vpop.f32.mrb[126].mxu1  ;;  %v20377_v11 = vpop.permute.xlu1 %10785  ;;  %v9655_v32 = vmul.f32 %v21649_v56, %v9419_v25  ;;  %v21650_v16 = vld [vmem:[#allocation135_spill] sm:$0xff] }
 0x6c6   : > { %v9262_v43 = vadd.f32 %v9230_v39, %v20088_v60  ;;  %21647 = vst [vmem:[#allocation228_spill] sm:$0xff] %v20377_v11  ;;  %v9231_v44 = vmul.f32 %v14190_v52, %v21648_v54  ;;  %v14224_v1 = vpop.f32.mrb[134].mxu0  ;;  %v20382_v0 = vpop.permute.xlu0 %10760  ;;  %v21651_v39 = vld [vmem:[#allocation121_spill] sm:$0xff] }
 0x6c7   : > { %v9260_v35 = vadd.f32 %v9228_v22, %v20093_v57  ;;  %v8995_v18 = vpop.f32.mrb[127].mxu1  ;;  %v9658_v60 = vmul.f32 %v14224_v1, %v21650_v16  ;;  %v9422_v42 = vpop.f32.mrb[135].mxu0  ;;  %v21652_v22 = vld [vmem:[#allocation166_spill] sm:$0xff] }
 0x6c8   : > { %v20384_v63 = vadd.f32 %v9657_v50, %v9262_v43  ;;  %v9263_v3 = vadd.f32 %v9231_v44, %v20095_v36  ;;  %v9229_v46 = vmul.f32 %v21651_v39, %v8995_v18  ;;  %v9656_v25 = vmul.f32 %v21652_v22, %v9422_v42  ;;  %v21653_v18 = vld [vmem:[#allocation174_spill] sm:$0xff]  ;;  %v21654_v39 = vld [vmem:[#allocation177_spill] sm:$0xff] }
 0x6c9   : > { %v20389_v11 = vadd.f32 %v9655_v32, %v9260_v35  ;;  %v20395_v54 = vpop.permute.xlu1 %10795 }
 0x6ca   : > { %v20391_v52 = vadd.f32 %v9658_v60, %v9263_v3  ;;  %v9261_v57 = vadd.f32 %v9229_v46, %v20109_v8  ;;  %v20397_v56 = vpop.permute.xlu0 %10770 }
 0x6cb   : > { %v14229_v43 = vpop.f32.mrb[128].mxu1  ;;  %v14263_v44 = vpop.f32.mrb[136].mxu0 }
 0x6cc   : > { %v20399_v50 = vadd.f32 %v9656_v25, %v9261_v57  ;;  %v10056_v36 = vmul.f32 %v14229_v43, %v19717_v6  ;;  %v9734_v1 = vpop.f32.mrb[129].mxu1  ;;  %v10161_v35 = vpop.f32.mrb[137].mxu0  ;;  %v10483_v8 = vmul.f32 %v14263_v44, %v20080_v53 }
 0x6cd   : > { %v10054_v32 = vmul.f32 %v21653_v18, %v9734_v1  ;;  %v14230_v3 = vpop.f32.mrb[130].mxu1  ;;  %v20405_v60 = vpop.permute.xlu1 %10805  ;;  %v10481_v22 = vmul.f32 %v20061_v31, %v10161_v35 }
 0x6ce   : > { %v10088_v16 = vadd.f32 %v10056_v36, %v20128_v58  ;;  %v10057_v46 = vmul.f32 %v14230_v3, %v21654_v39  ;;  %v14264_v42 = vpop.f32.mrb[138].mxu0  ;;  %v20410_v6 = vpop.permute.xlu0 %10780  ;;  %v21655_v36 = vld [vmem:[#allocation140_spill] sm:$0xff] }
 0x6cf   : > { %v10086_v57 = vadd.f32 %v10054_v32, %v20133_v19  ;;  %v9737_v25 = vpop.f32.mrb[131].mxu1  ;;  %v10484_v58 = vmul.f32 %v14264_v42, %v20035_v2  ;;  %v10164_v44 = vpop.f32.mrb[139].mxu0 }
 0x6d0   : > { %v20412_v43 = vadd.f32 %v10483_v8, %v10088_v16  ;;  %v10089_v1 = vadd.f32 %v10057_v46, %v20135_v13  ;;  %v10055_v53 = vmul.f32 %v21655_v36, %v9737_v25  ;;  %v10482_v31 = vmul.f32 %v20019_v59, %v10164_v44  ;;  %v21656_v46 = vld [vmem:[#allocation144_spill] sm:$0xff] }
 0x6d1   : > { %v20417_v18 = vadd.f32 %v10481_v22, %v10086_v57  ;;  %v20423_v32 = vpop.permute.xlu1 %10815 }
 0x6d2   : > { %v20419_v3 = vadd.f32 %v10484_v58, %v10089_v1  ;;  %v10087_v19 = vadd.f32 %v10055_v53, %v20149_v7  ;;  %v20425_v35 = vpop.permute.xlu0 %10790  ;;  %v21657_v1 = vld [vmem:[#allocation139_spill] sm:$0xff] }
 0x6d3   : > { %v14233_v16 = vpop.f32.mrb[132].mxu1  ;;  %v14267_v13 = vpop.f32.mrb[140].mxu0 }
 0x6d4   : > { %v20427_v8 = vadd.f32 %v10482_v31, %v10087_v19  ;;  %v10060_v2 = vmul.f32 %v14233_v16, %v19765_v28  ;;  %v9750_v39 = vpop.f32.mrb[133].mxu1  ;;  %v10177_v57 = vpop.f32.mrb[141].mxu0  ;;  %v10487_v7 = vmul.f32 %v14267_v13, %v20120_v21 }
 0x6d5   : > { %v10058_v42 = vmul.f32 %v21656_v46, %v9750_v39  ;;  %v14234_v22 = vpop.f32.mrb[134].mxu1  ;;  %v20433_v59 = vpop.permute.xlu1 %10825  ;;  %v10485_v44 = vmul.f32 %v20101_v17, %v10177_v57 }
 0x6d6   : > { %v10092_v25 = vadd.f32 %v10060_v2, %v20168_v4  ;;  %v10061_v58 = vmul.f32 %v14234_v22, %v21657_v1  ;;  %v14268_v36 = vpop.f32.mrb[142].mxu0  ;;  %v20438_v28 = vpop.permute.xlu0 %10800  ;;  %v21658_v2 = vld [vmem:[#allocation170_spill] sm:$0xff]  ;;  %v21660_v1 = vld [vmem:[#allocation145_spill] sm:$0xff] }
 0x6d7   : > { %v10090_v53 = vadd.f32 %v10058_v42, %v20173_v10  ;;  %v9753_v19 = vpop.f32.mrb[135].mxu1  ;;  %v10488_v4 = vmul.f32 %v14268_v36, %v20075_v33  ;;  %v10180_v13 = vpop.f32.mrb[143].mxu0 }
 0x6d8   : > { %v20440_v31 = vadd.f32 %v10487_v7, %v10092_v25  ;;  %v10093_v16 = vadd.f32 %v10061_v58, %v20175_v41  ;;  %v10059_v21 = vmul.f32 %v21658_v2, %v9753_v19  ;;  %v10486_v17 = vmul.f32 %v20059_v49, %v10180_v13  ;;  %v21664_v13 = vld [vmem:[#allocation83_spill] sm:$0xff] }
 0x6d9   : > { %v20445_v39 = vadd.f32 %v10485_v44, %v10090_v53  ;;  %v20451_v42 = vpop.permute.xlu1 %10835 }
 0x6da   : > { %v20447_v46 = vadd.f32 %v10488_v4, %v10093_v16  ;;  %v10091_v10 = vadd.f32 %v10059_v21, %v20189_v38  ;;  %21659 = vst [vmem:[#allocation194_spill] sm:$0xff] %v20451_v42  ;;  %v20453_v57 = vpop.permute.xlu0 %10810  ;;  %v21661_v38 = vld [vmem:[#allocation156_spill] sm:$0xff]  ;;  %v21663_v16 = vld [vmem:[#allocation142_spill] sm:$0xff] }
 0x6db   : > { %v14237_v22 = vpop.f32.mrb[136].mxu1  ;;  %v14271_v41 = vpop.f32.mrb[144].mxu0 }
 0x6dc   : > { %v20455_v25 = vadd.f32 %v10486_v17, %v10091_v10  ;;  %v10064_v33 = vmul.f32 %v14237_v22, %v19813_v40  ;;  %v9766_v7 = vpop.f32.mrb[137].mxu1  ;;  %v10193_v36 = vpop.f32.mrb[145].mxu0  ;;  %v10491_v19 = vmul.f32 %v14271_v41, %v21661_v38 }
 0x6dd   : > { %v10062_v58 = vmul.f32 %v21660_v1, %v9766_v7  ;;  %v14238_v53 = vpop.f32.mrb[138].mxu1  ;;  %v20461_v49 = vpop.permute.xlu1 %10845  ;;  %v10489_v10 = vmul.f32 %v21664_v13, %v10193_v36  ;;  %v21665_v1 = vld [vmem:[#allocation109_spill] sm:$0xff] }
 0x6de   : > { %v10096_v44 = vadd.f32 %v10064_v33, %v20208_v30  ;;  %21662 = vst [vmem:[#allocation226_spill] sm:$0xff] %v20461_v49  ;;  %v10065_v4 = vmul.f32 %v14238_v53, %v21663_v16  ;;  %v14272_v2 = vpop.f32.mrb[146].mxu0  ;;  %v20466_v40 = vpop.permute.xlu0 %10820  ;;  %v21666_v33 = vld [vmem:[#allocation171_spill] sm:$0xff] }
 0x6df   : > { %v10094_v21 = vadd.f32 %v10062_v58, %v20213_v48  ;;  %v9769_v17 = vpop.f32.mrb[139].mxu1  ;;  %v10492_v30 = vmul.f32 %v14272_v2, %v21665_v1  ;;  %v10196_v38 = vpop.f32.mrb[147].mxu0  ;;  %v21667_v58 = vld [vmem:[#allocation184_spill] sm:$0xff]  ;;  %v21671_v1 = vld [vmem:[#allocation143_spill] sm:$0xff] }
 0x6e0   : > { %v20468_v22 = vadd.f32 %v10491_v19, %v10096_v44  ;;  %v10097_v7 = vadd.f32 %v10065_v4, %v20215_v15  ;;  %v10063_v41 = vmul.f32 %v21666_v33, %v9769_v17  ;;  %v10490_v36 = vmul.f32 %v21667_v58, %v10196_v38  ;;  %v21670_v15 = vld [vmem:[#allocation148_spill] sm:$0xff]  ;;  %v21674_v38 = vld [vmem:[#allocation179_spill] sm:$0xff] }
 0x6e1   : > { %v20473_v42 = vadd.f32 %v10489_v10, %v10094_v21  ;;  %v20479_v16 = vpop.permute.xlu1 %10855 }
 0x6e2   : > { %v20475_v53 = vadd.f32 %v10492_v30, %v10097_v7  ;;  %v10095_v48 = vadd.f32 %v10063_v41, %v20229_v62  ;;  %21668 = vst [vmem:[#allocation205_spill] sm:$0xff] %v20479_v16  ;;  %v20481_v13 = vpop.permute.xlu0 %10830  ;;  %v21672_v62 = vld [vmem:[#allocation191_spill] sm:$0xff] }
 0x6e3   : > { %21669 = vst [vmem:[#allocation203_spill] sm:$0xff] %v20481_v13  ;;  %v14241_v44 = vpop.f32.mrb[140].mxu1  ;;  %v14275_v2 = vpop.f32.mrb[148].mxu0 }
 0x6e4   : > { %v20483_v19 = vadd.f32 %v10490_v36, %v10095_v48  ;;  %v10068_v4 = vmul.f32 %v14241_v44, %v21670_v15  ;;  %v9782_v17 = vpop.f32.mrb[141].mxu1  ;;  %v10209_v10 = vpop.f32.mrb[149].mxu0  ;;  %v10495_v33 = vmul.f32 %v14275_v2, %v21672_v62  ;;  %v21675_v36 = vld [vmem:[#allocation193_spill] sm:$0xff] }
 0x6e5   : > { %v10066_v21 = vmul.f32 %v21671_v1, %v9782_v17  ;;  %v14242_v7 = vpop.f32.mrb[142].mxu1  ;;  %v20489_v41 = vpop.permute.xlu1 %10865  ;;  %v10493_v49 = vmul.f32 %v21675_v36, %v10209_v10  ;;  %v21677_v1 = vld [vmem:[#allocation182_spill] sm:$0xff] }
 0x6e6   : > { %v10100_v30 = vadd.f32 %v10068_v4, %v20248_v20  ;;  %21673 = vst [vmem:[#allocation34_spill] sm:$0xff] %v20489_v41  ;;  %v10069_v58 = vmul.f32 %v14242_v7, %v21674_v38  ;;  %v14276_v16 = vpop.f32.mrb[150].mxu0  ;;  %v20494_v44 = vpop.permute.xlu0 %10840  ;;  %v21678_v4 = vld [vmem:[#allocation181_spill] sm:$0xff] }
 0x6e7   : > { %v10098_v48 = vadd.f32 %v10066_v21, %v20253_v5  ;;  %21676 = vst [vmem:[#allocation200_spill] sm:$0xff] %v20494_v44  ;;  %v9785_v15 = vpop.f32.mrb[143].mxu1  ;;  %v10496_v20 = vmul.f32 %v14276_v16, %v21677_v1  ;;  %v10212_v62 = vpop.f32.mrb[151].mxu0  ;;  %v21679_v21 = vld [vmem:[#allocation151_spill] sm:$0xff]  ;;  %v21683_v1 = vld [vmem:[#allocation185_spill] sm:$0xff] }
 0x6e8   : > { %v20496_v13 = vadd.f32 %v10495_v33, %v10100_v30  ;;  %v10101_v17 = vadd.f32 %v10069_v58, %v20255_v47  ;;  %v10067_v2 = vmul.f32 %v21678_v4, %v9785_v15  ;;  %v10494_v10 = vmul.f32 %v21679_v21, %v10212_v62  ;;  %v21682_v47 = vld [vmem:[#allocation183_spill] sm:$0xff] }
 0x6e9   : > { %v20501_v41 = vadd.f32 %v10493_v49, %v10098_v48  ;;  %v20507_v38 = vpop.permute.xlu1 %10875  ;;  %v21686_v62 = vld [vmem:[#allocation175_spill] sm:$0xff] }
 0x6ea   : > { %v20503_v7 = vadd.f32 %v10496_v20, %v10101_v17  ;;  %v10099_v5 = vadd.f32 %v10067_v2, %v20269_v12  ;;  %21680 = vst [vmem:[#allocation235_spill] sm:$0xff] %v20507_v38  ;;  %v20509_v36 = vpop.permute.xlu0 %10850  ;;  %v21684_v12 = vld [vmem:[#allocation186_spill] sm:$0xff] }
 0x6eb   : > { %21681 = vst [vmem:[#allocation232_spill] sm:$0xff] %v20509_v36  ;;  %v14245_v30 = vpop.f32.mrb[144].mxu1  ;;  %v14279_v58 = vpop.f32.mrb[152].mxu0 }
 0x6ec   : > { %v20511_v33 = vadd.f32 %v10494_v10, %v10099_v5  ;;  %v10072_v16 = vmul.f32 %v14245_v30, %v21682_v47  ;;  %v9798_v15 = vpop.f32.mrb[145].mxu1  ;;  %v10225_v48 = vpop.f32.mrb[153].mxu0  ;;  %v10499_v4 = vmul.f32 %v14279_v58, %v21684_v12  ;;  %v21687_v10 = vld [vmem:[#allocation155_spill] sm:$0xff] }
 0x6ed   : > { %v10070_v49 = vmul.f32 %v21683_v1, %v9798_v15  ;;  %v14246_v17 = vpop.f32.mrb[146].mxu1  ;;  %v20517_v2 = vpop.permute.xlu1 %10885  ;;  %v10497_v36 = vmul.f32 %v21687_v10, %v10225_v48  ;;  %v21689_v1 = vld [vmem:[#allocation157_spill] sm:$0xff] }
 0x6ee   : > { %v10104_v20 = vadd.f32 %v10072_v16, %v20288_v34  ;;  %21685 = vst [vmem:[#allocation198_spill] sm:$0xff] %v20517_v2  ;;  %v10073_v21 = vmul.f32 %v14246_v17, %v21686_v62  ;;  %v14280_v38 = vpop.f32.mrb[154].mxu0  ;;  %v20522_v30 = vpop.permute.xlu0 %10860  ;;  %v21690_v16 = vld [vmem:[#allocation176_spill] sm:$0xff] }
 0x6ef   : > { %v10102_v5 = vadd.f32 %v10070_v49, %v20293_v45  ;;  %21688 = vst [vmem:[#allocation230_spill] sm:$0xff] %v20522_v30  ;;  %v9801_v47 = vpop.f32.mrb[147].mxu1  ;;  %v10500_v34 = vmul.f32 %v14280_v38, %v21689_v1  ;;  %v10228_v12 = vpop.f32.mrb[155].mxu0  ;;  %v21692_v49 = vld [vmem:[#allocation154_spill] sm:$0xff]  ;;  %v21696_v1 = vld [vmem:[#allocation147_spill] sm:$0xff] }
 0x6f0   : > { %v20524_v44 = vadd.f32 %v10499_v4, %v10104_v20  ;;  %v10105_v15 = vadd.f32 %v10073_v21, %v20295_v61  ;;  %v10071_v58 = vmul.f32 %v21690_v16, %v9801_v47  ;;  %v10498_v48 = vmul.f32 %v21692_v49, %v10228_v12  ;;  %v21695_v61 = vld [vmem:[#allocation103_spill] sm:$0xff]  ;;  %v21698_v12 = vld [vmem:[#allocation149_spill] sm:$0xff] }
 0x6f1   : > { %v20529_v2 = vadd.f32 %v10497_v36, %v10102_v5  ;;  %v20535_v62 = vpop.permute.xlu1 %11182 }
 0x6f2   : > { %v20531_v17 = vadd.f32 %v10500_v34, %v10105_v15  ;;  %v10103_v45 = vadd.f32 %v10071_v58, %v20309_v55  ;;  %v20537_v10 = vpop.permute.xlu0 %10870  ;;  %v21697_v55 = vld [vmem:[#allocation192_spill] sm:$0xff] }
 0x6f3   : > { %21693 = vst [vmem:[#allocation207_spill] sm:$0xff] %v20537_v10  ;;  %v14249_v20 = vpop.f32.mrb[148].mxu1  ;;  %v14283_v21 = vpop.f32.mrb[156].mxu0 }
 0x6f4   : > { %21691 = vst [vmem:[#allocation209_spill] sm:$0xff] %v20531_v17  ;;  %v20539_v4 = vadd.f32 %v10498_v48, %v10103_v45  ;;  %v10076_v38 = vmul.f32 %v14249_v20, %v21695_v61  ;;  %v9814_v47 = vpop.f32.mrb[149].mxu1  ;;  %v10241_v5 = vpop.f32.mrb[157].mxu0  ;;  %v10503_v16 = vmul.f32 %v14283_v21, %v21697_v55  ;;  %v21699_v48 = vld [vmem:[#allocation195_spill] sm:$0xff] }
 0x6f5   : > { %v10074_v36 = vmul.f32 %v21696_v1, %v9814_v47  ;;  %v14250_v15 = vpop.f32.mrb[150].mxu1  ;;  %v20545_v58 = vpop.permute.xlu1 %11192  ;;  %v10501_v30 = vmul.f32 %v21699_v48, %v10241_v5  ;;  %v21702_v1 = vld [vmem:[#allocation113_spill] sm:$0xff] }
 0x6f6   : > { %21694 = vst [vmem:[#allocation36_spill] sm:$0xff] %v20539_v4  ;;  %v10108_v34 = vadd.f32 %v10076_v38, %v20325_v9  ;;  %v10077_v49 = vmul.f32 %v14250_v15, %v21698_v12  ;;  %v14284_v10 = vpop.f32.mrb[158].mxu0  ;;  %v20550_v20 = vpop.permute.xlu0 %10880  ;;  %v21703_v38 = vld [vmem:[#allocation146_spill] sm:$0xff] }
 0x6f7   : > { %v10106_v45 = vadd.f32 %v10074_v36, %v20330_v14  ;;  %21700 = vst [vmem:[#allocation204_spill] sm:$0xff] %v20550_v20  ;;  %v9817_v61 = vpop.f32.mrb[151].mxu1  ;;  %v10504_v9 = vmul.f32 %v14284_v10, %v21702_v1  ;;  %v10244_v55 = vpop.f32.mrb[159].mxu0  ;;  %v21706_v36 = vld [vmem:[#allocation188_spill] sm:$0xff] }
 0x6f8   : > { %v20552_v4 = vadd.f32 %v10503_v16, %v10108_v34  ;;  %v10109_v47 = vadd.f32 %v10077_v49, %v20332_v51  ;;  %v10075_v21 = vmul.f32 %v21703_v38, %v9817_v61  ;;  %v10502_v5 = vmul.f32 %v21706_v36, %v10244_v55  ;;  %v21708_v51 = vld [vmem:[#allocation189_spill] sm:$0xff]  ;;  %v21709_v1 = vld [vmem:[#allocation152_spill] sm:$0xff]  ;;  %v21711_v55 = vld [vmem:[#allocation178_spill] sm:$0xff] }
 0x6f9   : > { %v20557_v17 = vadd.f32 %v10501_v30, %v10106_v45  ;;  %v20563_v12 = vpop.permute.xlu1 %11202 }
 0x6fa   : > { %21701 = vst [vmem:[#allocation38_spill] sm:$0xff] %v20552_v4  ;;  %v20559_v15 = vadd.f32 %v10504_v9, %v10109_v47  ;;  %v10107_v14 = vadd.f32 %v10075_v21, %v20343_v37  ;;  %v20565_v48 = vpop.permute.xlu0 %11177  ;;  %v21710_v37 = vld [vmem:[#allocation222_spill] sm:$0xff] }
 0x6fb   : > { %21704 = vst [vmem:[#allocation4_spill] sm:$0xff] %v20557_v17  ;;  %v14253_v34 = vpop.f32.mrb[152].mxu1  ;;  %v14287_v49 = vpop.f32.mrb[160].mxu0 }
 0x6fc   : > { %21705 = vst [vmem:[#allocation202_spill] sm:$0xff] %v20559_v15  ;;  %v20567_v16 = vadd.f32 %v10502_v5, %v10107_v14  ;;  %v10080_v10 = vmul.f32 %v14253_v34, %v21708_v51  ;;  %v9830_v61 = vpop.f32.mrb[153].mxu1  ;;  %v10257_v45 = vpop.f32.mrb[161].mxu0  ;;  %v10507_v38 = vmul.f32 %v14287_v49, %v21710_v37  ;;  %v21712_v5 = vld [vmem:[#allocation224_spill] sm:$0xff] }
 0x6fd   : > { %v10078_v30 = vmul.f32 %v21709_v1, %v9830_v61  ;;  %v14254_v47 = vpop.f32.mrb[154].mxu1  ;;  %v20573_v21 = vpop.permute.xlu1 %11212  ;;  %v21713_v1 = vld [vmem:[#allocation229_spill] sm:$0xff] }
 0x6fe   : > { %21707 = vst [vmem:[#allocation234_spill] sm:$0xff] %v20567_v16  ;;  %v10112_v9 = vadd.f32 %v10080_v10, %v20356_v29  ;;  %v10081_v36 = vmul.f32 %v14254_v47, %v21711_v55  ;;  %v14288_v20 = vpop.f32.mrb[162].mxu0  ;;  %v10505_v16 = vmul.f32 %v21712_v5, %v10257_v45  ;;  %v11188_v34 = vpop.permute.xlu0 %11187  ;;  %v21714_v29 = vld [vmem:[#allocation180_spill] sm:$0xff] }
 0x6ff   : > { %v10110_v14 = vadd.f32 %v10078_v30, %v20361_v23  ;;  %v9833_v51 = vpop.f32.mrb[155].mxu1  ;;  %v10508_v17 = vmul.f32 %v14288_v20, %v21713_v1  ;;  %v10260_v49 = vpop.f32.mrb[163].mxu0  ;;  %v21717_v23 = vld [vmem:[#allocation197_spill] sm:$0xff] }
 0x700   : > { %v20578_v15 = vadd.f32 %v10507_v38, %v10112_v9  ;;  %v10113_v61 = vadd.f32 %v10081_v36, %v20363_v26  ;;  %v10079_v10 = vmul.f32 %v21714_v29, %v9833_v51  ;;  %v10506_v30 = vmul.f32 %v21717_v23, %v10260_v49  ;;  %v21719_v26 = vld [vmem:[#allocation187_spill] sm:$0xff]  ;;  %v21720_v51 = vld [vmem:[#allocation153_spill] sm:$0xff]  ;;  %v21721_v29 = vld [vmem:[#allocation150_spill] sm:$0xff] }
 0x701   : > { %v20583_v37 = vadd.f32 %v10505_v16, %v10110_v14  ;;  %v20589_v45 = vpop.permute.xlu1 %11222  ;;  %v21722_v23 = vld [vmem:[#allocation199_spill] sm:$0xff] }
 0x702   : > { %v20585_v4 = vadd.f32 %v10508_v17, %v10113_v61  ;;  %v10111_v47 = vadd.f32 %v10079_v10, %v20371_v24  ;;  %v20591_v55 = vpop.permute.xlu0 %11197 }
 0x703   : > { %21715 = vst [vmem:[#allocation213_spill] sm:$0xff] %v20583_v37  ;;  %v14257_v9 = vpop.f32.mrb[156].mxu1  ;;  %v14291_v36 = vpop.f32.mrb[164].mxu0 }
 0x704   : > { %21716 = vst [vmem:[#allocation211_spill] sm:$0xff] %v20585_v4  ;;  %v20593_v38 = vadd.f32 %v10506_v30, %v10111_v47  ;;  %v10084_v20 = vmul.f32 %v14257_v9, %v21719_v26  ;;  %v9846_v5 = vpop.f32.mrb[157].mxu1  ;;  %v10273_v14 = vpop.f32.mrb[165].mxu0  ;;  %v10511_v24 = vmul.f32 %v14291_v36, %v20354_v27 }
 0x705   : > { %v10082_v16 = vmul.f32 %v21720_v51, %v9846_v5  ;;  %v14258_v17 = vpop.f32.mrb[158].mxu1  ;;  %v20599_v1 = vpop.permute.xlu1 %11232  ;;  %v10509_v30 = vmul.f32 %v21722_v23, %v10273_v14  ;;  %v21723_v51 = vld [vmem:[#allocation190_spill] sm:$0xff]  ;;  %v21727_v23 = vld [vmem:[#allocation231_spill] sm:$0xff] }
 0x706   : > { %21718 = vst [vmem:[#allocation39_spill] sm:$0xff] %v20593_v38  ;;  %v10116_v61 = vadd.f32 %v10084_v20, %v20384_v63  ;;  %v10085_v10 = vmul.f32 %v14258_v17, %v21721_v29  ;;  %v14292_v49 = vpop.f32.mrb[166].mxu0  ;;  %v11208_v9 = vpop.permute.xlu0 %11207  ;;  %v21724_v63 = vld [vmem:[#allocation79_spill] sm:$0xff] }
 0x707   : > { %v10114_v47 = vadd.f32 %v10082_v16, %v20389_v11  ;;  %v9849_v26 = vpop.f32.mrb[159].mxu1  ;;  %v10512_v4 = vmul.f32 %v14292_v49, %v21723_v51  ;;  %v10276_v27 = vpop.f32.mrb[167].mxu0  ;;  %v21725_v11 = vld [vmem:[#allocation227_spill] sm:$0xff]  ;;  %v21728_v51 = vld [vmem:[#allocation233_spill] sm:$0xff] }
 0x708   : > { %v20604_v38 = vadd.f32 %v10511_v24, %v10116_v61  ;;  %v10117_v5 = vadd.f32 %v10085_v10, %v20391_v52  ;;  %v10083_v20 = vmul.f32 %v21724_v63, %v9849_v26  ;;  %v10510_v16 = vmul.f32 %v21725_v11, %v10276_v27 }
 0x709   : > { %v20609_v36 = vadd.f32 %v10509_v30, %v10114_v47  ;;  %v20615_v14 = vpop.permute.xlu1 %11242 }
 0x70a   : > { %v20611_v37 = vadd.f32 %v10512_v4, %v10117_v5  ;;  %v10115_v17 = vadd.f32 %v10083_v20, %v20399_v50  ;;  %v20617_v29 = vpop.permute.xlu0 %11217 }
 0x70b   : > { %v14297_v61 = vpop.f32.mrb[160].mxu1  ;;  %v14331_v10 = vpop.f32.mrb[168].mxu0 }
 0x70c   : > { %v20619_v24 = vadd.f32 %v10510_v16, %v10115_v17  ;;  %v10910_v52 = vmul.f32 %v14297_v61, %v20382_v0  ;;  %v10588_v49 = vpop.f32.mrb[161].mxu1  ;;  %v11015_v30 = vpop.f32.mrb[169].mxu0  ;;  %v11337_v50 = vmul.f32 %v14331_v10, %v11188_v34 }
 0x70d   : > { %v10908_v47 = vmul.f32 %v21727_v23, %v10588_v49  ;;  %v14298_v4 = vpop.f32.mrb[162].mxu1  ;;  %v20624_v5 = vpop.permute.xlu1 %11252  ;;  %v11335_v17 = vmul.f32 %v20565_v48, %v11015_v30  ;;  %v21729_v23 = vld [vmem:[#allocation201_spill] sm:$0xff] }
 0x70e   : > { %21726 = vst [vmem:[#allocation208_spill] sm:$0xff] %v20619_v24  ;;  %v10942_v26 = vadd.f32 %v10910_v52, %v20412_v43  ;;  %v10911_v63 = vmul.f32 %v14298_v4, %v21728_v51  ;;  %v14332_v20 = vpop.f32.mrb[170].mxu0  ;;  %v11228_v11 = vpop.permute.xlu0 %11227 }
 0x70f   : > { %v10940_v27 = vadd.f32 %v10908_v47, %v20417_v18  ;;  %v10591_v0 = vpop.f32.mrb[163].mxu1  ;;  %v11338_v49 = vmul.f32 %v14332_v20, %v20545_v58  ;;  %v11018_v43 = vpop.f32.mrb[171].mxu0 }
 0x710   : > { %v11369_v16 = vadd.f32 %v11337_v50, %v10942_v26  ;;  %v10943_v61 = vadd.f32 %v10911_v63, %v20419_v3  ;;  %v10909_v24 = vmul.f32 %v21729_v23, %v10591_v0  ;;  %v11336_v4 = vmul.f32 %v20535_v62, %v11018_v43 }
 0x711   : > { %v11367_v34 = vadd.f32 %v11335_v17, %v10940_v27  ;;  %v20634_v18 = vpop.permute.xlu1 %11262  ;;  %v21730_v17 = vld [vmem:[#allocation228_spill] sm:$0xff] }
 0x712   : > { %v11370_v52 = vadd.f32 %v11338_v49, %v10943_v61  ;;  %v10941_v10 = vadd.f32 %v10909_v24, %v20427_v8  ;;  %v20636_v48 = vpop.permute.xlu0 %11237 }
 0x713   : > { %v14301_v47 = vpop.f32.mrb[164].mxu1  ;;  %v14335_v26 = vpop.f32.mrb[172].mxu0  ;;  %v11400_v50 = vsel %vm11399_vm0, %v11367_v34, 0.0 }
 0x714   : > { %v11368_v30 = vadd.f32 %v11336_v4, %v10941_v10  ;;  %v10914_v3 = vmul.f32 %v14301_v47, %v20410_v6  ;;  %v10604_v58 = vpop.f32.mrb[165].mxu1  ;;  %v11031_v63 = vpop.f32.mrb[173].mxu0  ;;  %v11341_v24 = vmul.f32 %v14335_v26, %v11208_v9  ;;  %v11403_v6 = vsel %vm11399_vm0, %v11369_v16, 0.0  ;;  %v21731_v9 = vld [vmem:[#allocation196_spill] sm:$0xff] }
 0x715   : > { %v10912_v51 = vmul.f32 %v20397_v56, %v10604_v58  ;;  %v14302_v20 = vpop.f32.mrb[166].mxu1  ;;  %v20643_v27 = vpop.permute.xlu1 %11272  ;;  %v11339_v43 = vmul.f32 %v20591_v55, %v11031_v63  ;;  %v11405_v16 = vsel %vm11399_vm0, %v11370_v52, 0.0 }
 0x716   : > { %v11401_v8 = vsel %vm11399_vm0, %v11368_v30, 0.0  ;;  %v10946_v62 = vadd.f32 %v10914_v3, %v20440_v31  ;;  %v10915_v0 = vmul.f32 %v14302_v20, %v21730_v17  ;;  %v14336_v61 = vpop.f32.mrb[174].mxu0  ;;  %v20649_v56 = vpop.permute.xlu0 %11247 }
 0x717   : > { %v11402_v49 = vadd.f32 %v11401_v8, %v11400_v50  ;;  %v10944_v23 = vadd.f32 %v10912_v51, %v20445_v39  ;;  %v10607_v34 = vpop.f32.mrb[167].mxu1  ;;  %v11342_v31 = vmul.f32 %v14336_v61, %v20573_v21  ;;  %v11034_v30 = vpop.f32.mrb[175].mxu0 }
 0x718   : > { %v11373_v10 = vadd.f32 %v11341_v24, %v10946_v62  ;;  %v10947_v4 = vadd.f32 %v10915_v0, %v20447_v46  ;;  %v10913_v47 = vmul.f32 %v21731_v9, %v10607_v34  ;;  %v11340_v55 = vmul.f32 %v20563_v12, %v11034_v30 }
 0x719   : > { %v11404_v3 = vadd.f32 %v11403_v6, %v11402_v49  ;;  %v11371_v26 = vadd.f32 %v11339_v43, %v10944_v23  ;;  %v20657_v50 = vpop.permute.xlu1 %11282 }
 0x71a   : > { %v11374_v58 = vadd.f32 %v11342_v31, %v10947_v4  ;;  %v10945_v39 = vadd.f32 %v10913_v47, %v20455_v25  ;;  %v20660_v46 = vpop.permute.xlu0 %11257  ;;  %v11411_v34 = vsel %vm11399_vm0, %v11373_v10, 0.0 }
 0x71b   : > { %v11406_v51 = vadd.f32 %v11405_v16, %v11404_v3  ;;  %v11407_v63 = vsel %vm11399_vm0, %v11371_v26, 0.0  ;;  %v14305_v21 = vpop.f32.mrb[168].mxu1  ;;  %v14339_v62 = vpop.f32.mrb[176].mxu0 }
 0x71c   : > { %v11372_v20 = vadd.f32 %v11340_v55, %v10945_v39  ;;  %v10918_v8 = vmul.f32 %v14305_v21, %v20438_v28  ;;  %v10620_v24 = vpop.f32.mrb[169].mxu1  ;;  %v11047_v0 = vpop.f32.mrb[177].mxu0  ;;  %v11345_v6 = vmul.f32 %v14339_v62, %v11228_v11  ;;  %v11413_v10 = vsel %vm11399_vm0, %v11374_v58, 0.0 }
 0x71d   : > { %v11408_v17 = vadd.f32 %v11407_v63, %v11406_v51  ;;  %v10916_v52 = vmul.f32 %v20425_v35, %v10620_v24  ;;  %v14306_v25 = vpop.f32.mrb[170].mxu1  ;;  %v20666_v49 = vpop.permute.xlu1 %11292  ;;  %v11343_v31 = vmul.f32 %v20617_v29, %v11047_v0 }
 0x71e   : > { %v11409_v12 = vsel %vm11399_vm0, %v11372_v20, 0.0  ;;  %v10950_v61 = vadd.f32 %v10918_v8, %v20468_v22  ;;  %v10919_v23 = vmul.f32 %v14306_v25, %v20405_v60  ;;  %v14340_v43 = vpop.f32.mrb[178].mxu0  ;;  %v20672_v35 = vpop.permute.xlu0 %11267 }
 0x71f   : > { %v11410_v28 = vadd.f32 %v11409_v12, %v11408_v17  ;;  %v10948_v4 = vadd.f32 %v10916_v52, %v20473_v42  ;;  %v10623_v9 = vpop.f32.mrb[171].mxu1  ;;  %v11346_v22 = vmul.f32 %v14340_v43, %v20599_v1  ;;  %v11050_v3 = vpop.f32.mrb[179].mxu0 }
 0x720   : > { %v11377_v47 = vadd.f32 %v11345_v6, %v10950_v61  ;;  %v10951_v30 = vadd.f32 %v10919_v23, %v20475_v53  ;;  %v10917_v11 = vmul.f32 %v20395_v54, %v10623_v9  ;;  %v11344_v29 = vmul.f32 %v20589_v45, %v11050_v3 }
 0x721   : > { %v11412_v60 = vadd.f32 %v11411_v34, %v11410_v28  ;;  %v11375_v26 = vadd.f32 %v11343_v31, %v10948_v4  ;;  %v20680_v39 = vpop.permute.xlu1 %11302 }
 0x722   : > { %v11378_v16 = vadd.f32 %v11346_v22, %v10951_v30  ;;  %v10949_v42 = vadd.f32 %v10917_v11, %v20483_v19  ;;  %v20683_v53 = vpop.permute.xlu0 %11277  ;;  %v11419_v25 = vsel %vm11399_vm0, %v11377_v47, 0.0 }
 0x723   : > { %v11414_v55 = vadd.f32 %v11413_v10, %v11412_v60  ;;  %v11415_v51 = vsel %vm11399_vm0, %v11375_v26, 0.0  ;;  %v14309_v1 = vpop.f32.mrb[172].mxu1  ;;  %v14343_v21 = vpop.f32.mrb[180].mxu0  ;;  %v21733_v10 = vld [vmem:[#allocation203_spill] sm:$0xff] }
 0x724   : > { %v11376_v63 = vadd.f32 %v11344_v29, %v10949_v42  ;;  %v10922_v54 = vmul.f32 %v14309_v1, %v20466_v40  ;;  %v10636_v20 = vpop.f32.mrb[173].mxu1  ;;  %v11063_v62 = vpop.f32.mrb[181].mxu0  ;;  %v11349_v17 = vmul.f32 %v14343_v21, %v20649_v56  ;;  %v11421_v4 = vsel %vm11399_vm0, %v11378_v16, 0.0 }
 0x725   : > { %v11416_v8 = vadd.f32 %v11415_v51, %v11414_v55  ;;  %v10920_v58 = vmul.f32 %v20453_v57, %v10636_v20  ;;  %v14310_v19 = vpop.f32.mrb[174].mxu1  ;;  %v14344_v0 = vpop.f32.mrb[182].mxu0  ;;  %v11347_v61 = vmul.f32 %v20636_v48, %v11063_v62  ;;  %v21734_v51 = vld [vmem:[#allocation226_spill] sm:$0xff] }
 0x726   : > { %v11417_v45 = vsel %vm11399_vm0, %v11376_v63, 0.0  ;;  %v10954_v24 = vadd.f32 %v10922_v54, %v20496_v13  ;;  %v10923_v52 = vmul.f32 %v14310_v19, %v20433_v59  ;;  %v20694_v6 = vpop.permute.xlu0 %11287  ;;  %v10639_v57 = vpop.f32.mrb[175].mxu1  ;;  %v11350_v13 = vmul.f32 %v14344_v0, %v20624_v5 }
 0x727   : > { %v11418_v12 = vadd.f32 %v11417_v45, %v11416_v8  ;;  %v10952_v40 = vadd.f32 %v10920_v58, %v20501_v41  ;;  %v10921_v56 = vmul.f32 %v20423_v32, %v10639_v57  ;;  %v11066_v34 = vpop.f32.mrb[183].mxu0  ;;  %v20700_v31 = vpop.permute.xlu1 %10890  ;;  %v21732_v32 = vld [vmem:[#allocation200_spill] sm:$0xff]  ;;  %v21735_v45 = vld [vmem:[#allocation209_spill] sm:$0xff] }
 0x728   : > { %v11381_v23 = vadd.f32 %v11349_v17, %v10954_v24  ;;  %v10955_v43 = vadd.f32 %v10923_v52, %v20503_v7  ;;  %v11348_v9 = vmul.f32 %v20615_v14, %v11066_v34  ;;  %v21736_v17 = vld [vmem:[#allocation194_spill] sm:$0xff] }
 0x729   : > { %v11420_v59 = vadd.f32 %v11419_v25, %v11418_v12  ;;  %v11379_v28 = vadd.f32 %v11347_v61, %v10952_v40  ;;  %v10953_v48 = vadd.f32 %v10921_v56, %v20511_v33  ;;  %v21737_v61 = vld [vmem:[#allocation36_spill] sm:$0xff]  ;;  %v21738_v34 = vld [vmem:[#allocation230_spill] sm:$0xff] }
 0x72a   : > { %v11382_v41 = vadd.f32 %v11350_v13, %v10955_v43  ;;  %v20705_v7 = vpop.permute.xlu0 %11297  ;;  %v11427_v54 = vsel %vm11399_vm0, %v11381_v23, 0.0 }
 0x72b   : > { %v11422_v47 = vadd.f32 %v11421_v4, %v11420_v59  ;;  %v11423_v30 = vsel %vm11399_vm0, %v11379_v28, 0.0  ;;  %v14313_v5 = vpop.f32.mrb[176].mxu1  ;;  %v11380_v22 = vadd.f32 %v11348_v9, %v10953_v48  ;;  %v14347_v3 = vpop.f32.mrb[184].mxu0  ;;  %v21739_v9 = vld [vmem:[#allocation232_spill] sm:$0xff] }
 0x72c   : > { %v10926_v11 = vmul.f32 %v14313_v5, %v21732_v32  ;;  %v10652_v60 = vpop.f32.mrb[177].mxu1  ;;  %v11079_v42 = vpop.f32.mrb[185].mxu0  ;;  %v11353_v55 = vmul.f32 %v14347_v3, %v20672_v35  ;;  %v11429_v12 = vsel %vm11399_vm0, %v11382_v41, 0.0 }
 0x72d   : > { %v11424_v26 = vadd.f32 %v11423_v30, %v11422_v47  ;;  %v10924_v16 = vmul.f32 %v21733_v10, %v10652_v60  ;;  %v14314_v29 = vpop.f32.mrb[178].mxu1  ;;  %v11425_v33 = vsel %vm11399_vm0, %v11380_v22, 0.0  ;;  %v14348_v63 = vpop.f32.mrb[186].mxu0  ;;  %v11351_v8 = vmul.f32 %v20660_v46, %v11079_v42  ;;  %v21740_v22 = vld [vmem:[#allocation38_spill] sm:$0xff] }
 0x72e   : > { %v10958_v14 = vadd.f32 %v10926_v11, %v20524_v44  ;;  %v10927_v1 = vmul.f32 %v14314_v29, %v21734_v51  ;;  %v20716_v58 = vpop.permute.xlu0 %11307  ;;  %v10655_v62 = vpop.f32.mrb[179].mxu1  ;;  %v11354_v44 = vmul.f32 %v14348_v63, %v20643_v27  ;;  %v21741_v11 = vld [vmem:[#allocation34_spill] sm:$0xff] }
 0x72f   : > { %v11426_v21 = vadd.f32 %v11425_v33, %v11424_v26  ;;  %v10956_v20 = vadd.f32 %v10924_v16, %v20529_v2  ;;  %v10925_v35 = vmul.f32 %v21736_v17, %v10655_v62  ;;  %v11082_v52 = vpop.f32.mrb[187].mxu0  ;;  %v20722_v40 = vpop.permute.xlu1 %10895  ;;  %v21742_v16 = vld [vmem:[#allocation4_spill] sm:$0xff]  ;;  %v21743_v51 = vld [vmem:[#allocation202_spill] sm:$0xff] }
 0x730   : > { %v11385_v19 = vadd.f32 %v11353_v55, %v10958_v14  ;;  %v10959_v24 = vadd.f32 %v10927_v1, %v21735_v45  ;;  %v11352_v57 = vmul.f32 %v20634_v18, %v11082_v52 }
 0x731   : > { %v11428_v0 = vadd.f32 %v11427_v54, %v11426_v21  ;;  %v11383_v25 = vadd.f32 %v11351_v8, %v10956_v20  ;;  %v10957_v46 = vadd.f32 %v10925_v35, %v21737_v61  ;;  %v21744_v54 = vld [vmem:[#allocation205_spill] sm:$0xff] }
 0x732   : > { %v11386_v2 = vadd.f32 %v11354_v44, %v10959_v24  ;;  %v11313_v13 = vpop.permute.xlu0 %11312  ;;  %v11435_v26 = vsel %vm11399_vm0, %v11385_v19, 0.0  ;;  %v21745_v24 = vld [vmem:[#allocation234_spill] sm:$0xff] }
 0x733   : > { %v11430_v23 = vadd.f32 %v11429_v12, %v11428_v0  ;;  %v11431_v43 = vsel %vm11399_vm0, %v11383_v25, 0.0  ;;  %v14317_v56 = vpop.f32.mrb[180].mxu1  ;;  %v11384_v27 = vadd.f32 %v11352_v57, %v10957_v46  ;;  %v14351_v28 = vpop.f32.mrb[188].mxu0  ;;  %v21746_v25 = vld [vmem:[#allocation204_spill] sm:$0xff] }
 0x734   : > { %v10930_v59 = vmul.f32 %v14317_v56, %v21738_v34  ;;  %v10668_v4 = vpop.f32.mrb[181].mxu1  ;;  %v11095_v47 = vpop.f32.mrb[189].mxu0  ;;  %v11357_v18 = vmul.f32 %v14351_v28, %v20694_v6  ;;  %v11437_v19 = vsel %vm11399_vm0, %v11386_v2, 0.0 }
 0x735   : > { %v11432_v48 = vadd.f32 %v11431_v43, %v11430_v23  ;;  %v10928_v41 = vmul.f32 %v21739_v9, %v10668_v4  ;;  %v14318_v30 = vpop.f32.mrb[182].mxu1  ;;  %v11433_v5 = vsel %vm11399_vm0, %v11384_v27, 0.0  ;;  %v14352_v60 = vpop.f32.mrb[190].mxu0  ;;  %v11355_v29 = vmul.f32 %v20683_v53, %v11095_v47  ;;  %v21747_v23 = vld [vmem:[#allocation207_spill] sm:$0xff] }
 0x736   : > { %v10962_v32 = vadd.f32 %v10930_v59, %v21740_v22  ;;  %v10931_v3 = vmul.f32 %v14318_v30, %v21741_v11  ;;  %v20736_v33 = vpop.permute.xlu0 %11317  ;;  %v10671_v14 = vpop.f32.mrb[183].mxu1  ;;  %v11358_v63 = vmul.f32 %v14352_v60, %v20666_v49  ;;  %v21748_v59 = vld [vmem:[#allocation198_spill] sm:$0xff] }
 0x737   : > { %v11434_v10 = vadd.f32 %v11433_v5, %v11432_v48  ;;  %v10960_v42 = vadd.f32 %v10928_v41, %v21742_v16  ;;  %v10929_v6 = vmul.f32 %v21744_v54, %v10671_v14  ;;  %v11098_v21 = vpop.f32.mrb[191].mxu0  ;;  %v10901_v62 = vpop.permute.xlu1 %10900  ;;  %v21749_v41 = vld [vmem:[#allocation213_spill] sm:$0xff]  ;;  %v21750_v5 = vld [vmem:[#allocation235_spill] sm:$0xff] }
 0x738   : > { %v11389_v55 = vadd.f32 %v11357_v18, %v10962_v32  ;;  %v10963_v1 = vadd.f32 %v10931_v3, %v21743_v51  ;;  %v11356_v53 = vmul.f32 %v20657_v50, %v11098_v21  ;;  %v21751_v3 = vld [vmem:[#allocation211_spill] sm:$0xff] }
 0x739   : > { %v11436_v20 = vadd.f32 %v11435_v26, %v11434_v10  ;;  %v11387_v8 = vadd.f32 %v11355_v29, %v10960_v42  ;;  %v10961_v44 = vadd.f32 %v10929_v6, %v21745_v24  ;;  %v21752_v16 = vld [vmem:[#allocation39_spill] sm:$0xff] }
 0x73a   : > { %v11390_v45 = vadd.f32 %v11358_v63, %v10963_v1  ;;  %v20745_v52 = vpop.permute.xlu0 %11322  ;;  %v11443_v18 = vsel %vm11399_vm0, %v11389_v55, 0.0 }
 0x73b   : > { %v11438_v17 = vadd.f32 %v11437_v19, %v11436_v20  ;;  %v11439_v35 = vsel %vm11399_vm0, %v11387_v8, 0.0  ;;  %v14321_v0 = vpop.f32.mrb[184].mxu1  ;;  %v11388_v49 = vadd.f32 %v11356_v53, %v10961_v44  ;;  %v14355_v61 = vpop.f32.mrb[192].mxu0 }
 0x73c   : > { %v10934_v12 = vmul.f32 %v14321_v0, %v21746_v25  ;;  %v10684_v46 = vpop.f32.mrb[185].mxu1  ;;  %v11111_v2 = vpop.f32.mrb[193].mxu0  ;;  %v11361_v34 = vmul.f32 %v14355_v61, %v20716_v58  ;;  %v11445_v14 = vsel %vm11399_vm0, %v11390_v45, 0.0 }
 0x73d   : > { %v11440_v57 = vadd.f32 %v11439_v35, %v11438_v17  ;;  %v10932_v43 = vmul.f32 %v21747_v23, %v10684_v46  ;;  %v14322_v56 = vpop.f32.mrb[186].mxu1  ;;  %v11441_v27 = vsel %vm11399_vm0, %v11388_v49, 0.0  ;;  %v14356_v4 = vpop.f32.mrb[194].mxu0  ;;  %v11359_v30 = vmul.f32 %v20705_v7, %v11111_v2  ;;  %v21753_v2 = vld [vmem:[#allocation208_spill] sm:$0xff] }
 0x73e   : > { %v10966_v50 = vadd.f32 %v10934_v12, %v20578_v15  ;;  %v10935_v28 = vmul.f32 %v14322_v56, %v21748_v59  ;;  %v10687_v48 = vpop.f32.mrb[187].mxu1  ;;  %v11114_v32 = vpop.f32.mrb[195].mxu0  ;;  %v11362_v15 = vmul.f32 %v14356_v4, %v11313_v13 }
 0x73f   : > { %v11442_v9 = vadd.f32 %v11441_v27, %v11440_v57  ;;  %v10964_v47 = vadd.f32 %v10932_v43, %v21749_v41  ;;  %v10933_v22 = vmul.f32 %v21750_v5, %v10687_v48  ;;  %v10906_v26 = vpop.permute.xlu1 %10905  ;;  %v11360_v29 = vmul.f32 %v20680_v39, %v11114_v32  ;;  %v11328_v7 = vpop.permute.xlu0 %11327 }
 0x740   : > { %v11393_v11 = vadd.f32 %v11361_v34, %v10966_v50  ;;  %v10967_v60 = vadd.f32 %v10935_v28, %v21751_v3  ;;  %v11470_v32 = vstv %s11469_s24 }
 0x741   : > { %v11444_v58 = vadd.f32 %v11443_v18, %v11442_v9  ;;  %v11391_v10 = vadd.f32 %v11359_v30, %v10964_v47  ;;  %v10965_v42 = vadd.f32 %v10933_v22, %v21752_v16 }
 0x742   : > { %v11394_v51 = vadd.f32 %v11362_v15, %v10967_v60  ;;  %v11451_v46 = vsel %vm11399_vm0, %v11393_v11, 0.0 }
 0x743   : > { %v11446_v1 = vadd.f32 %v11445_v14, %v11444_v58  ;;  %v11447_v63 = vsel %vm11399_vm0, %v11391_v10, 0.0  ;;  %v11392_v54 = vadd.f32 %v11360_v29, %v10965_v42  ;;  %v14325_v55 = vpop.f32.mrb[188].mxu1  ;;  %v14359_v6 = vpop.f32.mrb[196].mxu0 }
 0x744   : > { %v10938_v21 = vmul.f32 %v14325_v55, %v10901_v62  ;;  %v10700_v20 = vpop.f32.mrb[189].mxu1  ;;  %v11127_v13 = vpop.f32.mrb[197].mxu0  ;;  %v11365_v53 = vmul.f32 %v14359_v6, %v11328_v7  ;;  %v11453_v50 = vsel %vm11399_vm0, %v11394_v51, 0.0 }
 0x745   : > { %v11448_v8 = vadd.f32 %v11447_v63, %v11446_v1  ;;  %v11449_v19 = vsel %vm11399_vm0, %v11392_v54, 0.0  ;;  %v10936_v24 = vmul.f32 %v20700_v31, %v10700_v20  ;;  %v14326_v44 = vpop.f32.mrb[190].mxu1  ;;  %v14360_v39 = vpop.f32.mrb[198].mxu0  ;;  %v11363_v62 = vmul.f32 %v20736_v33, %v11127_v13 }
 0x746   : > { %v10970_v45 = vadd.f32 %v10938_v21, %v20604_v38  ;;  %v10939_v17 = vmul.f32 %v14326_v44, %v10906_v26  ;;  %v10703_v35 = vpop.f32.mrb[191].mxu1  ;;  %v11130_v0 = vpop.f32.mrb[199].mxu0 }
 0x747   : > { %v11333_v49 = vpop.permute.xlu1 %11332  ;;  %v11450_v25 = vadd.f32 %v11449_v19, %v11448_v8  ;;  %v10968_v12 = vadd.f32 %v10936_v24, %v20609_v36  ;;  %v10937_v61 = vmul.f32 %v20722_v40, %v10703_v35  ;;  %v11364_v27 = vmul.f32 %v20745_v52, %v11130_v0 }
 0x748   : > { %v11397_v57 = vadd.f32 %v11365_v53, %v10970_v45  ;;  %v10971_v31 = vadd.f32 %v10939_v17, %v20611_v37  ;;  %v11366_v23 = vmul.f32 %v14360_v39, %v11333_v49 }
 0x749   : > { %v11452_v43 = vadd.f32 %v11451_v46, %v11450_v25  ;;  %v11395_v38 = vadd.f32 %v11363_v62, %v10968_v12  ;;  %v10969_v56 = vadd.f32 %v10937_v61, %v21753_v2 }
 0x74a   : > { %v11398_v34 = vadd.f32 %v11366_v23, %v10971_v31  ;;  %v11459_v37 = vsel %vm11399_vm0, %v11397_v57, 0.0 }
 0x74b   : > { %v11454_v36 = vadd.f32 %v11453_v50, %v11452_v43  ;;  %v11455_v33 = vsel %vm11399_vm0, %v11395_v38, 0.0  ;;  %v11396_v59 = vadd.f32 %v11364_v27, %v10969_v56 }
 0x74c   : > { %v11461_v9 = vsel %vm11399_vm0, %v11398_v34, 0.0 }
 0x74d   : > { %v11456_v40 = vadd.f32 %v11455_v33, %v11454_v36  ;;  %v11457_v28 = vsel %vm11399_vm0, %v11396_v59, 0.0 }
 0x74f   : > { %v11458_v4 = vadd.f32 %v11457_v28, %v11456_v40 }
 0x751   : > { %v11460_v48 = vadd.f32 %v11459_v37, %v11458_v4 }
 0x753   : > { %v11462_v41 = vadd.f32 %v11461_v9, %v11460_v48 }
 0x755   : > { %v11463_v47 = vrot.slane %v11462_v41, 4 }
 0x757   : > { %v11464_v52 = vadd.f32 %v11463_v47, %v11462_v41 }
 0x759   : > { %v11465_v30 = vrot.slane %v11464_v52, 2 }
 0x75b   : > { %v11466_v5 = vadd.f32 %v11465_v30, %v11464_v52 }
 0x75d   : > { %v11467_v22 = vrot.slane %v11466_v5, 1 }
 0x75f   : > { %v11468_v18 = vadd.f32 %v11467_v22, %v11466_v5 }
 0x761   : > { %v11471_v11 = vadd.f32 %v11470_v32, %v11468_v18 }
 0x763   : > { %11473 = vst.msk [vmem:[%s329_s27] sm:$0x1] %vm11472_vm12, %v11471_v11 }
 0x764 PF: > { %s20_s11 = sadd.s32 1, %s14527_s11  }
 0x765   : > { %p17_p4 = scmp.ge.s32.totalorder %s20_s11, 4  }
 0x767   :  { %19 = sbr.rel (!%p17_p4) target bundleno = 2 (0x2), region = 131 }

</bundles_post_ra>
